<compile_context>
chip_gen: v5e
topology: v5e:2x2
jax: 0.10.0
libtpu: 0.0.40
codegen_flags: <defaults>
</compile_context>

<pallas_src>
import math

import jax
import jax.numpy as jnp
from jax.experimental import pallas as pl
from jax.experimental.pallas import tpu as pltpu


def _make_sine_layer_kernel(is_last: bool, single_k: bool):
    """Build kernel computing sin(x @ W + b) (or x @ W + b if is_last).

    W / b already have omega_0 folded in and W is (in_f, out_f), so the body is
    a plain MXU matmul (+ f32 accumulate) + bias + sin.
    """
    is_last = bool(is_last)

    def _finalize(acc_f32, b_ref, o_ref):
        acc = acc_f32 + b_ref[...].astype(jnp.float32)  # (TM, out_f) + (1, out_f)
        if is_last:
            o_ref[...] = acc.astype(o_ref.dtype)
        else:
            o_ref[...] = jnp.sin(acc).astype(o_ref.dtype)

    if single_k:
        # Whole K resident: no scratch accumulator needed.
        def kernel(x_ref, w_ref, b_ref, o_ref):
            acc = jnp.dot(x_ref[...], w_ref[...], preferred_element_type=jnp.float32)
            _finalize(acc, b_ref, o_ref)

        return kernel

    # K tiled: f32 VMEM accumulator, init at k==0, finalize at the last k.
    def kernel(x_ref, w_ref, b_ref, o_ref, acc_ref):
        k = pl.program_id(1)

        @pl.when(k == 0)
        def _():
            acc_ref[...] = jnp.zeros_like(acc_ref)

        acc_ref[...] += jnp.dot(
            x_ref[...], w_ref[...], preferred_element_type=jnp.float32
        )

        @pl.when(k == pl.num_programs(1) - 1)
        def _():
            _finalize(acc_ref[...], b_ref, o_ref)

    return kernel


def fold_omega_into_params(weight, bias, omega_0, *, compute_dtype=None):
    """One-time (param-prep time) fold + layout fix.

    Returns W' = (omega_0 * W).T with shape (in_f, out_f) so the kernel
    contracts K on W's major (sublane) dim with a plain jnp.dot, and
    b' = omega_0 * b.  Optionally casts W' to `compute_dtype` (e.g. bf16) to
    halve DMA bytes; accumulation stays f32 inside the kernel.
    """
    w_kn = (omega_0 * weight).T  # (in_f, out_f)
    b = omega_0 * bias
    if compute_dtype is not None:
        w_kn = w_kn.astype(compute_dtype)
    return w_kn, b


def sine_layer_forward(x, weight_kn, bias_scaled, *, is_last=False,
                       block_m=512, block_k=1024):
    """Forward pass.

    x:            [B, in_features]
    weight_kn:    [in_features, out_features]  (pre-transposed, omega_0 folded)
    bias_scaled:  [out_features]               (omega_0 folded)

    Tiled over batch (and optionally over K for wide layers); weight/bias block
    index is constant across batch tiles so they stay VMEM-resident.
    On v7x keep >=2 batch tiles so both TensorCores get work.
    """
    B, in_f = x.shape
    in_f_w, out_f = weight_kn.shape
    assert in_f == in_f_w, "weight in_features mismatch"
    out_dtype = x.dtype

    # ---- batch (M) tiling -------------------------------------------------
    tm = min(block_m, B)
    if tm < B:
        tm = max(8, (tm // 8) * 8)
    grid_m = pl.cdiv(B, tm)

    # Fast path: no pad when B % tm == 0 (callers should arrange batch to be a
    # multiple of the tile; the pad is an extra XLA copy of x outside the
    # kernel's pipeline).
    b_pad = grid_m * tm - B
    x_in = jnp.pad(x, ((0, b_pad), (0, 0))) if b_pad else x

    # ---- contraction (K) tiling -------------------------------------------
    # Only tiles when in_f is a clean multiple of a lane-aligned block_k;
    # otherwise the whole K stays resident (typical SIREN widths).
    if in_f > block_k and block_k % 128 == 0 and in_f % block_k == 0:
        tk = block_k
    else:
        tk = in_f
    grid_k = in_f // tk

    bias2 = bias_scaled.reshape(1, out_f)

    kernel = _make_sine_layer_kernel(is_last, single_k=(grid_k == 1))

    if grid_k == 1:
        grid = (grid_m,)
        in_specs = [
            # x: fresh (tm, in_f) tile per step -> pipelined DMA.
            pl.BlockSpec((tm, in_f), lambda i: (i, 0)),
            # weight / bias: constant block index -> VMEM-resident across tiles.
            pl.BlockSpec((in_f, out_f), lambda i: (0, 0)),
            pl.BlockSpec((1, out_f), lambda i: (0, 0)),
        ]
        out_specs = pl.BlockSpec((tm, out_f), lambda i: (i, 0))
        scratch_shapes = []
        dim_sem = ("parallel",)
    else:
        grid = (grid_m, grid_k)
        in_specs = [
            pl.BlockSpec((tm, tk), lambda i, k: (i, k)),
            pl.BlockSpec((tk, out_f), lambda i, k: (k, 0)),
            pl.BlockSpec((1, out_f), lambda i, k: (0, 0)),
        ]
        # Output block index constant across k -> resident accumulator pattern.
        out_specs = pl.BlockSpec((tm, out_f), lambda i, k: (i, 0))
        scratch_shapes = [pltpu.VMEM((tm, out_f), jnp.float32)]
        dim_sem = ("parallel", "arbitrary")

    # ---- explicit VMEM budget + cost hint ----------------------------------
    x_bytes = jnp.dtype(x_in.dtype).itemsize
    w_bytes = jnp.dtype(weight_kn.dtype).itemsize
    o_bytes = jnp.dtype(out_dtype).itemsize
    footprint = (
        2 * tm * tk * x_bytes          # x double-buffer
        + 2 * tk * out_f * w_bytes     # weight (default double-buffered)
        + 2 * out_f * 4                # bias
        + 2 * tm * out_f * o_bytes     # output double-buffer
        + tm * out_f * 4               # f32 accumulator scratch (K-tiled path)
    )
    vmem_limit = int(min(128 * 1024 * 1024, max(32 * 1024 * 1024, 2 * footprint)))

    cost = pl.CostEstimate(
        flops=2 * (grid_m * tm) * in_f * out_f,
        transcendentals=0 if is_last else (grid_m * tm) * out_f,
        bytes_accessed=int(
            x_in.size * x_bytes
            + weight_kn.size * w_bytes
            + out_f * 4
            + grid_m * tm * out_f * o_bytes
        ),
    )

    out = pl.pallas_call(
        kernel,
        out_shape=jax.ShapeDtypeStruct((grid_m * tm, out_f), out_dtype),
        grid_spec=pltpu.PrefetchScalarGridSpec(
            num_scalar_prefetch=0,
            grid=grid,
            in_specs=in_specs,
            out_specs=out_specs,
            scratch_shapes=scratch_shapes,
        ),
        compiler_params=pltpu.CompilerParams(
            dimension_semantics=dim_sem,
            vmem_limit_bytes=vmem_limit,
        ),
        cost_estimate=cost,
    )(x_in, weight_kn, bias2)

    return out[:B] if b_pad else out


def init_sine_layer_params(key, in_features, out_features, *, is_first=False, omega_0=10.0):
    """Deterministic init matching SineLayer.init_weights (for self.linear).

    The `orth` Linear is also created in PyTorch (default init) but its result
    is unused in the forward output, so the kernel never computes it; its
    params are returned only for structural parity.
    """
    k_w, k_b, k_ow, k_ob = jax.random.split(key, 4)
    if is_first:
        bound = 1.0 / in_features
    else:
        bound = math.sqrt(6.0 / in_features) / omega_0
    weight = jax.random.uniform(
        k_w, (out_features, in_features), minval=-bound, maxval=bound, dtype=jnp.float32
    )
    b_bound = 1.0 / math.sqrt(in_features)
    bias = jax.random.uniform(
        k_b, (out_features,), minval=-b_bound, maxval=b_bound, dtype=jnp.float32
    )
    orth_w = jax.random.uniform(
        k_ow, (out_features, in_features), minval=-b_bound, maxval=b_bound, dtype=jnp.float32
    )
    orth_b = jax.random.uniform(
        k_ob, (out_features,), minval=-b_bound, maxval=b_bound, dtype=jnp.float32
    )
    return weight, bias, orth_w, orth_b


if __name__ == "__main__":
    key = jax.random.PRNGKey(0)
    k_x, k_p, k_x2, k_p2 = jax.random.split(key, 4)

    # Lane-dense feature dims (multiples of 128); block_m=256 with batch=512
    # gives 2 independent batch tiles (pipelining + both TCs on v7x).
    batch = 512
    in_features = 128
    out_features = 128
    omega_0 = 10.0
    block_m = 256

    x = jax.random.normal(k_x, (batch, in_features), dtype=jnp.float32)
    weight, bias, _orth_w, _orth_b = init_sine_layer_params(
        k_p, in_features, out_features, is_first=True, omega_0=omega_0
    )

    # One-time omega_0 fold + (K, N) transpose (done once per layer in a real stack).
    w_kn, b_s = fold_omega_into_params(weight, bias, omega_0)

    # Non-last layer: sin(omega_0 * (x @ W^T + b))
    out = sine_layer_forward(x, w_kn, b_s, is_last=False, block_m=block_m)
    out = jax.block_until_ready(out)
    ref = jnp.sin(omega_0 * (x @ weight.T + bias))
    assert out.shape == (batch, out_features)
    assert out.dtype == x.dtype
    assert jnp.allclose(out, ref, atol=1e-4, rtol=1e-4), "mismatch vs reference (sin path)"

    # Last layer: omega_0 * (x @ W^T + b)
    out_last = sine_layer_forward(x, w_kn, b_s, is_last=True, block_m=block_m)
    out_last = jax.block_until_ready(out_last)
    ref_last = omega_0 * (x @ weight.T + bias)
    assert jnp.allclose(out_last, ref_last, atol=1e-3, rtol=1e-4), "mismatch vs reference (last path)"

    # bf16 MXU-input path (halves DMA bytes; accumulation / bias / sin stay f32).
    w_bf, b_bf = fold_omega_into_params(weight, bias, omega_0, compute_dtype=jnp.bfloat16)
    out_bf = sine_layer_forward(x.astype(jnp.bfloat16), w_bf, b_bf, is_last=False, block_m=block_m)
    out_bf = jax.block_until_ready(out_bf)
    assert out_bf.dtype == jnp.bfloat16
    assert jnp.allclose(out_bf.astype(jnp.float32), ref, atol=1e-1), "mismatch vs reference (bf16 path)"

    # K-tiled path (wide in_features): exercises the f32 accumulator + pl.when
    # init/finalize across the reduction grid axis.
    batch2, in2, out2 = 256, 256, 128
    x2 = jax.random.normal(k_x2, (batch2, in2), dtype=jnp.float32)
    w2, b2, _, _ = init_sine_layer_params(k_p2, in2, out2, is_first=False, omega_0=omega_0)
    w2_kn, b2_s = fold_omega_into_params(w2, b2, omega_0)
    out2_pl = sine_layer_forward(x2, w2_kn, b2_s, is_last=False, block_m=128, block_k=128)
    out2_pl = jax.block_until_ready(out2_pl)
    ref2 = jnp.sin(omega_0 * (x2 @ w2.T + b2))
    assert jnp.allclose(out2_pl, ref2, atol=1e-4, rtol=1e-4), "mismatch vs reference (K-tiled path)"

    print("KERNEL_OK")
</pallas_src>

<mosaic_0001>
module attributes {stable_mosaic.version = 11 : i64} {
  func.func @kernel(%arg0: i32, %arg1: memref<256x128xf32, #tpu.memory_space<vmem>>, %arg2: memref<128x128xf32, #tpu.memory_space<vmem>>, %arg3: memref<1x128xf32, #tpu.memory_space<vmem>>, %arg4: memref<256x128xf32, #tpu.memory_space<vmem>>) attributes {dimension_semantics = [#tpu.dimension_semantics<parallel>], iteration_bounds = array<i64: 2>, scalar_prefetch = 0 : i64, scratch_operands = 0 : i64, tpu.core_type = #tpu.core_type<tc>, window_params = [{transform_indices = @transform_0, window_bounds = array<i64: 256, 128>}, {pipeline_mode = #tpu.pipeline_mode<synchronous>, transform_indices = @transform_1, window_bounds = array<i64: 128, 128>}, {pipeline_mode = #tpu.pipeline_mode<synchronous>, transform_indices = @transform_2, window_bounds = array<i64: 1, 128>}, {transform_indices = @transform_3, window_bounds = array<i64: 256, 128>}]} {
    %c0 = arith.constant 0 : index
    %c0_0 = arith.constant 0 : index
    %0 = vector.load %arg1[%c0, %c0_0] : memref<256x128xf32, #tpu.memory_space<vmem>>, vector<256x128xf32>
    %c0_1 = arith.constant 0 : index
    %c0_2 = arith.constant 0 : index
    %1 = vector.load %arg2[%c0_1, %c0_2] : memref<128x128xf32, #tpu.memory_space<vmem>>, vector<128x128xf32>
    %cst = arith.constant dense<0.000000e+00> : vector<256x128xf32>
    %2 = tpu.matmul %0, %1, %cst {dimension_numbers = #tpu.dot_dimension_numbers<[1], [0], [0], [1], [0, 0, 1, 1], [], []>} : vector<256x128xf32>, vector<128x128xf32>, vector<256x128xf32> -> vector<256x128xf32>
    %c0_3 = arith.constant 0 : index
    %c0_4 = arith.constant 0 : index
    %3 = vector.load %arg3[%c0_3, %c0_4] : memref<1x128xf32, #tpu.memory_space<vmem>>, vector<1x128xf32>
    %4 = vector.broadcast %3 : vector<1x128xf32> to vector<256x128xf32>
    %5 = arith.addf %2, %4 : vector<256x128xf32>
    %6 = math.sin %5 : vector<256x128xf32>
    %c0_5 = arith.constant 0 : index
    %c0_6 = arith.constant 0 : index
    %7 = vector.load %arg4[%c0_5, %c0_6] : memref<256x128xf32, #tpu.memory_space<vmem>>, vector<256x128xf32>
    tpu.vector_store %arg4[%c0_5, %c0_6], %6 {strides = array<i32>} : memref<256x128xf32, #tpu.memory_space<vmem>>, vector<256x128xf32>,
    return
  }
  func.func @transform_0(%arg0: i32) -> (i32, i32) {
    %c0_i32 = arith.constant 0 : i32
    %c0_i32_0 = arith.constant 0 : i32
    return %arg0, %c0_i32 : i32, i32
  }
  func.func @transform_1(%arg0: i32) -> (i32, i32) {
    %c0_i32 = arith.constant 0 : i32
    %c0_i32_0 = arith.constant 0 : i32
    %c0_i32_1 = arith.constant 0 : i32
    return %c0_i32, %c0_i32_0 : i32, i32
  }
  func.func @transform_2(%arg0: i32) -> (i32, i32) {
    %c0_i32 = arith.constant 0 : i32
    %c0_i32_0 = arith.constant 0 : i32
    %c0_i32_1 = arith.constant 0 : i32
    return %c0_i32, %c0_i32_0 : i32, i32
  }
  func.func @transform_3(%arg0: i32) -> (i32, i32) {
    %c0_i32 = arith.constant 0 : i32
    %c0_i32_0 = arith.constant 0 : i32
    return %arg0, %c0_i32 : i32, i32
  }
}

</mosaic_0001>

<bundles_post_ra>
// kernel: tpu_custom_call.1
= control target key start
LH: loop header
LB: loop body
LE: loop exit
PB: predicated region body
PF: predicated region fallthrough
CT: control target
= control target key end

     0   :  { %8 = vsyncpa [#allocation3], 0  ;;  %s9511_s0 = inlined_call_operand.hbm [shape: f32[512,128], index: 0, kind: input, shape index: {}]   ;;  %s9512_s1 = inlined_call_operand.hbm [shape: f32[128,128], index: 1, kind: input, shape index: {}]   ;;  %s9513_s2 = inlined_call_operand.vmem [shape: f32[1,128], index: 2, kind: input, shape index: {}]   ;;  %s9514_s3 = inlined_call_operand.hbm [shape: f32[512,128], index: 3, kind: output, shape index: {}]  }
   0x1   :  { %10 = vsyncpa [#allocation3 + $0x1], 0 }
   0x2   :  { %11 = vsyncpa [#allocation6], 0 }
   0x3   :  { %12 = vsyncpa [#allocation4], 0 }
   0x4   :  { %14 = vsyncpa [#allocation4 + $0x1], 0  ;;  %s5868_s12 = smov 0   ;;  %s5870_s13 = smov 0  }
   0x5   :  { %s5872_s14 = smov 0   ;;  %s5874_s15 = smov 0  }
   0x6 LB: > { %s5889_s16 = sadd.s32 4294967295, %s5834_s15   ;;  %s5466_s17 = sadd.s32 4294967294, %s5834_s15   ;;  %s5834_s15 = sphi %s5874_s15, %s9570_s15   ;;  %s5830_s14 = sphi %s5872_s14, %s9569_s14   ;;  %s5826_s13 = sphi %s5870_s13, %s9568_s13   ;;  %s5822_s12 = sphi %s5868_s12, %s9567_s12  }
   0x7   : > { %p40_p0 = scmp.ne.s32.totalorder %s5826_s13, %s5822_s12  ;;  %p41_p1 = scmp.eq.s32.totalorder %s5889_s16, 0 }
   0x8   : > { %p106_p2 = scmp.eq.s32.totalorder %s5889_s16, 1  ;;  %p112_p3 = scmp.eq.s32.totalorder %s5466_s17, 1 }
   0x9   : > { %p5898_p4 = por %p41_p1, %p40_p0  ;;  %p5467_p5 = scmp.ge.s32.totalorder %s5834_s15, 1 }
   0xa   : > { %p5903_p6 = por %p112_p3, %p40_p0  ;;  %p119_p7 = scmp.lt.s32.totalorder %s5834_s15, 3 }
   0xb   : > { %s130_s22 = sshll.u32 %s9512_s1, 4  ;;  %s5836_s24 = smov [#allocation5]   ;;  %s131_s22 = int_to_ptr.hbm [resolvable:$true] %s130_s22 }
   0xc   : > { %p5911_p8 = pnand %p5467_p5, %p119_p7  ;;  %s132_s25 = sshll.u32 %s5836_s24, 4  ;;  %s133_s25 = int_to_ptr.vmem [resolvable:$true] %s132_s25 }
   0xd   : > { %s5921_s26 = sadd.s32 1, %s5834_s15   ;;  %s5837_s27 = smov 128  }
   0xe   : > { %p5636_p9 = pneg %p5911_p8  ;;  %s5838_s28 = smov 8  }
   0xf   : > { %s24_s29 = ssub.s32 %s5834_s15, %s5921_s26  ;;  %s27_s30 = sadd.s32 1, %s5830_s14 }
  0x10   : > { %p5637_p10 = pnand %p5636_p9, %p41_p1  ;;  %p25_p12 = scmp.eq.s32.totalorder %s24_s29, 0 }
  0x11   : > { %p34_p13 = scmp.ne.s32.totalorder %s5830_s14, %s5826_s13  ;;  %p35_p0 = scmp.eq.s32.totalorder %s5834_s15, 0 }
  0x12   : > { %5639 = dma.hbm_to_vmem [thread:$0]  (!%p5637_p10), %s131_s22, 2048, %s133_s25, [#allocation6], %s5837_s27, %s5837_s27, %s5838_s28  }
  0x13   : > { %s5933_s4 = scalar_select %p25_p12, %s5830_s14, %s27_s30  }
  0x14   : > { %p5937_p3 = por %p106_p2, %p34_p13  ;;  %p5649_p5 = scmp.lt.s32.totalorder %s5834_s15, 2 }
  0x15   : > { %s149_s6 = sand.u32 1, %s5830_s14   ;;  %s5578_s7 = sshll.u32 %s5834_s15, 8 }
  0x16   : > { %p36_p7 = por %p35_p0, %p34_p13  ;;  %s5470_s8 = sshll.u32 %s149_s6, 8 }
  0x17   : > { %s158_s11 = scalar_lea.hbm %s9511_s0, %s5578_s7  ;;  %s153_s20 = scalar_lea.vmem [#allocation2], %s5470_s8 }
  0x18   : > { %s159_s17 = sshll.u32 %s158_s11, 4  ;;  %s161_s21 = sshll.u32 %s153_s20, 4  ;;  %s160_s17 = int_to_ptr.hbm [resolvable:$true] %s159_s17  ;;  %s162_s21 = int_to_ptr.vmem [resolvable:$true] %s161_s21 }
  0x19   : > { %p5947_p9 = pnand %p5649_p5, %p36_p7  ;;  %s150_s24 = scalar_lea.sflag [#allocation3], %s149_s6 }
  0x1a   : > { %s5734_s25 = sshra.s32 %s160_s17, 4  ;;  %s5741_s8 = scalar_lea.hbm %s9511_s0, 512  ;;  %s5735_s25 = int_to_ptr.hbm [resolvable:$true] %s5734_s25 }
  0x1b   : > { %s5736_s29 = scalar_lea.hbm %s5735_s25, 256  ;;  %p5738_p10 = pneg %p5947_p9 }
  0x1c   : > { %p5737_p2 = scmp.ne.s32.totalorder %s5735_s25, %s5736_s29  ;;  %p5742_p0 = scmp.lt.s32.totalorder %s5735_s25, %s9511_s0 }
  0x1d   : > { %p5743_p5 = scmp.lt.s32.totalorder %s5741_s8, %s5736_s29 }
  0x1e   : > { %p5739_p12 = pnand %p5738_p10, %p5737_p2 }
  0x1f   : > { %p5744_p7 = por %p5743_p5, %p5742_p0 }
  0x20   : > { %p5740_p13 = pneg %p5739_p12 }
  0x22   : > { %p5745_p11 = pnand %p5744_p7, %p5740_p13 }
  0x24   : > { %5748 = shalt.err (!%p5745_p11)
}
  0x25   : > { %5643 = dma.hbm_to_vmem [thread:$0]  (!%p5947_p9), %s160_s17, 4096, %s162_s21, %s150_s24, %s5837_s27, %s5837_s27, %s5838_s28  }
  0x26   : > { %173 = sbr.rel (%p5911_p8) target bundleno = 1446 (0x5a6), region = 32  ;;  %s5967_s6 = sand.u32 (!%p5911_p8), 1, %s5826_s13  }
  0x27   : > { %s5474_s11 = sshll.u32 (!%p5911_p8), %s5967_s6, 8  ;;  %s176_s20 = scalar_lea.sflag (!%p5911_p8), [#allocation3], %s5967_s6 }
  0x28   : > { %s5973_s25 = scalar_lea.vmem (!%p5911_p8), [#allocation2], %s5474_s11 }
  0x2b   : > { %5809 = dma.done.wait (%p5898_p4), %s176_s20, 4096  }
  0x2c   : > { %5811 = vsyncadd (%p5898_p4), %s176_s20, 4294963200 }
  0x2d   : > { %5813 = dma.done.wait (%p41_p1), [#allocation6], 2048  }
  0x2e   : > { %5815 = vsyncadd (%p41_p1), [#allocation6], 4294965248  ;;  %v257_v0 = vld [vmem:[#allocation5 + $0x78] sm:$0xff]  ;;  %v256_v1 = vld [vmem:[#allocation5 + $0x70] sm:$0xff]  ;;  %s6323_s27 = scalar_lea.vmem [#allocation7], %s5474_s11  ;;  %s5579_s18 = sshll.u32 %s5889_s16, 8 }
  0x2f   : > { %262 = vmatpush.msra.mxu0 %v257_v0  ;;  %5580 = vmatpush.msra.mxu1 %v257_v0  ;;  %v255_v2 = vld [vmem:[#allocation5 + $0x68] sm:$0xff]  ;;  %v254_v3 = vld [vmem:[#allocation5 + $0x60] sm:$0xff]  ;;  %v253_v4 = vld [vmem:[#allocation5 + $0x58] sm:$0xff]  ;;  %s5379_s17 = scalar_lea.hbm %s9514_s3, %s5579_s18  ;;  %s5380_s21 = sshll.u32 %s6323_s27, 4  ;;  %s5381_s21 = int_to_ptr.vmem [resolvable:$true] %s5380_s21 }
  0x30   : > { %5581 = vmatpush.msra.mxu2 %v257_v0  ;;  %5582 = vmatpush.msra.mxu3 %v257_v0  ;;  %v252_v5 = vld [vmem:[#allocation5 + $0x50] sm:$0xff]  ;;  %v251_v6 = vld [vmem:[#allocation5 + $0x48] sm:$0xff]  ;;  %v250_v7 = vld [vmem:[#allocation5 + $0x40] sm:$0xff]  ;;  %s5382_s22 = sshll.u32 %s5379_s17, 4  ;;  %s5368_s16 = scalar_lea.sflag [#allocation4], %s5967_s6  ;;  %s5383_s22 = int_to_ptr.hbm [resolvable:$true] %s5382_s22 }
  0x31   : > { %263 = vmatpush.msra.mxu0 %v256_v1  ;;  %5583 = vmatpush.msra.mxu1 %v256_v1  ;;  %v249_v8 = vld [vmem:[#allocation5 + $0x38] sm:$0xff]  ;;  %v248_v9 = vld [vmem:[#allocation5 + $0x30] sm:$0xff]  ;;  %v247_v10 = vld [vmem:[#allocation5 + $0x28] sm:$0xff]  ;;  %s5778_s24 = sshra.s32 %s5383_s22, 4  ;;  %s5784_s8 = scalar_lea.hbm %s9514_s3, 512  ;;  %s5779_s24 = int_to_ptr.hbm [resolvable:$true] %s5778_s24 }
  0x32   : > { %5584 = vmatpush.msra.mxu2 %v256_v1  ;;  %5585 = vmatpush.msra.mxu3 %v256_v1  ;;  %v246_v11 = vld [vmem:[#allocation5 + $0x20] sm:$0xff]  ;;  %v245_v12 = vld [vmem:[#allocation5 + $0x18] sm:$0xff]  ;;  %v244_v13 = vld [vmem:[#allocation5 + $0x10] sm:$0xff]  ;;  %s5780_s29 = scalar_lea.hbm %s5779_s24, 256  ;;  %p5785_p11 = scmp.lt.s32.totalorder %s5779_s24, %s9514_s3 }
  0x33   : > { %264 = vmatpush.msra.mxu0 %v255_v2  ;;  %5586 = vmatpush.msra.mxu1 %v255_v2  ;;  %v243_v14 = vld [vmem:[#allocation5 + $0x8] sm:$0xff]  ;;  %v242_v15 = vld [vmem:[#allocation5] sm:$0xff]  ;;  %v212_v24 = vld [vmem:[%s5973_s25 + $0x10] sm:$0xff]  ;;  %p5781_p1 = scmp.ne.s32.totalorder %s5779_s24, %s5780_s29  ;;  %p5786_p9 = scmp.lt.s32.totalorder %s5784_s8, %s5780_s29 }
  0x34   : > { %5587 = vmatpush.msra.mxu2 %v255_v2  ;;  %5588 = vmatpush.msra.mxu3 %v255_v2  ;;  %v210_v16 = vld [vmem:[%s5973_s25] sm:$0xff]  ;;  %v211_v20 = vld [vmem:[%s5973_s25 + $0x8] sm:$0xff]  ;;  %v220_v25 = vld [vmem:[%s5973_s25 + $0x50] sm:$0xff] }
  0x35   : > { %265 = vmatpush.msra.mxu0 %v254_v3  ;;  %5589 = vmatpush.msra.mxu1 %v254_v3  ;;  %v218_v17 = vld [vmem:[%s5973_s25 + $0x40] sm:$0xff]  ;;  %v219_v21 = vld [vmem:[%s5973_s25 + $0x48] sm:$0xff]  ;;  %v228_v26 = vld [vmem:[%s5973_s25 + $0x90] sm:$0xff]  ;;  %p5782_p4 = pnand %p5781_p1, %p5937_p3  ;;  %p5787_p2 = por %p5786_p9, %p5785_p11 }
  0x36   : > { %5590 = vmatpush.msra.mxu2 %v254_v3  ;;  %5591 = vmatpush.msra.mxu3 %v254_v3  ;;  %v226_v18 = vld [vmem:[%s5973_s25 + $0x80] sm:$0xff]  ;;  %v227_v22 = vld [vmem:[%s5973_s25 + $0x88] sm:$0xff]  ;;  %v236_v27 = vld [vmem:[%s5973_s25 + $0xd0] sm:$0xff] }
  0x37   : > { %266 = vmatpush.msra.mxu0 %v253_v4  ;;  %5592 = vmatpush.msra.mxu1 %v253_v4  ;;  %v234_v19 = vld [vmem:[%s5973_s25 + $0xc0] sm:$0xff]  ;;  %v235_v23 = vld [vmem:[%s5973_s25 + $0xc8] sm:$0xff]  ;;  %v213_v28 = vld [vmem:[%s5973_s25 + $0x18] sm:$0xff]  ;;  %p5783_p8 = pneg %p5782_p4 }
  0x38   : > { %5593 = vmatpush.msra.mxu2 %v253_v4  ;;  %5594 = vmatpush.msra.mxu3 %v253_v4  ;;  %v221_v29 = vld [vmem:[%s5973_s25 + $0x58] sm:$0xff]  ;;  %v214_v32 = vld [vmem:[%s5973_s25 + $0x20] sm:$0xff]  ;;  %v215_v36 = vld [vmem:[%s5973_s25 + $0x28] sm:$0xff] }
  0x39   : > { %267 = vmatpush.msra.mxu0 %v252_v5  ;;  %5595 = vmatpush.msra.mxu1 %v252_v5  ;;  %v229_v30 = vld [vmem:[%s5973_s25 + $0x98] sm:$0xff]  ;;  %v222_v33 = vld [vmem:[%s5973_s25 + $0x60] sm:$0xff]  ;;  %v223_v37 = vld [vmem:[%s5973_s25 + $0x68] sm:$0xff]  ;;  %p5788_p10 = pnand %p5787_p2, %p5783_p8 }
  0x3a   : > { %5596 = vmatpush.msra.mxu2 %v252_v5  ;;  %5597 = vmatpush.msra.mxu3 %v252_v5  ;;  %v237_v31 = vld [vmem:[%s5973_s25 + $0xd8] sm:$0xff]  ;;  %v230_v34 = vld [vmem:[%s5973_s25 + $0xa0] sm:$0xff]  ;;  %v231_v38 = vld [vmem:[%s5973_s25 + $0xa8] sm:$0xff] }
  0x3b   : > { %268 = vmatpush.msra.mxu0 %v251_v6  ;;  %5598 = vmatpush.msra.mxu1 %v251_v6  ;;  %v238_v35 = vld [vmem:[%s5973_s25 + $0xe0] sm:$0xff]  ;;  %v239_v39 = vld [vmem:[%s5973_s25 + $0xe8] sm:$0xff]  ;;  %v216_v40 = vld [vmem:[%s5973_s25 + $0x30] sm:$0xff] }
  0x3c   : > { %5599 = vmatpush.msra.mxu2 %v251_v6  ;;  %5600 = vmatpush.msra.mxu3 %v251_v6  ;;  %v224_v41 = vld [vmem:[%s5973_s25 + $0x70] sm:$0xff]  ;;  %v217_v44 = vld [vmem:[%s5973_s25 + $0x38] sm:$0xff]  ;;  %v6018_v48 = vld [vmem:[%s9513_s2] ss:$0 sm:$0xff] }
  0x3d   : > { %269 = vmatpush.msra.mxu0 %v250_v7  ;;  %5601 = vmatpush.msra.mxu1 %v250_v7  ;;  %v232_v42 = vld [vmem:[%s5973_s25 + $0xb0] sm:$0xff]  ;;  %v225_v45 = vld [vmem:[%s5973_s25 + $0x78] sm:$0xff] }
  0x3e   : > { %5602 = vmatpush.msra.mxu2 %v250_v7  ;;  %5603 = vmatpush.msra.mxu3 %v250_v7  ;;  %v240_v43 = vld [vmem:[%s5973_s25 + $0xf0] sm:$0xff]  ;;  %v233_v46 = vld [vmem:[%s5973_s25 + $0xb8] sm:$0xff] }
  0x3f   : > { %270 = vmatpush.msra.mxu0 %v249_v8  ;;  %5604 = vmatpush.msra.mxu1 %v249_v8  ;;  %v241_v47 = vld [vmem:[%s5973_s25 + $0xf8] sm:$0xff] }
  0x40   : > { %5605 = vmatpush.msra.mxu2 %v249_v8  ;;  %5606 = vmatpush.msra.mxu3 %v249_v8 }
  0x41   : > { %271 = vmatpush.msra.mxu0 %v248_v9  ;;  %5607 = vmatpush.msra.mxu1 %v248_v9 }
  0x42   : > { %5608 = vmatpush.msra.mxu2 %v248_v9  ;;  %5609 = vmatpush.msra.mxu3 %v248_v9 }
  0x43   : > { %272 = vmatpush.msra.mxu0 %v247_v10  ;;  %5610 = vmatpush.msra.mxu1 %v247_v10 }
  0x44   : > { %5611 = vmatpush.msra.mxu2 %v247_v10  ;;  %5612 = vmatpush.msra.mxu3 %v247_v10 }
  0x45   : > { %273 = vmatpush.msra.mxu0 %v246_v11  ;;  %5613 = vmatpush.msra.mxu1 %v246_v11 }
  0x46   : > { %5614 = vmatpush.msra.mxu2 %v246_v11  ;;  %5615 = vmatpush.msra.mxu3 %v246_v11 }
  0x47   : > { %274 = vmatpush.msra.mxu0 %v245_v12  ;;  %5616 = vmatpush.msra.mxu1 %v245_v12 }
  0x48   : > { %5617 = vmatpush.msra.mxu2 %v245_v12  ;;  %5618 = vmatpush.msra.mxu3 %v245_v12  ;;  %v5839_v12 = vmov 683565275  }
  0x49   : > { %275 = vmatpush.msra.mxu0 %v244_v13  ;;  %5619 = vmatpush.msra.mxu1 %v244_v13 }
  0x4a   : > { %5620 = vmatpush.msra.mxu2 %v244_v13  ;;  %5621 = vmatpush.msra.mxu3 %v244_v13 }
  0x4b   : > { %276 = vmatpush.msra.mxu0 %v243_v14  ;;  %5622 = vmatpush.msra.mxu1 %v243_v14 }
  0x4c   : > { %5623 = vmatpush.msra.mxu2 %v243_v14  ;;  %5624 = vmatpush.msra.mxu3 %v243_v14  ;;  %v5840_v14 = vmov 2475754826  }
  0x4d   : > { %277 = vmatpush.msra.mxu0 %v242_v15  ;;  %5625 = vmatpush.msra.mxu1 %v242_v15 }
  0x4e   : > { %5626 = vmatpush.msra.mxu2 %v242_v15  ;;  %5627 = vmatpush.msra.mxu3 %v242_v15 }
  0x4f   : > { %278 = vmatmul.f32.vlgmr.msra.gmra.mxu0 %v210_v16  ;;  %302 = vmatmul.f32.vlgmr.msra.gmra.mxu1 %v218_v17  ;;  %v5841_v16 = vmov 2131351028  }
  0x50   : > { %326 = vmatmul.f32.vlgmr.msra.gmra.mxu2 %v226_v18  ;;  %350 = vmatmul.f32.vlgmr.msra.gmra.mxu3 %v234_v19  ;;  %v5842_v18 = vmov 2102212464  }
  0x57   : > { %281 = vmatmul.f32.gmra.mxu0 %v211_v20  ;;  %305 = vmatmul.f32.gmra.mxu1 %v219_v21  ;;  %v5843_v20 = vmov 920167782  }
  0x58   : > { %329 = vmatmul.f32.gmra.mxu2 %v227_v22  ;;  %353 = vmatmul.f32.gmra.mxu3 %v235_v23 }
  0x5f   : > { %284 = vmatmul.f32.gmra.mxu0 %v212_v24  ;;  %308 = vmatmul.f32.gmra.mxu1 %v220_v25 }
  0x60   : > { %332 = vmatmul.f32.gmra.mxu2 %v228_v26  ;;  %356 = vmatmul.f32.gmra.mxu3 %v236_v27 }
  0x67   : > { %287 = vmatmul.f32.gmra.mxu0 %v213_v28  ;;  %311 = vmatmul.f32.gmra.mxu1 %v221_v29  ;;  %v5844_v29 = vmov 1326507024  }
  0x68   : > { %335 = vmatmul.f32.gmra.mxu2 %v229_v30  ;;  %359 = vmatmul.f32.gmra.mxu3 %v237_v31 }
  0x6f   : > { %290 = vmatmul.f32.gmra.mxu0 %v214_v32  ;;  %314 = vmatmul.f32.gmra.mxu1 %v222_v33 }
  0x70   : > { %338 = vmatmul.f32.gmra.mxu2 %v230_v34  ;;  %362 = vmatmul.f32.gmra.mxu3 %v238_v35 }
  0x77   : > { %293 = vmatmul.f32.gmra.mxu0 %v215_v36  ;;  %317 = vmatmul.f32.gmra.mxu1 %v223_v37 }
  0x78   : > { %341 = vmatmul.f32.gmra.mxu2 %v231_v38  ;;  %365 = vmatmul.f32.gmra.mxu3 %v239_v39 }
  0x7f   : > { %296 = vmatmul.f32.gmra.mxu0 %v216_v40  ;;  %320 = vmatmul.f32.gmra.mxu1 %v224_v41 }
  0x80   : > { %344 = vmatmul.f32.gmra.mxu2 %v232_v42  ;;  %368 = vmatmul.f32.gmra.mxu3 %v240_v43 }
  0x87   : > { %299 = vmatmul.f32.gmra.mxu0 %v217_v44  ;;  %323 = vmatmul.f32.gmra.mxu1 %v225_v45 }
  0x88   : > { %347 = vmatmul.f32.gmra.mxu2 %v233_v46  ;;  %371 = vmatmul.f32.gmra.mxu3 %v241_v47 }
  0xcc   : > { %v279_v49 = vpop.f32.mrf.mxu0  ;;  %v303_v50 = vpop.f32.mrf.mxu1 }
  0xcd   : > { %v6021_v51 = vadd.f32 %v6018_v48, %v279_v49  ;;  %v6024_v52 = vadd.f32 %v6018_v48, %v303_v50 }
  0xcf   : > { %v375_v53 = vand.u32 2147483647, %v6021_v51  ;;  %v378_v54 = vand.u32 2139095040, %v6021_v51  ;;  %v1615_v55 = vand.u32 2147483647, %v6024_v52  ;;  %v1618_v56 = vand.u32 2139095040, %v6024_v52 }
  0xd1   : > { %v379_v57 = vshrl.u32 %v378_v54, 23  ;;  %v382_v58 = vand.u32 8388607, %v375_v53  ;;  %v1619_v59 = vshrl.u32 %v1618_v56, 23  ;;  %v1622_v63 = vand.u32 8388607, %v1615_v55 }
  0xd3   : > { %v5477_v60 = vadd.s32 4294967169, %v379_v57  ;;  %v383_v61 = vor.u32 8388608, %v382_v58  ;;  %v5501_v62 = vadd.s32 4294967169, %v1619_v59  ;;  %v327_v2 = vpop.f32.mrf.mxu2  ;;  %v1623_v5 = vor.u32 8388608, %v1622_v63 }
  0xd4   : > { %v6041_v10 = vadd.f32 %v6018_v48, %v327_v2 }
  0xd5   : > { %v385_v0 = vadd.s32 1, %v5477_v60  ;;  %v1625_v1 = vadd.s32 1, %v5501_v62  ;;  %v6034_v4 = vshll.u32 %v383_v61, 8  ;;  %v6049_v23 = vshll.u32 %v1623_v5, 8 }
  0xd6   : > { %v2858_v37 = vand.u32 2139095040, %v6041_v10 }
  0xd7   : > { %vm386_vm0 = vcmp.gt.s32.totalorder %v385_v0, 0  ;;  %vm1626_vm1 = vcmp.gt.s32.totalorder %v1625_v1, 0  ;;  %v424_v22 = vand.u32 65535, %v6034_v4  ;;  %v425_v27 = vshrl.u32 %v6034_v4, 16 }
  0xd8   : > { %v387_v3 = vsel %vm386_vm0, %v385_v0, 0  ;;  %v1627_v7 = vsel %vm1626_vm1, %v1625_v1, 0  ;;  %v6093_v57 = vand.u32 65535, %v6049_v23 }
  0xd9   : > { %v389_v6 = vand.u32 31, %v387_v3  ;;  %v6036_v8 = vshrl.u32 %v387_v3, 5  ;;  %v6038_v9 = vand.u32 31, %v1627_v7  ;;  %v6099_v0 = vshrl.u32 %v1627_v7, 5 }
  0xdb   : > { %v390_v11 = vsub.s32 32, %v389_v6  ;;  %v392_v13 = vshll.u32 %v5839_v12, %v389_v6  ;;  %v395_v15 = vshll.u32 %v5840_v14, %v389_v6  ;;  %v398_v17 = vshll.u32 %v5841_v16, %v389_v6 }
  0xdc   : > { %v401_v19 = vshll.u32 %v5842_v18, %v389_v6  ;;  %v404_v21 = vshll.u32 %v5843_v20, %v389_v6  ;;  %vm407_vm2 = vcmp.lt.s32.totalorder %v6036_v8, 1  ;;  %vm410_vm3 = vcmp.lt.s32.totalorder %v6036_v8, 4 }
  0xdd   : > { %v393_v24 = vshrl.u32 %v5840_v14, %v390_v11  ;;  %v396_v25 = vshrl.u32 %v5841_v16, %v390_v11  ;;  %v399_v26 = vshrl.u32 %v5842_v18, %v390_v11  ;;  %v402_v28 = vshrl.u32 %v5843_v20, %v390_v11 }
  0xde   : > { %v405_v30 = vshrl.u32 %v5844_v29, %v390_v11  ;;  %v6060_v34 = vsub.s32 32, %v6038_v9  ;;  %vm409_vm4 = vcmp.lt.s32.totalorder %v6036_v8, 3  ;;  %v391_v38 = vshrl.u32 %v5839_v12, %v390_v11 }
  0xdf   : > { %v394_v31 = vor.u32 %v393_v24, %v392_v13  ;;  %v397_v32 = vor.u32 %v396_v25, %v395_v15  ;;  %v400_v33 = vor.u32 %v399_v26, %v398_v17  ;;  %v403_v35 = vor.u32 %v402_v28, %v401_v19 }
  0xe0   : > { %v406_v36 = vor.u32 %v405_v30, %v404_v21  ;;  %vm408_vm5 = vcmp.lt.s32.totalorder %v6036_v8, 2  ;;  %v1632_v43 = vshll.u32 %v5839_v12, %v6038_v9  ;;  %v1635_v44 = vshll.u32 %v5840_v14, %v6038_v9 }
  0xe1   : > { %v415_v39 = vsel %vm407_vm2, %v394_v31, %v397_v32  ;;  %v419_v40 = vsel %vm407_vm2, %v397_v32, %v400_v33  ;;  %v416_v41 = vsel %vm410_vm3, %v403_v35, 920167782  ;;  %v412_v45 = vsel %vm410_vm3, %v400_v33, 2102212464 }
  0xe2   : > { %v420_v42 = vsel %vm410_vm3, %v406_v36, 1326507024  ;;  %v417_v46 = vsel %vm409_vm4, %v400_v33, %v416_v41  ;;  %v1633_v49 = vshrl.u32 %v5840_v14, %v6060_v34  ;;  %v1636_v56 = vshrl.u32 %v5841_v16, %v6060_v34 }
  0xe3   : > { %v421_v47 = vsel %vm409_vm4, %v403_v35, %v420_v42  ;;  %v418_v50 = vsel %vm408_vm5, %v415_v39, %v417_v46  ;;  %v411_v62 = vsel %vm407_vm2, %v391_v38, %v394_v31  ;;  %v413_v63 = vsel %vm409_vm4, %v397_v32, %v412_v45 }
  0xe4   : > { %v422_v54 = vsel %vm408_vm5, %v419_v40, %v421_v47  ;;  %v448_v60 = vand.u32 65535, %v418_v50  ;;  %v449_v61 = vshrl.u32 %v418_v50, 16  ;;  %v6101_v1 = vor.u32 %v1633_v49, %v1632_v43 }
  0xe5   : > { %v426_v58 = vand.u32 65535, %v422_v54  ;;  %v427_v59 = vshrl.u32 %v422_v54, 16  ;;  %v6103_v5 = vor.u32 %v1636_v56, %v1635_v44  ;;  %v1638_v6 = vshll.u32 %v5841_v16, %v6038_v9 }
  0xe6   : > { %v451_v13 = vmul.u32 %v449_v61, %v424_v22  ;;  %v452_v15 = vmul.u32 %v448_v60, %v425_v27  ;;  %v1639_v17 = vshrl.u32 %v5842_v18, %v6060_v34  ;;  %v450_v24 = vmul.u32 %v448_v60, %v424_v22 }
  0xe7   : > { %v429_v2 = vmul.u32 %v427_v59, %v424_v22  ;;  %v430_v3 = vmul.u32 %v426_v58, %v425_v27  ;;  %v428_v11 = vmul.u32 %v426_v58, %v424_v22  ;;  %v431_v19 = vmul.u32 %v427_v59, %v425_v27 }
  0xe8   : > { %v453_v7 = vmul.u32 %v449_v61, %v425_v27  ;;  %v454_v30 = vshll.u32 %v451_v13, 16  ;;  %v456_v32 = vshll.u32 %v452_v15, 16  ;;  %v1641_v33 = vshll.u32 %v5842_v18, %v6038_v9 }
  0xe9   : > { %v432_v21 = vshll.u32 %v429_v2, 16  ;;  %v433_v25 = vshrl.u32 %v429_v2, 16  ;;  %v434_v26 = vshll.u32 %v430_v3, 16  ;;  %v435_v28 = vshrl.u32 %v430_v3, 16 }
  0xea   : > { %v5845_v35 = vmov 0   ;;  %vm458_vm7 = vc.u32 %v450_v24, %v454_v30  ;;  %v460_v38 = vadd.s32 %v454_v30, %v450_v24  ;;  %v1642_v39 = vshrl.u32 %v5843_v20, %v6060_v34 }
  0xeb   : > { %vm436_vm6 = vc.u32 %v428_v11, %v432_v21  ;;  %v438_v31 = vadd.s32 %v432_v21, %v428_v11  ;;  %v459_v27 = vsel %vm458_vm7, 1, %v5845_v35  ;;  %v1644_v40 = vshll.u32 %v5843_v20, %v6038_v9 }
  0xec   : > { %v437_v36 = vsel %vm436_vm6, 1, %v5845_v35  ;;  %v461_v42 = vadd.s32 %v459_v27, %v453_v7  ;;  %vm462_vm9 = vc.u32 %v460_v38, %v456_v32  ;;  %v1640_v43 = vor.u32 %v1639_v17, %v1638_v6 }
  0xed   : > { %v439_v22 = vadd.s32 %v437_v36, %v431_v19  ;;  %vm440_vm8 = vc.u32 %v438_v31, %v434_v26  ;;  %v463_v45 = vsel %vm462_vm9, 1, %v5845_v35  ;;  %v1643_v46 = vor.u32 %v1642_v39, %v1641_v33 }
  0xee   : > { %v441_v41 = vsel %vm440_vm8, 1, %v5845_v35  ;;  %v1645_v47 = vshrl.u32 %v5844_v29, %v6060_v34  ;;  %v455_v49 = vshrl.u32 %v451_v13, 16  ;;  %v465_v50 = vadd.s32 %v463_v45, %v461_v42 }
  0xef   : > { %v443_v44 = vadd.s32 %v441_v41, %v439_v22  ;;  %vm1647_vm10 = vcmp.lt.s32.totalorder %v6099_v0, 1  ;;  %vm1649_vm11 = vcmp.lt.s32.totalorder %v6099_v0, 3  ;;  %v457_v9 = vshrl.u32 %v452_v15, 16 }
  0xf0   : > { %v1646_v56 = vor.u32 %v1645_v47, %v1644_v40  ;;  %vm1650_vm12 = vcmp.lt.s32.totalorder %v6099_v0, 4  ;;  %v6124_v58 = vadd.s32 %v460_v38, %v456_v32  ;;  %v466_v59 = vadd.s32 %v465_v50, %v455_v49 }
  0xf1   : > { %v444_v54 = vadd.s32 %v443_v44, %v433_v25  ;;  %v1655_v60 = vsel %vm1647_vm10, %v6101_v1, %v6103_v5  ;;  %v1656_v61 = vsel %vm1650_vm12, %v1643_v46, 920167782  ;;  %vm1648_vm13 = vcmp.lt.s32.totalorder %v6099_v0, 2 }
  0xf2   : > { %v1657_v3 = vsel %vm1649_vm11, %v1640_v43, %v1656_v61  ;;  %v1659_v6 = vsel %vm1647_vm10, %v6103_v5, %v1640_v43  ;;  %v414_v11 = vsel %vm408_vm5, %v411_v62, %v413_v63  ;;  %v467_v13 = vadd.s32 %v466_v59, %v457_v9 }
  0xf3   : > { %v6132_v2 = vadd.s32 %v444_v54, %v435_v28  ;;  %v1658_v15 = vsel %vm1648_vm13, %v1655_v60, %v1657_v3  ;;  %v1660_v17 = vsel %vm1650_vm12, %v1646_v56, 1326507024  ;;  %v1665_v21 = vshrl.u32 %v6049_v23, 16 }
  0xf4   : > { %v1661_v19 = vsel %vm1649_vm11, %v1643_v46, %v1660_v17  ;;  %v1688_v24 = vand.u32 65535, %v1658_v15  ;;  %v471_v7 = vadd.s32 1, %v467_v13  ;;  %v1689_v62 = vshrl.u32 %v1658_v15, 16 }
  0xf5   : > { %vm470_vm14 = vc.u32 %v6132_v2, %v6124_v58  ;;  %v1662_v8 = vsel %vm1648_vm13, %v1659_v6, %v1661_v19  ;;  %v2859_v63 = vshrl.u32 %v2858_v37, 23  ;;  %v468_v25 = vmul.u32 %v6034_v4, %v414_v11 }
  0xf6   : > { %v1666_v26 = vand.u32 65535, %v1662_v8  ;;  %v1667_v28 = vshrl.u32 %v1662_v8, 16  ;;  %v2855_v30 = vand.u32 2147483647, %v6041_v10  ;;  %v472_v31 = vsel %vm470_vm14, %v471_v7, %v467_v13 }
  0xf7   : > { %v1631_v32 = vshrl.u32 %v5839_v12, %v6060_v34  ;;  %v1691_v33 = vmul.u32 %v1689_v62, %v6093_v57  ;;  %v1692_v36 = vmul.u32 %v1688_v24, %v1665_v21  ;;  %v473_v38 = vadd.s32 %v472_v31, %v468_v25 }
  0xf8   : > { %v1652_v39 = vsel %vm1650_vm12, %v1640_v43, 2102212464  ;;  %v1669_v22 = vmul.u32 %v1667_v28, %v6093_v57  ;;  %v1670_v37 = vmul.u32 %v1666_v26, %v1665_v21  ;;  %v1690_v4 = vmul.u32 %v1688_v24, %v6093_v57 }
  0xf9   : > { %v1693_v27 = vmul.u32 %v1689_v62, %v1665_v21  ;;  %v1694_v40 = vshll.u32 %v1691_v33, 16  ;;  %v5525_v41 = vadd.s32 4294967169, %v2859_v63  ;;  %v474_v42 = vadd.s32 536870912, %v473_v38 }
  0xfa   : > { %v1668_v44 = vmul.u32 %v1666_v26, %v6093_v57  ;;  %v1671_v45 = vmul.u32 %v1667_v28, %v1665_v21  ;;  %v1672_v34 = vshll.u32 %v1669_v22, 16  ;;  %v1674_v46 = vshll.u32 %v1670_v37, 16 }
  0xfb   : > { %v1696_v47 = vshll.u32 %v1692_v36, 16  ;;  %vm1698_vm15 = vc.u32 %v1690_v4, %v1694_v40  ;;  %v1700_v49 = vadd.s32 %v1694_v40, %v1690_v4  ;;  %v475_v50 = vshrl.u32 %v474_v42, 30 }
  0xfc   : > { %vm1676_vm0 = vc.u32 %v1668_v44, %v1672_v34  ;;  %v1678_v43 = vadd.s32 %v1672_v34, %v1668_v44  ;;  %v1699_v54 = vsel %vm1698_vm15, 1, %v5845_v35  ;;  %v2862_v59 = vand.u32 8388607, %v2855_v30 }
  0xfd   : > { %v1677_v9 = vsel %vm1676_vm0, 1, %v5845_v35  ;;  %v1701_v56 = vadd.s32 %v1699_v54, %v1693_v27  ;;  %vm1702_vm1 = vc.u32 %v1700_v49, %v1696_v47  ;;  %v476_v60 = vshll.u32 %v475_v50, 30 }
  0xfe   : > { %v1651_v57 = vsel %vm1647_vm10, %v1631_v32, %v6101_v1  ;;  %v1679_v61 = vadd.s32 %v1677_v9, %v1671_v45  ;;  %vm1680_vm2 = vc.u32 %v1678_v43, %v1674_v46  ;;  %v1653_v3 = vsel %vm1649_vm11, %v6103_v5, %v1652_v39 }
  0xff   : > { %v1681_v6 = vsel %vm1680_vm2, 1, %v5845_v35  ;;  %v1703_v11 = vsel %vm1702_vm1, 1, %v5845_v35  ;;  %v2865_v13 = vadd.s32 1, %v5525_v41  ;;  %v477_v15 = vsub.s32 %v473_v38, %v476_v60 }
 0x100   : > { %v1673_v17 = vshrl.u32 %v1669_v22, 16  ;;  %v1683_v19 = vadd.s32 %v1681_v6, %v1679_v61  ;;  %v1705_v21 = vadd.s32 %v1703_v11, %v1701_v56  ;;  %vm377_vm3 = vcmp.lt.s32.totalorder %v6021_v51, 0 }
 0x101   : > { %v499_v24 = vsub.s32 4, %v475_v50  ;;  %v1695_v7 = vshrl.u32 %v1691_v33, 16  ;;  %vm2866_vm4 = vcmp.gt.s32.totalorder %v2865_v13, 0  ;;  %vm478_vm5 = vcmp.lt.s32.totalorder %v477_v15, 0 }
 0x102   : > { %v479_v1 = vsub.s32 0, %v477_v15  ;;  %v1675_v8 = vshrl.u32 %v1670_v37, 16  ;;  %v1684_v62 = vadd.s32 %v1683_v19, %v1673_v17  ;;  %v1654_v5 = vsel %vm1648_vm13, %v1651_v57, %v1653_v3 }
 0x103   : > { %v1697_v63 = vshrl.u32 %v1692_v36, 16  ;;  %v1706_v25 = vadd.s32 %v1705_v21, %v1695_v7  ;;  %v2867_v26 = vsel %vm2866_vm4, %v2865_v13, 0  ;;  %v6182_v32 = vadd.s32 %v1700_v49, %v1696_v47 }
 0x104   : > { %v480_v28 = vsel %vm478_vm5, %v479_v1, %v477_v15  ;;  %v6180_v31 = vadd.s32 %v1684_v62, %v1675_v8  ;;  %v2863_v38 = vor.u32 8388608, %v2862_v59  ;;  %v500_v33 = vsel %vm377_vm3, %v499_v24, %v475_v50 }
 0x105   : > { %v481_v39 = vclz %v480_v28  ;;  %v1707_v22 = vadd.s32 %v1706_v25, %v1697_v63  ;;  %v2869_v4 = vand.u32 31, %v2867_v26  ;;  %vm6188_vm6 = vcmp.le.f32.partialorder %v375_v53, 0.7853982 }
 0x106   : > { %v469_v36 = vadd.s32 %v6124_v58, %v6132_v2  ;;  %v1708_v37 = vmul.u32 %v6049_v23, %v1654_v5  ;;  %vm1710_vm7 = vc.u32 %v6180_v31, %v6182_v32  ;;  %v502_v42 = vsel %vm6188_vm6, 0, %v500_v33 }
 0x107   : > { %v5478_v27 = vadd.s32 4294967294, %v481_v39  ;;  %v1711_v40 = vadd.s32 1, %v1707_v22  ;;  %v2870_v41 = vsub.s32 32, %v2869_v4  ;;  %v6199_v44 = vshrl.u32 %v2867_v26, 5 }
 0x108   : > { %v2872_v53 = vshll.u32 %v5839_v12, %v2869_v4  ;;  %v6202_v45 = vshll.u32 %v2863_v38, 8  ;;  %v2875_v23 = vshll.u32 %v5840_v14, %v2869_v4  ;;  %v2878_v49 = vshll.u32 %v5841_v16, %v2869_v4 }
 0x109   : > { %vm5479_vm8 = vcmp.lt.s32.totalorder %v5478_v27, 0  ;;  %v1712_v34 = vsel %vm1710_vm7, %v1711_v40, %v1707_v22  ;;  %v2873_v58 = vshrl.u32 %v5840_v14, %v2870_v41  ;;  %v2876_v47 = vshrl.u32 %v5841_v16, %v2870_v41 }
 0x10a   : > { %v484_v2 = vsel %vm5479_vm8, 0, %v5478_v27  ;;  %v1713_v46 = vadd.s32 %v1712_v34, %v1708_v37  ;;  %v2879_v54 = vshrl.u32 %v5842_v18, %v2870_v41  ;;  %v2881_v9 = vshll.u32 %v5842_v18, %v2869_v4  ;;  %v351_v34 = vpop.f32.mrf.mxu3 }
 0x10b   : > { %v485_v50 = vsub.s32 32, %v484_v2  ;;  %v489_v43 = vsub.s32 4294967266, %v484_v2  ;;  %v486_v56 = vshll.u32 %v477_v15, %v484_v2  ;;  %v2874_v60 = vor.u32 %v2873_v58, %v2872_v53 }
 0x10c   : > { %v1714_v59 = vadd.s32 536870912, %v1713_v46  ;;  %v2882_v57 = vshrl.u32 %v5843_v20, %v2870_v41  ;;  %v2877_v6 = vor.u32 %v2876_v47, %v2875_v23  ;;  %v2885_v11 = vshrl.u32 %v5844_v29, %v2870_v41 }
 0x10d   : > { %v487_v61 = vshrl.u32 %v469_v36, %v485_v50  ;;  %v490_v3 = vadd.s32 127, %v489_v43  ;;  %v519_v13 = vadd.s32 3, %v502_v42  ;;  %v2880_v7 = vor.u32 %v2879_v54, %v2878_v49 }
 0x10e   : > { %v1715_v17 = vshrl.u32 %v1714_v59, 30  ;;  %v2883_v19 = vor.u32 %v2882_v57, %v2881_v9  ;;  %v2884_v1 = vshll.u32 %v5843_v20, %v2869_v4  ;;  %vm1617_vm9 = vcmp.lt.s32.totalorder %v6024_v52, 0 }
 0x10f   : > { %v488_v21 = vor.u32 %v487_v61, %v486_v56  ;;  %v491_v24 = vshll.u32 %v490_v3, 23  ;;  %vm2887_vm10 = vcmp.lt.s32.totalorder %v6199_v44, 1  ;;  %v2904_v8 = vand.u32 65535, %v6202_v45 }
 0x110   : > { %v1716_v15 = vshll.u32 %v1715_v17, 30  ;;  %v2905_v62 = vshrl.u32 %v6202_v45, 16  ;;  %v2886_v63 = vor.u32 %v2885_v11, %v2884_v1  ;;  %vm2890_vm11 = vcmp.lt.s32.totalorder %v6199_v44, 4 }
 0x111   : > { %v492_v5 = vor.u32 4788187, %v491_v24  ;;  %v2895_v25 = vsel %vm2887_vm10, %v2874_v60, %v2877_v6  ;;  %v6220_v26 = vand.u32 3, %v519_v13  ;;  %vm2889_vm12 = vcmp.lt.s32.totalorder %v6199_v44, 3 }
 0x112   : > { %v6222_v28 = vsub.s32 %v1713_v46, %v1716_v15  ;;  %v2896_v38 = vsel %vm2890_vm11, %v2883_v19, 920167782  ;;  %v495_v33 = vcvt.s32.f32 %v488_v21  ;;  %vm2888_vm13 = vcmp.lt.s32.totalorder %v6199_v44, 2 }
 0x113   : > { %v493_v39 = vand.u32 2147483647, %v492_v5  ;;  %v2897_v22 = vsel %vm2889_vm12, %v2880_v7, %v2896_v38  ;;  %v2871_v36 = vshrl.u32 %v5839_v12, %v2870_v41  ;;  %v1739_v40 = vsub.s32 4, %v1715_v17 }
 0x114   : > { %vm1718_vm14 = vcmp.lt.s32.totalorder %v6222_v28, 0  ;;  %v1719_v4 = vsub.s32 0, %v6222_v28  ;;  %v2898_v37 = vsel %vm2888_vm13, %v2895_v25, %v2897_v22  ;;  %v2899_v42 = vsel %vm2887_vm10, %v2877_v6, %v2880_v7 }
 0x115   : > { %v496_v27 = vmul.f32 %v495_v33, %v493_v39  ;;  %v2900_v53 = vsel %vm2890_vm11, %v2886_v63, 1326507024  ;;  %v2892_v23 = vsel %vm2890_vm11, %v2880_v7, 2102212464  ;;  %v2928_v2 = vand.u32 65535, %v2898_v37 }
 0x116   : > { %v1720_v58 = vsel %vm1718_vm14, %v1719_v4, %v6222_v28  ;;  %v2901_v41 = vsel %vm2889_vm12, %v2883_v19, %v2900_v53  ;;  %v2929_v50 = vshrl.u32 %v2898_v37, 16  ;;  %v1709_v43 = vadd.s32 %v6182_v32, %v6180_v31 }
 0x117   : > { %v497_v46 = vxor.u32 2147483648, %v496_v27  ;;  %v1721_v47 = vclz %v1720_v58  ;;  %v2902_v49 = vsel %vm2888_vm13, %v2899_v42, %v2901_v41  ;;  %v6250_v54 = vsel %vm2887_vm10, %v2871_v36, %v2874_v60 }
 0x118   : > { %v2906_v9 = vand.u32 65535, %v2902_v49  ;;  %v6253_v56 = vadd.f32 %v6018_v48, %v351_v34  ;;  %v6259_v61 = vsel %vm1617_vm9, %v1739_v40, %v1715_v17  ;;  %v2907_v3 = vshrl.u32 %v2902_v49, 16 }
 0x119   : > { %v498_v59 = vsel %vm377_vm3, %v497_v46, %v496_v27  ;;  %v5502_v57 = vadd.s32 4294967294, %v1721_v47  ;;  %v6268_v32 = vsel %vm2889_vm12, %v2877_v6, %v2892_v23  ;;  %v2930_v11 = vmul.u32 %v2928_v2, %v2904_v8 }
 0x11a   : > { %v6264_v31 = vsel %vm6188_vm6, %v6021_v51, %v498_v59  ;;  %v2910_v60 = vmul.u32 %v2906_v9, %v2905_v62  ;;  %v2909_v19 = vmul.u32 %v2907_v3, %v2904_v8  ;;  %v6272_v21 = vmul.u32 %v2929_v50, %v2904_v8 }
 0x11b   : > { %v503_v13 = vmul.f32 %v6264_v31, %v6264_v31  ;;  %vm5503_vm15 = vcmp.lt.s32.totalorder %v5502_v57, 0  ;;  %v2908_v24 = vmul.u32 %v2906_v9, %v2904_v8  ;;  %v2911_v7 = vmul.u32 %v2907_v3, %v2905_v62 }
 0x11c   : > { %v1724_v17 = vsel %vm5503_vm15, 0, %v5502_v57  ;;  %v6274_v1 = vmul.u32 %v2928_v2, %v2905_v62  ;;  %v2914_v63 = vshll.u32 %v2910_v60, 16  ;;  %v2912_v25 = vshll.u32 %v2909_v19, 16 }
 0x11d   : > { %v504_v0 = vmul.f32 -0.001358992, %v503_v13  ;;  %v511_v15 = vmul.f32 -0.00019511016, %v503_v13  ;;  %v1725_v5 = vsub.s32 32, %v1724_v17  ;;  %v1729_v6 = vsub.s32 4294967266, %v1724_v17 }
 0x11e   : > { %v2915_v38 = vshrl.u32 %v2910_v60, 16  ;;  %v2933_v39 = vmul.u32 %v2929_v50, %v2905_v62  ;;  %v1726_v4 = vshll.u32 %v6222_v28, %v1724_v17  ;;  %vm2916_vm0 = vc.u32 %v2908_v24, %v2912_v25 }
 0x11f   : > { %v505_v33 = vadd.f32 0.041655596, %v504_v0  ;;  %v512_v22 = vadd.f32 0.008332121, %v511_v15  ;;  %v1727_v36 = vshrl.u32 %v1709_v43, %v1725_v5  ;;  %v1730_v37 = vadd.s32 127, %v1729_v6 }
 0x120   : > { %v2918_v27 = vadd.s32 %v2912_v25, %v2908_v24  ;;  %v2934_v8 = vshll.u32 %v6272_v21, 16  ;;  %v2917_v34 = vsel %vm2916_vm0, 1, %v5845_v35  ;;  %vm6281_vm1 = vcmp.le.f32.partialorder %v1615_v55, 0.7853982 }
 0x121   : > { %v506_v40 = vmul.f32 %v505_v33, %v503_v13  ;;  %v513_v42 = vmul.f32 %v512_v22, %v503_v13  ;;  %v1728_v53 = vor.u32 %v1727_v36, %v1726_v4  ;;  %v1731_v62 = vshll.u32 %v1730_v37, 23 }
 0x122   : > { %v2913_v23 = vshrl.u32 %v2909_v19, 16  ;;  %v2919_v28 = vadd.s32 %v2917_v34, %v2911_v7  ;;  %vm2920_vm2 = vc.u32 %v2918_v27, %v2914_v63  ;;  %v2936_v47 = vshll.u32 %v6274_v1, 16 }
 0x123   : > { %v507_v41 = vadd.f32 -0.4999988, %v506_v40  ;;  %v514_v2 = vadd.f32 -0.16666654, %v513_v42  ;;  %v2921_v46 = vsel %vm2920_vm2, 1, %v5845_v35  ;;  %vm522_vm3 = vcmp.eq.s32.totalorder %v6220_v26, 0 }
 0x124   : > { %v1732_v49 = vor.u32 4788187, %v1731_v62  ;;  %v2923_v50 = vadd.s32 %v2921_v46, %v2919_v28  ;;  %vm2938_vm4 = vc.u32 %v2930_v11, %v2934_v8  ;;  %v2940_v43 = vadd.s32 %v2934_v8, %v2930_v11 }
 0x125   : > { %v508_v55 = vmul.f32 %v507_v41, %v503_v13  ;;  %v515_v9 = vmul.f32 %v514_v2, %v503_v13  ;;  %vm521_vm5 = vcmp.lt.s32.totalorder %v6220_v26, 2  ;;  %v1735_v59 = vcvt.s32.f32 %v1728_v53  ;;  %v282_v2 = vpop.f32.mrf.mxu0 }
 0x126   : > { %v2939_v57 = vsel %vm2938_vm4, 1, %v5845_v35  ;;  %vm518_vm6 = vweird.f32 %v6021_v51  ;;  %v1733_v3 = vand.u32 2147483647, %v1732_v49  ;;  %v2924_v60 = vadd.s32 %v2923_v50, %v2913_v23 }
 0x127   : > { %v2941_v19 = vadd.s32 %v2939_v57, %v2933_v39  ;;  %vm2942_vm7 = vc.u32 %v2940_v43, %v2936_v47  ;;  %v509_v17 = vadd.f32 1.0, %v508_v55  ;;  %v516_v24 = vadd.f32 1.0, %v515_v9 }
 0x128   : > { %v2935_v7 = vshrl.u32 %v6272_v21, 16  ;;  %v2943_v0 = vsel %vm2942_vm7, 1, %v5845_v35  ;;  %v1736_v11 = vmul.f32 %v1735_v59, %v1733_v3  ;;  %v2925_v15 = vadd.s32 %v2924_v60, %v2915_v38 }
 0x129   : > { %v2945_v13 = vadd.s32 %v2943_v0, %v2941_v19  ;;  %v4095_v5 = vand.u32 2147483647, %v6253_v56  ;;  %v517_v63 = vmul.f32 %v516_v24, %v6264_v31  ;;  %vm525_vm8 = vcmp.eq.s32.totalorder %v6220_v26, 2 }
 0x12a   : > { %v526_v6 = vxor.u32 2147483648, %v509_v17  ;;  %v4098_v25 = vand.u32 2139095040, %v6253_v56  ;;  %v1737_v39 = vxor.u32 2147483648, %v1736_v11  ;;  %v2937_v33 = vshrl.u32 %v6274_v1, 16 }
 0x12b   : > { %v2944_v22 = vadd.s32 %v2940_v43, %v2936_v47  ;;  %v2946_v4 = vadd.s32 %v2945_v13, %v2935_v7  ;;  %v523_v21 = vxor.u32 2147483648, %v517_v63  ;;  %v1742_v38 = vsel %vm6281_vm1, 0, %v6259_v61 }
 0x12c   : > { %v2894_v31 = vsel %vm2888_vm13, %v6250_v54, %v6268_v32  ;;  %v4099_v36 = vshrl.u32 %v4098_v25, 23  ;;  %v1738_v37 = vsel %vm1617_vm9, %v1737_v39, %v1736_v11  ;;  %v4102_v1 = vand.u32 8388607, %v4095_v5 }
 0x12d   : > { %v2947_v27 = vadd.s32 %v2946_v4, %v2937_v33  ;;  %vm2950_vm10 = vc.u32 %v2925_v15, %v2944_v22  ;;  %v524_v8 = vsel %vm522_vm3, %v509_v17, %v523_v21  ;;  %v527_v61 = vsel %vm525_vm8, %v526_v6, %v517_v63 }
 0x12e   : > { %v1741_v44 = vsel %vm6281_vm1, %v6024_v52, %v1738_v37  ;;  %v5549_v54 = vadd.s32 4294967169, %v4099_v36  ;;  %v528_v32 = vsel %vm521_vm5, %v524_v8, %v527_v61  ;;  %v1759_v42 = vadd.s32 3, %v1742_v38 }
 0x12f   : > { %v1743_v40 = vmul.f32 %v1741_v44, %v1741_v44  ;;  %v2951_v53 = vadd.s32 1, %v2947_v27  ;;  %v529_v34 = vsel %vm518_vm6, nan, %v528_v32  ;;  %v2948_v62 = vmul.u32 %v6202_v45, %v2894_v31 }
 0x130   : > { %v4103_v23 = vor.u32 8388608, %v4102_v1  ;;  %v4105_v28 = vadd.s32 1, %v5549_v54  ;;  %5335 = vst [vmem:[%s6323_s27] sm:$0xff] %v529_v34  ;;  %v1760_v51 = vand.u32 3, %v1759_v42  ;;  %v6330_v9 = vadd.f32 %v6018_v48, %v282_v2 }
 0x131   : > { %v1744_v58 = vmul.f32 -0.001358992, %v1743_v40  ;;  %v1751_v41 = vmul.f32 -0.00019511016, %v1743_v40  ;;  %v2952_v26 = vsel %vm2950_vm10, %v2951_v53, %v2947_v27  ;;  %vm2857_vm11 = vcmp.lt.s32.totalorder %v6041_v10, 0 }
 0x132   : > { %v2953_v46 = vadd.s32 %v2952_v26, %v2948_v62  ;;  %vm4106_vm9 = vcmp.gt.s32.totalorder %v4105_v28, 0  ;;  %v6327_v55 = vshll.u32 %v4103_v23, 8  ;;  %vm6337_vm12 = vcmp.le.f32.partialorder %v2855_v30, 0.7853982 }
 0x133   : > { %v1745_v47 = vadd.f32 0.041655596, %v1744_v58  ;;  %v1752_v49 = vadd.f32 0.008332121, %v1751_v41  ;;  %v4107_v50 = vsel %vm4106_vm9, %v4105_v28, 0  ;;  %v6341_v7 = vadd.s32 %v2944_v22, %v2925_v15 }
 0x134   : > { %v2954_v43 = vadd.s32 536870912, %v2953_v46  ;;  %v4109_v45 = vand.u32 31, %v4107_v50  ;;  %v530_v48 = vand.u32 2147483647, %v6330_v9  ;;  %vm1762_vm13 = vcmp.eq.s32.totalorder %v1760_v51, 0 }
 0x135   : > { %v1746_v59 = vmul.f32 %v1745_v47, %v1743_v40  ;;  %v1753_v57 = vmul.f32 %v1752_v49, %v1743_v40  ;;  %vm1765_vm14 = vcmp.eq.s32.totalorder %v1760_v51, 2  ;;  %v6344_v11 = vshrl.u32 %v4107_v50, 5 }
 0x136   : > { %v2955_v3 = vshrl.u32 %v2954_v43, 30  ;;  %v6333_v60 = vsub.s32 32, %v4109_v45  ;;  %v6347_v13 = vand.u32 65535, %v6327_v55  ;;  %v533_v63 = vand.u32 2139095040, %v6330_v9 }
 0x137   : > { %v1747_v19 = vadd.f32 -0.4999988, %v1746_v59  ;;  %v1754_v17 = vadd.f32 -0.16666654, %v1753_v57  ;;  %vm1761_vm15 = vcmp.lt.s32.totalorder %v1760_v51, 2  ;;  %v6351_v39 = vshrl.u32 %v6327_v55, 16 }
 0x138   : > { %v2956_v0 = vshll.u32 %v2955_v3, 30  ;;  %v2979_v30 = vsub.s32 4, %v2955_v3  ;;  %vm1758_vm0 = vweird.f32 %v6024_v52  ;;  %v4112_v33 = vshll.u32 %v5839_v12, %v4109_v45 }
 0x139   : > { %v1748_v6 = vmul.f32 %v1747_v19, %v1743_v40  ;;  %v1755_v25 = vmul.f32 %v1754_v17, %v1743_v40  ;;  %v4113_v22 = vshrl.u32 %v5840_v14, %v6333_v60  ;;  %v4116_v4 = vshrl.u32 %v5841_v16, %v6333_v60 }
 0x13a   : > { %v2957_v15 = vsub.s32 %v2953_v46, %v2956_v0  ;;  %v4115_v31 = vshll.u32 %v5840_v14, %v4109_v45  ;;  %v4122_v36 = vshrl.u32 %v5843_v20, %v6333_v60  ;;  %v4118_v27 = vshll.u32 %v5841_v16, %v4109_v45 }
 0x13b   : > { %v1749_v21 = vadd.f32 1.0, %v1748_v6  ;;  %v1756_v38 = vadd.f32 1.0, %v1755_v25  ;;  %v4119_v1 = vshrl.u32 %v5842_v18, %v6333_v60  ;;  %v2980_v54 = vsel %vm2857_vm11, %v2979_v30, %v2955_v3 }
 0x13c   : > { %vm2958_vm1 = vcmp.lt.s32.totalorder %v2957_v15, 0  ;;  %v2959_v37 = vsub.s32 0, %v2957_v15  ;;  %v4121_v32 = vshll.u32 %v5842_v18, %v4109_v45  ;;  %v4114_v42 = vor.u32 %v4113_v22, %v4112_v33 }
 0x13d   : > { %v1757_v8 = vmul.f32 %v1756_v38, %v1741_v44  ;;  %v1766_v61 = vxor.u32 2147483648, %v1749_v21  ;;  %v4117_v53 = vor.u32 %v4116_v4, %v4115_v31  ;;  %v4125_v34 = vshrl.u32 %v5844_v29, %v6333_v60 }
 0x13e   : > { %v2960_v40 = vsel %vm2958_vm1, %v2959_v37, %v2957_v15  ;;  %v4123_v28 = vor.u32 %v4122_v36, %v4121_v32  ;;  %v534_v58 = vshrl.u32 %v533_v63, 23  ;;  %v2982_v41 = vsel %vm6337_vm12, 0, %v2980_v54 }
 0x13f   : > { %v1763_v62 = vxor.u32 2147483648, %v1757_v8  ;;  %v2961_v23 = vclz %v2960_v40  ;;  %v4120_v44 = vor.u32 %v4119_v1, %v4118_v27  ;;  %v4124_v26 = vshll.u32 %v5843_v20, %v4109_v45 }
 0x140   : > { %v6375_v2 = vand.u32 8388607, %v530_v48  ;;  %v1767_v47 = vsel %vm1765_vm14, %v1766_v61, %v1757_v8  ;;  %vm4127_vm2 = vcmp.lt.s32.totalorder %v6344_v11, 1  ;;  %vm4130_vm3 = vcmp.lt.s32.totalorder %v6344_v11, 4 }
 0x141   : > { %v1764_v46 = vsel %vm1762_vm13, %v1749_v21, %v1763_v62  ;;  %v5526_v49 = vadd.s32 4294967294, %v2961_v23  ;;  %v4126_v43 = vor.u32 %v4125_v34, %v4124_v26  ;;  %v4135_v59 = vsel %vm4127_vm2, %v4114_v42, %v4117_v53 }
 0x142   : > { %v1768_v50 = vsel %vm1761_vm15, %v1764_v46, %v1767_v47  ;;  %vm4129_vm5 = vcmp.lt.s32.totalorder %v6344_v11, 3  ;;  %v4136_v57 = vsel %vm4130_vm3, %v4123_v28, 920167782  ;;  %v2999_v19 = vadd.s32 3, %v2982_v41 }
 0x143   : > { %v1769_v45 = vsel %vm1758_vm0, nan, %v1768_v50  ;;  %vm5527_vm4 = vcmp.lt.s32.totalorder %v5526_v49, 0  ;;  %vm4128_vm6 = vcmp.lt.s32.totalorder %v6344_v11, 2  ;;  %v4137_v51 = vsel %vm4129_vm5, %v4120_v44, %v4136_v57 }
 0x144   : > { %5343 = vst [vmem:[%s6323_s27 + $0x40] sm:$0xff] %v1769_v45  ;;  %v2964_v3 = vsel %vm5527_vm4, 0, %v5526_v49  ;;  %v4138_v52 = vsel %vm4128_vm6, %v4135_v59, %v4137_v51  ;;  %v4139_v63 = vsel %vm4127_vm2, %v4117_v53, %v4120_v44  ;;  %v4111_v6 = vshrl.u32 %v5839_v12, %v6333_v60 }
 0x145   : > { %v2965_v17 = vsub.s32 32, %v2964_v3  ;;  %v2969_v0 = vsub.s32 4294967266, %v2964_v3  ;;  %v4140_v25 = vsel %vm4130_vm3, %v4126_v43, 1326507024  ;;  %v4168_v30 = vand.u32 65535, %v4138_v52 }
 0x146   : > { %v4169_v33 = vshrl.u32 %v4138_v52, 16  ;;  %v2966_v22 = vshll.u32 %v2957_v15, %v2964_v3  ;;  %v4141_v38 = vsel %vm4129_vm5, %v4123_v28, %v4140_v25  ;;  %v6404_v31 = vand.u32 3, %v2999_v19 }
 0x147   : > { %v2967_v4 = vshrl.u32 %v6341_v7, %v2965_v17  ;;  %v2970_v21 = vadd.s32 127, %v2969_v0  ;;  %v4132_v36 = vsel %vm4130_vm3, %v4120_v44, 2102212464  ;;  %v4142_v60 = vsel %vm4128_vm6, %v4139_v63, %v4141_v38 }
 0x148   : > { %v4171_v37 = vmul.u32 %v4169_v33, %v6347_v13  ;;  %v4146_v8 = vand.u32 65535, %v4142_v60  ;;  %v4147_v15 = vshrl.u32 %v4142_v60, 16  ;;  %v4131_v7 = vsel %vm4127_vm2, %v4111_v6, %v4114_v42 }
 0x149   : > { %v2968_v27 = vor.u32 %v2967_v4, %v2966_v22  ;;  %v2971_v1 = vshll.u32 %v2970_v21, 23  ;;  %v4170_v61 = vmul.u32 %v4168_v30, %v6347_v13  ;;  %v4172_v54 = vmul.u32 %v4168_v30, %v6351_v39 }
 0x14a   : > { %v4174_v32 = vshll.u32 %v4171_v37, 16  ;;  %v4133_v34 = vsel %vm4129_vm5, %v4117_v53, %v4132_v36  ;;  %v4149_v62 = vmul.u32 %v4147_v15, %v6347_v13  ;;  %v5480_v23 = vadd.s32 4294967169, %v534_v58 }
 0x14b   : > { %v2972_v40 = vor.u32 4788187, %v2971_v1  ;;  %v2975_v28 = vcvt.s32.f32 %v2968_v27  ;;  %v4150_v41 = vmul.u32 %v4146_v8, %v6351_v39  ;;  %v4173_v44 = vmul.u32 %v4169_v33, %v6351_v39 }
 0x14c   : > { %vm4178_vm7 = vc.u32 %v4170_v61, %v4174_v32  ;;  %v4148_v42 = vmul.u32 %v4146_v8, %v6347_v13  ;;  %v4152_v46 = vshll.u32 %v4149_v62, 16  ;;  %v4151_v49 = vmul.u32 %v4147_v15, %v6351_v39 }
 0x14d   : > { %v2973_v26 = vand.u32 2147483647, %v2972_v40  ;;  %v4179_v47 = vsel %vm4178_vm7, 1, %v5845_v35  ;;  %v4176_v50 = vshll.u32 %v4172_v54, 16  ;;  %v4180_v43 = vadd.s32 %v4174_v32, %v4170_v61 }
 0x14e   : > { %v4181_v53 = vadd.s32 %v4179_v47, %v4173_v44  ;;  %v4154_v45 = vshll.u32 %v4150_v41, 16  ;;  %vm4156_vm8 = vc.u32 %v4148_v42, %v4152_v46  ;;  %v4158_v58 = vadd.s32 %v4152_v46, %v4148_v42 }
 0x14f   : > { %v2976_v59 = vmul.f32 %v2975_v28, %v2973_v26  ;;  %v4134_v57 = vsel %vm4128_vm6, %v4131_v7, %v4133_v34  ;;  %v4157_v3 = vsel %vm4156_vm8, 1, %v5845_v35  ;;  %vm4182_vm10 = vc.u32 %v4180_v43, %v4176_v50 }
 0x150   : > { %v540_v19 = vadd.s32 1, %v5480_v23  ;;  %v4159_v51 = vadd.s32 %v4157_v3, %v4151_v49  ;;  %vm4160_vm9 = vc.u32 %v4158_v58, %v4154_v45  ;;  %v4183_v17 = vsel %vm4182_vm10, 1, %v5845_v35 }
 0x151   : > { %v2977_v13 = vxor.u32 2147483648, %v2976_v59  ;;  %v4161_v39 = vsel %vm4160_vm9, 1, %v5845_v35  ;;  %v4175_v0 = vshrl.u32 %v4171_v37, 16  ;;  %v4185_v52 = vadd.s32 %v4183_v17, %v4181_v53 }
 0x152   : > { %vm541_vm13 = vcmp.gt.s32.totalorder %v540_v19, 0  ;;  %v4153_v6 = vshrl.u32 %v4149_v62, 16  ;;  %v4163_v11 = vadd.s32 %v4161_v39, %v4159_v51  ;;  %v4177_v33 = vshrl.u32 %v4172_v54, 16 }
 0x153   : > { %v2978_v63 = vsel %vm2857_vm11, %v2977_v13, %v2976_v59  ;;  %v542_v25 = vsel %vm541_vm13, %v540_v19, 0  ;;  %v4186_v22 = vadd.s32 %v4185_v52, %v4175_v0  ;;  %v4155_v38 = vshrl.u32 %v4150_v41, 16 }
 0x154   : > { %v2981_v30 = vsel %vm6337_vm12, %v6041_v10, %v2978_v63  ;;  %v544_v4 = vand.u32 31, %v542_v25  ;;  %v4164_v36 = vadd.s32 %v4163_v11, %v4153_v6  ;;  %v4188_v60 = vmul.u32 %v6327_v55, %v4134_v57 }
 0x155   : > { %v2983_v21 = vmul.f32 %v2981_v30, %v2981_v30  ;;  %v4187_v37 = vadd.s32 %v4186_v22, %v4177_v33  ;;  %v538_v27 = vor.u32 8388608, %v6375_v2  ;;  %v6440_v24 = vadd.s32 %v4180_v43, %v4176_v50 }
 0x156   : > { %v6435_v1 = vsub.s32 32, %v544_v4  ;;  %v547_v8 = vshll.u32 %v5839_v12, %v544_v4  ;;  %v6438_v61 = vadd.s32 %v4164_v36, %v4155_v38  ;;  %v550_v40 = vshll.u32 %v5840_v14, %v544_v4 }
 0x157   : > { %v2984_v15 = vmul.f32 -0.001358992, %v2983_v21  ;;  %v2991_v7 = vmul.f32 -0.00019511016, %v2983_v21  ;;  %v4191_v54 = vadd.s32 1, %v4187_v37  ;;  %v553_v62 = vshll.u32 %v5841_v16, %v544_v4 }
 0x158   : > { %v548_v32 = vshrl.u32 %v5840_v14, %v6435_v1  ;;  %v551_v55 = vshrl.u32 %v5841_v16, %v6435_v1  ;;  %vm4190_vm11 = vc.u32 %v6438_v61, %v6440_v24  ;;  %v6450_v28 = vshrl.u32 %v542_v25, 5 }
 0x159   : > { %v2985_v2 = vadd.f32 0.041655596, %v2984_v15  ;;  %v2992_v34 = vadd.f32 0.008332121, %v2991_v7  ;;  %v4192_v23 = vsel %vm4190_vm11, %v4191_v54, %v4187_v37  ;;  %v554_v44 = vshrl.u32 %v5842_v18, %v6435_v1 }
 0x15a   : > { %v6452_v41 = vor.u32 %v548_v32, %v547_v8  ;;  %v4193_v46 = vadd.s32 %v4192_v23, %v4188_v60  ;;  %v556_v47 = vshll.u32 %v5842_v18, %v544_v4  ;;  %v6457_v49 = vor.u32 %v551_v55, %v550_v40 }
 0x15b   : > { %v2986_v26 = vmul.f32 %v2985_v2, %v2983_v21  ;;  %v2993_v42 = vmul.f32 %v2992_v34, %v2983_v21  ;;  %v557_v50 = vshrl.u32 %v5843_v20, %v6435_v1  ;;  %v559_v43 = vshll.u32 %v5843_v20, %v544_v4 }
 0x15c   : > { %v560_v53 = vshrl.u32 %v5844_v29, %v6435_v1  ;;  %v4194_v58 = vadd.s32 536870912, %v4193_v46  ;;  %v555_v57 = vor.u32 %v554_v44, %v553_v62  ;;  %vm562_vm12 = vcmp.lt.s32.totalorder %v6450_v28, 1 }
 0x15d   : > { %v2987_v59 = vadd.f32 -0.4999988, %v2986_v26  ;;  %v2994_v45 = vadd.f32 -0.16666654, %v2993_v42  ;;  %v558_v3 = vor.u32 %v557_v50, %v556_v47  ;;  %vm564_vm14 = vcmp.lt.s32.totalorder %v6450_v28, 3 }
 0x15e   : > { %v561_v19 = vor.u32 %v560_v53, %v559_v43  ;;  %v6466_v17 = vshrl.u32 %v4194_v58, 30  ;;  %vm565_vm15 = vcmp.lt.s32.totalorder %v6450_v28, 4  ;;  %vm3001_vm0 = vcmp.lt.s32.totalorder %v6404_v31, 2 }
 0x15f   : > { %v2988_v13 = vmul.f32 %v2987_v59, %v2983_v21  ;;  %v2995_v51 = vmul.f32 %v2994_v45, %v2983_v21  ;;  %v571_v39 = vsel %vm565_vm15, %v558_v3, 920167782  ;;  %v6472_v0 = vshll.u32 %v538_v27, 8 }
 0x160   : > { %v4196_v6 = vshll.u32 %v6466_v17, 30  ;;  %v570_v11 = vsel %vm562_vm12, %v6452_v41, %v6457_v49  ;;  %vm3002_vm1 = vcmp.eq.s32.totalorder %v6404_v31, 0  ;;  %vm563_vm2 = vcmp.lt.s32.totalorder %v6450_v28, 2 }
 0x161   : > { %v2989_v52 = vadd.f32 1.0, %v2988_v13  ;;  %v2996_v63 = vadd.f32 1.0, %v2995_v51  ;;  %v572_v25 = vsel %vm564_vm14, %v555_v57, %v571_v39  ;;  %v575_v33 = vsel %vm565_vm15, %v561_v19, 1326507024 }
 0x162   : > { %v4197_v21 = vsub.s32 %v4193_v46, %v4196_v6  ;;  %v574_v38 = vsel %vm562_vm12, %v6457_v49, %v555_v57  ;;  %vm3005_vm3 = vcmp.eq.s32.totalorder %v6404_v31, 2  ;;  %v573_v36 = vsel %vm563_vm2, %v570_v11, %v572_v25 }
 0x163   : > { %v2997_v22 = vmul.f32 %v2996_v63, %v2981_v30  ;;  %v3006_v4 = vxor.u32 2147483648, %v2989_v52  ;;  %v576_v60 = vsel %vm564_vm14, %v558_v3, %v575_v33  ;;  %v579_v37 = vand.u32 65535, %v6472_v0 }
 0x164   : > { %vm4198_vm4 = vcmp.lt.s32.totalorder %v4197_v21, 0  ;;  %v4199_v8 = vsub.s32 0, %v4197_v21  ;;  %v580_v30 = vshrl.u32 %v6472_v0, 16  ;;  %v546_v7 = vshrl.u32 %v5839_v12, %v6435_v1 }
 0x165   : > { %v3003_v27 = vxor.u32 2147483648, %v2997_v22  ;;  %v3007_v15 = vsel %vm3005_vm3, %v3006_v4, %v2997_v22  ;;  %v577_v54 = vsel %vm563_vm2, %v574_v38, %v576_v60  ;;  %v603_v32 = vand.u32 65535, %v573_v36  ;;  %v306_v38 = vpop.f32.mrf.mxu1 }
 0x166   : > { %v4200_v55 = vsel %vm4198_vm4, %v4199_v8, %v4197_v21  ;;  %v581_v2 = vand.u32 65535, %v577_v54  ;;  %v582_v34 = vshrl.u32 %v577_v54, 16  ;;  %vm2998_vm5 = vweird.f32 %v6041_v10  ;;  %v330_v8 = vpop.f32.mrf.mxu2 }
 0x167   : > { %v3004_v40 = vsel %vm3002_vm1, %v2989_v52, %v3003_v27  ;;  %v4201_v23 = vclz %v4200_v55  ;;  %v604_v44 = vshrl.u32 %v573_v36, 16  ;;  %v4189_v46 = vadd.s32 %v6440_v24, %v6438_v61 }
 0x168   : > { %v3008_v62 = vsel %vm3001_vm0, %v3004_v40, %v3007_v15  ;;  %v584_v42 = vmul.u32 %v582_v34, %v579_v37  ;;  %v585_v1 = vmul.u32 %v581_v2, %v580_v30  ;;  %v566_v50 = vsel %vm562_vm12, %v546_v7, %v6452_v41  ;;  %v6524_v40 = vld [vmem:[%s9513_s2] ss:$0 sm:$0xff] }
 0x169   : > { %v3009_v26 = vsel %vm2998_vm5, nan, %v3008_v62  ;;  %v5550_v47 = vadd.s32 4294967294, %v4201_v23  ;;  %v567_v10 = vsel %vm565_vm15, %v555_v57, 2102212464  ;;  %v583_v43 = vmul.u32 %v581_v2, %v579_v37 }
 0x16a   : > { %5351 = vst [vmem:[%s6323_s27 + $0x80] sm:$0xff] %v3009_v26  ;;  %v587_v31 = vshll.u32 %v584_v42, 16  ;;  %v605_v53 = vmul.u32 %v603_v32, %v579_v37  ;;  %v586_v59 = vmul.u32 %v582_v34, %v580_v30  ;;  %v589_v45 = vshll.u32 %v585_v1, 16 }
 0x16b   : > { %vm5551_vm6 = vcmp.lt.s32.totalorder %v5550_v47, 0  ;;  %v606_v58 = vmul.u32 %v604_v44, %v579_v37  ;;  %v607_v13 = vmul.u32 %v603_v32, %v580_v30  ;;  %vm4097_vm8 = vcmp.lt.s32.totalorder %v6253_v56, 0 }
 0x16c   : > { %v4204_v3 = vsel %vm5551_vm6, 0, %v5550_v47  ;;  %vm591_vm7 = vc.u32 %v583_v43, %v587_v31  ;;  %v593_v19 = vadd.s32 %v587_v31, %v583_v43  ;;  %v588_v51 = vshrl.u32 %v584_v42, 16 }
 0x16d   : > { %v4205_v61 = vsub.s32 32, %v4204_v3  ;;  %v4209_v24 = vsub.s32 4294967266, %v4204_v3  ;;  %v592_v41 = vsel %vm591_vm7, 1, %v5845_v35  ;;  %v608_v57 = vmul.u32 %v604_v44, %v580_v30 }
 0x16e   : > { %v594_v39 = vadd.s32 %v592_v41, %v586_v59  ;;  %vm595_vm10 = vc.u32 %v593_v19, %v589_v45  ;;  %v609_v52 = vshll.u32 %v606_v58, 16  ;;  %v4206_v63 = vshll.u32 %v4197_v21, %v4204_v3 }
 0x16f   : > { %v4207_v6 = vshrl.u32 %v4189_v46, %v4205_v61  ;;  %v4210_v11 = vadd.s32 127, %v4209_v24  ;;  %v596_v25 = vsel %vm595_vm10, 1, %v5845_v35  ;;  %v611_v22 = vshll.u32 %v607_v13, 16 }
 0x170   : > { %v598_v33 = vadd.s32 %v596_v25, %v594_v39  ;;  %vm613_vm9 = vc.u32 %v605_v53, %v609_v52  ;;  %v615_v4 = vadd.s32 %v609_v52, %v605_v53  ;;  %v4219_v37 = vsub.s32 4, %v6466_v17 }
 0x171   : > { %v4208_v36 = vor.u32 %v4207_v6, %v4206_v63  ;;  %v4211_v60 = vshll.u32 %v4210_v11, 23  ;;  %v614_v27 = vsel %vm613_vm9, 1, %v5845_v35  ;;  %v568_v21 = vsel %vm564_vm14, %v6457_v49, %v567_v10 }
 0x172   : > { %v599_v30 = vadd.s32 %v598_v33, %v588_v51  ;;  %v616_v15 = vadd.s32 %v614_v27, %v608_v57  ;;  %vm617_vm13 = vc.u32 %v615_v4, %v611_v22  ;;  %v590_v54 = vshrl.u32 %v585_v1, 16 }
 0x173   : > { %v4212_v7 = vor.u32 4788187, %v4211_v60  ;;  %v618_v32 = vsel %vm617_vm13, 1, %v5845_v35  ;;  %v6527_v55 = vadd.f32 %v6524_v40, %v306_v38  ;;  %v4215_v2 = vcvt.s32.f32 %v4208_v36 }
 0x174   : > { %v610_v34 = vshrl.u32 %v606_v58, 16  ;;  %v620_v62 = vadd.s32 %v618_v32, %v616_v15  ;;  %v6530_v49 = vadd.f32 %v6524_v40, %v330_v8  ;;  %v600_v44 = vadd.s32 %v599_v30, %v590_v54 }
 0x175   : > { %v4213_v23 = vand.u32 2147483647, %v4212_v7  ;;  %v1770_v26 = vand.u32 2147483647, %v6527_v55  ;;  %v1773_v42 = vand.u32 2139095040, %v6527_v55  ;;  %v4220_v1 = vsel %vm4097_vm8, %v4219_v37, %v6466_v17 }
 0x176   : > { %v612_v46 = vshrl.u32 %v607_v13, 16  ;;  %v621_v47 = vadd.s32 %v620_v62, %v610_v34  ;;  %v619_v43 = vadd.s32 %v615_v4, %v611_v22  ;;  %vm4096_vm11 = vcmp.le.f32.partialorder %v4095_v5, 0.7853982 }
 0x177   : > { %v4216_v10 = vmul.f32 %v4215_v2, %v4213_v23  ;;  %v1774_v31 = vshrl.u32 %v1773_v42, 23  ;;  %v1777_v53 = vand.u32 8388607, %v1770_v26  ;;  %v569_v59 = vsel %vm563_vm2, %v566_v50, %v568_v21 }
 0x178   : > { %v622_v45 = vadd.s32 %v621_v47, %v612_v46  ;;  %v3013_v58 = vand.u32 2139095040, %v6530_v49  ;;  %v4222_v19 = vsel %vm4096_vm11, 0, %v4220_v1  ;;  %vm625_vm12 = vc.u32 %v600_v44, %v619_v43 }
 0x179   : > { %v4217_v3 = vxor.u32 2147483648, %v4216_v10  ;;  %v5504_v17 = vadd.s32 4294967169, %v1774_v31  ;;  %v1778_v61 = vor.u32 8388608, %v1777_v53  ;;  %v623_v51 = vmul.u32 %v6472_v0, %v569_v59 }
 0x17a   : > { %v626_v13 = vadd.s32 1, %v622_v45  ;;  %v4239_v39 = vadd.s32 3, %v4222_v19  ;;  %v3014_v50 = vshrl.u32 %v3013_v58, 23  ;;  %v6552_v37 = vadd.s32 %v619_v43, %v600_v44 }
 0x17b   : > { %v4218_v24 = vsel %vm4097_vm8, %v4217_v3, %v4216_v10  ;;  %v1780_v41 = vadd.s32 1, %v5504_v17  ;;  %v6548_v6 = vshll.u32 %v1778_v61, 8  ;;  %v3010_v21 = vand.u32 2147483647, %v6530_v49 }
 0x17c   : > { %v4221_v5 = vsel %vm4096_vm11, %v6253_v56, %v4218_v24  ;;  %v627_v28 = vsel %vm625_vm12, %v626_v13, %v622_v45  ;;  %v6550_v22 = vand.u32 3, %v4239_v39  ;;  %v5528_v38 = vadd.s32 4294967169, %v3014_v50 }
 0x17d   : > { %v4223_v57 = vmul.f32 %v4221_v5, %v4221_v5  ;;  %v628_v52 = vadd.s32 %v627_v28, %v623_v51  ;;  %vm1781_vm14 = vcmp.gt.s32.totalorder %v1780_v41, 0  ;;  %v6555_v8 = vand.u32 65535, %v6548_v6 }
 0x17e   : > { %v1782_v63 = vsel %vm1781_vm14, %v1780_v41, 0  ;;  %vm532_vm15 = vcmp.lt.s32.totalorder %v6330_v9, 0  ;;  %v6560_v54 = vshrl.u32 %v6548_v6, 16  ;;  %vm4245_vm0 = vcmp.eq.s32.totalorder %v6550_v22, 2 }
 0x17f   : > { %v4224_v11 = vmul.f32 -0.001358992, %v4223_v57  ;;  %v4231_v25 = vmul.f32 -0.00019511016, %v4223_v57  ;;  %v629_v33 = vadd.s32 536870912, %v628_v52  ;;  %v1784_v4 = vand.u32 31, %v1782_v63 }
 0x180   : > { %v6563_v32 = vshrl.u32 %v1782_v63, 5  ;;  %v6567_v62 = vadd.s32 1, %v5528_v38  ;;  %vm4242_vm1 = vcmp.eq.s32.totalorder %v6550_v22, 0  ;;  %vm4241_vm2 = vcmp.lt.s32.totalorder %v6550_v22, 2 }
 0x181   : > { %v4225_v0 = vadd.f32 0.041655596, %v4224_v11  ;;  %v4232_v36 = vadd.f32 0.008332121, %v4231_v25  ;;  %v630_v60 = vshrl.u32 %v629_v33, 30  ;;  %v1785_v27 = vsub.s32 32, %v1784_v4 }
 0x182   : > { %v1787_v2 = vshll.u32 %v5839_v12, %v1784_v4  ;;  %v1790_v1 = vshll.u32 %v5840_v14, %v1784_v4  ;;  %v1793_v10 = vshll.u32 %v5841_v16, %v1784_v4  ;;  %vm4238_vm4 = vweird.f32 %v6253_v56 }
 0x183   : > { %v4226_v30 = vmul.f32 %v4225_v0, %v4223_v57  ;;  %v4233_v15 = vmul.f32 %v4232_v36, %v4223_v57  ;;  %v631_v7 = vshll.u32 %v630_v60, 30  ;;  %v1788_v34 = vshrl.u32 %v5840_v14, %v1785_v27 }
 0x184   : > { %v654_v46 = vsub.s32 4, %v630_v60  ;;  %v1791_v47 = vshrl.u32 %v5841_v16, %v1785_v27  ;;  %v1794_v43 = vshrl.u32 %v5842_v18, %v1785_v27  ;;  %v1796_v58 = vshll.u32 %v5842_v18, %v1784_v4 }
 0x185   : > { %v4227_v23 = vadd.f32 -0.4999988, %v4226_v30  ;;  %v4234_v44 = vadd.f32 -0.16666654, %v4233_v15  ;;  %v6569_v42 = vsub.s32 %v628_v52, %v631_v7  ;;  %v1789_v45 = vor.u32 %v1788_v34, %v1787_v2 }
 0x186   : > { %v1797_v3 = vshrl.u32 %v5843_v20, %v1785_v27  ;;  %v1799_v19 = vshll.u32 %v5843_v20, %v1784_v4  ;;  %v1800_v24 = vshrl.u32 %v5844_v29, %v1785_v27  ;;  %vm6587_vm5 = vcmp.le.f32.partialorder %v530_v48, 0.7853982 }
 0x187   : > { %v4228_v31 = vmul.f32 %v4227_v23, %v4223_v57  ;;  %v4235_v53 = vmul.f32 %v4234_v44, %v4223_v57  ;;  %vm633_vm3 = vcmp.lt.s32.totalorder %v6569_v42, 0  ;;  %v634_v59 = vsub.s32 0, %v6569_v42 }
 0x188   : > { %v1792_v39 = vor.u32 %v1791_v47, %v1790_v1  ;;  %v1795_v28 = vor.u32 %v1794_v43, %v1793_v10  ;;  %v1798_v50 = vor.u32 %v1797_v3, %v1796_v58  ;;  %v1786_v63 = vshrl.u32 %v5839_v12, %v1785_v27 }
 0x189   : > { %v4229_v17 = vadd.f32 1.0, %v4228_v31  ;;  %v4236_v13 = vadd.f32 1.0, %v4235_v53  ;;  %v635_v61 = vsel %vm633_vm3, %v634_v59, %v6569_v42  ;;  %vm1802_vm6 = vcmp.lt.s32.totalorder %v6563_v32, 1 }
 0x18a   : > { %v636_v41 = vclz %v635_v61  ;;  %v655_v25 = vsel %vm532_vm15, %v654_v46, %v630_v60  ;;  %vm1803_vm7 = vcmp.lt.s32.totalorder %v6563_v32, 2  ;;  %vm1804_vm8 = vcmp.lt.s32.totalorder %v6563_v32, 3 }
 0x18b   : > { %v4237_v57 = vmul.f32 %v4236_v13, %v4221_v5  ;;  %v4246_v52 = vxor.u32 2147483648, %v4229_v17  ;;  %v1801_v4 = vor.u32 %v1800_v24, %v1799_v19  ;;  %vm1805_vm10 = vcmp.lt.s32.totalorder %v6563_v32, 4 }
 0x18c   : > { %v5481_v11 = vadd.s32 4294967294, %v636_v41  ;;  %v1807_v5 = vsel %vm1805_vm10, %v1795_v28, 2102212464  ;;  %v1810_v38 = vsel %vm1802_vm6, %v1789_v45, %v1792_v39  ;;  %v1811_v0 = vsel %vm1805_vm10, %v1798_v50, 920167782 }
 0x18d   : > { %v4243_v48 = vxor.u32 2147483648, %v4237_v57  ;;  %v4247_v33 = vsel %vm4245_vm0, %v4246_v52, %v4237_v57  ;;  %v1806_v27 = vsel %vm1802_vm6, %v1786_v63, %v1789_v45  ;;  %v1812_v30 = vsel %vm1804_vm8, %v1795_v28, %v1811_v0 }
 0x18e   : > { %vm5482_vm9 = vcmp.lt.s32.totalorder %v5481_v11, 0  ;;  %v1808_v34 = vsel %vm1804_vm8, %v1792_v39, %v1807_v5  ;;  %v1813_v1 = vsel %vm1803_vm7, %v1810_v38, %v1812_v30  ;;  %v1814_v46 = vsel %vm1802_vm6, %v1792_v39, %v1795_v28 }
 0x18f   : > { %v4244_v36 = vsel %vm4242_vm1, %v4229_v17, %v4243_v48  ;;  %v639_v60 = vsel %vm5482_vm9, 0, %v5481_v11  ;;  %v1815_v10 = vsel %vm1805_vm10, %v1801_v4, 1326507024  ;;  %v1843_v43 = vand.u32 65535, %v1813_v1 }
 0x190   : > { %v4248_v15 = vsel %vm4241_vm2, %v4244_v36, %v4247_v33  ;;  %v640_v7 = vsub.s32 32, %v639_v60  ;;  %v644_v2 = vsub.s32 4294967266, %v639_v60  ;;  %v641_v44 = vshll.u32 %v6569_v42, %v639_v60 }
 0x191   : > { %v4249_v23 = vsel %vm4238_vm4, nan, %v4248_v15  ;;  %v657_v56 = vsel %vm6587_vm5, 0, %v655_v25  ;;  %v6631_v42 = vsel %vm1803_vm7, %v1806_v27, %v1808_v34  ;;  %v1816_v31 = vsel %vm1804_vm8, %v1798_v50, %v1815_v10 }
 0x192   : > { %5359 = vst [vmem:[%s6323_s27 + $0xc0] sm:$0xff] %v4249_v23  ;;  %v642_v22 = vshrl.u32 %v6552_v37, %v640_v7  ;;  %v645_v47 = vadd.s32 127, %v644_v2  ;;  %v1844_v53 = vshrl.u32 %v1813_v1, 16  ;;  %v1817_v37 = vsel %vm1803_vm7, %v1814_v46, %v1816_v31 }
 0x193   : > { %vm3021_vm13 = vcmp.gt.s32.totalorder %v6567_v62, 0  ;;  %v1821_v58 = vand.u32 65535, %v1817_v37  ;;  %v1822_v3 = vshrl.u32 %v1817_v37, 16  ;;  %v1847_v17 = vmul.u32 %v1843_v43, %v6560_v54 }
 0x194   : > { %v643_v59 = vor.u32 %v642_v22, %v641_v44  ;;  %v646_v45 = vshll.u32 %v645_v47, 23  ;;  %v1846_v19 = vmul.u32 %v1844_v53, %v6555_v8  ;;  %v6640_v61 = vadd.s32 3, %v657_v56 }
 0x195   : > { %v1863_v24 = vmul.u32 %v6548_v6, %v6631_v42  ;;  %v6646_v41 = vand.u32 8388607, %v3010_v21  ;;  %v1824_v32 = vmul.u32 %v1822_v3, %v6555_v8  ;;  %v1825_v39 = vmul.u32 %v1821_v58, %v6560_v54 }
 0x196   : > { %v647_v13 = vor.u32 4788187, %v646_v45  ;;  %v1845_v28 = vmul.u32 %v1843_v43, %v6555_v8  ;;  %v3022_v50 = vsel %vm3021_vm13, %v6567_v62, 0  ;;  %v650_v52 = vcvt.s32.f32 %v643_v59 }
 0x197   : > { %v1848_v63 = vmul.u32 %v1844_v53, %v6560_v54  ;;  %v1849_v11 = vshll.u32 %v1846_v19, 16  ;;  %v1823_v25 = vmul.u32 %v1821_v58, %v6555_v8  ;;  %v1826_v48 = vmul.u32 %v1822_v3, %v6560_v54 }
 0x198   : > { %v648_v57 = vand.u32 2147483647, %v647_v13  ;;  %v1827_v33 = vshll.u32 %v1824_v32, 16  ;;  %v1851_v4 = vshll.u32 %v1847_v17, 16  ;;  %v1829_v38 = vshll.u32 %v1825_v39, 16 }
 0x199   : > { %vm1853_vm11 = vc.u32 %v1845_v28, %v1849_v11  ;;  %v1855_v0 = vadd.s32 %v1849_v11, %v1845_v28  ;;  %v3024_v62 = vand.u32 31, %v3022_v50  ;;  %v1850_v8 = vshrl.u32 %v1846_v19, 16 }
 0x19a   : > { %v651_v5 = vmul.f32 %v650_v52, %v648_v57  ;;  %vm1831_vm12 = vc.u32 %v1823_v25, %v1827_v33  ;;  %v1833_v36 = vadd.s32 %v1827_v33, %v1823_v25  ;;  %v1854_v60 = vsel %vm1853_vm11, 1, %v5845_v35 }
 0x19b   : > { %v1832_v30 = vsel %vm1831_vm12, 1, %v5845_v35  ;;  %v1856_v15 = vadd.s32 %v1854_v60, %v1848_v63  ;;  %vm1857_vm14 = vc.u32 %v1855_v0, %v1851_v4  ;;  %v6661_v44 = vsub.s32 32, %v3024_v62 }
 0x19c   : > { %v652_v27 = vxor.u32 2147483648, %v651_v5  ;;  %v1834_v7 = vadd.s32 %v1832_v30, %v1826_v48  ;;  %vm1835_vm0 = vc.u32 %v1833_v36, %v1829_v38  ;;  %v1858_v54 = vsel %vm1857_vm14, 1, %v5845_v35 }
 0x19d   : > { %v1836_v34 = vsel %vm1835_vm0, 1, %v5845_v35  ;;  %v1860_v23 = vadd.s32 %v1858_v54, %v1856_v15  ;;  %v1828_v46 = vshrl.u32 %v1824_v32, 16  ;;  %v6666_v47 = vshrl.u32 %v3022_v50, 5 }
 0x19e   : > { %v653_v2 = vsel %vm532_vm15, %v652_v27, %v651_v5  ;;  %v1838_v22 = vadd.s32 %v1836_v34, %v1834_v7  ;;  %v1830_v43 = vshrl.u32 %v1825_v39, 16  ;;  %v1852_v56 = vshrl.u32 %v1847_v17, 16 }
 0x19f   : > { %v656_v1 = vsel %vm6587_vm5, %v6330_v9, %v653_v2  ;;  %v1861_v31 = vadd.s32 %v1860_v23, %v1850_v8  ;;  %v6668_v59 = vadd.s32 %v1855_v0, %v1851_v4  ;;  %v3027_v45 = vshll.u32 %v5839_v12, %v3024_v62 }
 0x1a0   : > { %v658_v10 = vmul.f32 %v656_v1, %v656_v1  ;;  %v1839_v53 = vadd.s32 %v1838_v22, %v1828_v46  ;;  %v3030_v37 = vshll.u32 %v5840_v14, %v3024_v62  ;;  %v3028_v51 = vshrl.u32 %v5840_v14, %v6661_v44 }
 0x1a1   : > { %v1862_v19 = vadd.s32 %v1861_v31, %v1852_v56  ;;  %v3031_v32 = vshrl.u32 %v5841_v16, %v6661_v44  ;;  %v3034_v17 = vshrl.u32 %v5842_v18, %v6661_v44  ;;  %v3036_v39 = vshll.u32 %v5842_v18, %v3024_v62 }
 0x1a2   : > { %v659_v58 = vmul.f32 -0.001358992, %v658_v10  ;;  %v666_v3 = vmul.f32 -0.00019511016, %v658_v10  ;;  %v6674_v13 = vadd.s32 %v1839_v53, %v1830_v43  ;;  %v3037_v52 = vshrl.u32 %v5843_v20, %v6661_v44 }
 0x1a3   : > { %v1866_v57 = vadd.s32 1, %v1862_v19  ;;  %v3033_v63 = vshll.u32 %v5841_v16, %v3024_v62  ;;  %v3039_v11 = vshll.u32 %v5843_v20, %v3024_v62  ;;  %v3040_v25 = vshrl.u32 %v5844_v29, %v6661_v44 }
 0x1a4   : > { %v660_v28 = vadd.f32 0.041655596, %v659_v58  ;;  %v667_v50 = vadd.f32 0.008332121, %v666_v3  ;;  %vm1865_vm15 = vc.u32 %v6674_v13, %v6668_v59  ;;  %v3038_v5 = vor.u32 %v3037_v52, %v3036_v39 }
 0x1a5   : > { %v1867_v4 = vsel %vm1865_vm15, %v1866_v57, %v1862_v19  ;;  %v6692_v0 = vor.u32 %v3028_v51, %v3027_v45  ;;  %v6694_v36 = vor.u32 %v3031_v32, %v3030_v37  ;;  %v6696_v60 = vor.u32 %v3034_v17, %v3033_v63 }
 0x1a6   : > { %v661_v48 = vmul.f32 %v660_v28, %v658_v10  ;;  %v668_v33 = vmul.f32 %v667_v50, %v658_v10  ;;  %v1868_v38 = vadd.s32 %v1867_v4, %v1863_v24  ;;  %v3041_v62 = vor.u32 %v3040_v25, %v3039_v11 }
 0x1a7   : > { %v675_v15 = vand.u32 3, %v6640_v61  ;;  %v3018_v8 = vor.u32 8388608, %v6646_v41  ;;  %vm3045_vm1 = vcmp.lt.s32.totalorder %v6666_v47, 4  ;;  %vm3042_vm2 = vcmp.lt.s32.totalorder %v6666_v47, 1 }
 0x1a8   : > { %v662_v27 = vadd.f32 -0.4999988, %v661_v48  ;;  %v669_v30 = vadd.f32 -0.16666654, %v668_v33  ;;  %v1869_v7 = vadd.s32 536870912, %v1868_v38  ;;  %vm3044_vm3 = vcmp.lt.s32.totalorder %v6666_v47, 3 }
 0x1a9   : > { %v3051_v6 = vsel %vm3045_vm1, %v3038_v5, 920167782  ;;  %v3050_v61 = vsel %vm3042_vm2, %v6692_v0, %v6694_v36  ;;  %v3054_v24 = vsel %vm3042_vm2, %v6694_v36, %v6696_v60  ;;  %v3055_v46 = vsel %vm3045_vm1, %v3041_v62, 1326507024 }
 0x1aa   : > { %v663_v54 = vmul.f32 %v662_v27, %v658_v10  ;;  %v670_v2 = vmul.f32 %v669_v30, %v658_v10  ;;  %v6704_v42 = vshrl.u32 %v1869_v7, 30  ;;  %v3052_v23 = vsel %vm3044_vm3, %v6696_v60, %v3051_v6 }
 0x1ab   : > { %vm3043_vm4 = vcmp.lt.s32.totalorder %v6666_v47, 2  ;;  %v3056_v10 = vsel %vm3044_vm3, %v3038_v5, %v3055_v46  ;;  %v6724_v43 = vshll.u32 %v3018_v8, 8  ;;  %vm673_vm5 = vweird.f32 %v6330_v9 }
 0x1ac   : > { %v664_v41 = vadd.f32 1.0, %v663_v54  ;;  %v671_v34 = vadd.f32 1.0, %v670_v2  ;;  %v1871_v22 = vshll.u32 %v6704_v42, 30  ;;  %v3057_v53 = vsel %vm3043_vm4, %v3054_v24, %v3056_v10 }
 0x1ad   : > { %vm676_vm6 = vcmp.lt.s32.totalorder %v675_v15, 2  ;;  %vm677_vm7 = vcmp.eq.s32.totalorder %v675_v15, 0  ;;  %v3053_v37 = vsel %vm3043_vm4, %v3050_v61, %v3052_v23  ;;  %vm680_vm8 = vcmp.eq.s32.totalorder %v675_v15, 2 }
 0x1ae   : > { %v672_v56 = vmul.f32 %v671_v34, %v656_v1  ;;  %v681_v31 = vxor.u32 2147483648, %v664_v41  ;;  %v1872_v45 = vsub.s32 %v1868_v38, %v1871_v22  ;;  %v3060_v3 = vshrl.u32 %v6724_v43, 16  ;;  %v354_v34 = vpop.f32.mrf.mxu3 }
 0x1af   : > { %v3061_v19 = vand.u32 65535, %v3057_v53  ;;  %v3059_v51 = vand.u32 65535, %v6724_v43  ;;  %v3062_v32 = vshrl.u32 %v3057_v53, 16  ;;  %v3083_v50 = vand.u32 65535, %v3053_v37 }
 0x1b0   : > { %v678_v58 = vxor.u32 2147483648, %v672_v56  ;;  %vm1873_vm10 = vcmp.lt.s32.totalorder %v1872_v45, 0  ;;  %v1874_v1 = vsub.s32 0, %v1872_v45  ;;  %v682_v39 = vsel %vm680_vm8, %v681_v31, %v672_v56 }
 0x1b1   : > { %v3065_v28 = vmul.u32 %v3061_v19, %v3060_v3  ;;  %v3064_v63 = vmul.u32 %v3062_v32, %v3059_v51  ;;  %v3084_v11 = vshrl.u32 %v3053_v37, 16  ;;  %v3026_v33 = vshrl.u32 %v5839_v12, %v6661_v44 }
 0x1b2   : > { %v679_v17 = vsel %vm677_vm7, %v664_v41, %v678_v58  ;;  %v1875_v52 = vsel %vm1873_vm10, %v1874_v1, %v1872_v45  ;;  %v3063_v4 = vmul.u32 %v3061_v19, %v3059_v51  ;;  %v1864_v38 = vadd.s32 %v6668_v59, %v6674_v13 }
 0x1b3   : > { %v683_v57 = vsel %vm676_vm6, %v679_v17, %v682_v39  ;;  %v1876_v48 = vclz %v1875_v52  ;;  %v3067_v5 = vshll.u32 %v3064_v63, 16  ;;  %v3066_v30 = vmul.u32 %v3062_v32, %v3060_v3 }
 0x1b4   : > { %v684_v25 = vsel %vm673_vm5, nan, %v683_v57  ;;  %v3069_v62 = vshll.u32 %v3065_v28, 16  ;;  %v3086_v7 = vmul.u32 %v3084_v11, %v3059_v51  ;;  %v3087_v8 = vmul.u32 %v3083_v50, %v3060_v3 }
 0x1b5   : > { %5336 = vst [vmem:[%s6323_s27 + $0x8] sm:$0xff] %v684_v25  ;;  %v5505_v27 = vadd.s32 4294967294, %v1876_v48  ;;  %vm3071_vm9 = vc.u32 %v3063_v4, %v3067_v5  ;;  %v3073_v15 = vadd.s32 %v3067_v5, %v3063_v4  ;;  %v3047_v9 = vsel %vm3045_vm1, %v6696_v60, 2102212464 }
 0x1b6   : > { %v3068_v54 = vshrl.u32 %v3064_v63, 16  ;;  %v3072_v44 = vsel %vm3071_vm9, 1, %v5845_v35  ;;  %v3089_v61 = vshll.u32 %v3086_v7, 16  ;;  %v3085_v41 = vmul.u32 %v3083_v50, %v3059_v51  ;;  %v285_v63 = vpop.f32.mrf.mxu0 }
 0x1b7   : > { %vm5506_vm13 = vcmp.lt.s32.totalorder %v5505_v27, 0  ;;  %v3074_v6 = vadd.s32 %v3072_v44, %v3066_v30  ;;  %vm3075_vm11 = vc.u32 %v3073_v15, %v3069_v62  ;;  %v3088_v22 = vmul.u32 %v3084_v11, %v3060_v3 }
 0x1b8   : > { %v1879_v2 = vsel %vm5506_vm13, 0, %v5505_v27  ;;  %v3076_v24 = vsel %vm3075_vm11, 1, %v5845_v35  ;;  %v3091_v10 = vshll.u32 %v3087_v8, 16  ;;  %vm3093_vm12 = vc.u32 %v3085_v41, %v3089_v61 }
 0x1b9   : > { %v1880_v59 = vsub.s32 32, %v1879_v2  ;;  %v1884_v13 = vsub.s32 4294967266, %v1879_v2  ;;  %v1881_v23 = vshll.u32 %v1872_v45, %v1879_v2  ;;  %v3078_v46 = vadd.s32 %v3076_v24, %v3074_v6 }
 0x1ba   : > { %v3095_v60 = vadd.s32 %v3089_v61, %v3085_v41  ;;  %v1894_v53 = vsub.s32 4, %v6704_v42  ;;  %v3094_v58 = vsel %vm3093_vm12, 1, %v5845_v35  ;;  %v6749_v19 = vadd.f32 %v6524_v40, %v354_v34 }
 0x1bb   : > { %v1882_v56 = vshrl.u32 %v1864_v38, %v1880_v59  ;;  %v1885_v31 = vadd.s32 127, %v1884_v13  ;;  %v3079_v37 = vadd.s32 %v3078_v46, %v3068_v54  ;;  %v3096_v51 = vadd.s32 %v3094_v58, %v3088_v22 }
 0x1bc   : > { %vm3097_vm14 = vc.u32 %v3095_v60, %v3091_v10  ;;  %vm1772_vm0 = vcmp.lt.s32.totalorder %v6527_v55, 0  ;;  %v3070_v45 = vshrl.u32 %v3065_v28, 16  ;;  %v4250_v17 = vand.u32 2147483647, %v6749_v19 }
 0x1bd   : > { %v1883_v1 = vor.u32 %v1882_v56, %v1881_v23  ;;  %v1886_v32 = vshll.u32 %v1885_v31, 23  ;;  %v3098_v3 = vsel %vm3097_vm14, 1, %v5845_v35  ;;  %v3046_v50 = vsel %vm3042_vm2, %v3026_v33, %v6692_v0 }
 0x1be   : > { %v3090_v57 = vshrl.u32 %v3086_v7, 16  ;;  %v3100_v52 = vadd.s32 %v3098_v3, %v3096_v51  ;;  %v1895_v11 = vsel %vm1772_vm0, %v1894_v53, %v6704_v42  ;;  %v3048_v28 = vsel %vm3044_vm3, %v6694_v36, %v3047_v9 }
 0x1bf   : > { %v1887_v39 = vor.u32 4788187, %v1886_v32  ;;  %v3080_v25 = vadd.s32 %v3079_v37, %v3070_v45  ;;  %v4253_v48 = vand.u32 2139095040, %v6749_v19  ;;  %v1890_v5 = vcvt.s32.f32 %v1883_v1 }
 0x1c0   : > { %v3092_v38 = vshrl.u32 %v3087_v8, 16  ;;  %v3101_v27 = vadd.s32 %v3100_v52, %v3090_v57  ;;  %v3099_v30 = vadd.s32 %v3095_v60, %v3091_v10  ;;  %v4257_v33 = vand.u32 8388607, %v4250_v17 }
 0x1c1   : > { %v1888_v4 = vand.u32 2147483647, %v1887_v39  ;;  %v4254_v0 = vshrl.u32 %v4253_v48, 23  ;;  %v6767_v62 = vadd.f32 %v6524_v40, %v285_v63  ;;  %v3049_v15 = vsel %vm3043_vm4, %v3046_v50, %v3048_v28 }
 0x1c2   : > { %v3102_v36 = vadd.s32 %v3101_v27, %v3092_v38  ;;  %vm1771_vm15 = vcmp.le.f32.partialorder %v1770_v26, 0.7853982  ;;  %vm3105_vm1 = vc.u32 %v3080_v25, %v3099_v30  ;;  %v3103_v44 = vmul.u32 %v6724_v43, %v3049_v15 }
 0x1c3   : > { %v1891_v42 = vmul.f32 %v1890_v5, %v1888_v4  ;;  %v5552_v7 = vadd.s32 4294967169, %v4254_v0  ;;  %v1897_v9 = vsel %vm1771_vm15, 0, %v1895_v11  ;;  %v4258_v2 = vor.u32 8388608, %v4257_v33 }
 0x1c4   : > { %v3106_v54 = vadd.s32 1, %v3102_v36  ;;  %v688_v40 = vand.u32 2139095040, %v6767_v62  ;;  %v1914_v13 = vadd.s32 3, %v1897_v9  ;;  %vm3012_vm3 = vcmp.lt.s32.totalorder %v6530_v49, 0 }
 0x1c5   : > { %v1892_v8 = vxor.u32 2147483648, %v1891_v42  ;;  %v4260_v6 = vadd.s32 1, %v5552_v7  ;;  %v6778_v46 = vshll.u32 %v4258_v2, 8  ;;  %v6783_v58 = vadd.s32 %v3099_v30, %v3080_v25 }
 0x1c6   : > { %v3107_v47 = vsel %vm3105_vm1, %v3106_v54, %v3102_v36  ;;  %v689_v43 = vshrl.u32 %v688_v40, 23  ;;  %v6780_v56 = vand.u32 3, %v1914_v13  ;;  %v685_v1 = vand.u32 2147483647, %v6767_v62 }
 0x1c7   : > { %v1893_v61 = vsel %vm1772_vm0, %v1892_v8, %v1891_v42  ;;  %v3108_v24 = vadd.s32 %v3107_v47, %v3103_v44  ;;  %vm4261_vm2 = vcmp.gt.s32.totalorder %v4260_v6, 0  ;;  %v6787_v51 = vand.u32 65535, %v6778_v46 }
 0x1c8   : > { %v1896_v59 = vsel %vm1771_vm15, %v6527_v55, %v1893_v61  ;;  %v4262_v41 = vsel %vm4261_vm2, %v4260_v6, 0  ;;  %v6790_v45 = vshrl.u32 %v6778_v46, 16  ;;  %v6792_v3 = vadd.s32 4294967169, %v689_v43 }
 0x1c9   : > { %v1898_v26 = vmul.f32 %v1896_v59, %v1896_v59  ;;  %v3109_v34 = vadd.s32 536870912, %v3108_v24  ;;  %v4264_v23 = vand.u32 31, %v4262_v41  ;;  %v6794_v57 = vshrl.u32 %v4262_v41, 5 }
 0x1ca   : > { %vm1920_vm4 = vcmp.eq.s32.totalorder %v6780_v56, 2  ;;  %vm1917_vm5 = vcmp.eq.s32.totalorder %v6780_v56, 0  ;;  %vm1916_vm7 = vcmp.lt.s32.totalorder %v6780_v56, 2  ;;  %vm1913_vm8 = vweird.f32 %v6527_v55 }
 0x1cb   : > { %v1899_v22 = vmul.f32 -0.001358992, %v1898_v26  ;;  %v1906_v10 = vmul.f32 -0.00019511016, %v1898_v26  ;;  %v3110_v31 = vshrl.u32 %v3109_v34, 30  ;;  %v4265_v60 = vsub.s32 32, %v4264_v23 }
 0x1cc   : > { %v4267_v11 = vshll.u32 %v5839_v12, %v4264_v23  ;;  %v4270_v28 = vshll.u32 %v5840_v14, %v4264_v23  ;;  %v4273_v5 = vshll.u32 %v5841_v16, %v4264_v23  ;;  %v4276_v36 = vshll.u32 %v5842_v18, %v4264_v23 }
 0x1cd   : > { %v1900_v53 = vadd.f32 0.041655596, %v1899_v22  ;;  %v1907_v37 = vadd.f32 0.008332121, %v1906_v10  ;;  %v3111_v32 = vshll.u32 %v3110_v31, 30  ;;  %v4268_v52 = vshrl.u32 %v5840_v14, %v4265_v60 }
 0x1ce   : > { %v4271_v25 = vshrl.u32 %v5841_v16, %v4265_v60  ;;  %v4274_v38 = vshrl.u32 %v5842_v18, %v4265_v60  ;;  %v3134_v30 = vsub.s32 4, %v3110_v31  ;;  %v4277_v0 = vshrl.u32 %v5843_v20, %v4265_v60 }
 0x1cf   : > { %v1901_v39 = vmul.f32 %v1900_v53, %v1898_v26  ;;  %v1908_v50 = vmul.f32 %v1907_v37, %v1898_v26  ;;  %v6797_v63 = vsub.s32 %v3108_v24, %v3111_v32  ;;  %v4269_v15 = vor.u32 %v4268_v52, %v4267_v11 }
 0x1d0   : > { %v4272_v8 = vor.u32 %v4271_v25, %v4270_v28  ;;  %v4279_v9 = vshll.u32 %v5843_v20, %v4264_v23  ;;  %v4280_v54 = vshrl.u32 %v5844_v29, %v4265_v60  ;;  %v4275_v40 = vor.u32 %v4274_v38, %v4273_v5 }
 0x1d1   : > { %v1902_v48 = vadd.f32 -0.4999988, %v1901_v39  ;;  %v1909_v4 = vadd.f32 -0.16666654, %v1908_v50  ;;  %vm3113_vm6 = vcmp.lt.s32.totalorder %v6797_v63, 0  ;;  %v3114_v27 = vsub.s32 0, %v6797_v63 }
 0x1d2   : > { %v6817_v61 = vsel %vm3012_vm3, %v3134_v30, %v3110_v31  ;;  %v4266_v47 = vshrl.u32 %v5839_v12, %v4265_v60  ;;  %v4278_v13 = vor.u32 %v4277_v0, %v4276_v36  ;;  %v4281_v24 = vor.u32 %v4280_v54, %v4279_v9 }
 0x1d3   : > { %v1903_v33 = vmul.f32 %v1902_v48, %v1898_v26  ;;  %v1910_v42 = vmul.f32 %v1909_v4, %v1898_v26  ;;  %v3115_v7 = vsel %vm3113_vm6, %v3114_v27, %v6797_v63  ;;  %vm4282_vm10 = vcmp.lt.s32.totalorder %v6794_v57, 1 }
 0x1d4   : > { %v3116_v6 = vclz %v3115_v7  ;;  %vm6823_vm9 = vcmp.le.f32.partialorder %v3010_v21, 0.7853982  ;;  %vm4283_vm13 = vcmp.lt.s32.totalorder %v6794_v57, 2  ;;  %vm4284_vm11 = vcmp.lt.s32.totalorder %v6794_v57, 3 }
 0x1d5   : > { %v1904_v44 = vadd.f32 1.0, %v1903_v33  ;;  %v1911_v2 = vadd.f32 1.0, %v1910_v42  ;;  %vm4285_vm12 = vcmp.lt.s32.totalorder %v6794_v57, 4  ;;  %v4286_v43 = vsel %vm4282_vm10, %v4266_v47, %v4269_v15 }
 0x1d6   : > { %v5529_v34 = vadd.s32 4294967294, %v3116_v6  ;;  %v4294_v10 = vsel %vm4282_vm10, %v4272_v8, %v4275_v40  ;;  %v4291_v21 = vsel %vm4285_vm12, %v4278_v13, 920167782  ;;  %v4295_v53 = vsel %vm4285_vm12, %v4281_v24, 1326507024 }
 0x1d7   : > { %v1912_v26 = vmul.f32 %v1911_v2, %v1896_v59  ;;  %v1921_v41 = vxor.u32 2147483648, %v1904_v44  ;;  %v4290_v59 = vsel %vm4282_vm10, %v4269_v15, %v4272_v8  ;;  %v4287_v50 = vsel %vm4285_vm12, %v4275_v40, 2102212464 }
 0x1d8   : > { %vm5530_vm14 = vcmp.lt.s32.totalorder %v5529_v34, 0  ;;  %v4292_v28 = vsel %vm4284_vm11, %v4275_v40, %v4291_v21  ;;  %v4296_v25 = vsel %vm4284_vm11, %v4278_v13, %v4295_v53  ;;  %v4288_v56 = vsel %vm4284_vm11, %v4272_v8, %v4287_v50 }
 0x1d9   : > { %v1918_v22 = vxor.u32 2147483648, %v1912_v26  ;;  %v1922_v31 = vsel %vm1920_vm4, %v1921_v41, %v1912_v26  ;;  %v3119_v60 = vsel %vm5530_vm14, 0, %v5529_v34  ;;  %v4293_v38 = vsel %vm4283_vm13, %v4290_v59, %v4292_v28 }
 0x1da   : > { %v3120_v32 = vsub.s32 32, %v3119_v60  ;;  %v3124_v39 = vsub.s32 4294967266, %v3119_v60  ;;  %v3121_v11 = vshll.u32 %v6797_v63, %v3119_v60  ;;  %v4297_v63 = vsel %vm4283_vm13, %v4294_v10, %v4296_v25 }
 0x1db   : > { %v1919_v37 = vsel %vm1917_vm5, %v1904_v44, %v1918_v22  ;;  %v4323_v27 = vand.u32 65535, %v4293_v38  ;;  %v4324_v30 = vshrl.u32 %v4293_v38, 16  ;;  %v4301_v42 = vand.u32 65535, %v4297_v63 }
 0x1dc   : > { %v1923_v52 = vsel %vm1916_vm7, %v1919_v37, %v1922_v31  ;;  %v3122_v4 = vshrl.u32 %v6783_v58, %v3120_v32  ;;  %v3125_v5 = vadd.s32 127, %v3124_v39  ;;  %v4302_v55 = vshrl.u32 %v4297_v63, 16 }
 0x1dd   : > { %v1924_v48 = vsel %vm1913_vm8, nan, %v1923_v52  ;;  %v4326_v15 = vmul.u32 %v4324_v30, %v6787_v51  ;;  %v4327_v58 = vmul.u32 %v4323_v27, %v6790_v45  ;;  %v6855_v36 = vand.u32 8388607, %v685_v1 }
 0x1de   : > { %5344 = vst [vmem:[%s6323_s27 + $0x48] sm:$0xff] %v1924_v48  ;;  %v3123_v0 = vor.u32 %v3122_v4, %v3121_v11  ;;  %v3126_v33 = vshll.u32 %v3125_v5, 23  ;;  %v695_v7 = vadd.s32 1, %v6792_v3  ;;  %v3137_v9 = vsel %vm6823_vm9, 0, %v6817_v61 }
 0x1df   : > { %v6863_v54 = vsel %vm4283_vm13, %v4286_v43, %v4288_v56  ;;  %v4304_v44 = vmul.u32 %v4302_v55, %v6787_v51  ;;  %v4305_v2 = vmul.u32 %v4301_v42, %v6790_v45  ;;  %v4325_v6 = vmul.u32 %v4323_v27, %v6787_v51 }
 0x1e0   : > { %v3127_v8 = vor.u32 4788187, %v3126_v33  ;;  %v4328_v40 = vmul.u32 %v4324_v30, %v6790_v45  ;;  %v4329_v47 = vshll.u32 %v4326_v15, 16  ;;  %v3130_v3 = vcvt.s32.f32 %v3123_v0 }
 0x1e1   : > { %v4303_v24 = vmul.u32 %v4301_v42, %v6787_v51  ;;  %v4307_v26 = vshll.u32 %v4304_v44, 16  ;;  %v4306_v61 = vmul.u32 %v4302_v55, %v6790_v45  ;;  %v4309_v41 = vshll.u32 %v4305_v2, 16 }
 0x1e2   : > { %v3128_v13 = vand.u32 2147483647, %v3127_v8  ;;  %v4331_v57 = vshll.u32 %v4327_v58, 16  ;;  %vm4333_vm0 = vc.u32 %v4325_v6, %v4329_v47  ;;  %v4335_v10 = vadd.s32 %v4329_v47, %v4325_v6 }
 0x1e3   : > { %vm4311_vm15 = vc.u32 %v4303_v24, %v4307_v26  ;;  %v4313_v43 = vadd.s32 %v4307_v26, %v4303_v24  ;;  %v4334_v22 = vsel %vm4333_vm0, 1, %v5845_v35  ;;  %vm696_vm1 = vcmp.gt.s32.totalorder %v695_v7, 0 }
 0x1e4   : > { %v3131_v34 = vmul.f32 %v3130_v3, %v3128_v13  ;;  %v4312_v59 = vsel %vm4311_vm15, 1, %v5845_v35  ;;  %v4336_v31 = vadd.s32 %v4334_v22, %v4328_v40  ;;  %v697_v51 = vsel %vm696_vm1, %v695_v7, 0 }
 0x1e5   : > { %v4314_v21 = vadd.s32 %v4312_v59, %v4306_v61  ;;  %vm4315_vm2 = vc.u32 %v4313_v43, %v4309_v41  ;;  %v3154_v53 = vadd.s32 3, %v3137_v9  ;;  %v4308_v37 = vshrl.u32 %v4304_v44, 16 }
 0x1e6   : > { %v3132_v60 = vxor.u32 2147483648, %v3131_v34  ;;  %v4316_v45 = vsel %vm4315_vm2, 1, %v5845_v35  ;;  %vm4337_vm4 = vc.u32 %v4335_v10, %v4331_v57  ;;  %v699_v52 = vand.u32 31, %v697_v51 }
 0x1e7   : > { %v4318_v39 = vadd.s32 %v4316_v45, %v4314_v21  ;;  %v4338_v50 = vsel %vm4337_vm4, 1, %v5845_v35  ;;  %v4330_v28 = vshrl.u32 %v4326_v15, 16  ;;  %v4343_v48 = vmul.u32 %v6778_v46, %v6863_v54 }
 0x1e8   : > { %v3133_v32 = vsel %vm3012_vm3, %v3132_v60, %v3131_v34  ;;  %v4340_v25 = vadd.s32 %v4338_v50, %v4336_v31  ;;  %v4310_v5 = vshrl.u32 %v4305_v2, 16  ;;  %v700_v56 = vsub.s32 32, %v699_v52 }
 0x1e9   : > { %v3136_v11 = vsel %vm6823_vm9, %v6530_v49, %v3133_v32  ;;  %v4319_v38 = vadd.s32 %v4318_v39, %v4308_v37  ;;  %v4332_v63 = vshrl.u32 %v4327_v58, 16  ;;  %v6882_v27 = vadd.s32 %v4335_v10, %v4331_v57 }
 0x1ea   : > { %v3138_v4 = vmul.f32 %v3136_v11, %v3136_v11  ;;  %v4341_v30 = vadd.s32 %v4340_v25, %v4330_v28  ;;  %v705_v0 = vshll.u32 %v5840_v14, %v699_v52  ;;  %v6887_v23 = vshrl.u32 %v697_v51, 5 }
 0x1eb   : > { %v6885_v55 = vadd.s32 %v4319_v38, %v4310_v5  ;;  %v706_v7 = vshrl.u32 %v5841_v16, %v700_v56  ;;  %v708_v46 = vshll.u32 %v5841_v16, %v699_v52  ;;  %v709_v8 = vshrl.u32 %v5842_v18, %v700_v56 }
 0x1ec   : > { %v3139_v33 = vmul.f32 -0.001358992, %v3138_v4  ;;  %v3146_v42 = vmul.f32 -0.00019511016, %v3138_v4  ;;  %v4342_v15 = vadd.s32 %v4341_v30, %v4332_v63  ;;  %v711_v54 = vshll.u32 %v5842_v18, %v699_v52 }
 0x1ed   : > { %vm4345_vm3 = vc.u32 %v6885_v55, %v6882_v27  ;;  %v702_v2 = vshll.u32 %v5839_v12, %v699_v52  ;;  %v703_v6 = vshrl.u32 %v5840_v14, %v700_v56  ;;  %v6897_v40 = vor.u32 %v706_v7, %v705_v0 }
 0x1ee   : > { %v3140_v9 = vadd.f32 0.041655596, %v3139_v33  ;;  %v3147_v58 = vadd.f32 0.008332121, %v3146_v42  ;;  %v4346_v44 = vadd.s32 1, %v4342_v15  ;;  %v712_v3 = vshrl.u32 %v5843_v20, %v700_v56 }
 0x1ef   : > { %v714_v24 = vshll.u32 %v5843_v20, %v699_v52  ;;  %v6901_v61 = vor.u32 %v709_v8, %v708_v46  ;;  %v715_v41 = vshrl.u32 %v5844_v29, %v700_v56  ;;  %vm720_vm5 = vcmp.lt.s32.totalorder %v6887_v23, 4 }
 0x1f0   : > { %v3141_v47 = vmul.f32 %v3140_v9, %v3138_v4  ;;  %v3148_v13 = vmul.f32 %v3147_v58, %v3138_v4  ;;  %v4347_v26 = vsel %vm4345_vm3, %v4346_v44, %v4342_v15  ;;  %v713_v22 = vor.u32 %v712_v3, %v711_v54 }
 0x1f1   : > { %v4348_v43 = vadd.s32 %v4347_v26, %v4343_v48  ;;  %v693_v59 = vor.u32 8388608, %v6855_v36  ;;  %v704_v10 = vor.u32 %v703_v6, %v702_v2  ;;  %v716_v31 = vor.u32 %v715_v41, %v714_v24 }
 0x1f2   : > { %v3142_v57 = vadd.f32 -0.4999988, %v3141_v47  ;;  %v3149_v34 = vadd.f32 -0.16666654, %v3148_v13  ;;  %vm717_vm6 = vcmp.lt.s32.totalorder %v6887_v23, 1  ;;  %vm719_vm7 = vcmp.lt.s32.totalorder %v6887_v23, 3 }
 0x1f3   : > { %v4349_v51 = vadd.s32 536870912, %v4348_v43  ;;  %v3155_v37 = vand.u32 3, %v3154_v53  ;;  %v726_v45 = vsel %vm720_vm5, %v713_v22, 920167782  ;;  %v730_v32 = vsel %vm720_vm5, %v716_v31, 1326507024 }
 0x1f4   : > { %v3143_v60 = vmul.f32 %v3142_v57, %v3138_v4  ;;  %v3150_v21 = vmul.f32 %v3149_v34, %v3138_v4  ;;  %v729_v36 = vsel %vm717_vm6, %v6897_v40, %v6901_v61  ;;  %v725_v28 = vsel %vm717_vm6, %v704_v10, %v6897_v40 }
 0x1f5   : > { %v6912_v52 = vshrl.u32 %v4349_v51, 30  ;;  %v727_v53 = vsel %vm719_vm7, %v6901_v61, %v726_v45  ;;  %v731_v25 = vsel %vm719_vm7, %v713_v22, %v730_v32  ;;  %v6926_v48 = vshll.u32 %v693_v59, 8 }
 0x1f6   : > { %v3144_v39 = vadd.f32 1.0, %v3143_v60  ;;  %v3151_v50 = vadd.f32 1.0, %v3150_v21  ;;  %vm718_vm8 = vcmp.lt.s32.totalorder %v6887_v23, 2  ;;  %vm3156_vm10 = vcmp.lt.s32.totalorder %v3155_v37, 2 }
 0x1f7   : > { %v4351_v38 = vshll.u32 %v6912_v52, 30  ;;  %vm3157_vm9 = vcmp.eq.s32.totalorder %v3155_v37, 0  ;;  %vm3160_vm13 = vcmp.eq.s32.totalorder %v3155_v37, 2  ;;  %v732_v63 = vsel %vm718_vm8, %v729_v36, %v731_v25 }
 0x1f8   : > { %v3152_v4 = vmul.f32 %v3151_v50, %v3136_v11  ;;  %v3161_v5 = vxor.u32 2147483648, %v3144_v39  ;;  %v701_v33 = vshrl.u32 %v5839_v12, %v700_v56  ;;  %v728_v42 = vsel %vm718_vm8, %v725_v28, %v727_v53  ;;  %v309_v28 = vpop.f32.mrf.mxu1 }
 0x1f9   : > { %v4352_v0 = vsub.s32 %v4348_v43, %v4351_v38  ;;  %v734_v11 = vand.u32 65535, %v6926_v48  ;;  %v735_v15 = vshrl.u32 %v6926_v48, 16  ;;  %v736_v7 = vand.u32 65535, %v732_v63 }
 0x1fa   : > { %v3158_v30 = vxor.u32 2147483648, %v3152_v4  ;;  %v737_v46 = vshrl.u32 %v732_v63, 16  ;;  %v3162_v9 = vsel %vm3160_vm13, %v3161_v5, %v3152_v4  ;;  %vm3153_vm12 = vweird.f32 %v6530_v49 }
 0x1fb   : > { %vm4353_vm11 = vcmp.lt.s32.totalorder %v4352_v0, 0  ;;  %v4354_v58 = vsub.s32 0, %v4352_v0  ;;  %v740_v56 = vmul.u32 %v736_v7, %v735_v15  ;;  %v758_v47 = vand.u32 65535, %v728_v42 }
 0x1fc   : > { %v3159_v8 = vsel %vm3157_vm9, %v3144_v39, %v3158_v30  ;;  %v739_v44 = vmul.u32 %v737_v46, %v734_v11  ;;  %v759_v13 = vshrl.u32 %v728_v42, 16  ;;  %v738_v24 = vmul.u32 %v736_v7, %v734_v11 }
 0x1fd   : > { %v3163_v54 = vsel %vm3156_vm10, %v3159_v8, %v3162_v9  ;;  %v4355_v6 = vsel %vm4353_vm11, %v4354_v58, %v4352_v0  ;;  %v4344_v41 = vadd.s32 %v6882_v27, %v6885_v55  ;;  %v721_v57 = vsel %vm717_vm6, %v701_v33, %v704_v10 }
 0x1fe   : > { %v3164_v2 = vsel %vm3153_vm12, nan, %v3163_v54  ;;  %v4356_v3 = vclz %v4355_v6  ;;  %v742_v26 = vshll.u32 %v739_v44, 16  ;;  %v741_v34 = vmul.u32 %v737_v46, %v735_v15 }
 0x1ff   : > { %5352 = vst [vmem:[%s6323_s27 + $0x88] sm:$0xff] %v3164_v2  ;;  %v744_v43 = vshll.u32 %v740_v56, 16  ;;  %vm4252_vm0 = vcmp.lt.s32.totalorder %v6749_v19, 0  ;;  %v4374_v59 = vsub.s32 4, %v6912_v52  ;;  %v761_v60 = vmul.u32 %v759_v13, %v734_v11 }
 0x200   : > { %v5553_v49 = vadd.s32 4294967294, %v4356_v3  ;;  %vm746_vm14 = vc.u32 %v738_v24, %v742_v26  ;;  %v748_v22 = vadd.s32 %v742_v26, %v738_v24  ;;  %v762_v21 = vmul.u32 %v758_v47, %v735_v15  ;;  %v333_v26 = vpop.f32.mrf.mxu2 }
 0x201   : > { %v747_v31 = vsel %vm746_vm14, 1, %v5845_v35  ;;  %v743_v51 = vshrl.u32 %v739_v44, 16  ;;  %v760_v10 = vmul.u32 %v758_v47, %v734_v11  ;;  %v764_v45 = vshll.u32 %v761_v60, 16  ;;  %v6955_v11 = vld [vmem:[%s9513_s2] ss:$0 sm:$0xff] }
 0x202   : > { %vm5554_vm15 = vcmp.lt.s32.totalorder %v5553_v49, 0  ;;  %v749_v37 = vadd.s32 %v747_v31, %v741_v34  ;;  %vm750_vm1 = vc.u32 %v748_v22, %v744_v43  ;;  %v763_v36 = vmul.u32 %v759_v13, %v735_v15 }
 0x203   : > { %v4359_v27 = vsel %vm5554_vm15, 0, %v5553_v49  ;;  %v751_v55 = vsel %vm750_vm1, 1, %v5845_v35  ;;  %v766_v25 = vshll.u32 %v762_v21, 16  ;;  %vm768_vm2 = vc.u32 %v760_v10, %v764_v45 }
 0x204   : > { %v4360_v32 = vsub.s32 32, %v4359_v27  ;;  %v4364_v39 = vsub.s32 4294967266, %v4359_v27  ;;  %v753_v50 = vadd.s32 %v751_v55, %v749_v37  ;;  %v4361_v53 = vshll.u32 %v4352_v0, %v4359_v27 }
 0x205   : > { %v770_v4 = vadd.s32 %v764_v45, %v760_v10  ;;  %v769_v30 = vsel %vm768_vm2, 1, %v5845_v35  ;;  %v722_v33 = vsel %vm720_vm5, %v6901_v61, 2102212464  ;;  %v6958_v0 = vadd.f32 %v6955_v11, %v309_v28 }
 0x206   : > { %v4362_v5 = vshrl.u32 %v4344_v41, %v4360_v32  ;;  %v4365_v38 = vadd.s32 127, %v4364_v39  ;;  %v754_v63 = vadd.s32 %v753_v50, %v743_v51  ;;  %v771_v42 = vadd.s32 %v769_v30, %v763_v36 }
 0x207   : > { %vm772_vm4 = vc.u32 %v770_v4, %v766_v25  ;;  %v745_v46 = vshrl.u32 %v740_v56, 16  ;;  %v765_v9 = vshrl.u32 %v761_v60, 16  ;;  %v1925_v54 = vand.u32 2147483647, %v6958_v0 }
 0x208   : > { %v4363_v15 = vor.u32 %v4362_v5, %v4361_v53  ;;  %v4366_v7 = vshll.u32 %v4365_v38, 23  ;;  %v773_v8 = vsel %vm772_vm4, 1, %v5845_v35  ;;  %v1928_v61 = vand.u32 2139095040, %v6958_v0 }
 0x209   : > { %v775_v58 = vadd.s32 %v773_v8, %v771_v42  ;;  %v4375_v2 = vsel %vm4252_vm0, %v4374_v59, %v6912_v52  ;;  %v723_v6 = vsel %vm719_vm7, %v6897_v40, %v722_v33  ;;  %v755_v47 = vadd.s32 %v754_v63, %v745_v46 }
 0x20a   : > { %v4367_v44 = vor.u32 4788187, %v4366_v7  ;;  %v767_v13 = vshrl.u32 %v762_v21, 16  ;;  %v1929_v3 = vshrl.u32 %v1928_v61, 23  ;;  %v1932_v24 = vand.u32 8388607, %v1925_v54 }
 0x20b   : > { %v776_v56 = vadd.s32 %v775_v58, %v765_v9  ;;  %v4370_v34 = vcvt.s32.f32 %v4363_v15  ;;  %v774_v49 = vadd.s32 %v770_v4, %v766_v25  ;;  %vm6973_vm3 = vcmp.le.f32.partialorder %v4250_v17, 0.7853982 }
 0x20c   : > { %v4368_v41 = vand.u32 2147483647, %v4367_v44  ;;  %v724_v40 = vsel %vm718_vm8, %v721_v57, %v723_v6  ;;  %v5507_v22 = vadd.s32 4294967169, %v1929_v3  ;;  %v4377_v31 = vsel %vm6973_vm3, 0, %v4375_v2 }
 0x20d   : > { %v777_v52 = vadd.s32 %v776_v56, %v767_v13  ;;  %vm780_vm5 = vc.u32 %v755_v47, %v774_v49  ;;  %v6982_v60 = vadd.f32 %v6955_v11, %v333_v26  ;;  %v1933_v51 = vor.u32 8388608, %v1932_v24 }
 0x20e   : > { %v4371_v59 = vmul.f32 %v4370_v34, %v4368_v41  ;;  %v1935_v37 = vadd.s32 1, %v5507_v22  ;;  %v778_v27 = vmul.u32 %v6926_v48, %v724_v40  ;;  %v4394_v55 = vadd.s32 3, %v4377_v31 }
 0x20f   : > { %v781_v21 = vadd.s32 1, %v777_v52  ;;  %v3168_v32 = vand.u32 2139095040, %v6982_v60  ;;  %v6993_v36 = vshll.u32 %v1933_v51, 8  ;;  %v3165_v48 = vand.u32 2147483647, %v6982_v60 }
 0x210   : > { %v4372_v17 = vxor.u32 2147483648, %v4371_v59  ;;  %vm1936_vm6 = vcmp.gt.s32.totalorder %v1935_v37, 0  ;;  %v6998_v25 = vand.u32 3, %v4394_v55  ;;  %v7000_v4 = vadd.s32 %v774_v49, %v755_v47 }
 0x211   : > { %v782_v10 = vsel %vm780_vm5, %v781_v21, %v777_v52  ;;  %v1937_v45 = vsel %vm1936_vm6, %v1935_v37, 0  ;;  %v3169_v33 = vshrl.u32 %v3168_v32, 23  ;;  %v7005_v7 = vand.u32 65535, %v6993_v36 }
 0x212   : > { %v4373_v23 = vsel %vm4252_vm0, %v4372_v17, %v4371_v59  ;;  %v783_v57 = vadd.s32 %v782_v10, %v778_v27  ;;  %v1939_v50 = vand.u32 31, %v1937_v45  ;;  %v7009_v46 = vand.u32 8388607, %v3165_v48 }
 0x213   : > { %v6991_v39 = vsel %vm6973_vm3, %v6749_v19, %v4373_v23  ;;  %v7012_v61 = vshrl.u32 %v6993_v36, 16  ;;  %vm687_vm7 = vcmp.lt.s32.totalorder %v6767_v62, 0  ;;  %v7021_v24 = vshrl.u32 %v1937_v45, 5 }
 0x214   : > { %v4378_v28 = vmul.f32 %v6991_v39, %v6991_v39  ;;  %v784_v53 = vadd.s32 536870912, %v783_v57  ;;  %v1940_v5 = vsub.s32 32, %v1939_v50  ;;  %v1942_v42 = vshll.u32 %v5839_v12, %v1939_v50 }
 0x215   : > { %v1945_v44 = vshll.u32 %v5840_v14, %v1939_v50  ;;  %v1951_v6 = vshll.u32 %v5842_v18, %v1939_v50  ;;  %vm4400_vm8 = vcmp.eq.s32.totalorder %v6998_v25, 2  ;;  %v1948_v34 = vshll.u32 %v5841_v16, %v1939_v50 }
 0x216   : > { %v4379_v38 = vmul.f32 -0.001358992, %v4378_v28  ;;  %v4386_v63 = vmul.f32 -0.00019511016, %v4378_v28  ;;  %v785_v30 = vshrl.u32 %v784_v53, 30  ;;  %v1943_v15 = vshrl.u32 %v5840_v14, %v1940_v5 }
 0x217   : > { %v1946_v2 = vshrl.u32 %v5841_v16, %v1940_v5  ;;  %v1952_v47 = vshrl.u32 %v5843_v20, %v1940_v5  ;;  %v1949_v49 = vshrl.u32 %v5842_v18, %v1940_v5  ;;  %vm4397_vm9 = vcmp.eq.s32.totalorder %v6998_v25, 0 }
 0x218   : > { %v4380_v8 = vadd.f32 0.041655596, %v4379_v38  ;;  %v4387_v9 = vadd.f32 0.008332121, %v4386_v63  ;;  %v786_v58 = vshll.u32 %v785_v30, 30  ;;  %v809_v26 = vsub.s32 4, %v785_v30 }
 0x219   : > { %v7024_v41 = vor.u32 %v1943_v15, %v1942_v42  ;;  %v7031_v22 = vor.u32 %v1946_v2, %v1945_v44  ;;  %v1953_v59 = vor.u32 %v1952_v47, %v1951_v6  ;;  %v1954_v31 = vshll.u32 %v5843_v20, %v1939_v50 }
 0x21a   : > { %v4381_v13 = vmul.f32 %v4380_v8, %v4378_v28  ;;  %v4388_v56 = vmul.f32 %v4387_v9, %v4378_v28  ;;  %v7019_v3 = vsub.s32 %v783_v57, %v786_v58  ;;  %v1955_v21 = vshrl.u32 %v5844_v29, %v1940_v5 }
 0x21b   : > { %vm4396_vm13 = vcmp.lt.s32.totalorder %v6998_v25, 2  ;;  %vm1957_vm11 = vcmp.lt.s32.totalorder %v7021_v24, 1  ;;  %vm4393_vm12 = vweird.f32 %v6749_v19  ;;  %v1950_v55 = vor.u32 %v1949_v49, %v1948_v34 }
 0x21c   : > { %v4382_v43 = vadd.f32 -0.4999988, %v4381_v13  ;;  %v4389_v40 = vadd.f32 -0.16666654, %v4388_v56  ;;  %vm788_vm10 = vcmp.lt.s32.totalorder %v7019_v3, 0  ;;  %v789_v52 = vsub.s32 0, %v7019_v3 }
 0x21d   : > { %vm1960_vm14 = vcmp.lt.s32.totalorder %v7021_v24, 4  ;;  %v5531_v10 = vadd.s32 4294967169, %v3169_v33  ;;  %vm1959_vm0 = vcmp.lt.s32.totalorder %v7021_v24, 3  ;;  %v3173_v45 = vor.u32 8388608, %v7009_v46 }
 0x21e   : > { %v4383_v51 = vmul.f32 %v4382_v43, %v4378_v28  ;;  %v4390_v37 = vmul.f32 %v4389_v40, %v4378_v28  ;;  %v790_v17 = vsel %vm788_vm10, %v789_v52, %v7019_v3  ;;  %vm7044_vm15 = vcmp.le.f32.partialorder %v685_v1, 0.7853982 }
 0x21f   : > { %v791_v27 = vclz %v790_v17  ;;  %v1941_v28 = vshrl.u32 %v5839_v12, %v1940_v5  ;;  %v1956_v53 = vor.u32 %v1955_v21, %v1954_v31  ;;  %v1965_v38 = vsel %vm1957_vm11, %v7024_v41, %v7031_v22 }
 0x220   : > { %v4384_v23 = vadd.f32 1.0, %v4383_v51  ;;  %v4391_v57 = vadd.f32 1.0, %v4390_v37  ;;  %v7056_v42 = vsel %vm687_vm7, %v809_v26, %v785_v30  ;;  %v1966_v1 = vsel %vm1960_vm14, %v1953_v59, 920167782 }
 0x221   : > { %v5484_v50 = vadd.s32 4294967294, %v791_v27  ;;  %vm1958_vm2 = vcmp.lt.s32.totalorder %v7021_v24, 2  ;;  %v1967_v5 = vsel %vm1959_vm0, %v1950_v55, %v1966_v1  ;;  %v1969_v15 = vsel %vm1957_vm11, %v7031_v22, %v1950_v55 }
 0x222   : > { %v4392_v63 = vmul.f32 %v4391_v57, %v6991_v39  ;;  %v4401_v33 = vxor.u32 2147483648, %v4384_v23  ;;  %v1968_v30 = vsel %vm1958_vm2, %v1965_v38, %v1967_v5  ;;  %v1970_v6 = vsel %vm1960_vm14, %v1956_v53, 1326507024 }
 0x223   : > { %vm5485_vm1 = vcmp.lt.s32.totalorder %v5484_v50, 0  ;;  %v1971_v13 = vsel %vm1959_vm0, %v1953_v59, %v1970_v6  ;;  %v1998_v56 = vand.u32 65535, %v1968_v30  ;;  %v1999_v26 = vshrl.u32 %v1968_v30, 16 }
 0x224   : > { %v4398_v8 = vxor.u32 2147483648, %v4392_v63  ;;  %v4402_v39 = vsel %vm4400_vm8, %v4401_v33, %v4392_v63  ;;  %v794_v9 = vsel %vm5485_vm1, 0, %v5484_v50  ;;  %v3175_v21 = vadd.s32 1, %v5531_v10 }
 0x225   : > { %v795_v58 = vsub.s32 32, %v794_v9  ;;  %v796_v44 = vshll.u32 %v7019_v3, %v794_v9  ;;  %v799_v2 = vsub.s32 4294967266, %v794_v9  ;;  %v1972_v3 = vsel %vm1958_vm2, %v1969_v15, %v1971_v13 }
 0x226   : > { %v4399_v47 = vsel %vm4397_vm9, %v4384_v23, %v4398_v8  ;;  %v1976_v52 = vand.u32 65535, %v1972_v3  ;;  %v1977_v31 = vshrl.u32 %v1972_v3, 16  ;;  %v2001_v37 = vmul.u32 %v1999_v26, %v7005_v7 }
 0x227   : > { %v4403_v34 = vsel %vm4396_vm13, %v4399_v47, %v4402_v39  ;;  %v797_v49 = vshrl.u32 %v7000_v4, %v795_v58  ;;  %v800_v43 = vadd.s32 127, %v799_v2  ;;  %v2002_v25 = vmul.u32 %v1998_v56, %v7012_v61 }
 0x228   : > { %v4404_v40 = vsel %vm4393_vm12, nan, %v4403_v34  ;;  %v812_v4 = vsel %vm7044_vm15, 0, %v7056_v42  ;;  %v1961_v17 = vsel %vm1957_vm11, %v1941_v28, %v7024_v41  ;;  %v1979_v19 = vmul.u32 %v1977_v31, %v7005_v7 }
 0x229   : > { %5360 = vst [vmem:[%s6323_s27 + $0xc8] sm:$0xff] %v4404_v40  ;;  %v798_v51 = vor.u32 %v797_v49, %v796_v44  ;;  %v801_v59 = vshll.u32 %v800_v43, 23  ;;  %v1980_v27 = vmul.u32 %v1976_v52, %v7012_v61  ;;  %v1962_v23 = vsel %vm1960_vm14, %v1950_v55, 2102212464 }
 0x22a   : > { %v2000_v57 = vmul.u32 %v1998_v56, %v7005_v7  ;;  %v2004_v50 = vshll.u32 %v2001_v37, 16  ;;  %v1978_v38 = vmul.u32 %v1976_v52, %v7005_v7  ;;  %v1981_v63 = vmul.u32 %v1977_v31, %v7012_v61 }
 0x22b   : > { %v802_v10 = vor.u32 4788187, %v801_v59  ;;  %v805_v53 = vcvt.s32.f32 %v798_v51  ;;  %v1982_v33 = vshll.u32 %v1979_v19, 16  ;;  %v1984_v1 = vshll.u32 %v1980_v27, 16 }
 0x22c   : > { %v2003_v41 = vmul.u32 %v1999_v26, %v7012_v61  ;;  %v2006_v28 = vshll.u32 %v2002_v25, 16  ;;  %vm2008_vm3 = vc.u32 %v2000_v57, %v2004_v50  ;;  %v2010_v15 = vadd.s32 %v2004_v50, %v2000_v57 }
 0x22d   : > { %v803_v42 = vand.u32 2147483647, %v802_v10  ;;  %vm1986_vm4 = vc.u32 %v1978_v38, %v1982_v33  ;;  %v1988_v5 = vadd.s32 %v1982_v33, %v1978_v38  ;;  %v1963_v55 = vsel %vm1959_vm0, %v7031_v22, %v1962_v23 }
 0x22e   : > { %v1987_v39 = vsel %vm1986_vm4, 1, %v5845_v35  ;;  %v2009_v7 = vsel %vm2008_vm3, 1, %v5845_v35  ;;  %vm2012_vm6 = vc.u32 %v2010_v15, %v2006_v28  ;;  %v1983_v61 = vshrl.u32 %v1979_v19, 16 }
 0x22f   : > { %v806_v8 = vmul.f32 %v805_v53, %v803_v42  ;;  %v1989_v9 = vadd.s32 %v1987_v39, %v1981_v63  ;;  %vm1990_vm5 = vc.u32 %v1988_v5, %v1984_v1  ;;  %v2011_v30 = vadd.s32 %v2009_v7, %v2003_v41 }
 0x230   : > { %v1991_v44 = vsel %vm1990_vm5, 1, %v5845_v35  ;;  %v2013_v2 = vsel %vm2012_vm6, 1, %v5845_v35  ;;  %v2005_v47 = vshrl.u32 %v2001_v37, 16  ;;  %vm3176_vm8 = vcmp.gt.s32.totalorder %v3175_v21, 0 }
 0x231   : > { %v807_v58 = vxor.u32 2147483648, %v806_v8  ;;  %v1993_v6 = vadd.s32 %v1991_v44, %v1989_v9  ;;  %v2015_v13 = vadd.s32 %v2013_v2, %v2011_v30  ;;  %v829_v56 = vadd.s32 3, %v812_v4 }
 0x232   : > { %v1985_v26 = vshrl.u32 %v1980_v27, 16  ;;  %v3177_v34 = vsel %vm3176_vm8, %v3175_v21, 0  ;;  %v2007_v3 = vshrl.u32 %v2002_v25, 16  ;;  %v1964_v31 = vsel %vm1958_vm2, %v1961_v17, %v1963_v55 }
 0x233   : > { %v808_v22 = vsel %vm687_vm7, %v807_v58, %v806_v8  ;;  %v1994_v43 = vadd.s32 %v1993_v6, %v1983_v61  ;;  %v2016_v40 = vadd.s32 %v2015_v13, %v2005_v47  ;;  %v3179_v51 = vand.u32 31, %v3177_v34 }
 0x234   : > { %v811_v49 = vsel %vm7044_vm15, %v6767_v62, %v808_v22  ;;  %v7117_v37 = vadd.s32 %v2010_v15, %v2006_v28  ;;  %v7119_v21 = vand.u32 3, %v829_v56  ;;  %v2018_v32 = vmul.u32 %v6993_v36, %v1964_v31 }
 0x235   : > { %v813_v52 = vmul.f32 %v811_v49, %v811_v49  ;;  %v7115_v59 = vadd.s32 %v1994_v43, %v1985_v26  ;;  %v2017_v19 = vadd.s32 %v2016_v40, %v2007_v3  ;;  %v7121_v10 = vsub.s32 32, %v3179_v51 }
 0x236   : > { %v7128_v24 = vshll.u32 %v3173_v45, 8  ;;  %v7130_v57 = vshrl.u32 %v3177_v34, 5  ;;  %v3182_v38 = vshll.u32 %v5839_v12, %v3179_v51  ;;  %v3185_v42 = vshll.u32 %v5840_v14, %v3179_v51 }
 0x237   : > { %v814_v4 = vmul.f32 -0.001358992, %v813_v52  ;;  %v821_v27 = vmul.f32 -0.00019511016, %v813_v52  ;;  %vm2020_vm7 = vc.u32 %v7115_v59, %v7117_v37  ;;  %v2021_v25 = vadd.s32 1, %v2017_v19 }
 0x238   : > { %v3183_v50 = vshrl.u32 %v5840_v14, %v7121_v10  ;;  %v3186_v36 = vshrl.u32 %v5841_v16, %v7121_v10  ;;  %v3189_v63 = vshrl.u32 %v5842_v18, %v7121_v10  ;;  %v3188_v41 = vshll.u32 %v5841_v16, %v3179_v51 }
 0x239   : > { %v815_v17 = vadd.f32 0.041655596, %v814_v4  ;;  %v822_v23 = vadd.f32 0.008332121, %v821_v27  ;;  %v2022_v53 = vsel %vm2020_vm7, %v2021_v25, %v2017_v19  ;;  %v3191_v28 = vshll.u32 %v5842_v18, %v3179_v51 }
 0x23a   : > { %v2023_v45 = vadd.s32 %v2022_v53, %v2018_v32  ;;  %v7140_v1 = vor.u32 %v3183_v50, %v3182_v38  ;;  %v3192_v5 = vshrl.u32 %v5843_v20, %v7121_v10  ;;  %v7146_v39 = vor.u32 %v3186_v36, %v3185_v42 }
 0x23b   : > { %v816_v33 = vmul.f32 %v815_v17, %v813_v52  ;;  %v823_v46 = vmul.f32 %v822_v23, %v813_v52  ;;  %v3190_v7 = vor.u32 %v3189_v63, %v3188_v41  ;;  %v3194_v30 = vshll.u32 %v5843_v20, %v3179_v51  ;;  %v357_v63 = vpop.f32.mrf.mxu3 }
 0x23c   : > { %v2024_v55 = vadd.s32 536870912, %v2023_v45  ;;  %v3193_v9 = vor.u32 %v3192_v5, %v3191_v28  ;;  %v3195_v58 = vshrl.u32 %v5844_v29, %v7121_v10  ;;  %vm3200_vm10 = vcmp.lt.s32.totalorder %v7130_v57, 4 }
 0x23d   : > { %v817_v15 = vadd.f32 -0.4999988, %v816_v33  ;;  %v824_v8 = vadd.f32 -0.16666654, %v823_v46  ;;  %vm3197_vm9 = vcmp.lt.s32.totalorder %v7130_v57, 1  ;;  %vm3199_vm13 = vcmp.lt.s32.totalorder %v7130_v57, 3 }
 0x23e   : > { %v7151_v2 = vshrl.u32 %v2024_v55, 30  ;;  %v3196_v6 = vor.u32 %v3195_v58, %v3194_v30  ;;  %v3206_v47 = vsel %vm3200_vm10, %v3193_v9, 920167782  ;;  %v3205_v26 = vsel %vm3197_vm9, %v7140_v1, %v7146_v39 }
 0x23f   : > { %v818_v61 = vmul.f32 %v817_v15, %v813_v52  ;;  %v825_v44 = vmul.f32 %v824_v8, %v813_v52  ;;  %vm831_vm11 = vcmp.lt.s32.totalorder %v7119_v21, 2  ;;  %vm3198_vm12 = vcmp.lt.s32.totalorder %v7130_v57, 2 }
 0x240   : > { %v2026_v56 = vshll.u32 %v7151_v2, 30  ;;  %v3207_v34 = vsel %vm3199_vm13, %v3190_v7, %v3206_v47  ;;  %v3210_v43 = vsel %vm3200_vm10, %v3196_v6, 1326507024  ;;  %v3209_v31 = vsel %vm3197_vm9, %v7146_v39, %v3190_v7 }
 0x241   : > { %v819_v13 = vadd.f32 1.0, %v818_v61  ;;  %v826_v22 = vadd.f32 1.0, %v825_v44  ;;  %vm832_vm14 = vcmp.eq.s32.totalorder %v7119_v21, 0  ;;  %vm835_vm0 = vcmp.eq.s32.totalorder %v7119_v21, 2 }
 0x242   : > { %v2027_v52 = vsub.s32 %v2023_v45, %v2026_v56  ;;  %v3208_v51 = vsel %vm3198_vm12, %v3205_v26, %v3207_v34  ;;  %v3211_v19 = vsel %vm3199_vm13, %v3193_v9, %v3210_v43  ;;  %v3215_v17 = vshrl.u32 %v7128_v24, 16 }
 0x243   : > { %v827_v3 = vmul.f32 %v826_v22, %v811_v49  ;;  %v836_v40 = vxor.u32 2147483648, %v819_v13  ;;  %v3214_v49 = vand.u32 65535, %v7128_v24  ;;  %v3212_v25 = vsel %vm3198_vm12, %v3209_v31, %v3211_v19 }
 0x244   : > { %vm2028_vm15 = vcmp.lt.s32.totalorder %v2027_v52, 0  ;;  %v2029_v27 = vsub.s32 0, %v2027_v52  ;;  %v3238_v23 = vand.u32 65535, %v3208_v51  ;;  %v3216_v38 = vand.u32 65535, %v3212_v25 }
 0x245   : > { %v833_v4 = vxor.u32 2147483648, %v827_v3  ;;  %v837_v32 = vsel %vm835_vm0, %v836_v40, %v827_v3  ;;  %v3217_v36 = vshrl.u32 %v3212_v25, 16  ;;  %vm828_vm1 = vweird.f32 %v6767_v62 }
 0x246   : > { %v2030_v53 = vsel %vm2028_vm15, %v2029_v27, %v2027_v52  ;;  %v3239_v45 = vshrl.u32 %v3208_v51, 16  ;;  %v3220_v28 = vmul.u32 %v3216_v38, %v3215_v17  ;;  %v2019_v5 = vadd.s32 %v7117_v37, %v7115_v59 }
 0x247   : > { %v834_v50 = vsel %vm832_vm14, %v819_v13, %v833_v4  ;;  %v2031_v46 = vclz %v2030_v53  ;;  %v3219_v41 = vmul.u32 %v3217_v36, %v3214_v49  ;;  %v3181_v8 = vshrl.u32 %v5839_v12, %v7121_v10 }
 0x248   : > { %v838_v33 = vsel %vm831_vm11, %v834_v50, %v837_v32  ;;  %v7191_v55 = vadd.f32 %v6955_v11, %v357_v63  ;;  %v3202_v62 = vsel %vm3200_vm10, %v3190_v7, 2102212464  ;;  %v3218_v21 = vmul.u32 %v3216_v38, %v3214_v49 }
 0x249   : > { %v839_v42 = vsel %vm828_vm1, nan, %v838_v33  ;;  %v5508_v15 = vadd.s32 4294967294, %v2031_v46  ;;  %v3222_v9 = vshll.u32 %v3219_v41, 16  ;;  %v3240_v30 = vmul.u32 %v3238_v23, %v3214_v49 }
 0x24a   : > { %5337 = vst [vmem:[%s6323_s27 + $0x10] sm:$0xff] %v839_v42  ;;  %v3221_v58 = vmul.u32 %v3217_v36, %v3215_v17  ;;  %v3224_v61 = vshll.u32 %v3220_v28, 16  ;;  %v3241_v44 = vmul.u32 %v3239_v45, %v3214_v49  ;;  %vm1927_vm4 = vcmp.lt.s32.totalorder %v6958_v0, 0 }
 0x24b   : > { %vm5509_vm2 = vcmp.lt.s32.totalorder %v5508_v15, 0  ;;  %vm3226_vm3 = vc.u32 %v3218_v21, %v3222_v9  ;;  %v3228_v37 = vadd.s32 %v3222_v9, %v3218_v21  ;;  %v3242_v6 = vmul.u32 %v3238_v23, %v3215_v17 }
 0x24c   : > { %v2034_v59 = vsel %vm5509_vm2, 0, %v5508_v15  ;;  %v3223_v13 = vshrl.u32 %v3219_v41, 16  ;;  %v3227_v22 = vsel %vm3226_vm3, 1, %v5845_v35  ;;  %v3243_v7 = vmul.u32 %v3239_v45, %v3215_v17 }
 0x24d   : > { %v2035_v10 = vsub.s32 32, %v2034_v59  ;;  %v2039_v47 = vsub.s32 4294967266, %v2034_v59  ;;  %v3229_v56 = vadd.s32 %v3227_v22, %v3221_v58  ;;  %vm3230_vm5 = vc.u32 %v3228_v37, %v3224_v61 }
 0x24e   : > { %v3244_v26 = vshll.u32 %v3241_v44, 16  ;;  %v2036_v34 = vshll.u32 %v2027_v52, %v2034_v59  ;;  %v3231_v40 = vsel %vm3230_vm5, 1, %v5845_v35  ;;  %v3246_v51 = vshll.u32 %v3242_v6, 16 }
 0x24f   : > { %v2037_v43 = vshrl.u32 %v2019_v5, %v2035_v10  ;;  %v2040_v3 = vadd.s32 127, %v2039_v47  ;;  %v3233_v31 = vadd.s32 %v3231_v40, %v3229_v56  ;;  %v2049_v49 = vsub.s32 4, %v7151_v2 }
 0x250   : > { %vm3248_vm6 = vc.u32 %v3240_v30, %v3244_v26  ;;  %v3250_v19 = vadd.s32 %v3244_v26, %v3240_v30  ;;  %v3201_v25 = vsel %vm3197_vm9, %v3181_v8, %v7140_v1  ;;  %v3225_v50 = vshrl.u32 %v3220_v28, 16 }
 0x251   : > { %v2038_v4 = vor.u32 %v2037_v43, %v2036_v34  ;;  %v2041_v27 = vshll.u32 %v2040_v3, 23  ;;  %v3249_v32 = vsel %vm3248_vm6, 1, %v5845_v35  ;;  %v3234_v17 = vadd.s32 %v3233_v31, %v3223_v13 }
 0x252   : > { %v3251_v52 = vadd.s32 %v3249_v32, %v3243_v7  ;;  %vm3252_vm8 = vc.u32 %v3250_v19, %v3246_v51  ;;  %v4405_v38 = vand.u32 2147483647, %v7191_v55  ;;  %v3203_v36 = vsel %vm3199_vm13, %v7146_v39, %v3202_v62  ;;  %v288_v39 = vpop.f32.mrf.mxu0 }
 0x253   : > { %v2042_v23 = vor.u32 4788187, %v2041_v27  ;;  %v3253_v53 = vsel %vm3252_vm8, 1, %v5845_v35  ;;  %v3245_v63 = vshrl.u32 %v3241_v44, 16  ;;  %v4408_v46 = vand.u32 2139095040, %v7191_v55 }
 0x254   : > { %v3255_v33 = vadd.s32 %v3253_v53, %v3251_v52  ;;  %v2045_v42 = vcvt.s32.f32 %v2038_v4  ;;  %v2050_v1 = vsel %vm1927_vm4, %v2049_v49, %v7151_v2  ;;  %v3235_v41 = vadd.s32 %v3234_v17, %v3225_v50 }
 0x255   : > { %v2043_v45 = vand.u32 2147483647, %v2042_v23  ;;  %v3247_v28 = vshrl.u32 %v3242_v6, 16  ;;  %v4409_v15 = vshrl.u32 %v4408_v46, 23  ;;  %v4412_v8 = vand.u32 8388607, %v4405_v38 }
 0x256   : > { %v3256_v5 = vadd.s32 %v3255_v33, %v3245_v63  ;;  %v3254_v9 = vadd.s32 %v3250_v19, %v3246_v51  ;;  %vm7216_vm7 = vcmp.le.f32.partialorder %v1925_v54, 0.7853982  ;;  %v3204_v30 = vsel %vm3198_vm12, %v3201_v25, %v3203_v36 }
 0x257   : > { %v2046_v21 = vmul.f32 %v2045_v42, %v2043_v45  ;;  %v5555_v58 = vadd.s32 4294967169, %v4409_v15  ;;  %v2052_v44 = vsel %vm7216_vm7, 0, %v2050_v1  ;;  %v4413_v37 = vor.u32 8388608, %v4412_v8 }
 0x258   : > { %v3257_v2 = vadd.s32 %v3256_v5, %v3247_v28  ;;  %vm3260_vm10 = vc.u32 %v3235_v41, %v3254_v9  ;;  %v7225_v10 = vadd.f32 %v6955_v11, %v288_v39  ;;  %v3258_v47 = vmul.u32 %v7128_v24, %v3204_v30 }
 0x259   : > { %v2047_v61 = vxor.u32 2147483648, %v2046_v21  ;;  %v4415_v6 = vadd.s32 1, %v5555_v58  ;;  %v2069_v56 = vadd.s32 3, %v2052_v44  ;;  %v7233_v43 = vshll.u32 %v4413_v37, 8 }
 0x25a   : > { %v3261_v59 = vadd.s32 1, %v3257_v2  ;;  %v843_v11 = vand.u32 2139095040, %v7225_v10  ;;  %v7240_v49 = vadd.s32 %v3254_v9, %v3235_v41  ;;  %vm2068_vm0 = vweird.f32 %v6958_v0 }
 0x25b   : > { %v2048_v54 = vsel %vm1927_vm4, %v2047_v61, %v2046_v21  ;;  %vm4416_vm9 = vcmp.gt.s32.totalorder %v4415_v6, 0  ;;  %v7236_v4 = vand.u32 3, %v2069_v56  ;;  %v7243_v32 = vand.u32 65535, %v7233_v43 }
 0x25c   : > { %v2051_v57 = vsel %vm7216_vm7, %v6958_v0, %v2048_v54  ;;  %v3262_v13 = vsel %vm3260_vm10, %v3261_v59, %v3257_v2  ;;  %v4417_v26 = vsel %vm4416_vm9, %v4415_v6, 0  ;;  %v7246_v25 = vshrl.u32 %v7233_v43, 16 }
 0x25d   : > { %v2053_v22 = vmul.f32 %v2051_v57, %v2051_v57  ;;  %v3263_v7 = vadd.s32 %v3262_v13, %v3258_v47  ;;  %v4419_v34 = vand.u32 31, %v4417_v26  ;;  %v7248_v17 = vshrl.u32 %v843_v11, 23 }
 0x25e   : > { %v7251_v53 = vshrl.u32 %v4417_v26, 5  ;;  %vm2075_vm13 = vcmp.eq.s32.totalorder %v7236_v4, 2  ;;  %vm2072_vm11 = vcmp.eq.s32.totalorder %v7236_v4, 0  ;;  %vm2071_vm12 = vcmp.lt.s32.totalorder %v7236_v4, 2 }
 0x25f   : > { %v2054_v3 = vmul.f32 -0.001358992, %v2053_v22  ;;  %v2061_v40 = vmul.f32 -0.00019511016, %v2053_v22  ;;  %v3264_v31 = vadd.s32 536870912, %v3263_v7  ;;  %v4420_v51 = vsub.s32 32, %v4419_v34 }
 0x260   : > { %v4422_v36 = vshll.u32 %v5839_v12, %v4419_v34  ;;  %v4425_v28 = vshll.u32 %v5840_v14, %v4419_v34  ;;  %v4428_v5 = vshll.u32 %v5841_v16, %v4419_v34  ;;  %v4431_v15 = vshll.u32 %v5842_v18, %v4419_v34 }
 0x261   : > { %v2055_v24 = vadd.f32 0.041655596, %v2054_v3  ;;  %v2062_v19 = vadd.f32 0.008332121, %v2061_v40  ;;  %v7238_v27 = vshrl.u32 %v3264_v31, 30  ;;  %v4423_v63 = vshrl.u32 %v5840_v14, %v4420_v51 }
 0x262   : > { %v4426_v33 = vshrl.u32 %v5841_v16, %v4420_v51  ;;  %v4429_v46 = vshrl.u32 %v5842_v18, %v4420_v51  ;;  %v4432_v41 = vshrl.u32 %v5843_v20, %v4420_v51  ;;  %v4435_v8 = vshrl.u32 %v5844_v29, %v4420_v51 }
 0x263   : > { %v2056_v52 = vmul.f32 %v2055_v24, %v2053_v22  ;;  %v2063_v23 = vmul.f32 %v2062_v19, %v2053_v22  ;;  %v3266_v50 = vshll.u32 %v7238_v27, 30  ;;  %v4424_v62 = vor.u32 %v4423_v63, %v4422_v36 }
 0x264   : > { %v4427_v30 = vor.u32 %v4426_v33, %v4425_v28  ;;  %v4430_v2 = vor.u32 %v4429_v46, %v4428_v5  ;;  %v4434_v58 = vshll.u32 %v5843_v20, %v4419_v34  ;;  %v4433_v37 = vor.u32 %v4432_v41, %v4431_v15 }
 0x265   : > { %v2057_v45 = vadd.f32 -0.4999988, %v2056_v52  ;;  %v2064_v42 = vadd.f32 -0.16666654, %v2063_v23  ;;  %v7258_v1 = vsub.s32 %v3263_v7, %v3266_v50  ;;  %v3289_v54 = vsub.s32 4, %v7238_v27 }
 0x266   : > { %v4421_v47 = vshrl.u32 %v5839_v12, %v4420_v51  ;;  %v4436_v13 = vor.u32 %v4435_v8, %v4434_v58  ;;  %vm4437_vm15 = vcmp.lt.s32.totalorder %v7251_v53, 1  ;;  %vm4438_vm1 = vcmp.lt.s32.totalorder %v7251_v53, 2 }
 0x267   : > { %v2058_v21 = vmul.f32 %v2057_v45, %v2053_v22  ;;  %v2065_v9 = vmul.f32 %v2064_v42, %v2053_v22  ;;  %vm3268_vm14 = vcmp.lt.s32.totalorder %v7258_v1, 0  ;;  %v3269_v39 = vsub.s32 0, %v7258_v1 }
 0x268   : > { %vm3167_vm2 = vcmp.lt.s32.totalorder %v6982_v60, 0  ;;  %vm4439_vm4 = vcmp.lt.s32.totalorder %v7251_v53, 3  ;;  %vm4440_vm3 = vcmp.lt.s32.totalorder %v7251_v53, 4  ;;  %v4445_v26 = vsel %vm4437_vm15, %v4424_v62, %v4427_v30 }
 0x269   : > { %v2059_v61 = vadd.f32 1.0, %v2058_v21  ;;  %v2066_v44 = vadd.f32 1.0, %v2065_v9  ;;  %v3270_v59 = vsel %vm3268_vm14, %v3269_v39, %v7258_v1  ;;  %v4441_v11 = vsel %vm4437_vm15, %v4421_v47, %v4424_v62 }
 0x26a   : > { %v3271_v6 = vclz %v3270_v59  ;;  %v4442_v3 = vsel %vm4440_vm3, %v4430_v2, 2102212464  ;;  %v4446_v40 = vsel %vm4440_vm3, %v4433_v37, 920167782  ;;  %v4449_v51 = vsel %vm4437_vm15, %v4427_v30, %v4430_v2 }
 0x26b   : > { %v2067_v22 = vmul.f32 %v2066_v44, %v2051_v57  ;;  %v2076_v56 = vxor.u32 2147483648, %v2059_v61  ;;  %v4447_v31 = vsel %vm4439_vm4, %v4430_v2, %v4446_v40  ;;  %v4450_v23 = vsel %vm4440_vm3, %v4436_v13, 1326507024 }
 0x26c   : > { %v5532_v7 = vadd.s32 4294967294, %v3271_v6  ;;  %v4448_v52 = vsel %vm4438_vm1, %v4445_v26, %v4447_v31  ;;  %v4443_v33 = vsel %vm4439_vm4, %v4427_v30, %v4442_v3  ;;  %v4451_v45 = vsel %vm4439_vm4, %v4433_v37, %v4450_v23 }
 0x26d   : > { %v2073_v34 = vxor.u32 2147483648, %v2067_v22  ;;  %v2077_v57 = vsel %vm2075_vm13, %v2076_v56, %v2067_v22  ;;  %v4478_v42 = vand.u32 65535, %v4448_v52  ;;  %v4479_v41 = vshrl.u32 %v4448_v52, 16 }
 0x26e   : > { %vm5533_vm5 = vcmp.lt.s32.totalorder %v5532_v7, 0  ;;  %v4452_v15 = vsel %vm4438_vm1, %v4449_v51, %v4451_v45  ;;  %v840_v0 = vand.u32 2147483647, %v7225_v10  ;;  %v5486_v2 = vadd.s32 4294967169, %v7248_v17 }
 0x26f   : > { %v2074_v24 = vsel %vm2072_vm11, %v2059_v61, %v2073_v34  ;;  %v3274_v19 = vsel %vm5533_vm5, 0, %v5532_v7  ;;  %v4456_v8 = vand.u32 65535, %v4452_v15  ;;  %v4457_v21 = vshrl.u32 %v4452_v15, 16 }
 0x270   : > { %v2078_v50 = vsel %vm2071_vm12, %v2074_v24, %v2077_v57  ;;  %v3275_v36 = vsub.s32 32, %v3274_v19  ;;  %v3279_v63 = vsub.s32 4294967266, %v3274_v19  ;;  %v3276_v28 = vshll.u32 %v7258_v1, %v3274_v19 }
 0x271   : > { %v2079_v46 = vsel %vm2068_vm0, nan, %v2078_v50  ;;  %v4481_v9 = vmul.u32 %v4479_v41, %v7243_v32  ;;  %v4482_v30 = vmul.u32 %v4478_v42, %v7246_v25  ;;  %v7311_v1 = vsel %vm4438_vm1, %v4441_v11, %v4443_v33 }
 0x272   : > { %5345 = vst [vmem:[%s6323_s27 + $0x50] sm:$0xff] %v2079_v46  ;;  %v3277_v5 = vshrl.u32 %v7240_v49, %v3275_v36  ;;  %v3280_v4 = vadd.s32 127, %v3279_v63  ;;  %v7307_v49 = vsel %vm3167_vm2, %v3289_v54, %v7238_v27  ;;  %v4459_v58 = vmul.u32 %v4457_v21, %v7243_v32 }
 0x273   : > { %v4460_v61 = vmul.u32 %v4456_v8, %v7246_v25  ;;  %vm7317_vm6 = vcmp.le.f32.partialorder %v3165_v48, 0.7853982  ;;  %v4480_v59 = vmul.u32 %v4478_v42, %v7243_v32  ;;  %v4483_v27 = vmul.u32 %v4479_v41, %v7246_v25 }
 0x274   : > { %v3278_v39 = vor.u32 %v3277_v5, %v3276_v28  ;;  %v3281_v62 = vshll.u32 %v3280_v4, 23  ;;  %v4484_v37 = vshll.u32 %v4481_v9, 16  ;;  %v4458_v53 = vmul.u32 %v4456_v8, %v7243_v32 }
 0x275   : > { %v4461_v54 = vmul.u32 %v4457_v21, %v7246_v25  ;;  %v4462_v47 = vshll.u32 %v4459_v58, 16  ;;  %v4464_v22 = vshll.u32 %v4460_v61, 16  ;;  %v4486_v56 = vshll.u32 %v4482_v30, 16 }
 0x276   : > { %v3282_v17 = vor.u32 4788187, %v3281_v62  ;;  %v3285_v6 = vcvt.s32.f32 %v3278_v39  ;;  %vm4488_vm8 = vc.u32 %v4480_v59, %v4484_v37  ;;  %v4490_v26 = vadd.s32 %v4484_v37, %v4480_v59 }
 0x277   : > { %vm4466_vm7 = vc.u32 %v4458_v53, %v4462_v47  ;;  %v4468_v48 = vadd.s32 %v4462_v47, %v4458_v53  ;;  %v4489_v7 = vsel %vm4488_vm8, 1, %v5845_v35  ;;  %v850_v40 = vadd.s32 1, %v5486_v2 }
 0x278   : > { %v3283_v13 = vand.u32 2147483647, %v3282_v17  ;;  %v4467_v11 = vsel %vm4466_vm7, 1, %v5845_v35  ;;  %v4491_v3 = vadd.s32 %v4489_v7, %v4483_v27  ;;  %v4485_v32 = vshrl.u32 %v4481_v9, 16 }
 0x279   : > { %v4469_v57 = vadd.s32 %v4467_v11, %v4461_v54  ;;  %vm4470_vm10 = vc.u32 %v4468_v48, %v4464_v22  ;;  %vm4492_vm9 = vc.u32 %v4490_v26, %v4486_v56  ;;  %vm851_vm13 = vcmp.gt.s32.totalorder %v850_v40, 0 }
 0x27a   : > { %v3286_v34 = vmul.f32 %v3285_v6, %v3283_v13  ;;  %v4471_v31 = vsel %vm4470_vm10, 1, %v5845_v35  ;;  %v4493_v51 = vsel %vm4492_vm9, 1, %v5845_v35  ;;  %v4463_v24 = vshrl.u32 %v4459_v58, 16 }
 0x27b   : > { %v4473_v19 = vadd.s32 %v4471_v31, %v4469_v57  ;;  %v4495_v52 = vadd.s32 %v4493_v51, %v4491_v3  ;;  %v852_v23 = vsel %vm851_vm13, %v850_v40, 0  ;;  %v4465_v36 = vshrl.u32 %v4460_v61, 16 }
 0x27c   : > { %v3287_v25 = vxor.u32 2147483648, %v3286_v34  ;;  %v847_v63 = vand.u32 8388607, %v840_v0  ;;  %v854_v33 = vand.u32 31, %v852_v23  ;;  %v4487_v42 = vshrl.u32 %v4482_v30, 16 }
 0x27d   : > { %v4474_v45 = vadd.s32 %v4473_v19, %v4463_v24  ;;  %v4496_v41 = vadd.s32 %v4495_v52, %v4485_v32  ;;  %v3292_v28 = vsel %vm7317_vm6, 0, %v7307_v49  ;;  %v4498_v4 = vmul.u32 %v7233_v43, %v7311_v1 }
 0x27e   : > { %v3288_v50 = vsel %vm3167_vm2, %v3287_v25, %v3286_v34  ;;  %v7341_v15 = vsub.s32 32, %v854_v33  ;;  %v7345_v21 = vadd.s32 %v4490_v26, %v4486_v56  ;;  %v7347_v39 = vshrl.u32 %v852_v23, 5 }
 0x27f   : > { %v3291_v46 = vsel %vm7317_vm6, %v6982_v60, %v3288_v50  ;;  %v7343_v8 = vadd.s32 %v4474_v45, %v4465_v36  ;;  %v4497_v9 = vadd.s32 %v4496_v41, %v4487_v42  ;;  %v857_v2 = vshll.u32 %v5839_v12, %v854_v33 }
 0x280   : > { %v3293_v5 = vmul.f32 %v3291_v46, %v3291_v46  ;;  %v860_v58 = vshll.u32 %v5840_v14, %v854_v33  ;;  %v861_v43 = vshrl.u32 %v5841_v16, %v7341_v15  ;;  %v866_v1 = vshll.u32 %v5842_v18, %v854_v33 }
 0x281   : > { %vm4500_vm11 = vc.u32 %v7343_v8, %v7345_v21  ;;  %v4501_v49 = vadd.s32 1, %v4497_v9  ;;  %v863_v17 = vshll.u32 %v5841_v16, %v854_v33  ;;  %v864_v59 = vshrl.u32 %v5842_v18, %v7341_v15 }
 0x282   : > { %v3294_v62 = vmul.f32 -0.001358992, %v3293_v5  ;;  %v3301_v30 = vmul.f32 -0.00019511016, %v3293_v5  ;;  %v858_v37 = vshrl.u32 %v5840_v14, %v7341_v15  ;;  %v867_v6 = vshrl.u32 %v5843_v20, %v7341_v15 }
 0x283   : > { %v4502_v27 = vsel %vm4500_vm11, %v4501_v49, %v4497_v9  ;;  %v869_v53 = vshll.u32 %v5843_v20, %v854_v33  ;;  %v848_v22 = vor.u32 8388608, %v847_v63  ;;  %v3309_v56 = vadd.s32 3, %v3292_v28 }
 0x284   : > { %v3295_v61 = vadd.f32 0.041655596, %v3294_v62  ;;  %v3302_v44 = vadd.f32 0.008332121, %v3301_v30  ;;  %v4503_v13 = vadd.s32 %v4502_v27, %v4498_v4  ;;  %v7364_v48 = vor.u32 %v861_v43, %v860_v58 }
 0x285   : > { %v868_v7 = vor.u32 %v867_v6, %v866_v1  ;;  %v870_v26 = vshrl.u32 %v5844_v29, %v7341_v15  ;;  %v865_v40 = vor.u32 %v864_v59, %v863_v17  ;;  %v7368_v57 = vor.u32 %v858_v37, %v857_v2  ;;  %v312_v37 = vpop.f32.mrf.mxu1 }
 0x286   : > { %v3296_v54 = vmul.f32 %v3295_v61, %v3293_v5  ;;  %v3303_v47 = vmul.f32 %v3302_v44, %v3293_v5  ;;  %v4504_v3 = vadd.s32 536870912, %v4503_v13  ;;  %vm872_vm12 = vcmp.lt.s32.totalorder %v7347_v39, 1 }
 0x287   : > { %v871_v32 = vor.u32 %v870_v26, %v869_v53  ;;  %vm875_vm14 = vcmp.lt.s32.totalorder %v7347_v39, 4  ;;  %vm874_vm0 = vcmp.lt.s32.totalorder %v7347_v39, 3  ;;  %v3310_v24 = vand.u32 3, %v3309_v56 }
 0x288   : > { %v3297_v34 = vadd.f32 -0.4999988, %v3296_v54  ;;  %v3304_v11 = vadd.f32 -0.16666654, %v3303_v47  ;;  %v7372_v51 = vshrl.u32 %v4504_v3, 30  ;;  %v884_v63 = vsel %vm872_vm12, %v7364_v48, %v865_v40 }
 0x289   : > { %v881_v19 = vsel %vm875_vm14, %v868_v7, 920167782  ;;  %v885_v52 = vsel %vm875_vm14, %v871_v32, 1326507024  ;;  %v880_v33 = vsel %vm872_vm12, %v7368_v57, %v7364_v48  ;;  %v7391_v41 = vshll.u32 %v848_v22, 8 }
 0x28a   : > { %v3298_v25 = vmul.f32 %v3297_v34, %v3293_v5  ;;  %v3305_v31 = vmul.f32 %v3304_v11, %v3293_v5  ;;  %v4506_v36 = vshll.u32 %v7372_v51, 30  ;;  %v882_v45 = vsel %vm874_vm0, %v865_v40, %v881_v19  ;;  %v7412_v11 = vld [vmem:[%s9513_s2] ss:$0 sm:$0xff] }
 0x28b   : > { %v886_v42 = vsel %vm874_vm0, %v868_v7, %v885_v52  ;;  %vm873_vm15 = vcmp.lt.s32.totalorder %v7347_v39, 2  ;;  %vm3311_vm1 = vcmp.lt.s32.totalorder %v3310_v24, 2  ;;  %vm3312_vm2 = vcmp.eq.s32.totalorder %v3310_v24, 0 }
 0x28c   : > { %v3299_v23 = vadd.f32 1.0, %v3298_v25  ;;  %v3306_v50 = vadd.f32 1.0, %v3305_v31  ;;  %v4507_v4 = vsub.s32 %v4503_v13, %v4506_v36  ;;  %v887_v9 = vsel %vm873_vm15, %v884_v63, %v886_v42 }
 0x28d   : > { %v883_v2 = vsel %vm873_vm15, %v880_v33, %v882_v45  ;;  %vm3315_vm3 = vcmp.eq.s32.totalorder %v3310_v24, 2  ;;  %v889_v58 = vand.u32 65535, %v7391_v41  ;;  %v892_v49 = vshrl.u32 %v887_v9, 16 }
 0x28e   : > { %v3307_v28 = vmul.f32 %v3306_v50, %v3291_v46  ;;  %v3316_v5 = vxor.u32 2147483648, %v3299_v23  ;;  %vm4508_vm4 = vcmp.lt.s32.totalorder %v4507_v4, 0  ;;  %v4509_v30 = vsub.s32 0, %v4507_v4 }
 0x28f   : > { %v891_v46 = vand.u32 65535, %v887_v9  ;;  %v890_v44 = vshrl.u32 %v7391_v41, 16  ;;  %vm3308_vm5 = vweird.f32 %v6982_v60  ;;  %v914_v27 = vshrl.u32 %v883_v2, 16 }
 0x290   : > { %v3313_v62 = vxor.u32 2147483648, %v3307_v28  ;;  %v3317_v1 = vsel %vm3315_vm3, %v3316_v5, %v3307_v28  ;;  %v4510_v61 = vsel %vm4508_vm4, %v4509_v30, %v4507_v4  ;;  %v894_v53 = vmul.u32 %v892_v49, %v889_v58 }
 0x291   : > { %v4511_v59 = vclz %v4510_v61  ;;  %v895_v54 = vmul.u32 %v891_v46, %v890_v44  ;;  %v913_v47 = vand.u32 65535, %v883_v2  ;;  %v4499_v13 = vadd.s32 %v7345_v21, %v7343_v8 }
 0x292   : > { %v3314_v43 = vsel %vm3312_vm2, %v3299_v23, %v3313_v62  ;;  %v856_v56 = vshrl.u32 %v5839_v12, %v7341_v15  ;;  %v877_v60 = vsel %vm875_vm14, %v865_v40, 2102212464  ;;  %v893_v7 = vmul.u32 %v891_v46, %v889_v58 }
 0x293   : > { %v3318_v17 = vsel %vm3311_vm1, %v3314_v43, %v3317_v1  ;;  %v5556_v22 = vadd.s32 4294967294, %v4511_v59  ;;  %v896_v26 = vmul.u32 %v892_v49, %v890_v44  ;;  %v897_v34 = vshll.u32 %v894_v53, 16 }
 0x294   : > { %v3319_v6 = vsel %vm3308_vm5, nan, %v3318_v17  ;;  %v7415_v3 = vadd.f32 %v7412_v11, %v312_v37  ;;  %v898_v8 = vshrl.u32 %v894_v53, 16  ;;  %v899_v21 = vshll.u32 %v895_v54, 16 }
 0x295   : > { %5353 = vst [vmem:[%s6323_s27 + $0x90] sm:$0xff] %v3319_v6  ;;  %vm5557_vm6 = vcmp.lt.s32.totalorder %v5556_v22, 0  ;;  %v916_v32 = vmul.u32 %v914_v27, %v889_v58  ;;  %vm4407_vm8 = vcmp.lt.s32.totalorder %v7191_v55, 0  ;;  %vm901_vm7 = vc.u32 %v893_v7, %v897_v34 }
 0x296   : > { %v4514_v15 = vsel %vm5557_vm6, 0, %v5556_v22  ;;  %v903_v40 = vadd.s32 %v897_v34, %v893_v7  ;;  %v917_v25 = vmul.u32 %v913_v47, %v890_v44  ;;  %v902_v19 = vsel %vm901_vm7, 1, %v5845_v35 }
 0x297   : > { %v4515_v31 = vsub.s32 32, %v4514_v15  ;;  %v4519_v24 = vsub.s32 4294967266, %v4514_v15  ;;  %v915_v52 = vmul.u32 %v913_v47, %v889_v58  ;;  %v904_v23 = vadd.s32 %v902_v19, %v896_v26 }
 0x298   : > { %vm905_vm10 = vc.u32 %v903_v40, %v899_v21  ;;  %v918_v50 = vmul.u32 %v914_v27, %v890_v44  ;;  %v919_v36 = vshll.u32 %v916_v32, 16  ;;  %v4516_v63 = vshll.u32 %v4507_v4, %v4514_v15 }
 0x299   : > { %v4517_v33 = vshrl.u32 %v4499_v13, %v4515_v31  ;;  %v4520_v45 = vadd.s32 127, %v4519_v24  ;;  %v906_v42 = vsel %vm905_vm10, 1, %v5845_v35  ;;  %v921_v5 = vshll.u32 %v917_v25, 16 }
 0x29a   : > { %v908_v28 = vadd.s32 %v906_v42, %v904_v23  ;;  %vm923_vm9 = vc.u32 %v915_v52, %v919_v36  ;;  %v925_v9 = vadd.s32 %v919_v36, %v915_v52  ;;  %v4529_v2 = vsub.s32 4, %v7372_v51 }
 0x29b   : > { %v4518_v62 = vor.u32 %v4517_v33, %v4516_v63  ;;  %v4521_v30 = vshll.u32 %v4520_v45, 23  ;;  %v924_v46 = vsel %vm923_vm9, 1, %v5845_v35  ;;  %v2080_v43 = vand.u32 2147483647, %v7415_v3 }
 0x29c   : > { %v909_v58 = vadd.s32 %v908_v28, %v898_v8  ;;  %v926_v49 = vadd.s32 %v924_v46, %v918_v50  ;;  %vm927_vm13 = vc.u32 %v925_v9, %v921_v5  ;;  %v876_v1 = vsel %vm872_vm12, %v856_v56, %v7368_v57 }
 0x29d   : > { %v4522_v4 = vor.u32 4788187, %v4521_v30  ;;  %v900_v61 = vshrl.u32 %v895_v54, 16  ;;  %v928_v44 = vsel %vm927_vm13, 1, %v5845_v35  ;;  %v878_v17 = vsel %vm874_vm0, %v7364_v48, %v877_v60  ;;  %v336_v48 = vpop.f32.mrf.mxu2 }
 0x29e   : > { %v920_v59 = vshrl.u32 %v916_v32, 16  ;;  %v930_v27 = vadd.s32 %v928_v44, %v926_v49  ;;  %v2083_v37 = vand.u32 2139095040, %v7415_v3  ;;  %v4525_v53 = vcvt.s32.f32 %v4518_v62 }
 0x29f   : > { %v4523_v6 = vand.u32 2147483647, %v4522_v4  ;;  %v4530_v47 = vsel %vm4407_vm8, %v4529_v2, %v7372_v51  ;;  %v910_v13 = vadd.s32 %v909_v58, %v900_v61  ;;  %v922_v22 = vshrl.u32 %v917_v25, 16 }
 0x2a0   : > { %v931_v57 = vadd.s32 %v930_v27, %v920_v59  ;;  %v2084_v54 = vshrl.u32 %v2083_v37, 23  ;;  %v2087_v56 = vand.u32 8388607, %v2080_v43  ;;  %v929_v26 = vadd.s32 %v925_v9, %v921_v5 }
 0x2a1   : > { %v4526_v7 = vmul.f32 %v4525_v53, %v4523_v6  ;;  %vm4406_vm11 = vcmp.le.f32.partialorder %v4405_v38, 0.7853982  ;;  %v879_v60 = vsel %vm873_vm15, %v876_v1, %v878_v17  ;;  %v7441_v25 = vadd.f32 %v7412_v11, %v336_v48 }
 0x2a2   : > { %v932_v34 = vadd.s32 %v931_v57, %v922_v22  ;;  %v5510_v8 = vadd.s32 4294967169, %v2084_v54  ;;  %v4532_v51 = vsel %vm4406_vm11, 0, %v4530_v47  ;;  %vm935_vm12 = vc.u32 %v910_v13, %v929_v26 }
 0x2a3   : > { %v4527_v21 = vxor.u32 2147483648, %v4526_v7  ;;  %v2088_v15 = vor.u32 8388608, %v2087_v56  ;;  %v933_v24 = vmul.u32 %v7391_v41, %v879_v60  ;;  %v4549_v39 = vadd.s32 3, %v4532_v51 }
 0x2a4   : > { %v936_v32 = vadd.s32 1, %v932_v34  ;;  %v2090_v40 = vadd.s32 1, %v5510_v8  ;;  %v3323_v33 = vand.u32 2139095040, %v7441_v25  ;;  %v7452_v30 = vadd.s32 %v929_v26, %v910_v13 }
 0x2a5   : > { %v4528_v31 = vsel %vm4407_vm8, %v4527_v21, %v4526_v7  ;;  %v7447_v63 = vshll.u32 %v2088_v15, 8  ;;  %v7450_v5 = vand.u32 3, %v4549_v39  ;;  %v3320_v49 = vand.u32 2147483647, %v7441_v25 }
 0x2a6   : > { %v4531_v38 = vsel %vm4406_vm11, %v7191_v55, %v4528_v31  ;;  %v937_v19 = vsel %vm935_vm12, %v936_v32, %v932_v34  ;;  %vm2091_vm14 = vcmp.gt.s32.totalorder %v2090_v40, 0  ;;  %v3324_v4 = vshrl.u32 %v3323_v33, 23 }
 0x2a7   : > { %v4533_v52 = vmul.f32 %v4531_v38, %v4531_v38  ;;  %v938_v23 = vadd.s32 %v937_v19, %v933_v24  ;;  %v2092_v50 = vsel %vm2091_vm14, %v2090_v40, 0  ;;  %v7456_v58 = vand.u32 65535, %v7447_v63 }
 0x2a8   : > { %v2094_v36 = vand.u32 31, %v2092_v50  ;;  %vm842_vm0 = vcmp.lt.s32.totalorder %v7225_v10, 0  ;;  %vm4555_vm15 = vcmp.eq.s32.totalorder %v7450_v5, 2  ;;  %v7468_v22 = vshrl.u32 %v2092_v50, 5 }
 0x2a9   : > { %v4534_v45 = vmul.f32 -0.001358992, %v4533_v52  ;;  %v4541_v42 = vmul.f32 -0.00019511016, %v4533_v52  ;;  %v939_v28 = vadd.s32 536870912, %v938_v23  ;;  %vm4552_vm1 = vcmp.eq.s32.totalorder %v7450_v5, 0 }
 0x2aa   : > { %v2095_v9 = vsub.s32 32, %v2094_v36  ;;  %v2097_v46 = vshll.u32 %v5839_v12, %v2094_v36  ;;  %v2100_v17 = vshll.u32 %v5840_v14, %v2094_v36  ;;  %v2106_v37 = vshll.u32 %v5842_v18, %v2094_v36 }
 0x2ab   : > { %v4535_v41 = vadd.f32 0.041655596, %v4534_v45  ;;  %v4542_v62 = vadd.f32 0.008332121, %v4541_v42  ;;  %v940_v2 = vshrl.u32 %v939_v28, 30  ;;  %v2103_v57 = vshll.u32 %v5841_v16, %v2094_v36 }
 0x2ac   : > { %v2098_v59 = vshrl.u32 %v5840_v14, %v2095_v9  ;;  %v2101_v27 = vshrl.u32 %v5841_v16, %v2095_v9  ;;  %v2107_v6 = vshrl.u32 %v5843_v20, %v2095_v9  ;;  %v2104_v54 = vshrl.u32 %v5842_v18, %v2095_v9 }
 0x2ad   : > { %v4536_v1 = vmul.f32 %v4535_v41, %v4533_v52  ;;  %v4543_v61 = vmul.f32 %v4542_v62, %v4533_v52  ;;  %v941_v44 = vshll.u32 %v940_v2, 30  ;;  %v2109_v56 = vshll.u32 %v5843_v20, %v2094_v36 }
 0x2ae   : > { %v2110_v7 = vshrl.u32 %v5844_v29, %v2095_v9  ;;  %vm4551_vm2 = vcmp.lt.s32.totalorder %v7450_v5, 2  ;;  %vm4548_vm3 = vweird.f32 %v7191_v55  ;;  %v964_v34 = vsub.s32 4, %v940_v2 }
 0x2af   : > { %v4537_v53 = vadd.f32 -0.4999988, %v4536_v1  ;;  %v4544_v47 = vadd.f32 -0.16666654, %v4543_v61  ;;  %v7466_v13 = vsub.s32 %v938_v23, %v941_v44  ;;  %v2099_v8 = vor.u32 %v2098_v59, %v2097_v46 }
 0x2b0   : > { %v2102_v21 = vor.u32 %v2101_v27, %v2100_v17  ;;  %v2108_v51 = vor.u32 %v2107_v6, %v2106_v37  ;;  %vm2112_vm5 = vcmp.lt.s32.totalorder %v7468_v22, 1  ;;  %v2105_v24 = vor.u32 %v2104_v54, %v2103_v57 }
 0x2b1   : > { %v4538_v26 = vmul.f32 %v4537_v53, %v4533_v52  ;;  %v4545_v48 = vmul.f32 %v4544_v47, %v4533_v52  ;;  %vm943_vm4 = vcmp.lt.s32.totalorder %v7466_v13, 0  ;;  %v944_v60 = vsub.s32 0, %v7466_v13 }
 0x2b2   : > { %vm2115_vm6 = vcmp.lt.s32.totalorder %v7468_v22, 4  ;;  %v2130_v39 = vshrl.u32 %v7447_v63, 16  ;;  %vm7485_vm8 = vcmp.le.f32.partialorder %v840_v0, 0.7853982  ;;  %v2111_v50 = vor.u32 %v2110_v7, %v2109_v56 }
 0x2b3   : > { %v4539_v32 = vadd.f32 1.0, %v4538_v26  ;;  %v4546_v15 = vadd.f32 1.0, %v4545_v48  ;;  %v945_v40 = vsel %vm943_vm4, %v944_v60, %v7466_v13  ;;  %vm2114_vm7 = vcmp.lt.s32.totalorder %v7468_v22, 3 }
 0x2b4   : > { %v946_v31 = vclz %v945_v40  ;;  %v2096_v33 = vshrl.u32 %v5839_v12, %v2095_v9  ;;  %v2120_v45 = vsel %vm2112_vm5, %v2099_v8, %v2102_v21  ;;  %v5534_v42 = vadd.s32 4294967169, %v3324_v4 }
 0x2b5   : > { %v4547_v19 = vmul.f32 %v4546_v15, %v4531_v38  ;;  %v4556_v52 = vxor.u32 2147483648, %v4539_v32  ;;  %v7495_v38 = vsel %vm842_vm0, %v964_v34, %v940_v2  ;;  %vm2113_vm10 = vcmp.lt.s32.totalorder %v7468_v22, 2 }
 0x2b6   : > { %v5487_v36 = vadd.s32 4294967294, %v946_v31  ;;  %v2121_v0 = vsel %vm2115_vm6, %v2108_v51, 920167782  ;;  %v2124_v62 = vsel %vm2112_vm5, %v2102_v21, %v2105_v24  ;;  %v2125_v1 = vsel %vm2115_vm6, %v2111_v50, 1326507024 }
 0x2b7   : > { %v4553_v28 = vxor.u32 2147483648, %v4547_v19  ;;  %v4557_v41 = vsel %vm4555_vm15, %v4556_v52, %v4547_v19  ;;  %v2122_v9 = vsel %vm2114_vm7, %v2105_v24, %v2121_v0  ;;  %v2117_v59 = vsel %vm2115_vm6, %v2105_v24, 2102212464 }
 0x2b8   : > { %vm5488_vm9 = vcmp.lt.s32.totalorder %v5487_v36, 0  ;;  %v2123_v4 = vsel %vm2113_vm10, %v2120_v45, %v2122_v9  ;;  %v2126_v37 = vsel %vm2114_vm7, %v2108_v51, %v2125_v1  ;;  %v3330_v55 = vadd.s32 1, %v5534_v42 }
 0x2b9   : > { %v4554_v2 = vsel %vm4552_vm1, %v4539_v32, %v4553_v28  ;;  %v949_v46 = vsel %vm5488_vm9, 0, %v5487_v36  ;;  %v2153_v6 = vand.u32 65535, %v2123_v4  ;;  %v2154_v53 = vshrl.u32 %v2123_v4, 16 }
 0x2ba   : > { %v4558_v61 = vsel %vm4551_vm2, %v4554_v2, %v4557_v41  ;;  %v950_v44 = vsub.s32 32, %v949_v46  ;;  %v954_v17 = vsub.s32 4294967266, %v949_v46  ;;  %v951_v47 = vshll.u32 %v7466_v13, %v949_v46 }
 0x2bb   : > { %v4559_v27 = vsel %vm4548_vm3, nan, %v4558_v61  ;;  %v2127_v54 = vsel %vm2113_vm10, %v2124_v62, %v2126_v37  ;;  %v2156_v26 = vmul.u32 %v2154_v53, %v7456_v58  ;;  %v967_v34 = vsel %vm7485_vm8, 0, %v7495_v38 }
 0x2bc   : > { %5361 = vst [vmem:[%s6323_s27 + $0xd0] sm:$0xff] %v4559_v27  ;;  %v952_v57 = vshrl.u32 %v7452_v30, %v950_v44  ;;  %v955_v5 = vadd.s32 127, %v954_v17  ;;  %v2131_v56 = vand.u32 65535, %v2127_v54  ;;  %v2132_v7 = vshrl.u32 %v2127_v54, 16 }
 0x2bd   : > { %v2157_v51 = vmul.u32 %v2153_v6, %v2130_v39  ;;  %v2116_v13 = vsel %vm2112_vm5, %v2096_v33, %v2099_v8  ;;  %v2118_v30 = vsel %vm2114_vm7, %v2102_v21, %v2117_v59  ;;  %v2155_v31 = vmul.u32 %v2153_v6, %v7456_v58 }
 0x2be   : > { %v953_v48 = vor.u32 %v952_v57, %v951_v47  ;;  %v956_v60 = vshll.u32 %v955_v5, 23  ;;  %v2134_v32 = vmul.u32 %v2132_v7, %v7456_v58  ;;  %v2135_v15 = vmul.u32 %v2131_v56, %v2130_v39 }
 0x2bf   : > { %v2158_v24 = vmul.u32 %v2154_v53, %v2130_v39  ;;  %v2159_v19 = vshll.u32 %v2156_v26, 16  ;;  %v2133_v50 = vmul.u32 %v2131_v56, %v7456_v58  ;;  %v2136_v36 = vmul.u32 %v2132_v7, %v2130_v39 }
 0x2c0   : > { %v957_v40 = vor.u32 4788187, %v956_v60  ;;  %v960_v52 = vcvt.s32.f32 %v953_v48  ;;  %v2137_v45 = vshll.u32 %v2134_v32, 16  ;;  %v2139_v28 = vshll.u32 %v2135_v15, 16 }
 0x2c1   : > { %v2161_v38 = vshll.u32 %v2157_v51, 16  ;;  %vm2163_vm13 = vc.u32 %v2155_v31, %v2159_v19  ;;  %v2165_v33 = vadd.s32 %v2159_v19, %v2155_v31  ;;  %vm3331_vm12 = vcmp.gt.s32.totalorder %v3330_v55, 0 }
 0x2c2   : > { %v958_v42 = vand.u32 2147483647, %v957_v40  ;;  %vm2141_vm11 = vc.u32 %v2133_v50, %v2137_v45  ;;  %v2143_v8 = vadd.s32 %v2137_v45, %v2133_v50  ;;  %v2164_v21 = vsel %vm2163_vm13, 1, %v5845_v35 }
 0x2c3   : > { %v2142_v41 = vsel %vm2141_vm11, 1, %v5845_v35  ;;  %v2166_v9 = vadd.s32 %v2164_v21, %v2158_v24  ;;  %v2160_v2 = vshrl.u32 %v2156_v26, 16  ;;  %vm2167_vm15 = vc.u32 %v2165_v33, %v2161_v38 }
 0x2c4   : > { %v961_v0 = vmul.f32 %v960_v52, %v958_v42  ;;  %v2144_v62 = vadd.s32 %v2142_v41, %v2136_v36  ;;  %vm2145_vm14 = vc.u32 %v2143_v8, %v2139_v28  ;;  %v2168_v46 = vsel %vm2167_vm15, 1, %v5845_v35 }
 0x2c5   : > { %v2146_v39 = vsel %vm2145_vm14, 1, %v5845_v35  ;;  %v3332_v4 = vsel %vm3331_vm12, %v3330_v55, 0  ;;  %v2138_v1 = vshrl.u32 %v2134_v32, 16  ;;  %v2170_v44 = vadd.s32 %v2168_v46, %v2166_v9 }
 0x2c6   : > { %v962_v58 = vxor.u32 2147483648, %v961_v0  ;;  %v2148_v61 = vadd.s32 %v2146_v39, %v2144_v62  ;;  %v3334_v17 = vand.u32 31, %v3332_v4  ;;  %v2119_v27 = vsel %vm2113_vm10, %v2116_v13, %v2118_v30 }
 0x2c7   : > { %v2140_v37 = vshrl.u32 %v2135_v15, 16  ;;  %v2162_v6 = vshrl.u32 %v2157_v51, 16  ;;  %v2171_v57 = vadd.s32 %v2170_v44, %v2160_v2  ;;  %v984_v56 = vadd.s32 3, %v967_v34 }
 0x2c8   : > { %v963_v59 = vsel %vm842_vm0, %v962_v58, %v961_v0  ;;  %v2149_v47 = vadd.s32 %v2148_v61, %v2138_v1  ;;  %v7547_v5 = vsub.s32 32, %v3334_v17  ;;  %v3327_v7 = vand.u32 8388607, %v3320_v49 }
 0x2c9   : > { %v966_v53 = vsel %vm7485_vm8, %v7225_v10, %v963_v59  ;;  %v7553_v55 = vadd.s32 %v2165_v33, %v2161_v38  ;;  %v2172_v22 = vadd.s32 %v2171_v57, %v2162_v6  ;;  %v2173_v48 = vmul.u32 %v7447_v63, %v2119_v27 }
 0x2ca   : > { %v968_v54 = vmul.f32 %v966_v53, %v966_v53  ;;  %v7551_v26 = vadd.s32 %v2149_v47, %v2140_v37  ;;  %v7556_v23 = vshrl.u32 %v3332_v4, 5  ;;  %v3340_v13 = vshll.u32 %v5840_v14, %v3334_v17 }
 0x2cb   : > { %v2176_v34 = vadd.s32 1, %v2172_v22  ;;  %v3341_v30 = vshrl.u32 %v5841_v16, %v7547_v5  ;;  %v3344_v32 = vshrl.u32 %v5842_v18, %v7547_v5  ;;  %v3338_v63 = vshrl.u32 %v5840_v14, %v7547_v5 }
 0x2cc   : > { %v969_v60 = vmul.f32 -0.001358992, %v968_v54  ;;  %v976_v51 = vmul.f32 -0.00019511016, %v968_v54  ;;  %vm2175_vm0 = vc.u32 %v7551_v26, %v7553_v55  ;;  %v3343_v31 = vshll.u32 %v5841_v16, %v3334_v17 }
 0x2cd   : > { %v2177_v24 = vsel %vm2175_vm0, %v2176_v34, %v2172_v22  ;;  %v3346_v19 = vshll.u32 %v5842_v18, %v3334_v17  ;;  %v3347_v52 = vshrl.u32 %v5843_v20, %v7547_v5  ;;  %v3349_v50 = vshll.u32 %v5843_v20, %v3334_v17  ;;  %v360_v34 = vpop.f32.mrf.mxu3 }
 0x2ce   : > { %v970_v15 = vadd.f32 0.041655596, %v969_v60  ;;  %v977_v40 = vadd.f32 0.008332121, %v976_v51  ;;  %v2178_v42 = vadd.s32 %v2177_v24, %v2173_v48  ;;  %v3350_v28 = vshrl.u32 %v5844_v29, %v7547_v5 }
 0x2cf   : > { %v3337_v38 = vshll.u32 %v5839_v12, %v3334_v17  ;;  %v7575_v8 = vor.u32 %v3341_v30, %v3340_v13  ;;  %v3345_v21 = vor.u32 %v3344_v32, %v3343_v31  ;;  %v3348_v33 = vor.u32 %v3347_v52, %v3346_v19 }
 0x2d0   : > { %v971_v36 = vmul.f32 %v970_v15, %v968_v54  ;;  %v978_v45 = vmul.f32 %v977_v40, %v968_v54  ;;  %v2179_v9 = vadd.s32 536870912, %v2178_v42  ;;  %v3351_v62 = vor.u32 %v3350_v28, %v3349_v50 }
 0x2d1   : > { %v985_v2 = vand.u32 3, %v984_v56  ;;  %v3328_v58 = vor.u32 8388608, %v3327_v7  ;;  %v7577_v39 = vor.u32 %v3338_v63, %v3337_v38  ;;  %vm3355_vm1 = vcmp.lt.s32.totalorder %v7556_v23, 4 }
 0x2d2   : > { %v972_v0 = vadd.f32 -0.4999988, %v971_v36  ;;  %v979_v41 = vadd.f32 -0.16666654, %v978_v45  ;;  %v7579_v1 = vshrl.u32 %v2179_v9, 30  ;;  %vm3352_vm2 = vcmp.lt.s32.totalorder %v7556_v23, 1 }
 0x2d3   : > { %vm3354_vm4 = vcmp.lt.s32.totalorder %v7556_v23, 3  ;;  %v3361_v61 = vsel %vm3355_vm1, %v3348_v33, 920167782  ;;  %v3365_v44 = vsel %vm3355_vm1, %v3351_v62, 1326507024  ;;  %v3364_v37 = vsel %vm3352_vm2, %v7575_v8, %v3345_v21 }
 0x2d4   : > { %v973_v46 = vmul.f32 %v972_v0, %v968_v54  ;;  %v980_v4 = vmul.f32 %v979_v41, %v968_v54  ;;  %v2181_v27 = vshll.u32 %v7579_v1, 30  ;;  %v3360_v6 = vsel %vm3352_vm2, %v7577_v39, %v7575_v8 }
 0x2d5   : > { %v3362_v47 = vsel %vm3354_vm4, %v3345_v21, %v3361_v61  ;;  %v3366_v57 = vsel %vm3354_vm4, %v3348_v33, %v3365_v44  ;;  %v7600_v54 = vshll.u32 %v3328_v58, 8  ;;  %vm3353_vm3 = vcmp.lt.s32.totalorder %v7556_v23, 2 }
 0x2d6   : > { %v974_v17 = vadd.f32 1.0, %v973_v46  ;;  %v981_v59 = vadd.f32 1.0, %v980_v4  ;;  %v2182_v22 = vsub.s32 %v2178_v42, %v2181_v27  ;;  %vm983_vm5 = vweird.f32 %v7225_v10 }
 0x2d7   : > { %vm986_vm6 = vcmp.lt.s32.totalorder %v985_v2, 2  ;;  %vm987_vm8 = vcmp.eq.s32.totalorder %v985_v2, 0  ;;  %v3367_v48 = vsel %vm3353_vm3, %v3364_v37, %v3366_v57  ;;  %v3363_v13 = vsel %vm3353_vm3, %v3360_v6, %v3362_v47 }
 0x2d8   : > { %v982_v56 = vmul.f32 %v981_v59, %v966_v53  ;;  %v991_v7 = vxor.u32 2147483648, %v974_v17  ;;  %vm2183_vm7 = vcmp.lt.s32.totalorder %v2182_v22, 0  ;;  %v2184_v51 = vsub.s32 0, %v2182_v22 }
 0x2d9   : > { %vm990_vm10 = vcmp.eq.s32.totalorder %v985_v2, 2  ;;  %v3369_v53 = vand.u32 65535, %v7600_v54  ;;  %v3371_v30 = vand.u32 65535, %v3367_v48  ;;  %v3372_v32 = vshrl.u32 %v3367_v48, 16 }
 0x2da   : > { %v988_v60 = vxor.u32 2147483648, %v982_v56  ;;  %v992_v40 = vsel %vm990_vm10, %v991_v7, %v982_v56  ;;  %v2185_v63 = vsel %vm2183_vm7, %v2184_v51, %v2182_v22  ;;  %v3370_v31 = vshrl.u32 %v7600_v54, 16 }
 0x2db   : > { %v2186_v19 = vclz %v2185_v63  ;;  %v3394_v52 = vshrl.u32 %v3363_v13, 16  ;;  %v7612_v50 = vadd.f32 %v7412_v11, %v360_v34  ;;  %v3374_v45 = vmul.u32 %v3372_v32, %v3369_v53 }
 0x2dc   : > { %v989_v15 = vsel %vm987_vm8, %v974_v17, %v988_v60  ;;  %v3375_v42 = vmul.u32 %v3371_v30, %v3370_v31  ;;  %v3393_v28 = vand.u32 65535, %v3363_v13  ;;  %v2174_v38 = vadd.s32 %v7553_v55, %v7551_v26 }
 0x2dd   : > { %v993_v24 = vsel %vm986_vm6, %v989_v15, %v992_v40  ;;  %v5511_v33 = vadd.s32 4294967294, %v2186_v19  ;;  %v3336_v0 = vshrl.u32 %v5839_v12, %v7547_v5  ;;  %v3357_v41 = vsel %vm3355_vm1, %v3345_v21, 2102212464 }
 0x2de   : > { %v994_v36 = vsel %vm983_vm5, nan, %v993_v24  ;;  %v2204_v9 = vsub.s32 4, %v7579_v1  ;;  %v3373_v62 = vmul.u32 %v3371_v30, %v3369_v53  ;;  %v3376_v2 = vmul.u32 %v3372_v32, %v3370_v31  ;;  %v291_v24 = vpop.f32.mrf.mxu0 }
 0x2df   : > { %5338 = vst [vmem:[%s6323_s27 + $0x18] sm:$0xff] %v994_v36  ;;  %v3377_v10 = vshll.u32 %v3374_v45, 16  ;;  %vm2082_vm9 = vcmp.lt.s32.totalorder %v7415_v3, 0  ;;  %vm5512_vm13 = vcmp.lt.s32.totalorder %v5511_v33, 0  ;;  %v3378_v58 = vshrl.u32 %v3374_v45, 16 }
 0x2e0   : > { %v3379_v46 = vshll.u32 %v3375_v42, 16  ;;  %v3396_v4 = vmul.u32 %v3394_v52, %v3369_v53  ;;  %v2189_v61 = vsel %vm5512_vm13, 0, %v5511_v33  ;;  %v3397_v55 = vmul.u32 %v3393_v28, %v3370_v31 }
 0x2e1   : > { %vm3381_vm11 = vc.u32 %v3373_v62, %v3377_v10  ;;  %v3383_v26 = vadd.s32 %v3377_v10, %v3373_v62  ;;  %v2190_v44 = vsub.s32 32, %v2189_v61  ;;  %v2194_v5 = vsub.s32 4294967266, %v2189_v61 }
 0x2e2   : > { %v3382_v17 = vsel %vm3381_vm11, 1, %v5845_v35  ;;  %v3395_v21 = vmul.u32 %v3393_v28, %v3369_v53  ;;  %v3398_v27 = vmul.u32 %v3394_v52, %v3370_v31  ;;  %v3399_v37 = vshll.u32 %v3396_v4, 16 }
 0x2e3   : > { %v3384_v59 = vadd.s32 %v3382_v17, %v3376_v2  ;;  %vm3385_vm12 = vc.u32 %v3383_v26, %v3379_v46  ;;  %v2191_v6 = vshll.u32 %v2182_v22, %v2189_v61  ;;  %v2192_v47 = vshrl.u32 %v2174_v38, %v2190_v44 }
 0x2e4   : > { %v2195_v57 = vadd.s32 127, %v2194_v5  ;;  %v3386_v56 = vsel %vm3385_vm12, 1, %v5845_v35  ;;  %v3401_v48 = vshll.u32 %v3397_v55, 16  ;;  %vm3403_vm14 = vc.u32 %v3395_v21, %v3399_v37 }
 0x2e5   : > { %v3388_v7 = vadd.s32 %v3386_v56, %v3384_v59  ;;  %v3405_v60 = vadd.s32 %v3399_v37, %v3395_v21  ;;  %v2193_v51 = vor.u32 %v2192_v47, %v2191_v6  ;;  %v3356_v34 = vsel %vm3352_vm2, %v3336_v0, %v7577_v39 }
 0x2e6   : > { %v2196_v13 = vshll.u32 %v2195_v57, 23  ;;  %v3404_v53 = vsel %vm3403_vm14, 1, %v5845_v35  ;;  %v4560_v22 = vand.u32 2147483647, %v7612_v50  ;;  %v3358_v40 = vsel %vm3354_vm4, %v7575_v8, %v3357_v41 }
 0x2e7   : > { %v3389_v30 = vadd.s32 %v3388_v7, %v3378_v58  ;;  %v3406_v32 = vadd.s32 %v3404_v53, %v3398_v27  ;;  %vm3407_vm15 = vc.u32 %v3405_v60, %v3401_v48  ;;  %v3380_v63 = vshrl.u32 %v3375_v42, 16 }
 0x2e8   : > { %v2197_v15 = vor.u32 4788187, %v2196_v13  ;;  %v3408_v31 = vsel %vm3407_vm15, 1, %v5845_v35  ;;  %v2205_v39 = vsel %vm2082_vm9, %v2204_v9, %v7579_v1  ;;  %v3400_v19 = vshrl.u32 %v3396_v4, 16 }
 0x2e9   : > { %v3410_v52 = vadd.s32 %v3408_v31, %v3406_v32  ;;  %v4563_v36 = vand.u32 2139095040, %v7612_v50  ;;  %v2200_v28 = vcvt.s32.f32 %v2193_v51  ;;  %v3390_v38 = vadd.s32 %v3389_v30, %v3380_v63 }
 0x2ea   : > { %v2198_v45 = vand.u32 2147483647, %v2197_v15  ;;  %v3402_v33 = vshrl.u32 %v3397_v55, 16  ;;  %v4567_v8 = vand.u32 8388607, %v4560_v22  ;;  %v7643_v42 = vadd.f32 %v7412_v11, %v291_v24 }
 0x2eb   : > { %v3411_v0 = vadd.s32 %v3410_v52, %v3400_v19  ;;  %v4564_v62 = vshrl.u32 %v4563_v36, 23  ;;  %v3409_v2 = vadd.s32 %v3405_v60, %v3401_v48  ;;  %vm7647_vm0 = vcmp.le.f32.partialorder %v2080_v43, 0.7853982 }
 0x2ec   : > { %v2201_v41 = vmul.f32 %v2200_v28, %v2198_v45  ;;  %v3359_v9 = vsel %vm3353_vm3, %v3356_v34, %v3358_v40  ;;  %v2207_v4 = vsel %vm7647_vm0, 0, %v2205_v39  ;;  %v4568_v61 = vor.u32 8388608, %v4567_v8 }
 0x2ed   : > { %v3412_v10 = vadd.s32 %v3411_v0, %v3402_v33  ;;  %v5558_v58 = vadd.s32 4294967169, %v4564_v62  ;;  %vm3415_vm1 = vc.u32 %v3390_v38, %v3409_v2  ;;  %v998_v55 = vand.u32 2139095040, %v7643_v42 }
 0x2ee   : > { %v2202_v46 = vxor.u32 2147483648, %v2201_v41  ;;  %v3413_v44 = vmul.u32 %v7600_v54, %v3359_v9  ;;  %v2224_v21 = vadd.s32 3, %v2207_v4  ;;  %v7662_v6 = vshll.u32 %v4568_v61, 8 }
 0x2ef   : > { %v3416_v11 = vadd.s32 1, %v3412_v10  ;;  %v4570_v26 = vadd.s32 1, %v5558_v58  ;;  %v999_v47 = vshrl.u32 %v998_v55, 23  ;;  %v7668_v34 = vadd.s32 %v3409_v2, %v3390_v38 }
 0x2f0   : > { %v2203_v43 = vsel %vm2082_vm9, %v2202_v46, %v2201_v41  ;;  %v7664_v51 = vand.u32 3, %v2224_v21  ;;  %v7671_v53 = vand.u32 65535, %v7662_v6  ;;  %v7674_v30 = vshrl.u32 %v7662_v6, 16 }
 0x2f1   : > { %v2206_v23 = vsel %vm7647_vm0, %v7415_v3, %v2203_v43  ;;  %v3417_v5 = vsel %vm3415_vm1, %v3416_v11, %v3412_v10  ;;  %vm4571_vm2 = vcmp.gt.s32.totalorder %v4570_v26, 0  ;;  %v7676_v32 = vadd.s32 4294967169, %v999_v47 }
 0x2f2   : > { %v2208_v17 = vmul.f32 %v2206_v23, %v2206_v23  ;;  %v3418_v59 = vadd.s32 %v3417_v5, %v3413_v44  ;;  %v4572_v27 = vsel %vm4571_vm2, %v4570_v26, 0  ;;  %vm2230_vm4 = vcmp.eq.s32.totalorder %v7664_v51, 2 }
 0x2f3   : > { %v4574_v37 = vand.u32 31, %v4572_v27  ;;  %v7679_v31 = vshrl.u32 %v4572_v27, 5  ;;  %vm2227_vm3 = vcmp.eq.s32.totalorder %v7664_v51, 0  ;;  %vm2226_vm5 = vcmp.lt.s32.totalorder %v7664_v51, 2 }
 0x2f4   : > { %v2209_v57 = vmul.f32 -0.001358992, %v2208_v17  ;;  %v2216_v56 = vmul.f32 -0.00019511016, %v2208_v17  ;;  %v3419_v7 = vadd.s32 536870912, %v3418_v59  ;;  %vm2223_vm8 = vweird.f32 %v7415_v3 }
 0x2f5   : > { %v4575_v48 = vsub.s32 32, %v4574_v37  ;;  %v4577_v24 = vshll.u32 %v5839_v12, %v4574_v37  ;;  %v4580_v33 = vshll.u32 %v5840_v14, %v4574_v37  ;;  %v4583_v0 = vshll.u32 %v5841_v16, %v4574_v37 }
 0x2f6   : > { %v2210_v60 = vadd.f32 0.041655596, %v2209_v57  ;;  %v2217_v54 = vadd.f32 0.008332121, %v2216_v56  ;;  %v7666_v13 = vshrl.u32 %v3419_v7, 30  ;;  %v4586_v62 = vshll.u32 %v5842_v18, %v4574_v37 }
 0x2f7   : > { %v4578_v39 = vshrl.u32 %v5840_v14, %v4575_v48  ;;  %v4581_v19 = vshrl.u32 %v5841_v16, %v4575_v48  ;;  %v4584_v52 = vshrl.u32 %v5842_v18, %v4575_v48  ;;  %v4587_v38 = vshrl.u32 %v5843_v20, %v4575_v48 }
 0x2f8   : > { %v2211_v15 = vmul.f32 %v2210_v60, %v2208_v17  ;;  %v2218_v40 = vmul.f32 %v2217_v54, %v2208_v17  ;;  %v3421_v63 = vshll.u32 %v7666_v13, 30  ;;  %v4590_v8 = vshrl.u32 %v5844_v29, %v4575_v48 }
 0x2f9   : > { %v4579_v9 = vor.u32 %v4578_v39, %v4577_v24  ;;  %v4582_v10 = vor.u32 %v4581_v19, %v4580_v33  ;;  %v4585_v58 = vor.u32 %v4584_v52, %v4583_v0  ;;  %v4589_v46 = vshll.u32 %v5843_v20, %v4574_v37 }
 0x2fa   : > { %v2212_v36 = vadd.f32 -0.4999988, %v2211_v15  ;;  %v2219_v45 = vadd.f32 -0.16666654, %v2218_v40  ;;  %v7686_v28 = vsub.s32 %v3418_v59, %v3421_v63  ;;  %v4588_v26 = vor.u32 %v4587_v38, %v4586_v62 }
 0x2fb   : > { %v3444_v43 = vsub.s32 4, %v7666_v13  ;;  %v4576_v44 = vshrl.u32 %v5839_v12, %v4575_v48  ;;  %v4591_v5 = vor.u32 %v4590_v8, %v4589_v46  ;;  %vm4592_vm7 = vcmp.lt.s32.totalorder %v7679_v31, 1 }
 0x2fc   : > { %v2213_v41 = vmul.f32 %v2212_v36, %v2208_v17  ;;  %v2220_v2 = vmul.f32 %v2219_v45, %v2208_v17  ;;  %vm3423_vm6 = vcmp.lt.s32.totalorder %v7686_v28, 0  ;;  %v3424_v1 = vsub.s32 0, %v7686_v28 }
 0x2fd   : > { %vm4593_vm10 = vcmp.lt.s32.totalorder %v7679_v31, 2  ;;  %vm3322_vm9 = vcmp.lt.s32.totalorder %v7441_v25, 0  ;;  %vm4594_vm13 = vcmp.lt.s32.totalorder %v7679_v31, 3  ;;  %vm4595_vm11 = vcmp.lt.s32.totalorder %v7679_v31, 4 }
 0x2fe   : > { %v2214_v4 = vadd.f32 1.0, %v2213_v41  ;;  %v2221_v11 = vadd.f32 1.0, %v2220_v2  ;;  %v3425_v61 = vsel %vm3423_vm6, %v3424_v1, %v7686_v28  ;;  %v4600_v27 = vsel %vm4592_vm7, %v4579_v9, %v4582_v10 }
 0x2ff   : > { %v3426_v55 = vclz %v3425_v61  ;;  %v4596_v47 = vsel %vm4592_vm7, %v4576_v44, %v4579_v9  ;;  %v4597_v57 = vsel %vm4595_vm11, %v4585_v58, 2102212464  ;;  %v4601_v56 = vsel %vm4595_vm11, %v4588_v26, 920167782 }
 0x300   : > { %v2222_v17 = vmul.f32 %v2221_v11, %v2206_v23  ;;  %v2231_v21 = vxor.u32 2147483648, %v2214_v4  ;;  %v4602_v7 = vsel %vm4594_vm13, %v4585_v58, %v4601_v56  ;;  %v4604_v48 = vsel %vm4592_vm7, %v4582_v10, %v4585_v58 }
 0x301   : > { %v5535_v59 = vadd.s32 4294967294, %v3426_v55  ;;  %v4603_v15 = vsel %vm4593_vm10, %v4600_v27, %v4602_v7  ;;  %v4605_v40 = vsel %vm4595_vm11, %v4591_v5, 1326507024  ;;  %v4598_v19 = vsel %vm4594_vm13, %v4582_v10, %v4597_v57 }
 0x302   : > { %v2228_v37 = vxor.u32 2147483648, %v2222_v17  ;;  %v2232_v23 = vsel %vm2230_vm4, %v2231_v21, %v2222_v17  ;;  %v4606_v36 = vsel %vm4594_vm13, %v4588_v26, %v4605_v40  ;;  %v4633_v45 = vand.u32 65535, %v4603_v15 }
 0x303   : > { %vm5536_vm12 = vcmp.lt.s32.totalorder %v5535_v59, 0  ;;  %v4634_v38 = vshrl.u32 %v4603_v15, 16  ;;  %v4607_v62 = vsel %vm4593_vm10, %v4604_v48, %v4606_v36  ;;  %v995_v3 = vand.u32 2147483647, %v7643_v42 }
 0x304   : > { %v2229_v60 = vsel %vm2227_vm3, %v2214_v4, %v2228_v37  ;;  %v3429_v54 = vsel %vm5536_vm12, 0, %v5535_v59  ;;  %v4611_v8 = vand.u32 65535, %v4607_v62  ;;  %v4612_v41 = vshrl.u32 %v4607_v62, 16 }
 0x305   : > { %v2233_v63 = vsel %vm2226_vm5, %v2229_v60, %v2232_v23  ;;  %v3430_v24 = vsub.s32 32, %v3429_v54  ;;  %v3434_v39 = vsub.s32 4294967266, %v3429_v54  ;;  %v3431_v33 = vshll.u32 %v7686_v28, %v3429_v54 }
 0x306   : > { %v2234_v52 = vsel %vm2223_vm8, nan, %v2233_v63  ;;  %v4636_v2 = vmul.u32 %v4634_v38, %v7671_v53  ;;  %v4637_v10 = vmul.u32 %v4633_v45, %v7674_v30  ;;  %v1005_v58 = vadd.s32 1, %v7676_v32 }
 0x307   : > { %5346 = vst [vmem:[%s6323_s27 + $0x58] sm:$0xff] %v2234_v52  ;;  %v3432_v0 = vshrl.u32 %v7668_v34, %v3430_v24  ;;  %v3435_v51 = vadd.s32 127, %v3434_v39  ;;  %v7735_v34 = vsel %vm3322_vm9, %v3444_v43, %v7666_v13  ;;  %v7739_v28 = vsel %vm4593_vm10, %v4596_v47, %v4598_v19 }
 0x308   : > { %v4614_v46 = vmul.u32 %v4612_v41, %v7671_v53  ;;  %v4615_v4 = vmul.u32 %v4611_v8, %v7674_v30  ;;  %v4635_v61 = vmul.u32 %v4633_v45, %v7671_v53  ;;  %v4638_v26 = vmul.u32 %v4634_v38, %v7674_v30 }
 0x309   : > { %v3433_v1 = vor.u32 %v3432_v0, %v3431_v33  ;;  %v3436_v9 = vshll.u32 %v3435_v51, 23  ;;  %v4639_v55 = vshll.u32 %v4636_v2, 16  ;;  %v4613_v44 = vmul.u32 %v4611_v8, %v7671_v53 }
 0x30a   : > { %v4616_v13 = vmul.u32 %v4612_v41, %v7674_v30  ;;  %v4617_v43 = vshll.u32 %v4614_v46, 16  ;;  %v4619_v31 = vshll.u32 %v4615_v4, 16  ;;  %v4641_v17 = vshll.u32 %v4637_v10, 16 }
 0x30b   : > { %v3437_v11 = vor.u32 4788187, %v3436_v9  ;;  %v3440_v32 = vcvt.s32.f32 %v3433_v1  ;;  %vm4643_vm14 = vc.u32 %v4635_v61, %v4639_v55  ;;  %v4645_v27 = vadd.s32 %v4639_v55, %v4635_v61 }
 0x30c   : > { %vm4621_vm15 = vc.u32 %v4613_v44, %v4617_v43  ;;  %v4623_v21 = vadd.s32 %v4617_v43, %v4613_v44  ;;  %v4644_v59 = vsel %vm4643_vm14, 1, %v5845_v35  ;;  %vm1006_vm0 = vcmp.gt.s32.totalorder %v1005_v58, 0 }
 0x30d   : > { %v3438_v5 = vand.u32 2147483647, %v3437_v11  ;;  %v4622_v47 = vsel %vm4621_vm15, 1, %v5845_v35  ;;  %v4646_v57 = vadd.s32 %v4644_v59, %v4638_v26  ;;  %v4640_v53 = vshrl.u32 %v4636_v2, 16 }
 0x30e   : > { %v4624_v56 = vadd.s32 %v4622_v47, %v4616_v13  ;;  %vm4625_vm1 = vc.u32 %v4623_v21, %v4619_v31  ;;  %vm4647_vm2 = vc.u32 %v4645_v27, %v4641_v17  ;;  %v1007_v48 = vsel %vm1006_vm0, %v1005_v58, 0 }
 0x30f   : > { %v3441_v37 = vmul.f32 %v3440_v32, %v3438_v5  ;;  %v4626_v23 = vsel %vm4625_vm1, 1, %v5845_v35  ;;  %v4648_v7 = vsel %vm4647_vm2, 1, %v5845_v35  ;;  %v4618_v60 = vshrl.u32 %v4614_v46, 16 }
 0x310   : > { %v4628_v54 = vadd.s32 %v4626_v23, %v4624_v56  ;;  %v4650_v15 = vadd.s32 %v4648_v7, %v4646_v57  ;;  %v1009_v40 = vand.u32 31, %v1007_v48  ;;  %vm7753_vm4 = vcmp.le.f32.partialorder %v3320_v49, 0.7853982 }
 0x311   : > { %v3442_v30 = vxor.u32 2147483648, %v3441_v37  ;;  %v4620_v39 = vshrl.u32 %v4615_v4, 16  ;;  %v4642_v19 = vshrl.u32 %v4637_v10, 16  ;;  %v3447_v49 = vsel %vm7753_vm4, 0, %v7735_v34 }
 0x312   : > { %v4629_v36 = vadd.s32 %v4628_v54, %v4618_v60  ;;  %v4651_v45 = vadd.s32 %v4650_v15, %v4640_v53  ;;  %v7762_v38 = vsub.s32 32, %v1009_v40  ;;  %v4653_v0 = vmul.u32 %v7662_v6, %v7739_v28 }
 0x313   : > { %v3443_v24 = vsel %vm3322_vm9, %v3442_v30, %v3441_v37  ;;  %v1002_v51 = vand.u32 8388607, %v995_v3  ;;  %v7773_v8 = vadd.s32 %v4645_v27, %v4641_v17  ;;  %v7775_v2 = vshrl.u32 %v1007_v48, 5 }
 0x314   : > { %v3446_v52 = vsel %vm7753_vm4, %v7441_v25, %v3443_v24  ;;  %v7771_v62 = vadd.s32 %v4629_v36, %v4620_v39  ;;  %v4652_v41 = vadd.s32 %v4651_v45, %v4642_v19  ;;  %v1015_v10 = vshll.u32 %v5840_v14, %v1009_v40 }
 0x315   : > { %v3448_v33 = vmul.f32 %v3446_v52, %v3446_v52  ;;  %v1018_v58 = vshll.u32 %v5841_v16, %v1009_v40  ;;  %v1016_v34 = vshrl.u32 %v5841_v16, %v7762_v38  ;;  %v1019_v28 = vshrl.u32 %v5842_v18, %v7762_v38 }
 0x316   : > { %vm4655_vm3 = vc.u32 %v7771_v62, %v7773_v8  ;;  %v4656_v6 = vadd.s32 1, %v4652_v41  ;;  %v1012_v11 = vshll.u32 %v5839_v12, %v1009_v40  ;;  %v1013_v61 = vshrl.u32 %v5840_v14, %v7762_v38 }
 0x317   : > { %v3449_v1 = vmul.f32 -0.001358992, %v3448_v33  ;;  %v3456_v9 = vmul.f32 -0.00019511016, %v3448_v33  ;;  %v1021_v55 = vshll.u32 %v5842_v18, %v1009_v40  ;;  %v1022_v32 = vshrl.u32 %v5843_v20, %v7762_v38 }
 0x318   : > { %v4657_v26 = vsel %vm4655_vm3, %v4656_v6, %v4652_v41  ;;  %v1024_v44 = vshll.u32 %v5843_v20, %v1009_v40  ;;  %v1025_v31 = vshrl.u32 %v5844_v29, %v7762_v38  ;;  %v3464_v17 = vadd.s32 3, %v3447_v49 }
 0x319   : > { %v3450_v46 = vadd.f32 0.041655596, %v3449_v1  ;;  %v3457_v4 = vadd.f32 0.008332121, %v3456_v9  ;;  %v4658_v5 = vadd.s32 %v4657_v26, %v4653_v0  ;;  %v7794_v21 = vor.u32 %v1016_v34, %v1015_v10 }
 0x31a   : > { %v1020_v59 = vor.u32 %v1019_v28, %v1018_v58  ;;  %v1023_v27 = vor.u32 %v1022_v32, %v1021_v55  ;;  %v1026_v56 = vor.u32 %v1025_v31, %v1024_v44  ;;  %v1003_v53 = vor.u32 8388608, %v1002_v51 }
 0x31b   : > { %v3451_v13 = vmul.f32 %v3450_v46, %v3448_v33  ;;  %v3458_v43 = vmul.f32 %v3457_v4, %v3448_v33  ;;  %v4659_v57 = vadd.s32 536870912, %v4658_v5  ;;  %v7796_v30 = vor.u32 %v1013_v61, %v1012_v11  ;;  %v315_v11 = vpop.f32.mrf.mxu1 }
 0x31c   : > { %vm1027_vm5 = vcmp.lt.s32.totalorder %v7775_v2, 1  ;;  %vm1030_vm6 = vcmp.lt.s32.totalorder %v7775_v2, 4  ;;  %vm1029_vm8 = vcmp.lt.s32.totalorder %v7775_v2, 3  ;;  %v3465_v60 = vand.u32 3, %v3464_v17 }
 0x31d   : > { %v3452_v37 = vadd.f32 -0.4999988, %v3451_v13  ;;  %v3459_v47 = vadd.f32 -0.16666654, %v3458_v43  ;;  %v7800_v48 = vshrl.u32 %v4659_v57, 30  ;;  %v1039_v39 = vsel %vm1027_vm5, %v7794_v21, %v1020_v59 }
 0x31e   : > { %v1036_v54 = vsel %vm1030_vm6, %v1023_v27, 920167782  ;;  %v1040_v15 = vsel %vm1030_vm6, %v1026_v56, 1326507024  ;;  %v1035_v19 = vsel %vm1027_vm5, %v7796_v30, %v7794_v21  ;;  %v7819_v49 = vshll.u32 %v1003_v53, 8 }
 0x31f   : > { %v3453_v23 = vmul.f32 %v3452_v37, %v3448_v33  ;;  %v3460_v7 = vmul.f32 %v3459_v47, %v3448_v33  ;;  %v4661_v24 = vshll.u32 %v7800_v48, 30  ;;  %v1037_v36 = vsel %vm1029_vm8, %v1020_v59, %v1036_v54 }
 0x320   : > { %v1041_v45 = vsel %vm1029_vm8, %v1023_v27, %v1040_v15  ;;  %vm1028_vm7 = vcmp.lt.s32.totalorder %v7775_v2, 2  ;;  %vm3466_vm10 = vcmp.lt.s32.totalorder %v3465_v60, 2  ;;  %vm3467_vm9 = vcmp.eq.s32.totalorder %v3465_v60, 0 }
 0x321   : > { %v3454_v40 = vadd.f32 1.0, %v3453_v23  ;;  %v3461_v63 = vadd.f32 1.0, %v3460_v7  ;;  %v4662_v51 = vsub.s32 %v4658_v5, %v4661_v24  ;;  %v1042_v41 = vsel %vm1028_vm7, %v1039_v39, %v1041_v45 }
 0x322   : > { %v1038_v10 = vsel %vm1028_vm7, %v1035_v19, %v1037_v36  ;;  %vm3470_vm11 = vcmp.eq.s32.totalorder %v3465_v60, 2  ;;  %v1044_v58 = vand.u32 65535, %v7819_v49  ;;  %v1047_v6 = vshrl.u32 %v1042_v41, 16 }
 0x323   : > { %v3462_v33 = vmul.f32 %v3461_v63, %v3446_v52  ;;  %v3471_v0 = vxor.u32 2147483648, %v3454_v40  ;;  %vm4663_vm13 = vcmp.lt.s32.totalorder %v4662_v51, 0  ;;  %v4664_v9 = vsub.s32 0, %v4662_v51 }
 0x324   : > { %v1046_v52 = vand.u32 65535, %v1042_v41  ;;  %v1045_v4 = vshrl.u32 %v7819_v49, 16  ;;  %vm3463_vm12 = vweird.f32 %v7441_v25  ;;  %v1069_v55 = vshrl.u32 %v1038_v10, 16  ;;  %v7838_v25 = vld [vmem:[%s9513_s2] ss:$0 sm:$0xff] }
 0x325   : > { %v3468_v1 = vxor.u32 2147483648, %v3462_v33  ;;  %v3472_v28 = vsel %vm3470_vm11, %v3471_v0, %v3462_v33  ;;  %v4665_v46 = vsel %vm4663_vm13, %v4664_v9, %v4662_v51  ;;  %v1049_v44 = vmul.u32 %v1047_v6, %v1044_v58 }
 0x326   : > { %v4666_v26 = vclz %v4665_v46  ;;  %v1050_v13 = vmul.u32 %v1046_v52, %v1045_v4  ;;  %v1068_v43 = vand.u32 65535, %v1038_v10  ;;  %v4654_v5 = vadd.s32 %v7773_v8, %v7771_v62 }
 0x327   : > { %v3469_v34 = vsel %vm3467_vm9, %v3454_v40, %v3468_v1  ;;  %v1011_v17 = vshrl.u32 %v5839_v12, %v7762_v38  ;;  %v7841_v27 = vadd.f32 %v7838_v25, %v315_v11  ;;  %v1032_v37 = vsel %vm1030_vm6, %v1020_v59, 2102212464 }
 0x328   : > { %v3473_v61 = vsel %vm3466_vm10, %v3469_v34, %v3472_v28  ;;  %v5559_v31 = vadd.s32 4294967294, %v4666_v26  ;;  %v1048_v47 = vmul.u32 %v1046_v52, %v1044_v58  ;;  %v1051_v57 = vmul.u32 %v1047_v6, %v1045_v4 }
 0x329   : > { %v3474_v32 = vsel %vm3463_vm12, nan, %v3473_v61  ;;  %v1052_v56 = vshll.u32 %v1049_v44, 16  ;;  %v1053_v62 = vshrl.u32 %v1049_v44, 16  ;;  %v1054_v8 = vshll.u32 %v1050_v13, 16 }
 0x32a   : > { %5354 = vst [vmem:[%s6323_s27 + $0x98] sm:$0xff] %v3474_v32  ;;  %vm5560_vm14 = vcmp.lt.s32.totalorder %v5559_v31, 0  ;;  %v1071_v53 = vmul.u32 %v1069_v55, %v1044_v58  ;;  %vm4562_vm15 = vcmp.lt.s32.totalorder %v7612_v50, 0  ;;  %v1072_v7 = vmul.u32 %v1068_v43, %v1045_v4 }
 0x32b   : > { %v4669_v38 = vsel %vm5560_vm14, 0, %v5559_v31  ;;  %vm1056_vm0 = vc.u32 %v1048_v47, %v1052_v56  ;;  %v1058_v23 = vadd.s32 %v1052_v56, %v1048_v47  ;;  %v1070_v40 = vmul.u32 %v1068_v43, %v1044_v58 }
 0x32c   : > { %v4670_v60 = vsub.s32 32, %v4669_v38  ;;  %v4674_v54 = vsub.s32 4294967266, %v4669_v38  ;;  %v1057_v15 = vsel %vm1056_vm0, 1, %v5845_v35  ;;  %v1073_v59 = vmul.u32 %v1069_v55, %v1045_v4 }
 0x32d   : > { %v1059_v63 = vadd.s32 %v1057_v15, %v1051_v57  ;;  %vm1060_vm1 = vc.u32 %v1058_v23, %v1054_v8  ;;  %v1074_v24 = vshll.u32 %v1071_v53, 16  ;;  %v4671_v39 = vshll.u32 %v4662_v51, %v4669_v38 }
 0x32e   : > { %v4672_v19 = vshrl.u32 %v4654_v5, %v4670_v60  ;;  %v4675_v36 = vadd.s32 127, %v4674_v54  ;;  %v1061_v45 = vsel %vm1060_vm1, 1, %v5845_v35  ;;  %v1076_v0 = vshll.u32 %v1072_v7, 16 }
 0x32f   : > { %v1063_v33 = vadd.s32 %v1061_v45, %v1059_v63  ;;  %vm1078_vm2 = vc.u32 %v1070_v40, %v1074_v24  ;;  %v1080_v41 = vadd.s32 %v1074_v24, %v1070_v40  ;;  %v4684_v10 = vsub.s32 4, %v7800_v48 }
 0x330   : > { %v4673_v1 = vor.u32 %v4672_v19, %v4671_v39  ;;  %v4676_v9 = vshll.u32 %v4675_v36, 23  ;;  %v1079_v52 = vsel %vm1078_vm2, 1, %v5845_v35  ;;  %v2235_v34 = vand.u32 2147483647, %v7841_v27 }
 0x331   : > { %v1064_v58 = vadd.s32 %v1063_v33, %v1053_v62  ;;  %v1081_v6 = vadd.s32 %v1079_v52, %v1073_v59  ;;  %vm1082_vm4 = vc.u32 %v1080_v41, %v1076_v0  ;;  %v1031_v28 = vsel %vm1027_vm5, %v1011_v17, %v7796_v30 }
 0x332   : > { %v4677_v51 = vor.u32 4788187, %v4676_v9  ;;  %v1055_v46 = vshrl.u32 %v1050_v13, 16  ;;  %v1083_v4 = vsel %vm1082_vm4, 1, %v5845_v35  ;;  %v1033_v11 = vsel %vm1029_vm8, %v7794_v21, %v1032_v37  ;;  %v339_v21 = vpop.f32.mrf.mxu2 }
 0x333   : > { %v1075_v61 = vshrl.u32 %v1071_v53, 16  ;;  %v1085_v26 = vadd.s32 %v1083_v4, %v1081_v6  ;;  %v2238_v55 = vand.u32 2139095040, %v7841_v27  ;;  %v4680_v44 = vcvt.s32.f32 %v4673_v1 }
 0x334   : > { %v4678_v32 = vand.u32 2147483647, %v4677_v51  ;;  %v4685_v43 = vsel %vm4562_vm15, %v4684_v10, %v7800_v48  ;;  %v1065_v5 = vadd.s32 %v1064_v58, %v1055_v46  ;;  %v1077_v31 = vshrl.u32 %v1072_v7, 16 }
 0x335   : > { %v1086_v30 = vadd.s32 %v1085_v26, %v1075_v61  ;;  %v2239_v13 = vshrl.u32 %v2238_v55, 23  ;;  %v2242_v17 = vand.u32 8388607, %v2235_v34  ;;  %v1084_v57 = vadd.s32 %v1080_v41, %v1076_v0 }
 0x336   : > { %v4681_v47 = vmul.f32 %v4680_v44, %v4678_v32  ;;  %vm4561_vm3 = vcmp.le.f32.partialorder %v4560_v22, 0.7853982  ;;  %v1034_v37 = vsel %vm1028_vm7, %v1031_v28, %v1033_v11  ;;  %v7869_v7 = vadd.f32 %v7838_v25, %v339_v21 }
 0x337   : > { %v1087_v56 = vadd.s32 %v1086_v30, %v1077_v31  ;;  %v5513_v62 = vadd.s32 4294967169, %v2239_v13  ;;  %v4687_v48 = vsel %vm4561_vm3, 0, %v4685_v43  ;;  %vm1090_vm5 = vc.u32 %v1065_v5, %v1084_v57 }
 0x338   : > { %v4682_v8 = vxor.u32 2147483648, %v4681_v47  ;;  %v2243_v38 = vor.u32 8388608, %v2242_v17  ;;  %v1088_v54 = vmul.u32 %v7819_v49, %v1034_v37  ;;  %v4704_v2 = vadd.s32 3, %v4687_v48 }
 0x339   : > { %v1091_v53 = vadd.s32 1, %v1087_v56  ;;  %v2245_v23 = vadd.s32 1, %v5513_v62  ;;  %v3478_v19 = vand.u32 2139095040, %v7869_v7  ;;  %v7880_v9 = vadd.s32 %v1084_v57, %v1065_v5 }
 0x33a   : > { %v4683_v60 = vsel %vm4562_vm15, %v4682_v8, %v4681_v47  ;;  %v7875_v39 = vshll.u32 %v2243_v38, 8  ;;  %v7878_v0 = vand.u32 3, %v4704_v2  ;;  %v3475_v6 = vand.u32 2147483647, %v7869_v7 }
 0x33b   : > { %v4686_v22 = vsel %vm4561_vm3, %v7612_v50, %v4683_v60  ;;  %v1092_v15 = vsel %vm1090_vm5, %v1091_v53, %v1087_v56  ;;  %vm2246_vm6 = vcmp.gt.s32.totalorder %v2245_v23, 0  ;;  %v3479_v51 = vshrl.u32 %v3478_v19, 23 }
 0x33c   : > { %v4688_v40 = vmul.f32 %v4686_v22, %v4686_v22  ;;  %v1093_v63 = vadd.s32 %v1092_v15, %v1088_v54  ;;  %v2247_v59 = vsel %vm2246_vm6, %v2245_v23, 0  ;;  %v7884_v58 = vand.u32 65535, %v7875_v39 }
 0x33d   : > { %v2249_v24 = vand.u32 31, %v2247_v59  ;;  %vm997_vm8 = vcmp.lt.s32.totalorder %v7643_v42, 0  ;;  %vm4710_vm7 = vcmp.eq.s32.totalorder %v7878_v0, 2  ;;  %v7896_v31 = vshrl.u32 %v2247_v59, 5 }
 0x33e   : > { %v4689_v36 = vmul.f32 -0.001358992, %v4688_v40  ;;  %v4696_v45 = vmul.f32 -0.00019511016, %v4688_v40  ;;  %v1094_v33 = vadd.s32 536870912, %v1093_v63  ;;  %vm4707_vm10 = vcmp.eq.s32.totalorder %v7878_v0, 0 }
 0x33f   : > { %v2250_v41 = vsub.s32 32, %v2249_v24  ;;  %v2252_v52 = vshll.u32 %v5839_v12, %v2249_v24  ;;  %v2255_v11 = vshll.u32 %v5840_v14, %v2249_v24  ;;  %v2261_v55 = vshll.u32 %v5842_v18, %v2249_v24 }
 0x340   : > { %v4690_v49 = vadd.f32 0.041655596, %v4689_v36  ;;  %v4697_v1 = vadd.f32 0.008332121, %v4696_v45  ;;  %v1095_v10 = vshrl.u32 %v1094_v33, 30  ;;  %v2258_v30 = vshll.u32 %v5841_v16, %v2249_v24 }
 0x341   : > { %v2253_v61 = vshrl.u32 %v5840_v14, %v2250_v41  ;;  %v2256_v26 = vshrl.u32 %v5841_v16, %v2250_v41  ;;  %v2262_v32 = vshrl.u32 %v5843_v20, %v2250_v41  ;;  %v2259_v13 = vshrl.u32 %v5842_v18, %v2250_v41 }
 0x342   : > { %v4691_v28 = vmul.f32 %v4690_v49, %v4688_v40  ;;  %v4698_v46 = vmul.f32 %v4697_v1, %v4688_v40  ;;  %v1096_v4 = vshll.u32 %v1095_v10, 30  ;;  %v2264_v17 = vshll.u32 %v5843_v20, %v2249_v24 }
 0x343   : > { %v2265_v47 = vshrl.u32 %v5844_v29, %v2250_v41  ;;  %vm4706_vm9 = vcmp.lt.s32.totalorder %v7878_v0, 2  ;;  %vm4703_vm11 = vweird.f32 %v7612_v50  ;;  %v1119_v56 = vsub.s32 4, %v1095_v10 }
 0x344   : > { %v4692_v44 = vadd.f32 -0.4999988, %v4691_v28  ;;  %v4699_v43 = vadd.f32 -0.16666654, %v4698_v46  ;;  %v7894_v5 = vsub.s32 %v1093_v63, %v1096_v4  ;;  %v2254_v62 = vor.u32 %v2253_v61, %v2252_v52 }
 0x345   : > { %v2257_v8 = vor.u32 %v2256_v26, %v2255_v11  ;;  %v2263_v48 = vor.u32 %v2262_v32, %v2261_v55  ;;  %vm2267_vm12 = vcmp.lt.s32.totalorder %v7896_v31, 1  ;;  %v2260_v54 = vor.u32 %v2259_v13, %v2258_v30 }
 0x346   : > { %v4693_v57 = vmul.f32 %v4692_v44, %v4688_v40  ;;  %v4700_v21 = vmul.f32 %v4699_v43, %v4688_v40  ;;  %vm1098_vm13 = vcmp.lt.s32.totalorder %v7894_v5, 0  ;;  %v1099_v37 = vsub.s32 0, %v7894_v5 }
 0x347   : > { %vm2270_vm14 = vcmp.lt.s32.totalorder %v7896_v31, 4  ;;  %v2285_v2 = vshrl.u32 %v7875_v39, 16  ;;  %vm7913_vm15 = vcmp.le.f32.partialorder %v995_v3, 0.7853982  ;;  %v2266_v59 = vor.u32 %v2265_v47, %v2264_v17 }
 0x348   : > { %v4694_v53 = vadd.f32 1.0, %v4693_v57  ;;  %v4701_v38 = vadd.f32 1.0, %v4700_v21  ;;  %v1100_v23 = vsel %vm1098_vm13, %v1099_v37, %v7894_v5  ;;  %vm2269_vm0 = vcmp.lt.s32.totalorder %v7896_v31, 3 }
 0x349   : > { %v1101_v60 = vclz %v1100_v23  ;;  %v2251_v19 = vshrl.u32 %v5839_v12, %v2250_v41  ;;  %v2275_v36 = vsel %vm2267_vm12, %v2254_v62, %v2257_v8  ;;  %v5537_v45 = vadd.s32 4294967169, %v3479_v51 }
 0x34a   : > { %v4702_v15 = vmul.f32 %v4701_v38, %v4686_v22  ;;  %v4711_v40 = vxor.u32 2147483648, %v4694_v53  ;;  %v7923_v22 = vsel %vm997_vm8, %v1119_v56, %v1095_v10  ;;  %vm2268_vm1 = vcmp.lt.s32.totalorder %v7896_v31, 2 }
 0x34b   : > { %v5490_v24 = vadd.s32 4294967294, %v1101_v60  ;;  %v2276_v3 = vsel %vm2270_vm14, %v2263_v48, 920167782  ;;  %v2279_v1 = vsel %vm2267_vm12, %v2257_v8, %v2260_v54  ;;  %v2280_v28 = vsel %vm2270_vm14, %v2266_v59, 1326507024 }
 0x34c   : > { %v4708_v33 = vxor.u32 2147483648, %v4702_v15  ;;  %v4712_v49 = vsel %vm4710_vm7, %v4711_v40, %v4702_v15  ;;  %v2277_v41 = vsel %vm2269_vm0, %v2260_v54, %v2276_v3  ;;  %v2272_v61 = vsel %vm2270_vm14, %v2260_v54, 2102212464 }
 0x34d   : > { %vm5491_vm2 = vcmp.lt.s32.totalorder %v5490_v24, 0  ;;  %v2278_v51 = vsel %vm2268_vm1, %v2275_v36, %v2277_v41  ;;  %v2281_v55 = vsel %vm2269_vm0, %v2263_v48, %v2280_v28  ;;  %v3485_v50 = vadd.s32 1, %v5537_v45 }
 0x34e   : > { %v4709_v10 = vsel %vm4707_vm10, %v4694_v53, %v4708_v33  ;;  %v1104_v52 = vsel %vm5491_vm2, 0, %v5490_v24  ;;  %v2308_v32 = vand.u32 65535, %v2278_v51  ;;  %v2309_v44 = vshrl.u32 %v2278_v51, 16 }
 0x34f   : > { %v4713_v46 = vsel %vm4706_vm9, %v4709_v10, %v4712_v49  ;;  %v1105_v4 = vsub.s32 32, %v1104_v52  ;;  %v1109_v11 = vsub.s32 4294967266, %v1104_v52  ;;  %v1106_v43 = vshll.u32 %v7894_v5, %v1104_v52 }
 0x350   : > { %v4714_v26 = vsel %vm4703_vm11, nan, %v4713_v46  ;;  %v2282_v13 = vsel %vm2268_vm1, %v2279_v1, %v2281_v55  ;;  %v2311_v57 = vmul.u32 %v2309_v44, %v7884_v58  ;;  %v1122_v56 = vsel %vm7913_vm15, 0, %v7923_v22 }
 0x351   : > { %5362 = vst [vmem:[%s6323_s27 + $0xd8] sm:$0xff] %v4714_v26  ;;  %v1107_v30 = vshrl.u32 %v7880_v9, %v1105_v4  ;;  %v1110_v0 = vadd.s32 127, %v1109_v11  ;;  %v2286_v17 = vand.u32 65535, %v2282_v13  ;;  %v2287_v47 = vshrl.u32 %v2282_v13, 16 }
 0x352   : > { %v2312_v48 = vmul.u32 %v2308_v32, %v2285_v2  ;;  %v2271_v5 = vsel %vm2267_vm12, %v2251_v19, %v2254_v62  ;;  %v2273_v9 = vsel %vm2269_vm0, %v2257_v8, %v2272_v61  ;;  %v2310_v60 = vmul.u32 %v2308_v32, %v7884_v58 }
 0x353   : > { %v1108_v21 = vor.u32 %v1107_v30, %v1106_v43  ;;  %v1111_v37 = vshll.u32 %v1110_v0, 23  ;;  %v2289_v53 = vmul.u32 %v2287_v47, %v7884_v58  ;;  %v2290_v38 = vmul.u32 %v2286_v17, %v2285_v2 }
 0x354   : > { %v2313_v54 = vmul.u32 %v2309_v44, %v2285_v2  ;;  %v2314_v15 = vshll.u32 %v2311_v57, 16  ;;  %v2288_v59 = vmul.u32 %v2286_v17, %v7884_v58  ;;  %v2291_v24 = vmul.u32 %v2287_v47, %v2285_v2 }
 0x355   : > { %v1112_v23 = vor.u32 4788187, %v1111_v37  ;;  %v1115_v40 = vcvt.s32.f32 %v1108_v21  ;;  %v2292_v36 = vshll.u32 %v2289_v53, 16  ;;  %v2294_v33 = vshll.u32 %v2290_v38, 16 }
 0x356   : > { %v2316_v22 = vshll.u32 %v2312_v48, 16  ;;  %vm2318_vm4 = vc.u32 %v2310_v60, %v2314_v15  ;;  %v2320_v19 = vadd.s32 %v2314_v15, %v2310_v60  ;;  %vm3486_vm5 = vcmp.gt.s32.totalorder %v3485_v50, 0 }
 0x357   : > { %v1113_v45 = vand.u32 2147483647, %v1112_v23  ;;  %vm2296_vm3 = vc.u32 %v2288_v59, %v2292_v36  ;;  %v2298_v62 = vadd.s32 %v2292_v36, %v2288_v59  ;;  %v2319_v8 = vsel %vm2318_vm4, 1, %v5845_v35 }
 0x358   : > { %v2297_v49 = vsel %vm2296_vm3, 1, %v5845_v35  ;;  %v2321_v41 = vadd.s32 %v2319_v8, %v2313_v54  ;;  %v2315_v10 = vshrl.u32 %v2311_v57, 16  ;;  %vm2322_vm7 = vc.u32 %v2320_v19, %v2316_v22 }
 0x359   : > { %v1116_v3 = vmul.f32 %v1115_v40, %v1113_v45  ;;  %v2299_v1 = vadd.s32 %v2297_v49, %v2291_v24  ;;  %vm2300_vm6 = vc.u32 %v2298_v62, %v2294_v33  ;;  %v2323_v52 = vsel %vm2322_vm7, 1, %v5845_v35 }
 0x35a   : > { %v2301_v2 = vsel %vm2300_vm6, 1, %v5845_v35  ;;  %v3487_v51 = vsel %vm3486_vm5, %v3485_v50, 0  ;;  %v2293_v28 = vshrl.u32 %v2289_v53, 16  ;;  %v2325_v4 = vadd.s32 %v2323_v52, %v2321_v41 }
 0x35b   : > { %v1117_v58 = vxor.u32 2147483648, %v1116_v3  ;;  %v2303_v46 = vadd.s32 %v2301_v2, %v2299_v1  ;;  %v3489_v11 = vand.u32 31, %v3487_v51  ;;  %v2274_v26 = vsel %vm2268_vm1, %v2271_v5, %v2273_v9 }
 0x35c   : > { %v2295_v55 = vshrl.u32 %v2290_v38, 16  ;;  %v2317_v32 = vshrl.u32 %v2312_v48, 16  ;;  %v2326_v30 = vadd.s32 %v2325_v4, %v2315_v10  ;;  %v1139_v17 = vadd.s32 3, %v1122_v56 }
 0x35d   : > { %v1118_v61 = vsel %vm997_vm8, %v1117_v58, %v1116_v3  ;;  %v2304_v43 = vadd.s32 %v2303_v46, %v2293_v28  ;;  %v7975_v0 = vsub.s32 32, %v3489_v11  ;;  %v3482_v47 = vand.u32 8388607, %v3475_v6 }
 0x35e   : > { %v1121_v44 = vsel %vm7913_vm15, %v7643_v42, %v1118_v61  ;;  %v7981_v50 = vadd.s32 %v2320_v19, %v2316_v22  ;;  %v2327_v31 = vadd.s32 %v2326_v30, %v2317_v32  ;;  %v2328_v21 = vmul.u32 %v7875_v39, %v2274_v26 }
 0x35f   : > { %v1123_v13 = vmul.f32 %v1121_v44, %v1121_v44  ;;  %v7979_v57 = vadd.s32 %v2304_v43, %v2295_v55  ;;  %v7984_v63 = vshrl.u32 %v3487_v51, 5  ;;  %v3495_v5 = vshll.u32 %v5840_v14, %v3489_v11 }
 0x360   : > { %v2331_v56 = vadd.s32 1, %v2327_v31  ;;  %v3496_v9 = vshrl.u32 %v5841_v16, %v7975_v0  ;;  %v3499_v53 = vshrl.u32 %v5842_v18, %v7975_v0  ;;  %v3493_v39 = vshrl.u32 %v5840_v14, %v7975_v0 }
 0x361   : > { %v1124_v37 = vmul.f32 -0.001358992, %v1123_v13  ;;  %v1131_v48 = vmul.f32 -0.00019511016, %v1123_v13  ;;  %vm2330_vm8 = vc.u32 %v7979_v57, %v7981_v50  ;;  %v3498_v60 = vshll.u32 %v5841_v16, %v3489_v11 }
 0x362   : > { %v2332_v54 = vsel %vm2330_vm8, %v2331_v56, %v2327_v31  ;;  %v3501_v15 = vshll.u32 %v5842_v18, %v3489_v11  ;;  %v3502_v40 = vshrl.u32 %v5843_v20, %v7975_v0  ;;  %v3504_v59 = vshll.u32 %v5843_v20, %v3489_v11  ;;  %v363_v56 = vpop.f32.mrf.mxu3 }
 0x363   : > { %v1125_v38 = vadd.f32 0.041655596, %v1124_v37  ;;  %v1132_v23 = vadd.f32 0.008332121, %v1131_v48  ;;  %v2333_v45 = vadd.s32 %v2332_v54, %v2328_v21  ;;  %v3505_v33 = vshrl.u32 %v5844_v29, %v7975_v0 }
 0x364   : > { %v3492_v22 = vshll.u32 %v5839_v12, %v3489_v11  ;;  %v8003_v62 = vor.u32 %v3496_v9, %v3495_v5  ;;  %v3500_v8 = vor.u32 %v3499_v53, %v3498_v60  ;;  %v3503_v19 = vor.u32 %v3502_v40, %v3501_v15 }
 0x365   : > { %v1126_v24 = vmul.f32 %v1125_v38, %v1123_v13  ;;  %v1133_v36 = vmul.f32 %v1132_v23, %v1123_v13  ;;  %v2334_v41 = vadd.s32 536870912, %v2333_v45  ;;  %v3506_v1 = vor.u32 %v3505_v33, %v3504_v59 }
 0x366   : > { %v1140_v10 = vand.u32 3, %v1139_v17  ;;  %v3483_v58 = vor.u32 8388608, %v3482_v47  ;;  %v8005_v2 = vor.u32 %v3493_v39, %v3492_v22  ;;  %vm3510_vm10 = vcmp.lt.s32.totalorder %v7984_v63, 4 }
 0x367   : > { %v1127_v3 = vadd.f32 -0.4999988, %v1126_v24  ;;  %v1134_v49 = vadd.f32 -0.16666654, %v1133_v36  ;;  %v8007_v28 = vshrl.u32 %v2334_v41, 30  ;;  %vm3507_vm9 = vcmp.lt.s32.totalorder %v7984_v63, 1 }
 0x368   : > { %vm3509_vm13 = vcmp.lt.s32.totalorder %v7984_v63, 3  ;;  %v3516_v46 = vsel %vm3510_vm10, %v3503_v19, 920167782  ;;  %v3520_v4 = vsel %vm3510_vm10, %v3506_v1, 1326507024  ;;  %v3519_v55 = vsel %vm3507_vm9, %v8003_v62, %v3500_v8 }
 0x369   : > { %v1128_v52 = vmul.f32 %v1127_v3, %v1123_v13  ;;  %v1135_v51 = vmul.f32 %v1134_v49, %v1123_v13  ;;  %v2336_v26 = vshll.u32 %v8007_v28, 30  ;;  %v3515_v32 = vsel %vm3507_vm9, %v8005_v2, %v8003_v62 }
 0x36a   : > { %v3517_v43 = vsel %vm3509_vm13, %v3500_v8, %v3516_v46  ;;  %v3521_v30 = vsel %vm3509_vm13, %v3503_v19, %v3520_v4  ;;  %v8028_v13 = vshll.u32 %v3483_v58, 8  ;;  %vm3508_vm11 = vcmp.lt.s32.totalorder %v7984_v63, 2 }
 0x36b   : > { %v1129_v11 = vadd.f32 1.0, %v1128_v52  ;;  %v1136_v61 = vadd.f32 1.0, %v1135_v51  ;;  %v2337_v31 = vsub.s32 %v2333_v45, %v2336_v26  ;;  %vm1138_vm12 = vweird.f32 %v7643_v42 }
 0x36c   : > { %vm1141_vm14 = vcmp.lt.s32.totalorder %v1140_v10, 2  ;;  %vm1142_vm15 = vcmp.eq.s32.totalorder %v1140_v10, 0  ;;  %v3522_v21 = vsel %vm3508_vm11, %v3519_v55, %v3521_v30  ;;  %v3518_v5 = vsel %vm3508_vm11, %v3515_v32, %v3517_v43 }
 0x36d   : > { %v1137_v17 = vmul.f32 %v1136_v61, %v1121_v44  ;;  %v1146_v47 = vxor.u32 2147483648, %v1129_v11  ;;  %vm2338_vm0 = vcmp.lt.s32.totalorder %v2337_v31, 0  ;;  %v2339_v48 = vsub.s32 0, %v2337_v31 }
 0x36e   : > { %vm1145_vm1 = vcmp.eq.s32.totalorder %v1140_v10, 2  ;;  %v3524_v44 = vand.u32 65535, %v8028_v13  ;;  %v3526_v9 = vand.u32 65535, %v3522_v21  ;;  %v3527_v53 = vshrl.u32 %v3522_v21, 16 }
 0x36f   : > { %v1143_v37 = vxor.u32 2147483648, %v1137_v17  ;;  %v1147_v23 = vsel %vm1145_vm1, %v1146_v47, %v1137_v17  ;;  %v2340_v39 = vsel %vm2338_vm0, %v2339_v48, %v2337_v31  ;;  %v3525_v60 = vshrl.u32 %v8028_v13, 16 }
 0x370   : > { %v2341_v15 = vclz %v2340_v39  ;;  %v3549_v40 = vshrl.u32 %v3518_v5, 16  ;;  %v8040_v59 = vadd.f32 %v7838_v25, %v363_v56  ;;  %v3529_v36 = vmul.u32 %v3527_v53, %v3524_v44 }
 0x371   : > { %v1144_v38 = vsel %vm1142_vm15, %v1129_v11, %v1143_v37  ;;  %v3530_v45 = vmul.u32 %v3526_v9, %v3525_v60  ;;  %v3548_v33 = vand.u32 65535, %v3518_v5  ;;  %v2329_v22 = vadd.s32 %v7981_v50, %v7979_v57 }
 0x372   : > { %v1148_v54 = vsel %vm1141_vm14, %v1144_v38, %v1147_v23  ;;  %v5514_v19 = vadd.s32 4294967294, %v2341_v15  ;;  %v3491_v3 = vshrl.u32 %v5839_v12, %v7975_v0  ;;  %v3512_v49 = vsel %vm3510_vm10, %v3500_v8, 2102212464 }
 0x373   : > { %v1149_v24 = vsel %vm1138_vm12, nan, %v1148_v54  ;;  %v2359_v41 = vsub.s32 4, %v8007_v28  ;;  %v3528_v1 = vmul.u32 %v3526_v9, %v3524_v44  ;;  %v3531_v10 = vmul.u32 %v3527_v53, %v3525_v60  ;;  %v294_v54 = vpop.f32.mrf.mxu0 }
 0x374   : > { %5339 = vst [vmem:[%s6323_s27 + $0x20] sm:$0xff] %v1149_v24  ;;  %v3532_v42 = vshll.u32 %v3529_v36, 16  ;;  %vm2237_vm2 = vcmp.lt.s32.totalorder %v7841_v27, 0  ;;  %vm5515_vm4 = vcmp.lt.s32.totalorder %v5514_v19, 0  ;;  %v3533_v58 = vshrl.u32 %v3529_v36, 16 }
 0x375   : > { %v3534_v52 = vshll.u32 %v3530_v45, 16  ;;  %v3551_v51 = vmul.u32 %v3549_v40, %v3524_v44  ;;  %v2344_v46 = vsel %vm5515_vm4, 0, %v5514_v19  ;;  %v3552_v50 = vmul.u32 %v3548_v33, %v3525_v60 }
 0x376   : > { %vm3536_vm3 = vc.u32 %v3528_v1, %v3532_v42  ;;  %v3538_v57 = vadd.s32 %v3532_v42, %v3528_v1  ;;  %v2345_v4 = vsub.s32 32, %v2344_v46  ;;  %v2349_v0 = vsub.s32 4294967266, %v2344_v46 }
 0x377   : > { %v3537_v11 = vsel %vm3536_vm3, 1, %v5845_v35  ;;  %v3550_v8 = vmul.u32 %v3548_v33, %v3524_v44  ;;  %v3553_v26 = vmul.u32 %v3549_v40, %v3525_v60  ;;  %v3554_v55 = vshll.u32 %v3551_v51, 16 }
 0x378   : > { %v3539_v61 = vadd.s32 %v3537_v11, %v3531_v10  ;;  %vm3540_vm5 = vc.u32 %v3538_v57, %v3534_v52  ;;  %v2346_v32 = vshll.u32 %v2337_v31, %v2344_v46  ;;  %v2347_v43 = vshrl.u32 %v2329_v22, %v2345_v4 }
 0x379   : > { %v2350_v30 = vadd.s32 127, %v2349_v0  ;;  %v3541_v17 = vsel %vm3540_vm5, 1, %v5845_v35  ;;  %v3556_v21 = vshll.u32 %v3552_v50, 16  ;;  %vm3558_vm6 = vc.u32 %v3550_v8, %v3554_v55 }
 0x37a   : > { %v3543_v47 = vadd.s32 %v3541_v17, %v3539_v61  ;;  %v3560_v37 = vadd.s32 %v3554_v55, %v3550_v8  ;;  %v2348_v48 = vor.u32 %v2347_v43, %v2346_v32  ;;  %v3511_v56 = vsel %vm3507_vm9, %v3491_v3, %v8005_v2 }
 0x37b   : > { %v2351_v5 = vshll.u32 %v2350_v30, 23  ;;  %v3559_v44 = vsel %vm3558_vm6, 1, %v5845_v35  ;;  %v4715_v31 = vand.u32 2147483647, %v8040_v59  ;;  %v3513_v23 = vsel %vm3509_vm13, %v8003_v62, %v3512_v49 }
 0x37c   : > { %v3544_v9 = vadd.s32 %v3543_v47, %v3533_v58  ;;  %v3561_v53 = vadd.s32 %v3559_v44, %v3553_v26  ;;  %vm3562_vm7 = vc.u32 %v3560_v37, %v3556_v21  ;;  %v3535_v39 = vshrl.u32 %v3530_v45, 16 }
 0x37d   : > { %v2352_v38 = vor.u32 4788187, %v2351_v5  ;;  %v3563_v60 = vsel %vm3562_vm7, 1, %v5845_v35  ;;  %v2360_v2 = vsel %vm2237_vm2, %v2359_v41, %v8007_v28  ;;  %v3555_v15 = vshrl.u32 %v3551_v51, 16 }
 0x37e   : > { %v3565_v40 = vadd.s32 %v3563_v60, %v3561_v53  ;;  %v4718_v24 = vand.u32 2139095040, %v8040_v59  ;;  %v2355_v33 = vcvt.s32.f32 %v2348_v48  ;;  %v3545_v22 = vadd.s32 %v3544_v9, %v3535_v39 }
 0x37f   : > { %v2353_v36 = vand.u32 2147483647, %v2352_v38  ;;  %v3557_v19 = vshrl.u32 %v3552_v50, 16  ;;  %v4722_v62 = vand.u32 8388607, %v4715_v31  ;;  %v8071_v45 = vadd.f32 %v7838_v25, %v294_v54 }
 0x380   : > { %v3566_v3 = vadd.s32 %v3565_v40, %v3555_v15  ;;  %v4719_v1 = vshrl.u32 %v4718_v24, 23  ;;  %v3564_v10 = vadd.s32 %v3560_v37, %v3556_v21  ;;  %vm8075_vm8 = vcmp.le.f32.partialorder %v2235_v34, 0.7853982 }
 0x381   : > { %v2356_v49 = vmul.f32 %v2355_v33, %v2353_v36  ;;  %v3514_v41 = vsel %vm3508_vm11, %v3511_v56, %v3513_v23  ;;  %v2362_v51 = vsel %vm8075_vm8, 0, %v2360_v2  ;;  %v4723_v46 = vor.u32 8388608, %v4722_v62 }
 0x382   : > { %v3567_v42 = vadd.s32 %v3566_v3, %v3557_v19  ;;  %v5561_v58 = vadd.s32 4294967169, %v4719_v1  ;;  %vm3570_vm10 = vc.u32 %v3545_v22, %v3564_v10  ;;  %v1153_v50 = vand.u32 2139095040, %v8071_v45 }
 0x383   : > { %v2357_v52 = vxor.u32 2147483648, %v2356_v49  ;;  %v3568_v4 = vmul.u32 %v8028_v13, %v3514_v41  ;;  %v2379_v8 = vadd.s32 3, %v2362_v51  ;;  %v8090_v32 = vshll.u32 %v4723_v46, 8 }
 0x384   : > { %v3571_v25 = vadd.s32 1, %v3567_v42  ;;  %v4725_v57 = vadd.s32 1, %v5561_v58  ;;  %v1154_v43 = vshrl.u32 %v1153_v50, 23  ;;  %v8096_v56 = vadd.s32 %v3564_v10, %v3545_v22 }
 0x385   : > { %v2358_v34 = vsel %vm2237_vm2, %v2357_v52, %v2356_v49  ;;  %v8092_v48 = vand.u32 3, %v2379_v8  ;;  %v8099_v44 = vand.u32 65535, %v8090_v32  ;;  %v8102_v9 = vshrl.u32 %v8090_v32, 16 }
 0x386   : > { %v2361_v63 = vsel %vm8075_vm8, %v7841_v27, %v2358_v34  ;;  %v3572_v0 = vsel %vm3570_vm10, %v3571_v25, %v3567_v42  ;;  %vm4726_vm9 = vcmp.gt.s32.totalorder %v4725_v57, 0  ;;  %v8104_v53 = vadd.s32 4294967169, %v1154_v43 }
 0x387   : > { %v2363_v11 = vmul.f32 %v2361_v63, %v2361_v63  ;;  %v3573_v61 = vadd.s32 %v3572_v0, %v3568_v4  ;;  %v4727_v26 = vsel %vm4726_vm9, %v4725_v57, 0  ;;  %vm2385_vm13 = vcmp.eq.s32.totalorder %v8092_v48, 2 }
 0x388   : > { %v4729_v55 = vand.u32 31, %v4727_v26  ;;  %v8107_v60 = vshrl.u32 %v4727_v26, 5  ;;  %vm2382_vm11 = vcmp.eq.s32.totalorder %v8092_v48, 0  ;;  %vm2381_vm12 = vcmp.lt.s32.totalorder %v8092_v48, 2 }
 0x389   : > { %v2364_v30 = vmul.f32 -0.001358992, %v2363_v11  ;;  %v2371_v17 = vmul.f32 -0.00019511016, %v2363_v11  ;;  %v3574_v47 = vadd.s32 536870912, %v3573_v61  ;;  %vm2378_vm15 = vweird.f32 %v7841_v27 }
 0x38a   : > { %v4730_v21 = vsub.s32 32, %v4729_v55  ;;  %v4732_v54 = vshll.u32 %v5839_v12, %v4729_v55  ;;  %v4735_v19 = vshll.u32 %v5840_v14, %v4729_v55  ;;  %v4738_v3 = vshll.u32 %v5841_v16, %v4729_v55 }
 0x38b   : > { %v2365_v37 = vadd.f32 0.041655596, %v2364_v30  ;;  %v2372_v13 = vadd.f32 0.008332121, %v2371_v17  ;;  %v8094_v5 = vshrl.u32 %v3574_v47, 30  ;;  %v4741_v1 = vshll.u32 %v5842_v18, %v4729_v55 }
 0x38c   : > { %v4733_v2 = vshrl.u32 %v5840_v14, %v4730_v21  ;;  %v4736_v15 = vshrl.u32 %v5841_v16, %v4730_v21  ;;  %v4739_v40 = vshrl.u32 %v5842_v18, %v4730_v21  ;;  %v4742_v22 = vshrl.u32 %v5843_v20, %v4730_v21 }
 0x38d   : > { %v2366_v38 = vmul.f32 %v2365_v37, %v2363_v11  ;;  %v2373_v23 = vmul.f32 %v2372_v13, %v2363_v11  ;;  %v3576_v39 = vshll.u32 %v8094_v5, 30  ;;  %v4745_v62 = vshrl.u32 %v5844_v29, %v4730_v21 }
 0x38e   : > { %v4734_v41 = vor.u32 %v4733_v2, %v4732_v54  ;;  %v4737_v42 = vor.u32 %v4736_v15, %v4735_v19  ;;  %v4740_v58 = vor.u32 %v4739_v40, %v4738_v3  ;;  %v4744_v52 = vshll.u32 %v5843_v20, %v4729_v55 }
 0x38f   : > { %v2367_v24 = vadd.f32 -0.4999988, %v2366_v38  ;;  %v2374_v36 = vadd.f32 -0.16666654, %v2373_v23  ;;  %v8114_v33 = vsub.s32 %v3573_v61, %v3576_v39  ;;  %v4743_v57 = vor.u32 %v4742_v22, %v4741_v1 }
 0x390   : > { %v3599_v34 = vsub.s32 4, %v8094_v5  ;;  %v4731_v4 = vshrl.u32 %v5839_v12, %v4730_v21  ;;  %v4746_v0 = vor.u32 %v4745_v62, %v4744_v52  ;;  %vm4747_vm0 = vcmp.lt.s32.totalorder %v8107_v60, 1 }
 0x391   : > { %v2368_v49 = vmul.f32 %v2367_v24, %v2363_v11  ;;  %v2375_v10 = vmul.f32 %v2374_v36, %v2363_v11  ;;  %vm3578_vm14 = vcmp.lt.s32.totalorder %v8114_v33, 0  ;;  %v3579_v28 = vsub.s32 0, %v8114_v33 }
 0x392   : > { %vm4748_vm1 = vcmp.lt.s32.totalorder %v8107_v60, 2  ;;  %vm3477_vm2 = vcmp.lt.s32.totalorder %v7869_v7, 0  ;;  %vm4749_vm4 = vcmp.lt.s32.totalorder %v8107_v60, 3  ;;  %vm4750_vm3 = vcmp.lt.s32.totalorder %v8107_v60, 4 }
 0x393   : > { %v2369_v51 = vadd.f32 1.0, %v2368_v49  ;;  %v2376_v25 = vadd.f32 1.0, %v2375_v10  ;;  %v3580_v46 = vsel %vm3578_vm14, %v3579_v28, %v8114_v33  ;;  %v4755_v26 = vsel %vm4747_vm0, %v4734_v41, %v4737_v42 }
 0x394   : > { %v3581_v50 = vclz %v3580_v46  ;;  %v4751_v43 = vsel %vm4747_vm0, %v4731_v4, %v4734_v41  ;;  %v4752_v30 = vsel %vm4750_vm3, %v4740_v58, 2102212464  ;;  %v4756_v17 = vsel %vm4750_vm3, %v4743_v57, 920167782 }
 0x395   : > { %v2377_v11 = vmul.f32 %v2376_v25, %v2361_v63  ;;  %v2386_v8 = vxor.u32 2147483648, %v2369_v51  ;;  %v4757_v47 = vsel %vm4749_vm4, %v4740_v58, %v4756_v17  ;;  %v4759_v21 = vsel %vm4747_vm0, %v4737_v42, %v4740_v58 }
 0x396   : > { %v5538_v61 = vadd.s32 4294967294, %v3581_v50  ;;  %v4758_v38 = vsel %vm4748_vm1, %v4755_v26, %v4757_v47  ;;  %v4760_v23 = vsel %vm4750_vm3, %v4746_v0, 1326507024  ;;  %v4753_v15 = vsel %vm4749_vm4, %v4737_v42, %v4752_v30 }
 0x397   : > { %v2383_v55 = vxor.u32 2147483648, %v2377_v11  ;;  %v2387_v63 = vsel %vm2385_vm13, %v2386_v8, %v2377_v11  ;;  %v4761_v24 = vsel %vm4749_vm4, %v4743_v57, %v4760_v23  ;;  %v4788_v36 = vand.u32 65535, %v4758_v38 }
 0x398   : > { %vm5539_vm5 = vcmp.lt.s32.totalorder %v5538_v61, 0  ;;  %v4789_v22 = vshrl.u32 %v4758_v38, 16  ;;  %v4762_v1 = vsel %vm4748_vm1, %v4759_v21, %v4761_v24  ;;  %v1150_v27 = vand.u32 2147483647, %v8071_v45 }
 0x399   : > { %v2384_v37 = vsel %vm2382_vm11, %v2369_v51, %v2383_v55  ;;  %v3584_v13 = vsel %vm5539_vm5, 0, %v5538_v61  ;;  %v4766_v62 = vand.u32 65535, %v4762_v1  ;;  %v4767_v49 = vshrl.u32 %v4762_v1, 16 }
 0x39a   : > { %v2388_v39 = vsel %vm2381_vm12, %v2384_v37, %v2387_v63  ;;  %v3585_v54 = vsub.s32 32, %v3584_v13  ;;  %v3589_v2 = vsub.s32 4294967266, %v3584_v13  ;;  %v3586_v19 = vshll.u32 %v8114_v33, %v3584_v13 }
 0x39b   : > { %v2389_v40 = vsel %vm2378_vm15, nan, %v2388_v39  ;;  %v4791_v10 = vmul.u32 %v4789_v22, %v8099_v44  ;;  %v4792_v42 = vmul.u32 %v4788_v36, %v8102_v9  ;;  %v1160_v58 = vadd.s32 1, %v8104_v53 }
 0x39c   : > { %5347 = vst [vmem:[%s6323_s27 + $0x60] sm:$0xff] %v2389_v40  ;;  %v3587_v3 = vshrl.u32 %v8096_v56, %v3585_v54  ;;  %v3590_v48 = vadd.s32 127, %v3589_v2  ;;  %v8163_v56 = vsel %vm3477_vm2, %v3599_v34, %v8094_v5  ;;  %v8167_v33 = vsel %vm4748_vm1, %v4751_v43, %v4753_v15 }
 0x39d   : > { %v4769_v52 = vmul.u32 %v4767_v49, %v8099_v44  ;;  %v4770_v51 = vmul.u32 %v4766_v62, %v8102_v9  ;;  %v4790_v46 = vmul.u32 %v4788_v36, %v8099_v44  ;;  %v4793_v57 = vmul.u32 %v4789_v22, %v8102_v9 }
 0x39e   : > { %v3588_v28 = vor.u32 %v3587_v3, %v3586_v19  ;;  %v3591_v41 = vshll.u32 %v3590_v48, 23  ;;  %v4794_v50 = vshll.u32 %v4791_v10, 16  ;;  %v4768_v4 = vmul.u32 %v4766_v62, %v8099_v44 }
 0x39f   : > { %v4771_v5 = vmul.u32 %v4767_v49, %v8102_v9  ;;  %v4772_v34 = vshll.u32 %v4769_v52, 16  ;;  %v4774_v60 = vshll.u32 %v4770_v51, 16  ;;  %v4796_v11 = vshll.u32 %v4792_v42, 16 }
 0x3a0   : > { %v3592_v25 = vor.u32 4788187, %v3591_v41  ;;  %v3595_v53 = vcvt.s32.f32 %v3588_v28  ;;  %vm4798_vm6 = vc.u32 %v4790_v46, %v4794_v50  ;;  %v4800_v26 = vadd.s32 %v4794_v50, %v4790_v46 }
 0x3a1   : > { %vm4776_vm7 = vc.u32 %v4768_v4, %v4772_v34  ;;  %v4778_v8 = vadd.s32 %v4772_v34, %v4768_v4  ;;  %v4799_v61 = vsel %vm4798_vm6, 1, %v5845_v35  ;;  %vm1161_vm8 = vcmp.gt.s32.totalorder %v1160_v58, 0 }
 0x3a2   : > { %v3593_v0 = vand.u32 2147483647, %v3592_v25  ;;  %v4777_v43 = vsel %vm4776_vm7, 1, %v5845_v35  ;;  %v4801_v30 = vadd.s32 %v4799_v61, %v4793_v57  ;;  %v4795_v44 = vshrl.u32 %v4791_v10, 16 }
 0x3a3   : > { %v4779_v17 = vadd.s32 %v4777_v43, %v4771_v5  ;;  %vm4780_vm10 = vc.u32 %v4778_v8, %v4774_v60  ;;  %vm4802_vm9 = vc.u32 %v4800_v26, %v4796_v11  ;;  %v1162_v21 = vsel %vm1161_vm8, %v1160_v58, 0 }
 0x3a4   : > { %v3596_v55 = vmul.f32 %v3595_v53, %v3593_v0  ;;  %v4781_v63 = vsel %vm4780_vm10, 1, %v5845_v35  ;;  %v4803_v47 = vsel %vm4802_vm9, 1, %v5845_v35  ;;  %v4773_v37 = vshrl.u32 %v4769_v52, 16 }
 0x3a5   : > { %v4783_v13 = vadd.s32 %v4781_v63, %v4779_v17  ;;  %v4805_v38 = vadd.s32 %v4803_v47, %v4801_v30  ;;  %v1164_v23 = vand.u32 31, %v1162_v21  ;;  %vm8181_vm13 = vcmp.le.f32.partialorder %v3475_v6, 0.7853982 }
 0x3a6   : > { %v3597_v9 = vxor.u32 2147483648, %v3596_v55  ;;  %v4775_v2 = vshrl.u32 %v4770_v51, 16  ;;  %v4797_v15 = vshrl.u32 %v4792_v42, 16  ;;  %v3602_v6 = vsel %vm8181_vm13, 0, %v8163_v56 }
 0x3a7   : > { %v4784_v24 = vadd.s32 %v4783_v13, %v4773_v37  ;;  %v4806_v36 = vadd.s32 %v4805_v38, %v4795_v44  ;;  %v8190_v22 = vsub.s32 32, %v1164_v23  ;;  %v4808_v3 = vmul.u32 %v8090_v32, %v8167_v33 }
 0x3a8   : > { %v3598_v54 = vsel %vm3477_vm2, %v3597_v9, %v3596_v55  ;;  %v1157_v48 = vand.u32 8388607, %v1150_v27  ;;  %v8201_v62 = vadd.s32 %v4800_v26, %v4796_v11  ;;  %v8203_v10 = vshrl.u32 %v1162_v21, 5 }
 0x3a9   : > { %v3601_v40 = vsel %vm8181_vm13, %v7869_v7, %v3598_v54  ;;  %v8199_v1 = vadd.s32 %v4784_v24, %v4775_v2  ;;  %v4807_v49 = vadd.s32 %v4806_v36, %v4797_v15  ;;  %v1170_v42 = vshll.u32 %v5840_v14, %v1164_v23 }
 0x3aa   : > { %v3603_v19 = vmul.f32 %v3601_v40, %v3601_v40  ;;  %v1173_v58 = vshll.u32 %v5841_v16, %v1164_v23  ;;  %v1171_v56 = vshrl.u32 %v5841_v16, %v8190_v22  ;;  %v1174_v33 = vshrl.u32 %v5842_v18, %v8190_v22 }
 0x3ab   : > { %vm4810_vm11 = vc.u32 %v8199_v1, %v8201_v62  ;;  %v4811_v32 = vadd.s32 1, %v4807_v49  ;;  %v1167_v25 = vshll.u32 %v5839_v12, %v1164_v23  ;;  %v1168_v46 = vshrl.u32 %v5840_v14, %v8190_v22 }
 0x3ac   : > { %v3604_v28 = vmul.f32 -0.001358992, %v3603_v19  ;;  %v3611_v41 = vmul.f32 -0.00019511016, %v3603_v19  ;;  %v1176_v50 = vshll.u32 %v5842_v18, %v1164_v23  ;;  %v1177_v53 = vshrl.u32 %v5843_v20, %v8190_v22 }
 0x3ad   : > { %v4812_v57 = vsel %vm4810_vm11, %v4811_v32, %v4807_v49  ;;  %v1179_v4 = vshll.u32 %v5843_v20, %v1164_v23  ;;  %v1180_v60 = vshrl.u32 %v5844_v29, %v8190_v22  ;;  %v3619_v11 = vadd.s32 3, %v3602_v6 }
 0x3ae   : > { %v3605_v52 = vadd.f32 0.041655596, %v3604_v28  ;;  %v3612_v51 = vadd.f32 0.008332121, %v3611_v41  ;;  %v4813_v0 = vadd.s32 %v4812_v57, %v4808_v3  ;;  %v8222_v8 = vor.u32 %v1171_v56, %v1170_v42 }
 0x3af   : > { %v1175_v61 = vor.u32 %v1174_v33, %v1173_v58  ;;  %v1178_v26 = vor.u32 %v1177_v53, %v1176_v50  ;;  %v1181_v17 = vor.u32 %v1180_v60, %v1179_v4  ;;  %v1158_v44 = vor.u32 8388608, %v1157_v48 }
 0x3b0   : > { %v3606_v5 = vmul.f32 %v3605_v52, %v3603_v19  ;;  %v3613_v34 = vmul.f32 %v3612_v51, %v3603_v19  ;;  %v4814_v30 = vadd.s32 536870912, %v4813_v0  ;;  %v8224_v9 = vor.u32 %v1168_v46, %v1167_v25  ;;  %v318_v25 = vpop.f32.mrf.mxu1 }
 0x3b1   : > { %vm1182_vm12 = vcmp.lt.s32.totalorder %v8203_v10, 1  ;;  %vm1185_vm14 = vcmp.lt.s32.totalorder %v8203_v10, 4  ;;  %vm1184_vm15 = vcmp.lt.s32.totalorder %v8203_v10, 3  ;;  %v3620_v37 = vand.u32 3, %v3619_v11 }
 0x3b2   : > { %v3607_v55 = vadd.f32 -0.4999988, %v3606_v5  ;;  %v3614_v43 = vadd.f32 -0.16666654, %v3613_v34  ;;  %v8228_v21 = vshrl.u32 %v4814_v30, 30  ;;  %v1194_v2 = vsel %vm1182_vm12, %v8222_v8, %v1175_v61 }
 0x3b3   : > { %v1191_v13 = vsel %vm1185_vm14, %v1178_v26, 920167782  ;;  %v1195_v38 = vsel %vm1185_vm14, %v1181_v17, 1326507024  ;;  %v1190_v15 = vsel %vm1182_vm12, %v8224_v9, %v8222_v8  ;;  %v8247_v6 = vshll.u32 %v1158_v44, 8 }
 0x3b4   : > { %v3608_v63 = vmul.f32 %v3607_v55, %v3603_v19  ;;  %v3615_v47 = vmul.f32 %v3614_v43, %v3603_v19  ;;  %v4816_v54 = vshll.u32 %v8228_v21, 30  ;;  %v1192_v24 = vsel %vm1184_vm15, %v1175_v61, %v1191_v13 }
 0x3b5   : > { %v1196_v36 = vsel %vm1184_vm15, %v1178_v26, %v1195_v38  ;;  %vm1183_vm0 = vcmp.lt.s32.totalorder %v8203_v10, 2  ;;  %vm3621_vm1 = vcmp.lt.s32.totalorder %v3620_v37, 2  ;;  %vm3622_vm2 = vcmp.eq.s32.totalorder %v3620_v37, 0 }
 0x3b6   : > { %v3609_v23 = vadd.f32 1.0, %v3608_v63  ;;  %v3616_v39 = vadd.f32 1.0, %v3615_v47  ;;  %v4817_v48 = vsub.s32 %v4813_v0, %v4816_v54  ;;  %v1197_v49 = vsel %vm1183_vm0, %v1194_v2, %v1196_v36 }
 0x3b7   : > { %v1193_v42 = vsel %vm1183_vm0, %v1190_v15, %v1192_v24  ;;  %vm3625_vm3 = vcmp.eq.s32.totalorder %v3620_v37, 2  ;;  %v1199_v58 = vand.u32 65535, %v8247_v6  ;;  %v1202_v32 = vshrl.u32 %v1197_v49, 16 }
 0x3b8   : > { %v3617_v19 = vmul.f32 %v3616_v39, %v3601_v40  ;;  %v3626_v3 = vxor.u32 2147483648, %v3609_v23  ;;  %vm4818_vm4 = vcmp.lt.s32.totalorder %v4817_v48, 0  ;;  %v4819_v41 = vsub.s32 0, %v4817_v48 }
 0x3b9   : > { %v1201_v40 = vand.u32 65535, %v1197_v49  ;;  %v1200_v51 = vshrl.u32 %v8247_v6, 16  ;;  %vm3618_vm5 = vweird.f32 %v7869_v7  ;;  %v1224_v50 = vshrl.u32 %v1193_v42, 16  ;;  %v8266_v7 = vld [vmem:[%s9513_s2] ss:$0 sm:$0xff] }
 0x3ba   : > { %v3623_v28 = vxor.u32 2147483648, %v3617_v19  ;;  %v3627_v33 = vsel %vm3625_vm3, %v3626_v3, %v3617_v19  ;;  %v4820_v52 = vsel %vm4818_vm4, %v4819_v41, %v4817_v48  ;;  %v1204_v4 = vmul.u32 %v1202_v32, %v1199_v58 }
 0x3bb   : > { %v4821_v57 = vclz %v4820_v52  ;;  %v1205_v5 = vmul.u32 %v1201_v40, %v1200_v51  ;;  %v1223_v34 = vand.u32 65535, %v1193_v42  ;;  %v4809_v0 = vadd.s32 %v8201_v62, %v8199_v1 }
 0x3bc   : > { %v3624_v56 = vsel %vm3622_vm2, %v3609_v23, %v3623_v28  ;;  %v1166_v11 = vshrl.u32 %v5839_v12, %v8190_v22  ;;  %v8269_v26 = vadd.f32 %v8266_v7, %v318_v25  ;;  %v1187_v55 = vsel %vm1185_vm14, %v1175_v61, 2102212464 }
 0x3bd   : > { %v3628_v46 = vsel %vm3621_vm1, %v3624_v56, %v3627_v33  ;;  %v5562_v60 = vadd.s32 4294967294, %v4821_v57  ;;  %v1203_v43 = vmul.u32 %v1201_v40, %v1199_v58  ;;  %v1206_v30 = vmul.u32 %v1202_v32, %v1200_v51 }
 0x3be   : > { %v3629_v53 = vsel %vm3618_vm5, nan, %v3628_v46  ;;  %v1207_v17 = vshll.u32 %v1204_v4, 16  ;;  %v1208_v1 = vshrl.u32 %v1204_v4, 16  ;;  %v1209_v62 = vshll.u32 %v1205_v5, 16 }
 0x3bf   : > { %5355 = vst [vmem:[%s6323_s27 + $0xa0] sm:$0xff] %v3629_v53  ;;  %vm5563_vm6 = vcmp.lt.s32.totalorder %v5562_v60, 0  ;;  %v1226_v44 = vmul.u32 %v1224_v50, %v1199_v58  ;;  %vm4717_vm7 = vcmp.lt.s32.totalorder %v8040_v59, 0  ;;  %v1227_v47 = vmul.u32 %v1223_v34, %v1200_v51 }
 0x3c0   : > { %v4824_v22 = vsel %vm5563_vm6, 0, %v5562_v60  ;;  %vm1211_vm8 = vc.u32 %v1203_v43, %v1207_v17  ;;  %v1213_v63 = vadd.s32 %v1207_v17, %v1203_v43  ;;  %v1225_v23 = vmul.u32 %v1223_v34, %v1199_v58 }
 0x3c1   : > { %v4825_v37 = vsub.s32 32, %v4824_v22  ;;  %v4829_v13 = vsub.s32 4294967266, %v4824_v22  ;;  %v1212_v38 = vsel %vm1211_vm8, 1, %v5845_v35  ;;  %v1228_v61 = vmul.u32 %v1224_v50, %v1200_v51 }
 0x3c2   : > { %v1214_v39 = vadd.s32 %v1212_v38, %v1206_v30  ;;  %vm1215_vm10 = vc.u32 %v1213_v63, %v1209_v62  ;;  %v1229_v54 = vshll.u32 %v1226_v44, 16  ;;  %v4826_v2 = vshll.u32 %v4817_v48, %v4824_v22 }
 0x3c3   : > { %v4827_v15 = vshrl.u32 %v4809_v0, %v4825_v37  ;;  %v4830_v24 = vadd.s32 127, %v4829_v13  ;;  %v1216_v36 = vsel %vm1215_vm10, 1, %v5845_v35  ;;  %v1231_v3 = vshll.u32 %v1227_v47, 16 }
 0x3c4   : > { %v1218_v19 = vadd.s32 %v1216_v36, %v1214_v39  ;;  %vm1233_vm9 = vc.u32 %v1225_v23, %v1229_v54  ;;  %v1235_v49 = vadd.s32 %v1229_v54, %v1225_v23  ;;  %v4839_v42 = vsub.s32 4, %v8228_v21 }
 0x3c5   : > { %v4828_v28 = vor.u32 %v4827_v15, %v4826_v2  ;;  %v4831_v41 = vshll.u32 %v4830_v24, 23  ;;  %v1234_v40 = vsel %vm1233_vm9, 1, %v5845_v35  ;;  %v2390_v56 = vand.u32 2147483647, %v8269_v26 }
 0x3c6   : > { %v1219_v58 = vadd.s32 %v1218_v19, %v1208_v1  ;;  %v1236_v32 = vadd.s32 %v1234_v40, %v1228_v61  ;;  %vm1237_vm13 = vc.u32 %v1235_v49, %v1231_v3  ;;  %v1186_v33 = vsel %vm1182_vm12, %v1166_v11, %v8224_v9 }
 0x3c7   : > { %v4832_v48 = vor.u32 4788187, %v4831_v41  ;;  %v1210_v52 = vshrl.u32 %v1205_v5, 16  ;;  %v1238_v51 = vsel %vm1237_vm13, 1, %v5845_v35  ;;  %v1188_v25 = vsel %vm1184_vm15, %v8222_v8, %v1187_v55  ;;  %v342_v8 = vpop.f32.mrf.mxu2 }
 0x3c8   : > { %v1230_v46 = vshrl.u32 %v1226_v44, 16  ;;  %v1240_v57 = vadd.s32 %v1238_v51, %v1236_v32  ;;  %v2393_v50 = vand.u32 2139095040, %v8269_v26  ;;  %v4835_v4 = vcvt.s32.f32 %v4828_v28 }
 0x3c9   : > { %v4833_v53 = vand.u32 2147483647, %v4832_v48  ;;  %v4840_v34 = vsel %vm4717_vm7, %v4839_v42, %v8228_v21  ;;  %v1220_v0 = vadd.s32 %v1219_v58, %v1210_v52  ;;  %v1232_v60 = vshrl.u32 %v1227_v47, 16 }
 0x3ca   : > { %v1241_v9 = vadd.s32 %v1240_v57, %v1230_v46  ;;  %v2394_v5 = vshrl.u32 %v2393_v50, 23  ;;  %v2397_v11 = vand.u32 8388607, %v2390_v56  ;;  %v1239_v30 = vadd.s32 %v1235_v49, %v1231_v3 }
 0x3cb   : > { %v4836_v43 = vmul.f32 %v4835_v4, %v4833_v53  ;;  %vm4716_vm11 = vcmp.le.f32.partialorder %v4715_v31, 0.7853982  ;;  %v1189_v55 = vsel %vm1183_vm0, %v1186_v33, %v1188_v25  ;;  %v8297_v47 = vadd.f32 %v8266_v7, %v342_v8 }
 0x3cc   : > { %v1242_v17 = vadd.s32 %v1241_v9, %v1232_v60  ;;  %v5516_v1 = vadd.s32 4294967169, %v2394_v5  ;;  %v4842_v21 = vsel %vm4716_vm11, 0, %v4840_v34  ;;  %vm1245_vm12 = vc.u32 %v1220_v0, %v1239_v30 }
 0x3cd   : > { %v4837_v62 = vxor.u32 2147483648, %v4836_v43  ;;  %v2398_v22 = vor.u32 8388608, %v2397_v11  ;;  %v1243_v13 = vmul.u32 %v8247_v6, %v1189_v55  ;;  %v4859_v10 = vadd.s32 3, %v4842_v21 }
 0x3ce   : > { %v1246_v44 = vadd.s32 1, %v1242_v17  ;;  %v2400_v63 = vadd.s32 1, %v5516_v1  ;;  %v3633_v15 = vand.u32 2139095040, %v8297_v47  ;;  %v8308_v41 = vadd.s32 %v1239_v30, %v1220_v0 }
 0x3cf   : > { %v4838_v37 = vsel %vm4717_vm7, %v4837_v62, %v4836_v43  ;;  %v8303_v2 = vshll.u32 %v2398_v22, 8  ;;  %v8306_v3 = vand.u32 3, %v4859_v10  ;;  %v3630_v32 = vand.u32 2147483647, %v8297_v47 }
 0x3d0   : > { %v4841_v31 = vsel %vm4716_vm11, %v8040_v59, %v4838_v37  ;;  %v1247_v38 = vsel %vm1245_vm12, %v1246_v44, %v1242_v17  ;;  %vm2401_vm14 = vcmp.gt.s32.totalorder %v2400_v63, 0  ;;  %v3634_v48 = vshrl.u32 %v3633_v15, 23 }
 0x3d1   : > { %v4843_v23 = vmul.f32 %v4841_v31, %v4841_v31  ;;  %v1248_v39 = vadd.s32 %v1247_v38, %v1243_v13  ;;  %v2402_v61 = vsel %vm2401_vm14, %v2400_v63, 0  ;;  %v8312_v58 = vand.u32 65535, %v8303_v2 }
 0x3d2   : > { %v2404_v54 = vand.u32 31, %v2402_v61  ;;  %vm1152_vm15 = vcmp.lt.s32.totalorder %v8071_v45, 0  ;;  %vm4865_vm0 = vcmp.eq.s32.totalorder %v8306_v3, 2  ;;  %v8324_v60 = vshrl.u32 %v2402_v61, 5 }
 0x3d3   : > { %v4844_v24 = vmul.f32 -0.001358992, %v4843_v23  ;;  %v4851_v36 = vmul.f32 -0.00019511016, %v4843_v23  ;;  %v1249_v19 = vadd.s32 536870912, %v1248_v39  ;;  %vm4862_vm1 = vcmp.eq.s32.totalorder %v8306_v3, 0 }
 0x3d4   : > { %v2405_v49 = vsub.s32 32, %v2404_v54  ;;  %v2407_v40 = vshll.u32 %v5839_v12, %v2404_v54  ;;  %v2410_v25 = vshll.u32 %v5840_v14, %v2404_v54  ;;  %v2416_v50 = vshll.u32 %v5842_v18, %v2404_v54 }
 0x3d5   : > { %v4845_v6 = vadd.f32 0.041655596, %v4844_v24  ;;  %v4852_v28 = vadd.f32 0.008332121, %v4851_v36  ;;  %v1250_v42 = vshrl.u32 %v1249_v19, 30  ;;  %v2413_v9 = vshll.u32 %v5841_v16, %v2404_v54 }
 0x3d6   : > { %v2408_v46 = vshrl.u32 %v5840_v14, %v2405_v49  ;;  %v2411_v57 = vshrl.u32 %v5841_v16, %v2405_v49  ;;  %v2417_v53 = vshrl.u32 %v5843_v20, %v2405_v49  ;;  %v2414_v5 = vshrl.u32 %v5842_v18, %v2405_v49 }
 0x3d7   : > { %v4846_v33 = vmul.f32 %v4845_v6, %v4843_v23  ;;  %v4853_v52 = vmul.f32 %v4852_v28, %v4843_v23  ;;  %v1251_v51 = vshll.u32 %v1250_v42, 30  ;;  %v2419_v11 = vshll.u32 %v5843_v20, %v2404_v54 }
 0x3d8   : > { %v2420_v43 = vshrl.u32 %v5844_v29, %v2405_v49  ;;  %vm4861_vm2 = vcmp.lt.s32.totalorder %v8306_v3, 2  ;;  %vm4858_vm3 = vweird.f32 %v8040_v59  ;;  %v1274_v17 = vsub.s32 4, %v1250_v42 }
 0x3d9   : > { %v4847_v4 = vadd.f32 -0.4999988, %v4846_v33  ;;  %v4854_v34 = vadd.f32 -0.16666654, %v4853_v52  ;;  %v8322_v0 = vsub.s32 %v1248_v39, %v1251_v51  ;;  %v2409_v1 = vor.u32 %v2408_v46, %v2407_v40 }
 0x3da   : > { %v2412_v62 = vor.u32 %v2411_v57, %v2410_v25  ;;  %v2418_v21 = vor.u32 %v2417_v53, %v2416_v50  ;;  %vm2422_vm5 = vcmp.lt.s32.totalorder %v8324_v60, 1  ;;  %v2415_v13 = vor.u32 %v2414_v5, %v2413_v9 }
 0x3db   : > { %v4848_v30 = vmul.f32 %v4847_v4, %v4843_v23  ;;  %v4855_v8 = vmul.f32 %v4854_v34, %v4843_v23  ;;  %vm1253_vm4 = vcmp.lt.s32.totalorder %v8322_v0, 0  ;;  %v1254_v55 = vsub.s32 0, %v8322_v0 }
 0x3dc   : > { %vm2425_vm6 = vcmp.lt.s32.totalorder %v8324_v60, 4  ;;  %v2440_v10 = vshrl.u32 %v8303_v2, 16  ;;  %vm8341_vm7 = vcmp.le.f32.partialorder %v1150_v27, 0.7853982  ;;  %v2421_v61 = vor.u32 %v2420_v43, %v2419_v11 }
 0x3dd   : > { %v4849_v44 = vadd.f32 1.0, %v4848_v30  ;;  %v4856_v22 = vadd.f32 1.0, %v4855_v8  ;;  %v1255_v63 = vsel %vm1253_vm4, %v1254_v55, %v8322_v0  ;;  %vm2424_vm8 = vcmp.lt.s32.totalorder %v8324_v60, 3 }
 0x3de   : > { %v1256_v37 = vclz %v1255_v63  ;;  %v2406_v15 = vshrl.u32 %v5839_v12, %v2405_v49  ;;  %v2430_v24 = vsel %vm2422_vm5, %v2409_v1, %v2412_v62  ;;  %v5540_v36 = vadd.s32 4294967169, %v3634_v48 }
 0x3df   : > { %v4857_v38 = vmul.f32 %v4856_v22, %v4841_v31  ;;  %v4866_v23 = vxor.u32 2147483648, %v4849_v44  ;;  %v8351_v31 = vsel %vm1152_vm15, %v1274_v17, %v1250_v42  ;;  %vm2423_vm10 = vcmp.lt.s32.totalorder %v8324_v60, 2 }
 0x3e0   : > { %v5493_v54 = vadd.s32 4294967294, %v1256_v37  ;;  %v2431_v27 = vsel %vm2425_vm6, %v2418_v21, 920167782  ;;  %v2434_v28 = vsel %vm2422_vm5, %v2412_v62, %v2415_v13  ;;  %v2435_v33 = vsel %vm2425_vm6, %v2421_v61, 1326507024 }
 0x3e1   : > { %v4863_v19 = vxor.u32 2147483648, %v4857_v38  ;;  %v4867_v6 = vsel %vm4865_vm0, %v4866_v23, %v4857_v38  ;;  %v2432_v49 = vsel %vm2424_vm8, %v2415_v13, %v2431_v27  ;;  %v2427_v46 = vsel %vm2425_vm6, %v2415_v13, 2102212464 }
 0x3e2   : > { %vm5494_vm9 = vcmp.lt.s32.totalorder %v5493_v54, 0  ;;  %v2433_v48 = vsel %vm2423_vm10, %v2430_v24, %v2432_v49  ;;  %v2436_v50 = vsel %vm2424_vm8, %v2418_v21, %v2435_v33  ;;  %v3640_v59 = vadd.s32 1, %v5540_v36 }
 0x3e3   : > { %v4864_v42 = vsel %vm4862_vm1, %v4849_v44, %v4863_v19  ;;  %v1259_v40 = vsel %vm5494_vm9, 0, %v5493_v54  ;;  %v2463_v53 = vand.u32 65535, %v2433_v48  ;;  %v2464_v4 = vshrl.u32 %v2433_v48, 16 }
 0x3e4   : > { %v4868_v52 = vsel %vm4861_vm2, %v4864_v42, %v4867_v6  ;;  %v1260_v51 = vsub.s32 32, %v1259_v40  ;;  %v1264_v25 = vsub.s32 4294967266, %v1259_v40  ;;  %v1261_v34 = vshll.u32 %v8322_v0, %v1259_v40 }
 0x3e5   : > { %v4869_v57 = vsel %vm4858_vm3, nan, %v4868_v52  ;;  %v2437_v5 = vsel %vm2423_vm10, %v2434_v28, %v2436_v50  ;;  %v2466_v30 = vmul.u32 %v2464_v4, %v8312_v58  ;;  %v1277_v17 = vsel %vm8341_vm7, 0, %v8351_v31 }
 0x3e6   : > { %5363 = vst [vmem:[%s6323_s27 + $0xe0] sm:$0xff] %v4869_v57  ;;  %v1262_v9 = vshrl.u32 %v8308_v41, %v1260_v51  ;;  %v1265_v3 = vadd.s32 127, %v1264_v25  ;;  %v2441_v11 = vand.u32 65535, %v2437_v5  ;;  %v2442_v43 = vshrl.u32 %v2437_v5, 16 }
 0x3e7   : > { %v2467_v21 = vmul.u32 %v2463_v53, %v2440_v10  ;;  %v2426_v0 = vsel %vm2422_vm5, %v2406_v15, %v2409_v1  ;;  %v2428_v41 = vsel %vm2424_vm8, %v2412_v62, %v2427_v46  ;;  %v2465_v37 = vmul.u32 %v2463_v53, %v8312_v58 }
 0x3e8   : > { %v1263_v8 = vor.u32 %v1262_v9, %v1261_v34  ;;  %v1266_v55 = vshll.u32 %v1265_v3, 23  ;;  %v2444_v44 = vmul.u32 %v2442_v43, %v8312_v58  ;;  %v2445_v22 = vmul.u32 %v2441_v11, %v2440_v10 }
 0x3e9   : > { %v2468_v13 = vmul.u32 %v2464_v4, %v2440_v10  ;;  %v2469_v38 = vshll.u32 %v2466_v30, 16  ;;  %v2443_v61 = vmul.u32 %v2441_v11, %v8312_v58  ;;  %v2446_v54 = vmul.u32 %v2442_v43, %v2440_v10 }
 0x3ea   : > { %v1267_v63 = vor.u32 4788187, %v1266_v55  ;;  %v1270_v23 = vcvt.s32.f32 %v1263_v8  ;;  %v2447_v24 = vshll.u32 %v2444_v44, 16  ;;  %v2449_v19 = vshll.u32 %v2445_v22, 16 }
 0x3eb   : > { %v2471_v31 = vshll.u32 %v2467_v21, 16  ;;  %vm2473_vm13 = vc.u32 %v2465_v37, %v2469_v38  ;;  %v2475_v15 = vadd.s32 %v2469_v38, %v2465_v37  ;;  %vm3641_vm12 = vcmp.gt.s32.totalorder %v3640_v59, 0 }
 0x3ec   : > { %v1268_v36 = vand.u32 2147483647, %v1267_v63  ;;  %vm2451_vm11 = vc.u32 %v2443_v61, %v2447_v24  ;;  %v2453_v1 = vadd.s32 %v2447_v24, %v2443_v61  ;;  %v2474_v62 = vsel %vm2473_vm13, 1, %v5845_v35 }
 0x3ed   : > { %v2452_v6 = vsel %vm2451_vm11, 1, %v5845_v35  ;;  %v2476_v49 = vadd.s32 %v2474_v62, %v2468_v13  ;;  %v2470_v42 = vshrl.u32 %v2466_v30, 16  ;;  %vm2477_vm0 = vc.u32 %v2475_v15, %v2471_v31 }
 0x3ee   : > { %v1271_v27 = vmul.f32 %v1270_v23, %v1268_v36  ;;  %v2454_v28 = vadd.s32 %v2452_v6, %v2446_v54  ;;  %vm2455_vm14 = vc.u32 %v2453_v1, %v2449_v19  ;;  %v2478_v40 = vsel %vm2477_vm0, 1, %v5845_v35 }
 0x3ef   : > { %v2456_v10 = vsel %vm2455_vm14, 1, %v5845_v35  ;;  %v3642_v48 = vsel %vm3641_vm12, %v3640_v59, 0  ;;  %v2448_v33 = vshrl.u32 %v2444_v44, 16  ;;  %v2480_v51 = vadd.s32 %v2478_v40, %v2476_v49 }
 0x3f0   : > { %v1272_v58 = vxor.u32 2147483648, %v1271_v27  ;;  %v2458_v52 = vadd.s32 %v2456_v10, %v2454_v28  ;;  %v3644_v25 = vand.u32 31, %v3642_v48  ;;  %v2429_v57 = vsel %vm2423_vm10, %v2426_v0, %v2428_v41 }
 0x3f1   : > { %v2450_v50 = vshrl.u32 %v2445_v22, 16  ;;  %v2472_v53 = vshrl.u32 %v2467_v21, 16  ;;  %v2481_v9 = vadd.s32 %v2480_v51, %v2470_v42  ;;  %v1294_v11 = vadd.s32 3, %v1277_v17 }
 0x3f2   : > { %v1273_v46 = vsel %vm1152_vm15, %v1272_v58, %v1271_v27  ;;  %v2459_v34 = vadd.s32 %v2458_v52, %v2448_v33  ;;  %v8403_v3 = vsub.s32 32, %v3644_v25  ;;  %v3637_v43 = vand.u32 8388607, %v3630_v32 }
 0x3f3   : > { %v1276_v4 = vsel %vm8341_vm7, %v8071_v45, %v1273_v46  ;;  %v8409_v59 = vadd.s32 %v2475_v15, %v2471_v31  ;;  %v2482_v60 = vadd.s32 %v2481_v9, %v2472_v53  ;;  %v2483_v8 = vmul.u32 %v8303_v2, %v2429_v57 }
 0x3f4   : > { %v1278_v5 = vmul.f32 %v1276_v4, %v1276_v4  ;;  %v8407_v30 = vadd.s32 %v2459_v34, %v2450_v50  ;;  %v8412_v39 = vshrl.u32 %v3642_v48, 5  ;;  %v3650_v0 = vshll.u32 %v5840_v14, %v3644_v25 }
 0x3f5   : > { %v2486_v17 = vadd.s32 1, %v2482_v60  ;;  %v3651_v41 = vshrl.u32 %v5841_v16, %v8403_v3  ;;  %v3654_v44 = vshrl.u32 %v5842_v18, %v8403_v3  ;;  %v3648_v2 = vshrl.u32 %v5840_v14, %v8403_v3 }
 0x3f6   : > { %v1279_v55 = vmul.f32 -0.001358992, %v1278_v5  ;;  %v1286_v21 = vmul.f32 -0.00019511016, %v1278_v5  ;;  %vm2485_vm15 = vc.u32 %v8407_v30, %v8409_v59  ;;  %v3653_v37 = vshll.u32 %v5841_v16, %v3644_v25 }
 0x3f7   : > { %v2487_v13 = vsel %vm2485_vm15, %v2486_v17, %v2482_v60  ;;  %v3656_v38 = vshll.u32 %v5842_v18, %v3644_v25  ;;  %v3657_v23 = vshrl.u32 %v5843_v20, %v8403_v3  ;;  %v3659_v61 = vshll.u32 %v5843_v20, %v3644_v25  ;;  %v366_v17 = vpop.f32.mrf.mxu3 }
 0x3f8   : > { %v1280_v22 = vadd.f32 0.041655596, %v1279_v55  ;;  %v1287_v63 = vadd.f32 0.008332121, %v1286_v21  ;;  %v2488_v36 = vadd.s32 %v2487_v13, %v2483_v8  ;;  %v3660_v19 = vshrl.u32 %v5844_v29, %v8403_v3 }
 0x3f9   : > { %v3647_v31 = vshll.u32 %v5839_v12, %v3644_v25  ;;  %v8431_v1 = vor.u32 %v3651_v41, %v3650_v0  ;;  %v3655_v62 = vor.u32 %v3654_v44, %v3653_v37  ;;  %v3658_v15 = vor.u32 %v3657_v23, %v3656_v38 }
 0x3fa   : > { %v1281_v54 = vmul.f32 %v1280_v22, %v1278_v5  ;;  %v1288_v24 = vmul.f32 %v1287_v63, %v1278_v5  ;;  %v2489_v49 = vadd.s32 536870912, %v2488_v36  ;;  %v3661_v28 = vor.u32 %v3660_v19, %v3659_v61 }
 0x3fb   : > { %v1295_v42 = vand.u32 3, %v1294_v11  ;;  %v3638_v58 = vor.u32 8388608, %v3637_v43  ;;  %v8433_v10 = vor.u32 %v3648_v2, %v3647_v31  ;;  %vm3665_vm1 = vcmp.lt.s32.totalorder %v8412_v39, 4 }
 0x3fc   : > { %v1282_v27 = vadd.f32 -0.4999988, %v1281_v54  ;;  %v1289_v6 = vadd.f32 -0.16666654, %v1288_v24  ;;  %v8435_v33 = vshrl.u32 %v2489_v49, 30  ;;  %vm3662_vm2 = vcmp.lt.s32.totalorder %v8412_v39, 1 }
 0x3fd   : > { %vm3664_vm4 = vcmp.lt.s32.totalorder %v8412_v39, 3  ;;  %v3671_v52 = vsel %vm3665_vm1, %v3658_v15, 920167782  ;;  %v3675_v51 = vsel %vm3665_vm1, %v3661_v28, 1326507024  ;;  %v3674_v50 = vsel %vm3662_vm2, %v8431_v1, %v3655_v62 }
 0x3fe   : > { %v1283_v40 = vmul.f32 %v1282_v27, %v1278_v5  ;;  %v1290_v48 = vmul.f32 %v1289_v6, %v1278_v5  ;;  %v2491_v57 = vshll.u32 %v8435_v33, 30  ;;  %v3670_v53 = vsel %vm3662_vm2, %v8433_v10, %v8431_v1 }
 0x3ff   : > { %v3672_v34 = vsel %vm3664_vm4, %v3655_v62, %v3671_v52  ;;  %v3676_v9 = vsel %vm3664_vm4, %v3658_v15, %v3675_v51  ;;  %v8456_v5 = vshll.u32 %v3638_v58, 8  ;;  %vm3663_vm3 = vcmp.lt.s32.totalorder %v8412_v39, 2 }
 0x400   : > { %v1284_v25 = vadd.f32 1.0, %v1283_v40  ;;  %v1291_v46 = vadd.f32 1.0, %v1290_v48  ;;  %v2492_v60 = vsub.s32 %v2488_v36, %v2491_v57  ;;  %vm1293_vm5 = vweird.f32 %v8071_v45 }
 0x401   : > { %vm1296_vm6 = vcmp.lt.s32.totalorder %v1295_v42, 2  ;;  %vm1297_vm7 = vcmp.eq.s32.totalorder %v1295_v42, 0  ;;  %v3677_v8 = vsel %vm3663_vm3, %v3674_v50, %v3676_v9  ;;  %v3673_v0 = vsel %vm3663_vm3, %v3670_v53, %v3672_v34 }
 0x402   : > { %v1292_v11 = vmul.f32 %v1291_v46, %v1276_v4  ;;  %v1301_v43 = vxor.u32 2147483648, %v1284_v25  ;;  %vm2493_vm8 = vcmp.lt.s32.totalorder %v2492_v60, 0  ;;  %v2494_v21 = vsub.s32 0, %v2492_v60 }
 0x403   : > { %vm1300_vm10 = vcmp.eq.s32.totalorder %v1295_v42, 2  ;;  %v3679_v4 = vand.u32 65535, %v8456_v5  ;;  %v3681_v41 = vand.u32 65535, %v3677_v8  ;;  %v3682_v44 = vshrl.u32 %v3677_v8, 16 }
 0x404   : > { %v1298_v55 = vxor.u32 2147483648, %v1292_v11  ;;  %v1302_v63 = vsel %vm1300_vm10, %v1301_v43, %v1292_v11  ;;  %v2495_v2 = vsel %vm2493_vm8, %v2494_v21, %v2492_v60  ;;  %v3680_v37 = vshrl.u32 %v8456_v5, 16 }
 0x405   : > { %v2496_v38 = vclz %v2495_v2  ;;  %v3704_v23 = vshrl.u32 %v3673_v0, 16  ;;  %v8468_v61 = vadd.f32 %v8266_v7, %v366_v17  ;;  %v3684_v24 = vmul.u32 %v3682_v44, %v3679_v4 }
 0x406   : > { %v1299_v22 = vsel %vm1297_vm7, %v1284_v25, %v1298_v55  ;;  %v3685_v36 = vmul.u32 %v3681_v41, %v3680_v37  ;;  %v3703_v19 = vand.u32 65535, %v3673_v0  ;;  %v2484_v31 = vadd.s32 %v8409_v59, %v8407_v30 }
 0x407   : > { %v1303_v13 = vsel %vm1296_vm6, %v1299_v22, %v1302_v63  ;;  %v5517_v15 = vadd.s32 4294967294, %v2496_v38  ;;  %v3646_v27 = vshrl.u32 %v5839_v12, %v8403_v3  ;;  %v3667_v6 = vsel %vm3665_vm1, %v3655_v62, 2102212464 }
 0x408   : > { %v1304_v54 = vsel %vm1293_vm5, nan, %v1303_v13  ;;  %v2514_v49 = vsub.s32 4, %v8435_v33  ;;  %v3683_v28 = vmul.u32 %v3681_v41, %v3679_v4  ;;  %v3686_v42 = vmul.u32 %v3682_v44, %v3680_v37  ;;  %v297_v13 = vpop.f32.mrf.mxu0 }
 0x409   : > { %5340 = vst [vmem:[%s6323_s27 + $0x28] sm:$0xff] %v1304_v54  ;;  %v3687_v45 = vshll.u32 %v3684_v24, 16  ;;  %vm2392_vm9 = vcmp.lt.s32.totalorder %v8269_v26, 0  ;;  %vm5518_vm13 = vcmp.lt.s32.totalorder %v5517_v15, 0  ;;  %v3688_v58 = vshrl.u32 %v3684_v24, 16 }
 0x40a   : > { %v3689_v40 = vshll.u32 %v3685_v36, 16  ;;  %v3706_v48 = vmul.u32 %v3704_v23, %v3679_v4  ;;  %v2499_v52 = vsel %vm5518_vm13, 0, %v5517_v15  ;;  %v3707_v59 = vmul.u32 %v3703_v19, %v3680_v37 }
 0x40b   : > { %vm3691_vm11 = vc.u32 %v3683_v28, %v3687_v45  ;;  %v3693_v30 = vadd.s32 %v3687_v45, %v3683_v28  ;;  %v2500_v51 = vsub.s32 32, %v2499_v52  ;;  %v2504_v3 = vsub.s32 4294967266, %v2499_v52 }
 0x40c   : > { %v3692_v25 = vsel %vm3691_vm11, 1, %v5845_v35  ;;  %v3705_v62 = vmul.u32 %v3703_v19, %v3679_v4  ;;  %v3708_v57 = vmul.u32 %v3704_v23, %v3680_v37  ;;  %v3709_v50 = vshll.u32 %v3706_v48, 16 }
 0x40d   : > { %v3694_v46 = vadd.s32 %v3692_v25, %v3686_v42  ;;  %vm3695_vm12 = vc.u32 %v3693_v30, %v3689_v40  ;;  %v2501_v53 = vshll.u32 %v2492_v60, %v2499_v52  ;;  %v2502_v34 = vshrl.u32 %v2484_v31, %v2500_v51 }
 0x40e   : > { %v2505_v9 = vadd.s32 127, %v2504_v3  ;;  %v3696_v11 = vsel %vm3695_vm12, 1, %v5845_v35  ;;  %v3711_v8 = vshll.u32 %v3707_v59, 16  ;;  %vm3713_vm14 = vc.u32 %v3705_v62, %v3709_v50 }
 0x40f   : > { %v3698_v43 = vadd.s32 %v3696_v11, %v3694_v46  ;;  %v3715_v55 = vadd.s32 %v3709_v50, %v3705_v62  ;;  %v2503_v21 = vor.u32 %v2502_v34, %v2501_v53  ;;  %v3666_v17 = vsel %vm3662_vm2, %v3646_v27, %v8433_v10 }
 0x410   : > { %v2506_v0 = vshll.u32 %v2505_v9, 23  ;;  %v3714_v4 = vsel %vm3713_vm14, 1, %v5845_v35  ;;  %v4870_v60 = vand.u32 2147483647, %v8468_v61  ;;  %v3668_v63 = vsel %vm3664_vm4, %v8431_v1, %v3667_v6 }
 0x411   : > { %v3699_v41 = vadd.s32 %v3698_v43, %v3688_v58  ;;  %v3716_v44 = vadd.s32 %v3714_v4, %v3708_v57  ;;  %vm3717_vm0 = vc.u32 %v3715_v55, %v3711_v8  ;;  %v3690_v2 = vshrl.u32 %v3685_v36, 16 }
 0x412   : > { %v2507_v22 = vor.u32 4788187, %v2506_v0  ;;  %v3718_v37 = vsel %vm3717_vm0, 1, %v5845_v35  ;;  %v2515_v10 = vsel %vm2392_vm9, %v2514_v49, %v8435_v33  ;;  %v3710_v38 = vshrl.u32 %v3706_v48, 16 }
 0x413   : > { %v3720_v23 = vadd.s32 %v3718_v37, %v3716_v44  ;;  %v4873_v54 = vand.u32 2139095040, %v8468_v61  ;;  %v2510_v19 = vcvt.s32.f32 %v2503_v21  ;;  %v3700_v31 = vadd.s32 %v3699_v41, %v3690_v2 }
 0x414   : > { %v2508_v24 = vand.u32 2147483647, %v2507_v22  ;;  %v3712_v15 = vshrl.u32 %v3707_v59, 16  ;;  %v4877_v1 = vand.u32 8388607, %v4870_v60  ;;  %v8499_v36 = vadd.f32 %v8266_v7, %v297_v13 }
 0x415   : > { %v3721_v27 = vadd.s32 %v3720_v23, %v3710_v38  ;;  %v4874_v28 = vshrl.u32 %v4873_v54, 23  ;;  %v3719_v42 = vadd.s32 %v3715_v55, %v3711_v8  ;;  %vm8503_vm15 = vcmp.le.f32.partialorder %v2390_v56, 0.7853982 }
 0x416   : > { %v2511_v6 = vmul.f32 %v2510_v19, %v2508_v24  ;;  %v3669_v49 = vsel %vm3663_vm3, %v3666_v17, %v3668_v63  ;;  %v2517_v48 = vsel %vm8503_vm15, 0, %v2515_v10  ;;  %v4878_v52 = vor.u32 8388608, %v4877_v1 }
 0x417   : > { %v3722_v45 = vadd.s32 %v3721_v27, %v3712_v15  ;;  %v5564_v58 = vadd.s32 4294967169, %v4874_v28  ;;  %vm3725_vm1 = vc.u32 %v3700_v31, %v3719_v42  ;;  %v1308_v59 = vand.u32 2139095040, %v8499_v36 }
 0x418   : > { %v2512_v40 = vxor.u32 2147483648, %v2511_v6  ;;  %v3723_v51 = vmul.u32 %v8456_v5, %v3669_v49  ;;  %v2534_v62 = vadd.s32 3, %v2517_v48  ;;  %v8518_v53 = vshll.u32 %v4878_v52, 8 }
 0x419   : > { %v3726_v7 = vadd.s32 1, %v3722_v45  ;;  %v4880_v30 = vadd.s32 1, %v5564_v58  ;;  %v1309_v34 = vshrl.u32 %v1308_v59, 23  ;;  %v8524_v17 = vadd.s32 %v3719_v42, %v3700_v31 }
 0x41a   : > { %v2513_v56 = vsel %vm2392_vm9, %v2512_v40, %v2511_v6  ;;  %v8520_v21 = vand.u32 3, %v2534_v62  ;;  %v8527_v4 = vand.u32 65535, %v8518_v53  ;;  %v8530_v41 = vshrl.u32 %v8518_v53, 16 }
 0x41b   : > { %v2516_v39 = vsel %vm8503_vm15, %v8269_v26, %v2513_v56  ;;  %v3727_v3 = vsel %vm3725_vm1, %v3726_v7, %v3722_v45  ;;  %vm4881_vm2 = vcmp.gt.s32.totalorder %v4880_v30, 0  ;;  %v8532_v44 = vadd.s32 4294967169, %v1309_v34 }
 0x41c   : > { %v2518_v25 = vmul.f32 %v2516_v39, %v2516_v39  ;;  %v3728_v46 = vadd.s32 %v3727_v3, %v3723_v51  ;;  %v4882_v57 = vsel %vm4881_vm2, %v4880_v30, 0  ;;  %vm2540_vm4 = vcmp.eq.s32.totalorder %v8520_v21, 2 }
 0x41d   : > { %v4884_v50 = vand.u32 31, %v4882_v57  ;;  %v8535_v37 = vshrl.u32 %v4882_v57, 5  ;;  %vm2537_vm3 = vcmp.eq.s32.totalorder %v8520_v21, 0  ;;  %vm2536_vm5 = vcmp.lt.s32.totalorder %v8520_v21, 2 }
 0x41e   : > { %v2519_v9 = vmul.f32 -0.001358992, %v2518_v25  ;;  %v2526_v11 = vmul.f32 -0.00019511016, %v2518_v25  ;;  %v3729_v43 = vadd.s32 536870912, %v3728_v46  ;;  %vm2533_vm7 = vweird.f32 %v8269_v26 }
 0x41f   : > { %v4885_v8 = vsub.s32 32, %v4884_v50  ;;  %v4887_v13 = vshll.u32 %v5839_v12, %v4884_v50  ;;  %v4890_v15 = vshll.u32 %v5840_v14, %v4884_v50  ;;  %v4893_v27 = vshll.u32 %v5841_v16, %v4884_v50 }
 0x420   : > { %v2520_v55 = vadd.f32 0.041655596, %v2519_v9  ;;  %v2527_v5 = vadd.f32 0.008332121, %v2526_v11  ;;  %v8522_v0 = vshrl.u32 %v3729_v43, 30  ;;  %v4896_v28 = vshll.u32 %v5842_v18, %v4884_v50 }
 0x421   : > { %v4888_v10 = vshrl.u32 %v5840_v14, %v4885_v8  ;;  %v4891_v38 = vshrl.u32 %v5841_v16, %v4885_v8  ;;  %v4894_v23 = vshrl.u32 %v5842_v18, %v4885_v8  ;;  %v4897_v31 = vshrl.u32 %v5843_v20, %v4885_v8 }
 0x422   : > { %v2521_v22 = vmul.f32 %v2520_v55, %v2518_v25  ;;  %v2528_v63 = vmul.f32 %v2527_v5, %v2518_v25  ;;  %v3731_v2 = vshll.u32 %v8522_v0, 30  ;;  %v4900_v1 = vshrl.u32 %v5844_v29, %v4885_v8 }
 0x423   : > { %v4889_v49 = vor.u32 %v4888_v10, %v4887_v13  ;;  %v4892_v45 = vor.u32 %v4891_v38, %v4890_v15  ;;  %v4895_v58 = vor.u32 %v4894_v23, %v4893_v27  ;;  %v4899_v40 = vshll.u32 %v5843_v20, %v4884_v50 }
 0x424   : > { %v2522_v54 = vadd.f32 -0.4999988, %v2521_v22  ;;  %v2529_v24 = vadd.f32 -0.16666654, %v2528_v63  ;;  %v8542_v19 = vsub.s32 %v3728_v46, %v3731_v2  ;;  %v4898_v30 = vor.u32 %v4897_v31, %v4896_v28 }
 0x425   : > { %v3754_v56 = vsub.s32 4, %v8522_v0  ;;  %v4886_v51 = vshrl.u32 %v5839_v12, %v4885_v8  ;;  %v4901_v3 = vor.u32 %v4900_v1, %v4899_v40  ;;  %vm4902_vm8 = vcmp.lt.s32.totalorder %v8535_v37, 1 }
 0x426   : > { %v2523_v6 = vmul.f32 %v2522_v54, %v2518_v25  ;;  %v2530_v42 = vmul.f32 %v2529_v24, %v2518_v25  ;;  %vm3733_vm6 = vcmp.lt.s32.totalorder %v8542_v19, 0  ;;  %v3734_v33 = vsub.s32 0, %v8542_v19 }
 0x427   : > { %vm4903_vm10 = vcmp.lt.s32.totalorder %v8535_v37, 2  ;;  %vm3632_vm9 = vcmp.lt.s32.totalorder %v8297_v47, 0  ;;  %vm4904_vm13 = vcmp.lt.s32.totalorder %v8535_v37, 3  ;;  %vm4905_vm11 = vcmp.lt.s32.totalorder %v8535_v37, 4 }
 0x428   : > { %v2524_v48 = vadd.f32 1.0, %v2523_v6  ;;  %v2531_v7 = vadd.f32 1.0, %v2530_v42  ;;  %v3735_v52 = vsel %vm3733_vm6, %v3734_v33, %v8542_v19  ;;  %v4910_v57 = vsel %vm4902_vm8, %v4889_v49, %v4892_v45 }
 0x429   : > { %v3736_v59 = vclz %v3735_v52  ;;  %v4906_v34 = vsel %vm4902_vm8, %v4886_v51, %v4889_v49  ;;  %v4907_v9 = vsel %vm4905_vm11, %v4895_v58, 2102212464  ;;  %v4911_v11 = vsel %vm4905_vm11, %v4898_v30, 920167782 }
 0x42a   : > { %v2532_v25 = vmul.f32 %v2531_v7, %v2516_v39  ;;  %v2541_v62 = vxor.u32 2147483648, %v2524_v48  ;;  %v4912_v43 = vsel %vm4904_vm13, %v4895_v58, %v4911_v11  ;;  %v4914_v8 = vsel %vm4902_vm8, %v4892_v45, %v4895_v58 }
 0x42b   : > { %v5541_v46 = vadd.s32 4294967294, %v3736_v59  ;;  %v4913_v22 = vsel %vm4903_vm10, %v4910_v57, %v4912_v43  ;;  %v4915_v63 = vsel %vm4905_vm11, %v4901_v3, 1326507024  ;;  %v4908_v38 = vsel %vm4904_vm13, %v4892_v45, %v4907_v9 }
 0x42c   : > { %v2538_v50 = vxor.u32 2147483648, %v2532_v25  ;;  %v2542_v39 = vsel %vm2540_vm4, %v2541_v62, %v2532_v25  ;;  %v4916_v54 = vsel %vm4904_vm13, %v4898_v30, %v4915_v63  ;;  %v4943_v24 = vand.u32 65535, %v4913_v22 }
 0x42d   : > { %vm5542_vm12 = vcmp.lt.s32.totalorder %v5541_v46, 0  ;;  %v4944_v31 = vshrl.u32 %v4913_v22, 16  ;;  %v4917_v28 = vsel %vm4903_vm10, %v4914_v8, %v4916_v54  ;;  %v1305_v26 = vand.u32 2147483647, %v8499_v36 }
 0x42e   : > { %v2539_v55 = vsel %vm2537_vm3, %v2524_v48, %v2538_v50  ;;  %v3739_v5 = vsel %vm5542_vm12, 0, %v5541_v46  ;;  %v4921_v1 = vand.u32 65535, %v4917_v28  ;;  %v4922_v6 = vshrl.u32 %v4917_v28, 16 }
 0x42f   : > { %v2543_v2 = vsel %vm2536_vm5, %v2539_v55, %v2542_v39  ;;  %v3740_v13 = vsub.s32 32, %v3739_v5  ;;  %v3744_v10 = vsub.s32 4294967266, %v3739_v5  ;;  %v3741_v15 = vshll.u32 %v8542_v19, %v3739_v5 }
 0x430   : > { %v2544_v23 = vsel %vm2533_vm7, nan, %v2543_v2  ;;  %v4946_v42 = vmul.u32 %v4944_v31, %v8527_v4  ;;  %v4947_v45 = vmul.u32 %v4943_v24, %v8530_v41  ;;  %v1315_v58 = vadd.s32 1, %v8532_v44 }
 0x431   : > { %5348 = vst [vmem:[%s6323_s27 + $0x68] sm:$0xff] %v2544_v23  ;;  %v3742_v27 = vshrl.u32 %v8524_v17, %v3740_v13  ;;  %v3745_v21 = vadd.s32 127, %v3744_v10  ;;  %v8591_v17 = vsel %vm3632_vm9, %v3754_v56, %v8522_v0  ;;  %v8595_v19 = vsel %vm4903_vm10, %v4906_v34, %v4908_v38 }
 0x432   : > { %v4924_v40 = vmul.u32 %v4922_v6, %v8527_v4  ;;  %v4925_v48 = vmul.u32 %v4921_v1, %v8530_v41  ;;  %v4945_v52 = vmul.u32 %v4943_v24, %v8527_v4  ;;  %v4948_v30 = vmul.u32 %v4944_v31, %v8530_v41 }
 0x433   : > { %v3743_v33 = vor.u32 %v3742_v27, %v3741_v15  ;;  %v3746_v49 = vshll.u32 %v3745_v21, 23  ;;  %v4949_v59 = vshll.u32 %v4946_v42, 16  ;;  %v4923_v51 = vmul.u32 %v4921_v1, %v8527_v4 }
 0x434   : > { %v4926_v0 = vmul.u32 %v4922_v6, %v8530_v41  ;;  %v4927_v56 = vshll.u32 %v4924_v40, 16  ;;  %v4929_v37 = vshll.u32 %v4925_v48, 16  ;;  %v4951_v25 = vshll.u32 %v4947_v45, 16 }
 0x435   : > { %v3747_v7 = vor.u32 4788187, %v3746_v49  ;;  %v3750_v44 = vcvt.s32.f32 %v3743_v33  ;;  %vm4953_vm14 = vc.u32 %v4945_v52, %v4949_v59  ;;  %v4955_v57 = vadd.s32 %v4949_v59, %v4945_v52 }
 0x436   : > { %vm4931_vm0 = vc.u32 %v4923_v51, %v4927_v56  ;;  %v4933_v62 = vadd.s32 %v4927_v56, %v4923_v51  ;;  %v4954_v46 = vsel %vm4953_vm14, 1, %v5845_v35  ;;  %vm1316_vm15 = vcmp.gt.s32.totalorder %v1315_v58, 0 }
 0x437   : > { %v3748_v3 = vand.u32 2147483647, %v3747_v7  ;;  %v4932_v34 = vsel %vm4931_vm0, 1, %v5845_v35  ;;  %v4956_v9 = vadd.s32 %v4954_v46, %v4948_v30  ;;  %v4950_v4 = vshrl.u32 %v4946_v42, 16 }
 0x438   : > { %v4934_v11 = vadd.s32 %v4932_v34, %v4926_v0  ;;  %vm4935_vm1 = vc.u32 %v4933_v62, %v4929_v37  ;;  %vm4957_vm2 = vc.u32 %v4955_v57, %v4951_v25  ;;  %v1317_v8 = vsel %vm1316_vm15, %v1315_v58, 0 }
 0x439   : > { %v3751_v50 = vmul.f32 %v3750_v44, %v3748_v3  ;;  %v4936_v39 = vsel %vm4935_vm1, 1, %v5845_v35  ;;  %v4958_v43 = vsel %vm4957_vm2, 1, %v5845_v35  ;;  %v4928_v55 = vshrl.u32 %v4924_v40, 16 }
 0x43a   : > { %v4938_v5 = vadd.s32 %v4936_v39, %v4934_v11  ;;  %v4960_v22 = vadd.s32 %v4958_v43, %v4956_v9  ;;  %v1319_v63 = vand.u32 31, %v1317_v8  ;;  %vm8609_vm4 = vcmp.le.f32.partialorder %v3630_v32, 0.7853982 }
 0x43b   : > { %v3752_v41 = vxor.u32 2147483648, %v3751_v50  ;;  %v4930_v10 = vshrl.u32 %v4925_v48, 16  ;;  %v4952_v38 = vshrl.u32 %v4947_v45, 16  ;;  %v3757_v32 = vsel %vm8609_vm4, 0, %v8591_v17 }
 0x43c   : > { %v4939_v54 = vadd.s32 %v4938_v5, %v4928_v55  ;;  %v4961_v24 = vadd.s32 %v4960_v22, %v4950_v4  ;;  %v8618_v31 = vsub.s32 32, %v1319_v63  ;;  %v4963_v27 = vmul.u32 %v8518_v53, %v8595_v19 }
 0x43d   : > { %v3753_v13 = vsel %vm3632_vm9, %v3752_v41, %v3751_v50  ;;  %v1312_v21 = vand.u32 8388607, %v1305_v26  ;;  %v8629_v1 = vadd.s32 %v4955_v57, %v4951_v25  ;;  %v8631_v42 = vshrl.u32 %v1317_v8, 5 }
 0x43e   : > { %v3756_v23 = vsel %vm8609_vm4, %v8297_v47, %v3753_v13  ;;  %v8627_v28 = vadd.s32 %v4939_v54, %v4930_v10  ;;  %v4962_v6 = vadd.s32 %v4961_v24, %v4952_v38  ;;  %v1325_v45 = vshll.u32 %v5840_v14, %v1319_v63 }
 0x43f   : > { %v3758_v15 = vmul.f32 %v3756_v23, %v3756_v23  ;;  %v1328_v58 = vshll.u32 %v5841_v16, %v1319_v63  ;;  %v1326_v17 = vshrl.u32 %v5841_v16, %v8618_v31  ;;  %v1329_v19 = vshrl.u32 %v5842_v18, %v8618_v31 }
 0x440   : > { %vm4965_vm3 = vc.u32 %v8627_v28, %v8629_v1  ;;  %v4966_v53 = vadd.s32 1, %v4962_v6  ;;  %v1322_v7 = vshll.u32 %v5839_v12, %v1319_v63  ;;  %v1323_v52 = vshrl.u32 %v5840_v14, %v8618_v31 }
 0x441   : > { %v3759_v33 = vmul.f32 -0.001358992, %v3758_v15  ;;  %v3766_v49 = vmul.f32 -0.00019511016, %v3758_v15  ;;  %v1331_v59 = vshll.u32 %v5842_v18, %v1319_v63  ;;  %v1332_v44 = vshrl.u32 %v5843_v20, %v8618_v31 }
 0x442   : > { %v4967_v30 = vsel %vm4965_vm3, %v4966_v53, %v4962_v6  ;;  %v1334_v51 = vshll.u32 %v5843_v20, %v1319_v63  ;;  %v1335_v37 = vshrl.u32 %v5844_v29, %v8618_v31  ;;  %v3774_v25 = vadd.s32 3, %v3757_v32 }
 0x443   : > { %v3760_v40 = vadd.f32 0.041655596, %v3759_v33  ;;  %v3767_v48 = vadd.f32 0.008332121, %v3766_v49  ;;  %v4968_v3 = vadd.s32 %v4967_v30, %v4963_v27  ;;  %v8650_v62 = vor.u32 %v1326_v17, %v1325_v45 }
 0x444   : > { %v1330_v46 = vor.u32 %v1329_v19, %v1328_v58  ;;  %v1333_v57 = vor.u32 %v1332_v44, %v1331_v59  ;;  %v1336_v11 = vor.u32 %v1335_v37, %v1334_v51  ;;  %v1313_v4 = vor.u32 8388608, %v1312_v21 }
 0x445   : > { %v3761_v0 = vmul.f32 %v3760_v40, %v3758_v15  ;;  %v3768_v56 = vmul.f32 %v3767_v48, %v3758_v15  ;;  %v4969_v9 = vadd.s32 536870912, %v4968_v3  ;;  %v8652_v41 = vor.u32 %v1323_v52, %v1322_v7  ;;  %v321_v7 = vpop.f32.mrf.mxu1 }
 0x446   : > { %vm1337_vm5 = vcmp.lt.s32.totalorder %v8631_v42, 1  ;;  %vm1340_vm6 = vcmp.lt.s32.totalorder %v8631_v42, 4  ;;  %vm1339_vm7 = vcmp.lt.s32.totalorder %v8631_v42, 3  ;;  %v3775_v55 = vand.u32 3, %v3774_v25 }
 0x447   : > { %v3762_v50 = vadd.f32 -0.4999988, %v3761_v0  ;;  %v3769_v34 = vadd.f32 -0.16666654, %v3768_v56  ;;  %v8656_v8 = vshrl.u32 %v4969_v9, 30  ;;  %v1349_v10 = vsel %vm1337_vm5, %v8650_v62, %v1330_v46 }
 0x448   : > { %v1346_v5 = vsel %vm1340_vm6, %v1333_v57, 920167782  ;;  %v1350_v22 = vsel %vm1340_vm6, %v1336_v11, 1326507024  ;;  %v1345_v38 = vsel %vm1337_vm5, %v8652_v41, %v8650_v62  ;;  %v8675_v32 = vshll.u32 %v1313_v4, 8 }
 0x449   : > { %v3763_v39 = vmul.f32 %v3762_v50, %v3758_v15  ;;  %v3770_v43 = vmul.f32 %v3769_v34, %v3758_v15  ;;  %v4971_v13 = vshll.u32 %v8656_v8, 30  ;;  %v1347_v54 = vsel %vm1339_vm7, %v1330_v46, %v1346_v5 }
 0x44a   : > { %v1351_v24 = vsel %vm1339_vm7, %v1333_v57, %v1350_v22  ;;  %vm1338_vm8 = vcmp.lt.s32.totalorder %v8631_v42, 2  ;;  %vm3776_vm10 = vcmp.lt.s32.totalorder %v3775_v55, 2  ;;  %vm3777_vm9 = vcmp.eq.s32.totalorder %v3775_v55, 0 }
 0x44b   : > { %v3764_v63 = vadd.f32 1.0, %v3763_v39  ;;  %v3771_v2 = vadd.f32 1.0, %v3770_v43  ;;  %v4972_v21 = vsub.s32 %v4968_v3, %v4971_v13  ;;  %v1352_v6 = vsel %vm1338_vm8, %v1349_v10, %v1351_v24 }
 0x44c   : > { %v1348_v45 = vsel %vm1338_vm8, %v1345_v38, %v1347_v54  ;;  %vm3780_vm11 = vcmp.eq.s32.totalorder %v3775_v55, 2  ;;  %v1354_v58 = vand.u32 65535, %v8675_v32  ;;  %v1357_v53 = vshrl.u32 %v1352_v6, 16 }
 0x44d   : > { %v3772_v15 = vmul.f32 %v3771_v2, %v3756_v23  ;;  %v3781_v27 = vxor.u32 2147483648, %v3764_v63  ;;  %vm4973_vm13 = vcmp.lt.s32.totalorder %v4972_v21, 0  ;;  %v4974_v49 = vsub.s32 0, %v4972_v21 }
 0x44e   : > { %v1356_v23 = vand.u32 65535, %v1352_v6  ;;  %v1355_v48 = vshrl.u32 %v8675_v32, 16  ;;  %vm3773_vm12 = vweird.f32 %v8297_v47  ;;  %v1379_v59 = vshrl.u32 %v1348_v45, 16  ;;  %v8694_v47 = vld [vmem:[%s9513_s2] ss:$0 sm:$0xff] }
 0x44f   : > { %v3778_v33 = vxor.u32 2147483648, %v3772_v15  ;;  %v3782_v19 = vsel %vm3780_vm11, %v3781_v27, %v3772_v15  ;;  %v4975_v40 = vsel %vm4973_vm13, %v4974_v49, %v4972_v21  ;;  %v1359_v51 = vmul.u32 %v1357_v53, %v1354_v58 }
 0x450   : > { %v4976_v30 = vclz %v4975_v40  ;;  %v1360_v0 = vmul.u32 %v1356_v23, %v1355_v48  ;;  %v1378_v56 = vand.u32 65535, %v1348_v45  ;;  %v4964_v3 = vadd.s32 %v8629_v1, %v8627_v28 }
 0x451   : > { %v3779_v17 = vsel %vm3777_vm9, %v3764_v63, %v3778_v33  ;;  %v1321_v25 = vshrl.u32 %v5839_v12, %v8618_v31  ;;  %v8697_v57 = vadd.f32 %v8694_v47, %v321_v7  ;;  %v1342_v50 = vsel %vm1340_vm6, %v1330_v46, 2102212464 }
 0x452   : > { %v3783_v52 = vsel %vm3776_vm10, %v3779_v17, %v3782_v19  ;;  %v5565_v37 = vadd.s32 4294967294, %v4976_v30  ;;  %v1358_v34 = vmul.u32 %v1356_v23, %v1354_v58  ;;  %v1361_v9 = vmul.u32 %v1357_v53, %v1355_v48 }
 0x453   : > { %v3784_v44 = vsel %vm3773_vm12, nan, %v3783_v52  ;;  %v1362_v11 = vshll.u32 %v1359_v51, 16  ;;  %v1363_v28 = vshrl.u32 %v1359_v51, 16  ;;  %v1364_v1 = vshll.u32 %v1360_v0, 16 }
 0x454   : > { %5356 = vst [vmem:[%s6323_s27 + $0xa8] sm:$0xff] %v3784_v44  ;;  %vm5566_vm14 = vcmp.lt.s32.totalorder %v5565_v37, 0  ;;  %v1381_v4 = vmul.u32 %v1379_v59, %v1354_v58  ;;  %vm4872_vm0 = vcmp.lt.s32.totalorder %v8468_v61, 0  ;;  %v1382_v43 = vmul.u32 %v1378_v56, %v1355_v48 }
 0x455   : > { %v4979_v31 = vsel %vm5566_vm14, 0, %v5565_v37  ;;  %vm1366_vm15 = vc.u32 %v1358_v34, %v1362_v11  ;;  %v1368_v39 = vadd.s32 %v1362_v11, %v1358_v34  ;;  %v1380_v63 = vmul.u32 %v1378_v56, %v1354_v58 }
 0x456   : > { %v4980_v55 = vsub.s32 32, %v4979_v31  ;;  %v4984_v5 = vsub.s32 4294967266, %v4979_v31  ;;  %v1367_v22 = vsel %vm1366_vm15, 1, %v5845_v35  ;;  %v1383_v46 = vmul.u32 %v1379_v59, %v1355_v48 }
 0x457   : > { %v1369_v2 = vadd.s32 %v1367_v22, %v1361_v9  ;;  %vm1370_vm1 = vc.u32 %v1368_v39, %v1364_v1  ;;  %v1384_v13 = vshll.u32 %v1381_v4, 16  ;;  %v4981_v10 = vshll.u32 %v4972_v21, %v4979_v31 }
 0x458   : > { %v4982_v38 = vshrl.u32 %v4964_v3, %v4980_v55  ;;  %v4985_v54 = vadd.s32 127, %v4984_v5  ;;  %v1371_v24 = vsel %vm1370_vm1, 1, %v5845_v35  ;;  %v1386_v27 = vshll.u32 %v1382_v43, 16 }
 0x459   : > { %v1373_v15 = vadd.s32 %v1371_v24, %v1369_v2  ;;  %vm1388_vm2 = vc.u32 %v1380_v63, %v1384_v13  ;;  %v1390_v6 = vadd.s32 %v1384_v13, %v1380_v63  ;;  %v4994_v45 = vsub.s32 4, %v8656_v8 }
 0x45a   : > { %v4983_v33 = vor.u32 %v4982_v38, %v4981_v10  ;;  %v4986_v49 = vshll.u32 %v4985_v54, 23  ;;  %v1389_v23 = vsel %vm1388_vm2, 1, %v5845_v35  ;;  %v2545_v17 = vand.u32 2147483647, %v8697_v57 }
 0x45b   : > { %v1374_v58 = vadd.s32 %v1373_v15, %v1363_v28  ;;  %v1391_v53 = vadd.s32 %v1389_v23, %v1383_v46  ;;  %vm1392_vm4 = vc.u32 %v1390_v6, %v1386_v27  ;;  %v1341_v19 = vsel %vm1337_vm5, %v1321_v25, %v8652_v41 }
 0x45c   : > { %v4987_v21 = vor.u32 4788187, %v4986_v49  ;;  %v1365_v40 = vshrl.u32 %v1360_v0, 16  ;;  %v1393_v48 = vsel %vm1392_vm4, 1, %v5845_v35  ;;  %v1343_v7 = vsel %vm1339_vm7, %v8650_v62, %v1342_v50  ;;  %v345_v62 = vpop.f32.mrf.mxu2 }
 0x45d   : > { %v1385_v52 = vshrl.u32 %v1381_v4, 16  ;;  %v1395_v30 = vadd.s32 %v1393_v48, %v1391_v53  ;;  %v2548_v59 = vand.u32 2139095040, %v8697_v57  ;;  %v4990_v51 = vcvt.s32.f32 %v4983_v33 }
 0x45e   : > { %v4988_v44 = vand.u32 2147483647, %v4987_v21  ;;  %v4995_v56 = vsel %vm4872_vm0, %v4994_v45, %v8656_v8  ;;  %v1375_v3 = vadd.s32 %v1374_v58, %v1365_v40  ;;  %v1387_v37 = vshrl.u32 %v1382_v43, 16 }
 0x45f   : > { %v1396_v41 = vadd.s32 %v1395_v30, %v1385_v52  ;;  %v2549_v0 = vshrl.u32 %v2548_v59, 23  ;;  %v2552_v25 = vand.u32 8388607, %v2545_v17  ;;  %v1394_v9 = vadd.s32 %v1390_v6, %v1386_v27 }
 0x460   : > { %v4991_v34 = vmul.f32 %v4990_v51, %v4988_v44  ;;  %vm4871_vm3 = vcmp.le.f32.partialorder %v4870_v60, 0.7853982  ;;  %v1344_v50 = vsel %vm1338_vm8, %v1341_v19, %v1343_v7  ;;  %v8725_v43 = vadd.f32 %v8694_v47, %v345_v62 }
 0x461   : > { %v1397_v11 = vadd.s32 %v1396_v41, %v1387_v37  ;;  %v5519_v28 = vadd.s32 4294967169, %v2549_v0  ;;  %v4997_v8 = vsel %vm4871_vm3, 0, %v4995_v56  ;;  %vm1400_vm5 = vc.u32 %v1375_v3, %v1394_v9 }
 0x462   : > { %v4992_v1 = vxor.u32 2147483648, %v4991_v34  ;;  %v2553_v31 = vor.u32 8388608, %v2552_v25  ;;  %v1398_v5 = vmul.u32 %v8675_v32, %v1344_v50  ;;  %v5014_v42 = vadd.s32 3, %v4997_v8 }
 0x463   : > { %v1401_v4 = vadd.s32 1, %v1397_v11  ;;  %v2555_v39 = vadd.s32 1, %v5519_v28  ;;  %v3788_v38 = vand.u32 2139095040, %v8725_v43  ;;  %v8736_v49 = vadd.s32 %v1394_v9, %v1375_v3 }
 0x464   : > { %v4993_v55 = vsel %vm4872_vm0, %v4992_v1, %v4991_v34  ;;  %v8731_v10 = vshll.u32 %v2553_v31, 8  ;;  %v8734_v27 = vand.u32 3, %v5014_v42  ;;  %v3785_v53 = vand.u32 2147483647, %v8725_v43 }
 0x465   : > { %v4996_v60 = vsel %vm4871_vm3, %v8468_v61, %v4993_v55  ;;  %v1402_v22 = vsel %vm1400_vm5, %v1401_v4, %v1397_v11  ;;  %vm2556_vm6 = vcmp.gt.s32.totalorder %v2555_v39, 0  ;;  %v3789_v21 = vshrl.u32 %v3788_v38, 23 }
 0x466   : > { %v4998_v63 = vmul.f32 %v4996_v60, %v4996_v60  ;;  %v1403_v2 = vadd.s32 %v1402_v22, %v1398_v5  ;;  %v2557_v46 = vsel %vm2556_vm6, %v2555_v39, 0  ;;  %v8740_v58 = vand.u32 65535, %v8731_v10 }
 0x467   : > { %v2559_v13 = vand.u32 31, %v2557_v46  ;;  %vm1307_vm7 = vcmp.lt.s32.totalorder %v8499_v36, 0  ;;  %vm5020_vm8 = vcmp.eq.s32.totalorder %v8734_v27, 2  ;;  %v8752_v37 = vshrl.u32 %v2557_v46, 5 }
 0x468   : > { %v4999_v54 = vmul.f32 -0.001358992, %v4998_v63  ;;  %v5006_v24 = vmul.f32 -0.00019511016, %v4998_v63  ;;  %v1404_v15 = vadd.s32 536870912, %v1403_v2  ;;  %vm5017_vm10 = vcmp.eq.s32.totalorder %v8734_v27, 0 }
 0x469   : > { %v2560_v6 = vsub.s32 32, %v2559_v13  ;;  %v2562_v23 = vshll.u32 %v5839_v12, %v2559_v13  ;;  %v2565_v7 = vshll.u32 %v5840_v14, %v2559_v13  ;;  %v2571_v59 = vshll.u32 %v5842_v18, %v2559_v13 }
 0x46a   : > { %v5000_v32 = vadd.f32 0.041655596, %v4999_v54  ;;  %v5007_v33 = vadd.f32 0.008332121, %v5006_v24  ;;  %v1405_v45 = vshrl.u32 %v1404_v15, 30  ;;  %v2568_v41 = vshll.u32 %v5841_v16, %v2559_v13 }
 0x46b   : > { %v2563_v52 = vshrl.u32 %v5840_v14, %v2560_v6  ;;  %v2566_v30 = vshrl.u32 %v5841_v16, %v2560_v6  ;;  %v2572_v44 = vshrl.u32 %v5843_v20, %v2560_v6  ;;  %v2569_v0 = vshrl.u32 %v5842_v18, %v2560_v6 }
 0x46c   : > { %v5001_v19 = vmul.f32 %v5000_v32, %v4998_v63  ;;  %v5008_v40 = vmul.f32 %v5007_v33, %v4998_v63  ;;  %v1406_v48 = vshll.u32 %v1405_v45, 30  ;;  %v2574_v25 = vshll.u32 %v5843_v20, %v2559_v13 }
 0x46d   : > { %v2575_v34 = vshrl.u32 %v5844_v29, %v2560_v6  ;;  %vm5016_vm9 = vcmp.lt.s32.totalorder %v8734_v27, 2  ;;  %vm5013_vm11 = vweird.f32 %v8468_v61  ;;  %v1429_v11 = vsub.s32 4, %v1405_v45 }
 0x46e   : > { %v5002_v51 = vadd.f32 -0.4999988, %v5001_v19  ;;  %v5009_v56 = vadd.f32 -0.16666654, %v5008_v40  ;;  %v8750_v3 = vsub.s32 %v1403_v2, %v1406_v48  ;;  %v2564_v28 = vor.u32 %v2563_v52, %v2562_v23 }
 0x46f   : > { %v2567_v1 = vor.u32 %v2566_v30, %v2565_v7  ;;  %v2573_v8 = vor.u32 %v2572_v44, %v2571_v59  ;;  %vm2577_vm12 = vcmp.lt.s32.totalorder %v8752_v37, 1  ;;  %v2570_v5 = vor.u32 %v2569_v0, %v2568_v41 }
 0x470   : > { %v5003_v9 = vmul.f32 %v5002_v51, %v4998_v63  ;;  %v5010_v62 = vmul.f32 %v5009_v56, %v4998_v63  ;;  %vm1408_vm13 = vcmp.lt.s32.totalorder %v8750_v3, 0  ;;  %v1409_v50 = vsub.s32 0, %v8750_v3 }
 0x471   : > { %vm2580_vm14 = vcmp.lt.s32.totalorder %v8752_v37, 4  ;;  %v2595_v42 = vshrl.u32 %v8731_v10, 16  ;;  %vm8769_vm0 = vcmp.le.f32.partialorder %v1305_v26, 0.7853982  ;;  %v2576_v46 = vor.u32 %v2575_v34, %v2574_v25 }
 0x472   : > { %v5004_v4 = vadd.f32 1.0, %v5003_v9  ;;  %v5011_v31 = vadd.f32 1.0, %v5010_v62  ;;  %v1410_v39 = vsel %vm1408_vm13, %v1409_v50, %v8750_v3  ;;  %vm2579_vm15 = vcmp.lt.s32.totalorder %v8752_v37, 3 }
 0x473   : > { %v1411_v55 = vclz %v1410_v39  ;;  %v2561_v38 = vshrl.u32 %v5839_v12, %v2560_v6  ;;  %v2585_v54 = vsel %vm2577_vm12, %v2564_v28, %v2567_v1  ;;  %v5543_v24 = vadd.s32 4294967169, %v3789_v21 }
 0x474   : > { %v5012_v22 = vmul.f32 %v5011_v31, %v4996_v60  ;;  %v5021_v63 = vxor.u32 2147483648, %v5004_v4  ;;  %v8779_v60 = vsel %vm1307_vm7, %v1429_v11, %v1405_v45  ;;  %vm2578_vm1 = vcmp.lt.s32.totalorder %v8752_v37, 2 }
 0x475   : > { %v5496_v13 = vadd.s32 4294967294, %v1411_v55  ;;  %v2586_v26 = vsel %vm2580_vm14, %v2573_v8, 920167782  ;;  %v2589_v33 = vsel %vm2577_vm12, %v2567_v1, %v2570_v5  ;;  %v2590_v19 = vsel %vm2580_vm14, %v2576_v46, 1326507024 }
 0x476   : > { %v5018_v15 = vxor.u32 2147483648, %v5012_v22  ;;  %v5022_v32 = vsel %vm5020_vm8, %v5021_v63, %v5012_v22  ;;  %v2587_v6 = vsel %vm2579_vm15, %v2570_v5, %v2586_v26  ;;  %v2582_v52 = vsel %vm2580_vm14, %v2570_v5, 2102212464 }
 0x477   : > { %vm5497_vm2 = vcmp.lt.s32.totalorder %v5496_v13, 0  ;;  %v2588_v21 = vsel %vm2578_vm1, %v2585_v54, %v2587_v6  ;;  %v2591_v59 = vsel %vm2579_vm15, %v2573_v8, %v2590_v19  ;;  %v3795_v61 = vadd.s32 1, %v5543_v24 }
 0x478   : > { %v5019_v45 = vsel %vm5017_vm10, %v5004_v4, %v5018_v15  ;;  %v1414_v23 = vsel %vm5497_vm2, 0, %v5496_v13  ;;  %v2618_v44 = vand.u32 65535, %v2588_v21  ;;  %v2619_v51 = vshrl.u32 %v2588_v21, 16 }
 0x479   : > { %v5023_v40 = vsel %vm5016_vm9, %v5019_v45, %v5022_v32  ;;  %v1415_v48 = vsub.s32 32, %v1414_v23  ;;  %v1419_v7 = vsub.s32 4294967266, %v1414_v23  ;;  %v1416_v56 = vshll.u32 %v8750_v3, %v1414_v23 }
 0x47a   : > { %v5024_v30 = vsel %vm5013_vm11, nan, %v5023_v40  ;;  %v2592_v0 = vsel %vm2578_vm1, %v2589_v33, %v2591_v59  ;;  %v2621_v9 = vmul.u32 %v2619_v51, %v8740_v58  ;;  %v1432_v11 = vsel %vm8769_vm0, 0, %v8779_v60 }
 0x47b   : > { %5364 = vst [vmem:[%s6323_s27 + $0xe8] sm:$0xff] %v5024_v30  ;;  %v1417_v41 = vshrl.u32 %v8736_v49, %v1415_v48  ;;  %v1420_v27 = vadd.s32 127, %v1419_v7  ;;  %v2596_v25 = vand.u32 65535, %v2592_v0  ;;  %v2597_v34 = vshrl.u32 %v2592_v0, 16 }
 0x47c   : > { %v2622_v8 = vmul.u32 %v2618_v44, %v2595_v42  ;;  %v2581_v3 = vsel %vm2577_vm12, %v2561_v38, %v2564_v28  ;;  %v2583_v49 = vsel %vm2579_vm15, %v2567_v1, %v2582_v52  ;;  %v2620_v55 = vmul.u32 %v2618_v44, %v8740_v58 }
 0x47d   : > { %v1418_v62 = vor.u32 %v1417_v41, %v1416_v56  ;;  %v1421_v50 = vshll.u32 %v1420_v27, 23  ;;  %v2599_v4 = vmul.u32 %v2597_v34, %v8740_v58  ;;  %v2600_v31 = vmul.u32 %v2596_v25, %v2595_v42 }
 0x47e   : > { %v2623_v5 = vmul.u32 %v2619_v51, %v2595_v42  ;;  %v2624_v22 = vshll.u32 %v2621_v9, 16  ;;  %v2598_v46 = vmul.u32 %v2596_v25, %v8740_v58  ;;  %v2601_v13 = vmul.u32 %v2597_v34, %v2595_v42 }
 0x47f   : > { %v1422_v39 = vor.u32 4788187, %v1421_v50  ;;  %v1425_v63 = vcvt.s32.f32 %v1418_v62  ;;  %v2602_v54 = vshll.u32 %v2599_v4, 16  ;;  %v2604_v15 = vshll.u32 %v2600_v31, 16 }
 0x480   : > { %v2626_v60 = vshll.u32 %v2622_v8, 16  ;;  %vm2628_vm4 = vc.u32 %v2620_v55, %v2624_v22  ;;  %v2630_v38 = vadd.s32 %v2624_v22, %v2620_v55  ;;  %vm3796_vm5 = vcmp.gt.s32.totalorder %v3795_v61, 0 }
 0x481   : > { %v1423_v24 = vand.u32 2147483647, %v1422_v39  ;;  %vm2606_vm3 = vc.u32 %v2598_v46, %v2602_v54  ;;  %v2608_v28 = vadd.s32 %v2602_v54, %v2598_v46  ;;  %v2629_v1 = vsel %vm2628_vm4, 1, %v5845_v35 }
 0x482   : > { %v2607_v32 = vsel %vm2606_vm3, 1, %v5845_v35  ;;  %v2631_v6 = vadd.s32 %v2629_v1, %v2623_v5  ;;  %v2625_v45 = vshrl.u32 %v2621_v9, 16  ;;  %vm2632_vm8 = vc.u32 %v2630_v38, %v2626_v60 }
 0x483   : > { %v1426_v26 = vmul.f32 %v1425_v63, %v1423_v24  ;;  %v2609_v33 = vadd.s32 %v2607_v32, %v2601_v13  ;;  %vm2610_vm6 = vc.u32 %v2608_v28, %v2604_v15  ;;  %v2633_v23 = vsel %vm2632_vm8, 1, %v5845_v35 }
 0x484   : > { %v2611_v42 = vsel %vm2610_vm6, 1, %v5845_v35  ;;  %v3797_v21 = vsel %vm3796_vm5, %v3795_v61, 0  ;;  %v2603_v19 = vshrl.u32 %v2599_v4, 16  ;;  %v2635_v48 = vadd.s32 %v2633_v23, %v2631_v6 }
 0x485   : > { %v1427_v58 = vxor.u32 2147483648, %v1426_v26  ;;  %v2613_v40 = vadd.s32 %v2611_v42, %v2609_v33  ;;  %v3799_v7 = vand.u32 31, %v3797_v21  ;;  %v2584_v30 = vsel %vm2578_vm1, %v2581_v3, %v2583_v49 }
 0x486   : > { %v2605_v59 = vshrl.u32 %v2600_v31, 16  ;;  %v2627_v44 = vshrl.u32 %v2622_v8, 16  ;;  %v2636_v41 = vadd.s32 %v2635_v48, %v2625_v45  ;;  %v1449_v25 = vadd.s32 3, %v1432_v11 }
 0x487   : > { %v1428_v52 = vsel %vm1307_vm7, %v1427_v58, %v1426_v26  ;;  %v2614_v56 = vadd.s32 %v2613_v40, %v2603_v19  ;;  %v8831_v27 = vsub.s32 32, %v3799_v7  ;;  %v3792_v34 = vand.u32 8388607, %v3785_v53 }
 0x488   : > { %v1431_v51 = vsel %vm8769_vm0, %v8499_v36, %v1428_v52  ;;  %v8837_v61 = vadd.s32 %v2630_v38, %v2626_v60  ;;  %v2637_v37 = vadd.s32 %v2636_v41, %v2627_v44  ;;  %v2638_v62 = vmul.u32 %v8731_v10, %v2584_v30 }
 0x489   : > { %v1433_v0 = vmul.f32 %v1431_v51, %v1431_v51  ;;  %v8835_v9 = vadd.s32 %v2614_v56, %v2605_v59  ;;  %v8840_v2 = vshrl.u32 %v3797_v21, 5  ;;  %v3805_v3 = vshll.u32 %v5840_v14, %v3799_v7 }
 0x48a   : > { %v2641_v11 = vadd.s32 1, %v2637_v37  ;;  %v3806_v49 = vshrl.u32 %v5841_v16, %v8831_v27  ;;  %v3809_v4 = vshrl.u32 %v5842_v18, %v8831_v27  ;;  %v3803_v10 = vshrl.u32 %v5840_v14, %v8831_v27 }
 0x48b   : > { %v1434_v50 = vmul.f32 -0.001358992, %v1433_v0  ;;  %v1441_v8 = vmul.f32 -0.00019511016, %v1433_v0  ;;  %vm2640_vm7 = vc.u32 %v8835_v9, %v8837_v61  ;;  %v3808_v55 = vshll.u32 %v5841_v16, %v3799_v7 }
 0x48c   : > { %v2642_v5 = vsel %vm2640_vm7, %v2641_v11, %v2637_v37  ;;  %v3811_v22 = vshll.u32 %v5842_v18, %v3799_v7  ;;  %v3812_v63 = vshrl.u32 %v5843_v20, %v8831_v27  ;;  %v3814_v46 = vshll.u32 %v5843_v20, %v3799_v7  ;;  %v369_v11 = vpop.f32.mrf.mxu3 }
 0x48d   : > { %v1435_v31 = vadd.f32 0.041655596, %v1434_v50  ;;  %v1442_v39 = vadd.f32 0.008332121, %v1441_v8  ;;  %v2643_v24 = vadd.s32 %v2642_v5, %v2638_v62  ;;  %v3815_v15 = vshrl.u32 %v5844_v29, %v8831_v27 }
 0x48e   : > { %v3802_v60 = vshll.u32 %v5839_v12, %v3799_v7  ;;  %v8859_v28 = vor.u32 %v3806_v49, %v3805_v3  ;;  %v3810_v1 = vor.u32 %v3809_v4, %v3808_v55  ;;  %v3813_v38 = vor.u32 %v3812_v63, %v3811_v22 }
 0x48f   : > { %v1436_v13 = vmul.f32 %v1435_v31, %v1433_v0  ;;  %v1443_v54 = vmul.f32 %v1442_v39, %v1433_v0  ;;  %v2644_v6 = vadd.s32 536870912, %v2643_v24  ;;  %v3816_v33 = vor.u32 %v3815_v15, %v3814_v46 }
 0x490   : > { %v1450_v45 = vand.u32 3, %v1449_v25  ;;  %v3793_v58 = vor.u32 8388608, %v3792_v34  ;;  %v8861_v42 = vor.u32 %v3803_v10, %v3802_v60  ;;  %vm3820_vm10 = vcmp.lt.s32.totalorder %v8840_v2, 4 }
 0x491   : > { %v1437_v26 = vadd.f32 -0.4999988, %v1436_v13  ;;  %v1444_v32 = vadd.f32 -0.16666654, %v1443_v54  ;;  %v8863_v19 = vshrl.u32 %v2644_v6, 30  ;;  %vm3817_vm9 = vcmp.lt.s32.totalorder %v8840_v2, 1 }
 0x492   : > { %vm3819_vm13 = vcmp.lt.s32.totalorder %v8840_v2, 3  ;;  %v3826_v40 = vsel %vm3820_vm10, %v3813_v38, 920167782  ;;  %v3830_v48 = vsel %vm3820_vm10, %v3816_v33, 1326507024  ;;  %v3829_v59 = vsel %vm3817_vm9, %v8859_v28, %v3810_v1 }
 0x493   : > { %v1438_v23 = vmul.f32 %v1437_v26, %v1433_v0  ;;  %v1445_v21 = vmul.f32 %v1444_v32, %v1433_v0  ;;  %v2646_v30 = vshll.u32 %v8863_v19, 30  ;;  %v3825_v44 = vsel %vm3817_vm9, %v8861_v42, %v8859_v28 }
 0x494   : > { %v3827_v56 = vsel %vm3819_vm13, %v3810_v1, %v3826_v40  ;;  %v3831_v41 = vsel %vm3819_vm13, %v3813_v38, %v3830_v48  ;;  %v8884_v0 = vshll.u32 %v3793_v58, 8  ;;  %vm3818_vm11 = vcmp.lt.s32.totalorder %v8840_v2, 2 }
 0x495   : > { %v1439_v7 = vadd.f32 1.0, %v1438_v23  ;;  %v1446_v52 = vadd.f32 1.0, %v1445_v21  ;;  %v2647_v37 = vsub.s32 %v2643_v24, %v2646_v30  ;;  %vm1448_vm12 = vweird.f32 %v8499_v36 }
 0x496   : > { %vm1451_vm14 = vcmp.lt.s32.totalorder %v1450_v45, 2  ;;  %vm1452_vm0 = vcmp.eq.s32.totalorder %v1450_v45, 0  ;;  %v3832_v62 = vsel %vm3818_vm11, %v3829_v59, %v3831_v41  ;;  %v3828_v3 = vsel %vm3818_vm11, %v3825_v44, %v3827_v56 }
 0x497   : > { %v1447_v25 = vmul.f32 %v1446_v52, %v1431_v51  ;;  %v1456_v34 = vxor.u32 2147483648, %v1439_v7  ;;  %vm2648_vm15 = vcmp.lt.s32.totalorder %v2647_v37, 0  ;;  %v2649_v8 = vsub.s32 0, %v2647_v37 }
 0x498   : > { %vm1455_vm1 = vcmp.eq.s32.totalorder %v1450_v45, 2  ;;  %v3834_v51 = vand.u32 65535, %v8884_v0  ;;  %v3836_v49 = vand.u32 65535, %v3832_v62  ;;  %v3837_v4 = vshrl.u32 %v3832_v62, 16 }
 0x499   : > { %v1453_v50 = vxor.u32 2147483648, %v1447_v25  ;;  %v1457_v39 = vsel %vm1455_vm1, %v1456_v34, %v1447_v25  ;;  %v2650_v10 = vsel %vm2648_vm15, %v2649_v8, %v2647_v37  ;;  %v3835_v55 = vshrl.u32 %v8884_v0, 16 }
 0x49a   : > { %v2651_v22 = vclz %v2650_v10  ;;  %v3859_v63 = vshrl.u32 %v3828_v3, 16  ;;  %v8896_v46 = vadd.f32 %v8694_v47, %v369_v11  ;;  %v3839_v54 = vmul.u32 %v3837_v4, %v3834_v51 }
 0x49b   : > { %v1454_v31 = vsel %vm1452_vm0, %v1439_v7, %v1453_v50  ;;  %v3840_v24 = vmul.u32 %v3836_v49, %v3835_v55  ;;  %v3858_v15 = vand.u32 65535, %v3828_v3  ;;  %v2639_v60 = vadd.s32 %v8837_v61, %v8835_v9 }
 0x49c   : > { %v1458_v5 = vsel %vm1451_vm14, %v1454_v31, %v1457_v39  ;;  %v5520_v38 = vadd.s32 4294967294, %v2651_v22  ;;  %v3801_v26 = vshrl.u32 %v5839_v12, %v8831_v27  ;;  %v3822_v32 = vsel %vm3820_vm10, %v3810_v1, 2102212464 }
 0x49d   : > { %v1459_v13 = vsel %vm1448_vm12, nan, %v1458_v5  ;;  %v2669_v6 = vsub.s32 4, %v8863_v19  ;;  %v3838_v33 = vmul.u32 %v3836_v49, %v3834_v51  ;;  %v3841_v45 = vmul.u32 %v3837_v4, %v3835_v55  ;;  %v300_v5 = vpop.f32.mrf.mxu0 }
 0x49e   : > { %5341 = vst [vmem:[%s6323_s27 + $0x30] sm:$0xff] %v1459_v13  ;;  %v3842_v36 = vshll.u32 %v3839_v54, 16  ;;  %vm2547_vm2 = vcmp.lt.s32.totalorder %v8697_v57, 0  ;;  %vm5521_vm4 = vcmp.lt.s32.totalorder %v5520_v38, 0  ;;  %v3843_v58 = vshrl.u32 %v3839_v54, 16 }
 0x49f   : > { %v3844_v23 = vshll.u32 %v3840_v24, 16  ;;  %v3861_v21 = vmul.u32 %v3859_v63, %v3834_v51  ;;  %v2654_v40 = vsel %vm5521_vm4, 0, %v5520_v38  ;;  %v3862_v61 = vmul.u32 %v3858_v15, %v3835_v55 }
 0x4a0   : > { %vm3846_vm3 = vc.u32 %v3838_v33, %v3842_v36  ;;  %v3848_v9 = vadd.s32 %v3842_v36, %v3838_v33  ;;  %v2655_v48 = vsub.s32 32, %v2654_v40  ;;  %v2659_v27 = vsub.s32 4294967266, %v2654_v40 }
 0x4a1   : > { %v3847_v7 = vsel %vm3846_vm3, 1, %v5845_v35  ;;  %v3860_v1 = vmul.u32 %v3858_v15, %v3834_v51  ;;  %v3863_v30 = vmul.u32 %v3859_v63, %v3835_v55  ;;  %v3864_v59 = vshll.u32 %v3861_v21, 16 }
 0x4a2   : > { %v3849_v52 = vadd.s32 %v3847_v7, %v3841_v45  ;;  %vm3850_vm5 = vc.u32 %v3848_v9, %v3844_v23  ;;  %v2656_v44 = vshll.u32 %v2647_v37, %v2654_v40  ;;  %v2657_v56 = vshrl.u32 %v2639_v60, %v2655_v48 }
 0x4a3   : > { %v2660_v41 = vadd.s32 127, %v2659_v27  ;;  %v3851_v25 = vsel %vm3850_vm5, 1, %v5845_v35  ;;  %v3866_v62 = vshll.u32 %v3862_v61, 16  ;;  %vm3868_vm6 = vc.u32 %v3860_v1, %v3864_v59 }
 0x4a4   : > { %v3853_v34 = vadd.s32 %v3851_v25, %v3849_v52  ;;  %v3870_v50 = vadd.s32 %v3864_v59, %v3860_v1  ;;  %v2658_v8 = vor.u32 %v2657_v56, %v2656_v44  ;;  %v3821_v11 = vsel %vm3817_vm9, %v3801_v26, %v8861_v42 }
 0x4a5   : > { %v2661_v3 = vshll.u32 %v2660_v41, 23  ;;  %v3869_v51 = vsel %vm3868_vm6, 1, %v5845_v35  ;;  %v5025_v37 = vand.u32 2147483647, %v8896_v46  ;;  %v3823_v39 = vsel %vm3819_vm13, %v8859_v28, %v3822_v32 }
 0x4a6   : > { %v3854_v49 = vadd.s32 %v3853_v34, %v3843_v58  ;;  %v3871_v4 = vadd.s32 %v3869_v51, %v3863_v30  ;;  %vm3872_vm8 = vc.u32 %v3870_v50, %v3866_v62  ;;  %v3845_v10 = vshrl.u32 %v3840_v24, 16 }
 0x4a7   : > { %v2662_v31 = vor.u32 4788187, %v2661_v3  ;;  %v3873_v55 = vsel %vm3872_vm8, 1, %v5845_v35  ;;  %v2670_v42 = vsel %vm2547_vm2, %v2669_v6, %v8863_v19  ;;  %v3865_v22 = vshrl.u32 %v3861_v21, 16 }
 0x4a8   : > { %v3875_v63 = vadd.s32 %v3873_v55, %v3871_v4  ;;  %v5028_v13 = vand.u32 2139095040, %v8896_v46  ;;  %v2665_v15 = vcvt.s32.f32 %v2658_v8  ;;  %v3855_v60 = vadd.s32 %v3854_v49, %v3845_v10 }
 0x4a9   : > { %v2663_v54 = vand.u32 2147483647, %v2662_v31  ;;  %v3867_v38 = vshrl.u32 %v3862_v61, 16  ;;  %v5032_v28 = vand.u32 8388607, %v5025_v37  ;;  %v8927_v24 = vadd.f32 %v8694_v47, %v300_v5 }
 0x4aa   : > { %v3876_v26 = vadd.s32 %v3875_v63, %v3865_v22  ;;  %v5029_v33 = vshrl.u32 %v5028_v13, 23  ;;  %v3874_v45 = vadd.s32 %v3870_v50, %v3866_v62  ;;  %vm8931_vm7 = vcmp.le.f32.partialorder %v2545_v17, 0.7853982 }
 0x4ab   : > { %v2666_v32 = vmul.f32 %v2665_v15, %v2663_v54  ;;  %v3824_v6 = vsel %vm3818_vm11, %v3821_v11, %v3823_v39  ;;  %v2672_v21 = vsel %vm8931_vm7, 0, %v2670_v42  ;;  %v5033_v40 = vor.u32 8388608, %v5032_v28 }
 0x4ac   : > { %v3877_v36 = vadd.s32 %v3876_v26, %v3867_v38  ;;  %v5567_v58 = vadd.s32 4294967169, %v5029_v33  ;;  %vm3880_vm10 = vc.u32 %v3855_v60, %v3874_v45  ;;  %v1463_v61 = vand.u32 2139095040, %v8927_v24 }
 0x4ad   : > { %v2667_v23 = vxor.u32 2147483648, %v2666_v32  ;;  %v3878_v48 = vmul.u32 %v8884_v0, %v3824_v6  ;;  %v2689_v1 = vadd.s32 3, %v2672_v21  ;;  %v8946_v44 = vshll.u32 %v5033_v40, 8 }
 0x4ae   : > { %v3881_v47 = vadd.s32 1, %v3877_v36  ;;  %v5035_v9 = vadd.s32 1, %v5567_v58  ;;  %v1464_v56 = vshrl.u32 %v1463_v61, 23  ;;  %v8952_v11 = vadd.s32 %v3874_v45, %v3855_v60 }
 0x4af   : > { %v2668_v17 = vsel %vm2547_vm2, %v2667_v23, %v2666_v32  ;;  %v8948_v8 = vand.u32 3, %v2689_v1  ;;  %v8955_v51 = vand.u32 65535, %v8946_v44  ;;  %v8958_v49 = vshrl.u32 %v8946_v44, 16 }
 0x4b0   : > { %v2671_v2 = vsel %vm8931_vm7, %v8697_v57, %v2668_v17  ;;  %v3882_v27 = vsel %vm3880_vm10, %v3881_v47, %v3877_v36  ;;  %vm5036_vm9 = vcmp.gt.s32.totalorder %v5035_v9, 0  ;;  %v8960_v4 = vadd.s32 4294967169, %v1464_v56 }
 0x4b1   : > { %v2673_v7 = vmul.f32 %v2671_v2, %v2671_v2  ;;  %v3883_v52 = vadd.s32 %v3882_v27, %v3878_v48  ;;  %v5037_v30 = vsel %vm5036_vm9, %v5035_v9, 0  ;;  %vm2695_vm13 = vcmp.eq.s32.totalorder %v8948_v8, 2 }
 0x4b2   : > { %v5039_v59 = vand.u32 31, %v5037_v30  ;;  %v8963_v55 = vshrl.u32 %v5037_v30, 5  ;;  %vm2692_vm11 = vcmp.eq.s32.totalorder %v8948_v8, 0  ;;  %vm2691_vm12 = vcmp.lt.s32.totalorder %v8948_v8, 2 }
 0x4b3   : > { %v2674_v41 = vmul.f32 -0.001358992, %v2673_v7  ;;  %v2681_v25 = vmul.f32 -0.00019511016, %v2673_v7  ;;  %v3884_v34 = vadd.s32 536870912, %v3883_v52  ;;  %vm2688_vm0 = vweird.f32 %v8697_v57 }
 0x4b4   : > { %v5040_v62 = vsub.s32 32, %v5039_v59  ;;  %v5042_v5 = vshll.u32 %v5839_v12, %v5039_v59  ;;  %v5045_v38 = vshll.u32 %v5840_v14, %v5039_v59  ;;  %v5048_v26 = vshll.u32 %v5841_v16, %v5039_v59 }
 0x4b5   : > { %v2675_v50 = vadd.f32 0.041655596, %v2674_v41  ;;  %v2682_v0 = vadd.f32 0.008332121, %v2681_v25  ;;  %v8950_v3 = vshrl.u32 %v3884_v34, 30  ;;  %v5051_v33 = vshll.u32 %v5842_v18, %v5039_v59 }
 0x4b6   : > { %v5043_v42 = vshrl.u32 %v5840_v14, %v5040_v62  ;;  %v5046_v22 = vshrl.u32 %v5841_v16, %v5040_v62  ;;  %v5049_v63 = vshrl.u32 %v5842_v18, %v5040_v62  ;;  %v5052_v60 = vshrl.u32 %v5843_v20, %v5040_v62 }
 0x4b7   : > { %v2676_v31 = vmul.f32 %v2675_v50, %v2673_v7  ;;  %v2683_v39 = vmul.f32 %v2682_v0, %v2673_v7  ;;  %v3886_v10 = vshll.u32 %v8950_v3, 30  ;;  %v5055_v28 = vshrl.u32 %v5844_v29, %v5040_v62 }
 0x4b8   : > { %v5044_v6 = vor.u32 %v5043_v42, %v5042_v5  ;;  %v5047_v36 = vor.u32 %v5046_v22, %v5045_v38  ;;  %v5050_v58 = vor.u32 %v5049_v63, %v5048_v26  ;;  %v5054_v23 = vshll.u32 %v5843_v20, %v5039_v59 }
 0x4b9   : > { %v2677_v13 = vadd.f32 -0.4999988, %v2676_v31  ;;  %v2684_v54 = vadd.f32 -0.16666654, %v2683_v39  ;;  %v8970_v15 = vsub.s32 %v3883_v52, %v3886_v10  ;;  %v5053_v9 = vor.u32 %v5052_v60, %v5051_v33 }
 0x4ba   : > { %v3909_v17 = vsub.s32 4, %v8950_v3  ;;  %v5041_v48 = vshrl.u32 %v5839_v12, %v5040_v62  ;;  %v5056_v27 = vor.u32 %v5055_v28, %v5054_v23  ;;  %vm5057_vm15 = vcmp.lt.s32.totalorder %v8963_v55, 1 }
 0x4bb   : > { %v2678_v32 = vmul.f32 %v2677_v13, %v2673_v7  ;;  %v2685_v45 = vmul.f32 %v2684_v54, %v2673_v7  ;;  %vm3888_vm14 = vcmp.lt.s32.totalorder %v8970_v15, 0  ;;  %v3889_v19 = vsub.s32 0, %v8970_v15 }
 0x4bc   : > { %vm5058_vm1 = vcmp.lt.s32.totalorder %v8963_v55, 2  ;;  %vm3787_vm2 = vcmp.lt.s32.totalorder %v8725_v43, 0  ;;  %vm5059_vm4 = vcmp.lt.s32.totalorder %v8963_v55, 3  ;;  %vm5060_vm3 = vcmp.lt.s32.totalorder %v8963_v55, 4 }
 0x4bd   : > { %v2679_v21 = vadd.f32 1.0, %v2678_v32  ;;  %v2686_v47 = vadd.f32 1.0, %v2685_v45  ;;  %v3890_v40 = vsel %vm3888_vm14, %v3889_v19, %v8970_v15  ;;  %v5065_v30 = vsel %vm5057_vm15, %v5044_v6, %v5047_v36 }
 0x4be   : > { %v3891_v61 = vclz %v3890_v40  ;;  %v5061_v56 = vsel %vm5057_vm15, %v5041_v48, %v5044_v6  ;;  %v5062_v41 = vsel %vm5060_vm3, %v5050_v58, 2102212464  ;;  %v5066_v25 = vsel %vm5060_vm3, %v5053_v9, 920167782 }
 0x4bf   : > { %v2687_v7 = vmul.f32 %v2686_v47, %v2671_v2  ;;  %v2696_v1 = vxor.u32 2147483648, %v2679_v21  ;;  %v5067_v34 = vsel %vm5059_vm4, %v5050_v58, %v5066_v25  ;;  %v5069_v62 = vsel %vm5057_vm15, %v5047_v36, %v5050_v58 }
 0x4c0   : > { %v5544_v52 = vadd.s32 4294967294, %v3891_v61  ;;  %v5068_v31 = vsel %vm5058_vm1, %v5065_v30, %v5067_v34  ;;  %v5070_v39 = vsel %vm5060_vm3, %v5056_v27, 1326507024  ;;  %v5063_v22 = vsel %vm5059_vm4, %v5047_v36, %v5062_v41 }
 0x4c1   : > { %v2693_v59 = vxor.u32 2147483648, %v2687_v7  ;;  %v2697_v2 = vsel %vm2695_vm13, %v2696_v1, %v2687_v7  ;;  %v5071_v13 = vsel %vm5059_vm4, %v5053_v9, %v5070_v39  ;;  %v5098_v54 = vand.u32 65535, %v5068_v31 }
 0x4c2   : > { %vm5545_vm5 = vcmp.lt.s32.totalorder %v5544_v52, 0  ;;  %v5099_v60 = vshrl.u32 %v5068_v31, 16  ;;  %v5072_v33 = vsel %vm5058_vm1, %v5069_v62, %v5071_v13  ;;  %v1460_v57 = vand.u32 2147483647, %v8927_v24 }
 0x4c3   : > { %v2694_v50 = vsel %vm2692_vm11, %v2679_v21, %v2693_v59  ;;  %v3894_v0 = vsel %vm5545_vm5, 0, %v5544_v52  ;;  %v5076_v28 = vand.u32 65535, %v5072_v33  ;;  %v5077_v32 = vshrl.u32 %v5072_v33, 16 }
 0x4c4   : > { %v2698_v10 = vsel %vm2691_vm12, %v2694_v50, %v2697_v2  ;;  %v3895_v5 = vsub.s32 32, %v3894_v0  ;;  %v3899_v42 = vsub.s32 4294967266, %v3894_v0  ;;  %v3896_v38 = vshll.u32 %v8970_v15, %v3894_v0 }
 0x4c5   : > { %v2699_v63 = vsel %vm2688_vm0, nan, %v2698_v10  ;;  %v5101_v45 = vmul.u32 %v5099_v60, %v8955_v51  ;;  %v5102_v36 = vmul.u32 %v5098_v54, %v8958_v49  ;;  %v1470_v58 = vadd.s32 1, %v8960_v4 }
 0x4c6   : > { %5349 = vst [vmem:[%s6323_s27 + $0x70] sm:$0xff] %v2699_v63  ;;  %v3897_v26 = vshrl.u32 %v8952_v11, %v3895_v5  ;;  %v3900_v8 = vadd.s32 127, %v3899_v42  ;;  %v9019_v11 = vsel %vm3787_vm2, %v3909_v17, %v8950_v3  ;;  %v9023_v15 = vsel %vm5058_vm1, %v5061_v56, %v5063_v22 }
 0x4c7   : > { %v5079_v23 = vmul.u32 %v5077_v32, %v8955_v51  ;;  %v5080_v21 = vmul.u32 %v5076_v28, %v8958_v49  ;;  %v5100_v40 = vmul.u32 %v5098_v54, %v8955_v51  ;;  %v5103_v9 = vmul.u32 %v5099_v60, %v8958_v49 }
 0x4c8   : > { %v3898_v19 = vor.u32 %v3897_v26, %v3896_v38  ;;  %v3901_v6 = vshll.u32 %v3900_v8, 23  ;;  %v5104_v61 = vshll.u32 %v5101_v45, 16  ;;  %v5078_v48 = vmul.u32 %v5076_v28, %v8955_v51 }
 0x4c9   : > { %v5081_v3 = vmul.u32 %v5077_v32, %v8958_v49  ;;  %v5082_v17 = vshll.u32 %v5079_v23, 16  ;;  %v5084_v55 = vshll.u32 %v5080_v21, 16  ;;  %v5106_v7 = vshll.u32 %v5102_v36, 16 }
 0x4ca   : > { %v3902_v47 = vor.u32 4788187, %v3901_v6  ;;  %v3905_v4 = vcvt.s32.f32 %v3898_v19  ;;  %vm5108_vm6 = vc.u32 %v5100_v40, %v5104_v61  ;;  %v5110_v30 = vadd.s32 %v5104_v61, %v5100_v40 }
 0x4cb   : > { %vm5086_vm8 = vc.u32 %v5078_v48, %v5082_v17  ;;  %v5088_v1 = vadd.s32 %v5082_v17, %v5078_v48  ;;  %v5109_v52 = vsel %vm5108_vm6, 1, %v5845_v35  ;;  %vm1471_vm7 = vcmp.gt.s32.totalorder %v1470_v58, 0 }
 0x4cc   : > { %v3903_v27 = vand.u32 2147483647, %v3902_v47  ;;  %v5087_v56 = vsel %vm5086_vm8, 1, %v5845_v35  ;;  %v5111_v41 = vadd.s32 %v5109_v52, %v5103_v9  ;;  %v5105_v51 = vshrl.u32 %v5101_v45, 16 }
 0x4cd   : > { %v5089_v25 = vadd.s32 %v5087_v56, %v5081_v3  ;;  %vm5090_vm10 = vc.u32 %v5088_v1, %v5084_v55  ;;  %vm5112_vm9 = vc.u32 %v5110_v30, %v5106_v7  ;;  %v1472_v62 = vsel %vm1471_vm7, %v1470_v58, 0 }
 0x4ce   : > { %v3906_v59 = vmul.f32 %v3905_v4, %v3903_v27  ;;  %v5091_v2 = vsel %vm5090_vm10, 1, %v5845_v35  ;;  %v5113_v34 = vsel %vm5112_vm9, 1, %v5845_v35  ;;  %v5083_v50 = vshrl.u32 %v5079_v23, 16 }
 0x4cf   : > { %v5093_v0 = vadd.s32 %v5091_v2, %v5089_v25  ;;  %v5115_v31 = vadd.s32 %v5113_v34, %v5111_v41  ;;  %v1474_v39 = vand.u32 31, %v1472_v62  ;;  %vm9037_vm13 = vcmp.le.f32.partialorder %v3785_v53, 0.7853982 }
 0x4d0   : > { %v3907_v49 = vxor.u32 2147483648, %v3906_v59  ;;  %v5085_v42 = vshrl.u32 %v5080_v21, 16  ;;  %v5107_v22 = vshrl.u32 %v5102_v36, 16  ;;  %v3912_v53 = vsel %vm9037_vm13, 0, %v9019_v11 }
 0x4d1   : > { %v5094_v13 = vadd.s32 %v5093_v0, %v5083_v50  ;;  %v5116_v54 = vadd.s32 %v5115_v31, %v5105_v51  ;;  %v9046_v60 = vsub.s32 32, %v1474_v39  ;;  %v5118_v26 = vmul.u32 %v8946_v44, %v9023_v15 }
 0x4d2   : > { %v3908_v5 = vsel %vm3787_vm2, %v3907_v49, %v3906_v59  ;;  %v1467_v8 = vand.u32 8388607, %v1460_v57  ;;  %v9057_v28 = vadd.s32 %v5110_v30, %v5106_v7  ;;  %v9059_v45 = vshrl.u32 %v1472_v62, 5 }
 0x4d3   : > { %v3911_v63 = vsel %vm9037_vm13, %v8725_v43, %v3908_v5  ;;  %v9055_v33 = vadd.s32 %v5094_v13, %v5085_v42  ;;  %v5117_v32 = vadd.s32 %v5116_v54, %v5107_v22  ;;  %v1480_v36 = vshll.u32 %v5840_v14, %v1474_v39 }
 0x4d4   : > { %v3913_v38 = vmul.f32 %v3911_v63, %v3911_v63  ;;  %v1483_v58 = vshll.u32 %v5841_v16, %v1474_v39  ;;  %v1481_v11 = vshrl.u32 %v5841_v16, %v9046_v60  ;;  %v1484_v15 = vshrl.u32 %v5842_v18, %v9046_v60 }
 0x4d5   : > { %vm5120_vm11 = vc.u32 %v9055_v33, %v9057_v28  ;;  %v5121_v44 = vadd.s32 1, %v5117_v32  ;;  %v1477_v47 = vshll.u32 %v5839_v12, %v1474_v39  ;;  %v1478_v40 = vshrl.u32 %v5840_v14, %v9046_v60 }
 0x4d6   : > { %v3914_v19 = vmul.f32 -0.001358992, %v3913_v38  ;;  %v3921_v6 = vmul.f32 -0.00019511016, %v3913_v38  ;;  %v1486_v61 = vshll.u32 %v5842_v18, %v1474_v39  ;;  %v1487_v4 = vshrl.u32 %v5843_v20, %v9046_v60 }
 0x4d7   : > { %v5122_v9 = vsel %vm5120_vm11, %v5121_v44, %v5117_v32  ;;  %v1489_v48 = vshll.u32 %v5843_v20, %v1474_v39  ;;  %v1490_v55 = vshrl.u32 %v5844_v29, %v9046_v60  ;;  %v3929_v7 = vadd.s32 3, %v3912_v53 }
 0x4d8   : > { %v3915_v23 = vadd.f32 0.041655596, %v3914_v19  ;;  %v3922_v21 = vadd.f32 0.008332121, %v3921_v6  ;;  %v5123_v27 = vadd.s32 %v5122_v9, %v5118_v26  ;;  %v9078_v1 = vor.u32 %v1481_v11, %v1480_v36 }
 0x4d9   : > { %v1485_v52 = vor.u32 %v1484_v15, %v1483_v58  ;;  %v1488_v30 = vor.u32 %v1487_v4, %v1486_v61  ;;  %v1491_v25 = vor.u32 %v1490_v55, %v1489_v48  ;;  %v1468_v51 = vor.u32 8388608, %v1467_v8 }
 0x4da   : > { %v3916_v3 = vmul.f32 %v3915_v23, %v3913_v38  ;;  %v3923_v17 = vmul.f32 %v3922_v21, %v3913_v38  ;;  %v5124_v41 = vadd.s32 536870912, %v5123_v27  ;;  %v9080_v49 = vor.u32 %v1478_v40, %v1477_v47  ;;  %v324_v47 = vpop.f32.mrf.mxu1 }
 0x4db   : > { %vm1492_vm12 = vcmp.lt.s32.totalorder %v9059_v45, 1  ;;  %vm1495_vm14 = vcmp.lt.s32.totalorder %v9059_v45, 4  ;;  %vm1494_vm0 = vcmp.lt.s32.totalorder %v9059_v45, 3  ;;  %v3930_v50 = vand.u32 3, %v3929_v7 }
 0x4dc   : > { %v3917_v59 = vadd.f32 -0.4999988, %v3916_v3  ;;  %v3924_v56 = vadd.f32 -0.16666654, %v3923_v17  ;;  %v9084_v62 = vshrl.u32 %v5124_v41, 30  ;;  %v1504_v42 = vsel %vm1492_vm12, %v9078_v1, %v1485_v52 }
 0x4dd   : > { %v1501_v0 = vsel %vm1495_vm14, %v1488_v30, 920167782  ;;  %v1505_v31 = vsel %vm1495_vm14, %v1491_v25, 1326507024  ;;  %v1500_v22 = vsel %vm1492_vm12, %v9080_v49, %v9078_v1  ;;  %v9103_v53 = vshll.u32 %v1468_v51, 8 }
 0x4de   : > { %v3918_v2 = vmul.f32 %v3917_v59, %v3913_v38  ;;  %v3925_v34 = vmul.f32 %v3924_v56, %v3913_v38  ;;  %v5126_v5 = vshll.u32 %v9084_v62, 30  ;;  %v1502_v13 = vsel %vm1494_vm0, %v1485_v52, %v1501_v0 }
 0x4df   : > { %v1506_v54 = vsel %vm1494_vm0, %v1488_v30, %v1505_v31  ;;  %vm1493_vm15 = vcmp.lt.s32.totalorder %v9059_v45, 2  ;;  %vm3931_vm1 = vcmp.lt.s32.totalorder %v3930_v50, 2  ;;  %vm3932_vm2 = vcmp.eq.s32.totalorder %v3930_v50, 0 }
 0x4e0   : > { %v3919_v39 = vadd.f32 1.0, %v3918_v2  ;;  %v3926_v10 = vadd.f32 1.0, %v3925_v34  ;;  %v5127_v8 = vsub.s32 %v5123_v27, %v5126_v5  ;;  %v1507_v32 = vsel %vm1493_vm15, %v1504_v42, %v1506_v54 }
 0x4e1   : > { %v1503_v36 = vsel %vm1493_vm15, %v1500_v22, %v1502_v13  ;;  %vm3935_vm3 = vcmp.eq.s32.totalorder %v3930_v50, 2  ;;  %v1509_v58 = vand.u32 65535, %v9103_v53  ;;  %v1512_v44 = vshrl.u32 %v1507_v32, 16 }
 0x4e2   : > { %v3927_v38 = vmul.f32 %v3926_v10, %v3911_v63  ;;  %v3936_v26 = vxor.u32 2147483648, %v3919_v39  ;;  %vm5128_vm4 = vcmp.lt.s32.totalorder %v5127_v8, 0  ;;  %v5129_v6 = vsub.s32 0, %v5127_v8 }
 0x4e3   : > { %v1511_v63 = vand.u32 65535, %v1507_v32  ;;  %v1510_v21 = vshrl.u32 %v9103_v53, 16  ;;  %vm3928_vm5 = vweird.f32 %v8725_v43  ;;  %v1534_v61 = vshrl.u32 %v1503_v36, 16  ;;  %v9122_v43 = vld [vmem:[%s9513_s2] ss:$0 sm:$0xff] }
 0x4e4   : > { %v3933_v19 = vxor.u32 2147483648, %v3927_v38  ;;  %v3937_v15 = vsel %vm3935_vm3, %v3936_v26, %v3927_v38  ;;  %v5130_v23 = vsel %vm5128_vm4, %v5129_v6, %v5127_v8  ;;  %v1514_v48 = vmul.u32 %v1512_v44, %v1509_v58 }
 0x4e5   : > { %v5131_v9 = vclz %v5130_v23  ;;  %v1515_v3 = vmul.u32 %v1511_v63, %v1510_v21  ;;  %v1533_v17 = vand.u32 65535, %v1503_v36  ;;  %v5119_v27 = vadd.s32 %v9057_v28, %v9055_v33 }
 0x4e6   : > { %v3934_v11 = vsel %vm3932_vm2, %v3919_v39, %v3933_v19  ;;  %v1476_v7 = vshrl.u32 %v5839_v12, %v9046_v60  ;;  %v9125_v30 = vadd.f32 %v9122_v43, %v324_v47  ;;  %v1497_v59 = vsel %vm1495_vm14, %v1485_v52, 2102212464 }
 0x4e7   : > { %v3938_v40 = vsel %vm3931_vm1, %v3934_v11, %v3937_v15  ;;  %v5568_v55 = vadd.s32 4294967294, %v5131_v9  ;;  %v1513_v56 = vmul.u32 %v1511_v63, %v1509_v58  ;;  %v1516_v41 = vmul.u32 %v1512_v44, %v1510_v21 }
 0x4e8   : > { %v3939_v4 = vsel %vm3928_vm5, nan, %v3938_v40  ;;  %v1517_v25 = vshll.u32 %v1514_v48, 16  ;;  %v1518_v33 = vshrl.u32 %v1514_v48, 16  ;;  %v1519_v28 = vshll.u32 %v1515_v3, 16 }
 0x4e9   : > { %5357 = vst [vmem:[%s6323_s27 + $0xb0] sm:$0xff] %v3939_v4  ;;  %vm5569_vm6 = vcmp.lt.s32.totalorder %v5568_v55, 0  ;;  %v1536_v51 = vmul.u32 %v1534_v61, %v1509_v58  ;;  %vm5027_vm8 = vcmp.lt.s32.totalorder %v8896_v46, 0  ;;  %v1537_v34 = vmul.u32 %v1533_v17, %v1510_v21 }
 0x4ea   : > { %v5134_v60 = vsel %vm5569_vm6, 0, %v5568_v55  ;;  %vm1521_vm7 = vc.u32 %v1513_v56, %v1517_v25  ;;  %v1523_v2 = vadd.s32 %v1517_v25, %v1513_v56  ;;  %v1535_v39 = vmul.u32 %v1533_v17, %v1509_v58 }
 0x4eb   : > { %v5135_v50 = vsub.s32 32, %v5134_v60  ;;  %v5139_v0 = vsub.s32 4294967266, %v5134_v60  ;;  %v1522_v31 = vsel %vm1521_vm7, 1, %v5845_v35  ;;  %v1538_v52 = vmul.u32 %v1534_v61, %v1510_v21 }
 0x4ec   : > { %v1524_v10 = vadd.s32 %v1522_v31, %v1516_v41  ;;  %vm1525_vm10 = vc.u32 %v1523_v2, %v1519_v28  ;;  %v1539_v5 = vshll.u32 %v1536_v51, 16  ;;  %v5136_v42 = vshll.u32 %v5127_v8, %v5134_v60 }
 0x4ed   : > { %v5137_v22 = vshrl.u32 %v5119_v27, %v5135_v50  ;;  %v5140_v13 = vadd.s32 127, %v5139_v0  ;;  %v1526_v54 = vsel %vm1525_vm10, 1, %v5845_v35  ;;  %v1541_v26 = vshll.u32 %v1537_v34, 16 }
 0x4ee   : > { %v1528_v38 = vadd.s32 %v1526_v54, %v1524_v10  ;;  %vm1543_vm9 = vc.u32 %v1535_v39, %v1539_v5  ;;  %v1545_v32 = vadd.s32 %v1539_v5, %v1535_v39  ;;  %v5149_v36 = vsub.s32 4, %v9084_v62 }
 0x4ef   : > { %v5138_v19 = vor.u32 %v5137_v22, %v5136_v42  ;;  %v5141_v6 = vshll.u32 %v5140_v13, 23  ;;  %v1544_v63 = vsel %vm1543_vm9, 1, %v5845_v35  ;;  %v2700_v11 = vand.u32 2147483647, %v9125_v30 }
 0x4f0   : > { %v1529_v58 = vadd.s32 %v1528_v38, %v1518_v33  ;;  %v1546_v44 = vadd.s32 %v1544_v63, %v1538_v52  ;;  %vm1547_vm13 = vc.u32 %v1545_v32, %v1541_v26  ;;  %v1496_v15 = vsel %vm1492_vm12, %v1476_v7, %v9080_v49 }
 0x4f1   : > { %v5142_v8 = vor.u32 4788187, %v5141_v6  ;;  %v1520_v23 = vshrl.u32 %v1515_v3, 16  ;;  %v1548_v21 = vsel %vm1547_vm13, 1, %v5845_v35  ;;  %v1498_v47 = vsel %vm1494_vm0, %v9078_v1, %v1497_v59  ;;  %v348_v1 = vpop.f32.mrf.mxu2 }
 0x4f2   : > { %v1540_v40 = vshrl.u32 %v1536_v51, 16  ;;  %v1550_v9 = vadd.s32 %v1548_v21, %v1546_v44  ;;  %v2703_v61 = vand.u32 2139095040, %v9125_v30  ;;  %v5145_v48 = vcvt.s32.f32 %v5138_v19 }
 0x4f3   : > { %v5143_v4 = vand.u32 2147483647, %v5142_v8  ;;  %v5150_v17 = vsel %vm5027_vm8, %v5149_v36, %v9084_v62  ;;  %v1530_v27 = vadd.s32 %v1529_v58, %v1520_v23  ;;  %v1542_v55 = vshrl.u32 %v1537_v34, 16 }
 0x4f4   : > { %v1551_v49 = vadd.s32 %v1550_v9, %v1540_v40  ;;  %v2704_v3 = vshrl.u32 %v2703_v61, 23  ;;  %v2707_v7 = vand.u32 8388607, %v2700_v11  ;;  %v1549_v41 = vadd.s32 %v1545_v32, %v1541_v26 }
 0x4f5   : > { %v5146_v56 = vmul.f32 %v5145_v48, %v5143_v4  ;;  %vm5026_vm11 = vcmp.le.f32.partialorder %v5025_v37, 0.7853982  ;;  %v1499_v59 = vsel %vm1493_vm15, %v1496_v15, %v1498_v47  ;;  %v9153_v34 = vadd.f32 %v9122_v43, %v348_v1 }
 0x4f6   : > { %v1552_v25 = vadd.s32 %v1551_v49, %v1542_v55  ;;  %v5522_v33 = vadd.s32 4294967169, %v2704_v3  ;;  %v5152_v62 = vsel %vm5026_vm11, 0, %v5150_v17  ;;  %vm1555_vm12 = vc.u32 %v1530_v27, %v1549_v41 }
 0x4f7   : > { %v5147_v28 = vxor.u32 2147483648, %v5146_v56  ;;  %v2708_v60 = vor.u32 8388608, %v2707_v7  ;;  %v1553_v0 = vmul.u32 %v9103_v53, %v1499_v59  ;;  %v5169_v45 = vadd.s32 3, %v5152_v62 }
 0x4f8   : > { %v1556_v51 = vadd.s32 1, %v1552_v25  ;;  %v2710_v2 = vadd.s32 1, %v5522_v33  ;;  %v3943_v22 = vand.u32 2139095040, %v9153_v34  ;;  %v9164_v6 = vadd.s32 %v1549_v41, %v1530_v27 }
 0x4f9   : > { %v5148_v50 = vsel %vm5027_vm8, %v5147_v28, %v5146_v56  ;;  %v9159_v42 = vshll.u32 %v2708_v60, 8  ;;  %v9162_v26 = vand.u32 3, %v5169_v45  ;;  %v3940_v44 = vand.u32 2147483647, %v9153_v34 }
 0x4fa   : > { %v5151_v37 = vsel %vm5026_vm11, %v8896_v46, %v5148_v50  ;;  %v1557_v31 = vsel %vm1555_vm12, %v1556_v51, %v1552_v25  ;;  %vm2711_vm14 = vcmp.gt.s32.totalorder %v2710_v2, 0  ;;  %v3944_v8 = vshrl.u32 %v3943_v22, 23 }
 0x4fb   : > { %v5153_v39 = vmul.f32 %v5151_v37, %v5151_v37  ;;  %v1558_v10 = vadd.s32 %v1557_v31, %v1553_v0  ;;  %v2712_v52 = vsel %vm2711_vm14, %v2710_v2, 0  ;;  %v9168_v58 = vand.u32 65535, %v9159_v42 }
 0x4fc   : > { %v2714_v5 = vand.u32 31, %v2712_v52  ;;  %vm1462_vm0 = vcmp.lt.s32.totalorder %v8927_v24, 0  ;;  %vm5175_vm15 = vcmp.eq.s32.totalorder %v9162_v26, 2  ;;  %v9180_v55 = vshrl.u32 %v2712_v52, 5 }
 0x4fd   : > { %v5154_v13 = vmul.f32 -0.001358992, %v5153_v39  ;;  %v5161_v54 = vmul.f32 -0.00019511016, %v5153_v39  ;;  %v1559_v38 = vadd.s32 536870912, %v1558_v10  ;;  %vm5172_vm1 = vcmp.eq.s32.totalorder %v9162_v26, 0 }
 0x4fe   : > { %v2715_v32 = vsub.s32 32, %v2714_v5  ;;  %v2717_v63 = vshll.u32 %v5839_v12, %v2714_v5  ;;  %v2720_v47 = vshll.u32 %v5840_v14, %v2714_v5  ;;  %v2726_v61 = vshll.u32 %v5842_v18, %v2714_v5 }
 0x4ff   : > { %v5155_v53 = vadd.f32 0.041655596, %v5154_v13  ;;  %v5162_v19 = vadd.f32 0.008332121, %v5161_v54  ;;  %v1560_v36 = vshrl.u32 %v1559_v38, 30  ;;  %v2723_v49 = vshll.u32 %v5841_v16, %v2714_v5 }
 0x500   : > { %v2718_v40 = vshrl.u32 %v5840_v14, %v2715_v32  ;;  %v2721_v9 = vshrl.u32 %v5841_v16, %v2715_v32  ;;  %v2727_v4 = vshrl.u32 %v5843_v20, %v2715_v32  ;;  %v2724_v3 = vshrl.u32 %v5842_v18, %v2715_v32 }
 0x501   : > { %v5156_v15 = vmul.f32 %v5155_v53, %v5153_v39  ;;  %v5163_v23 = vmul.f32 %v5162_v19, %v5153_v39  ;;  %v1561_v21 = vshll.u32 %v1560_v36, 30  ;;  %v2729_v7 = vshll.u32 %v5843_v20, %v2714_v5 }
 0x502   : > { %v2730_v56 = vshrl.u32 %v5844_v29, %v2715_v32  ;;  %vm5171_vm2 = vcmp.lt.s32.totalorder %v9162_v26, 2  ;;  %vm5168_vm3 = vweird.f32 %v8896_v46  ;;  %v1584_v25 = vsub.s32 4, %v1560_v36 }
 0x503   : > { %v5157_v48 = vadd.f32 -0.4999988, %v5156_v15  ;;  %v5164_v17 = vadd.f32 -0.16666654, %v5163_v23  ;;  %v9178_v27 = vsub.s32 %v1558_v10, %v1561_v21  ;;  %v2719_v33 = vor.u32 %v2718_v40, %v2717_v63 }
 0x504   : > { %v2722_v28 = vor.u32 %v2721_v9, %v2720_v47  ;;  %v2728_v62 = vor.u32 %v2727_v4, %v2726_v61  ;;  %vm2732_vm5 = vcmp.lt.s32.totalorder %v9180_v55, 1  ;;  %v2725_v0 = vor.u32 %v2724_v3, %v2723_v49 }
 0x505   : > { %v5158_v41 = vmul.f32 %v5157_v48, %v5153_v39  ;;  %v5165_v1 = vmul.f32 %v5164_v17, %v5153_v39  ;;  %vm1563_vm4 = vcmp.lt.s32.totalorder %v9178_v27, 0  ;;  %v1564_v59 = vsub.s32 0, %v9178_v27 }
 0x506   : > { %vm2735_vm6 = vcmp.lt.s32.totalorder %v9180_v55, 4  ;;  %v2750_v45 = vshrl.u32 %v9159_v42, 16  ;;  %vm9197_vm8 = vcmp.le.f32.partialorder %v1460_v57, 0.7853982  ;;  %v2731_v52 = vor.u32 %v2730_v56, %v2729_v7 }
 0x507   : > { %v5159_v51 = vadd.f32 1.0, %v5158_v41  ;;  %v5166_v60 = vadd.f32 1.0, %v5165_v1  ;;  %v1565_v2 = vsel %vm1563_vm4, %v1564_v59, %v9178_v27  ;;  %vm2734_vm7 = vcmp.lt.s32.totalorder %v9180_v55, 3 }
 0x508   : > { %v1566_v50 = vclz %v1565_v2  ;;  %v2716_v22 = vshrl.u32 %v5839_v12, %v2715_v32  ;;  %v2740_v13 = vsel %vm2732_vm5, %v2719_v33, %v2722_v28  ;;  %v5546_v54 = vadd.s32 4294967169, %v3944_v8 }
 0x509   : > { %v5167_v31 = vmul.f32 %v5166_v60, %v5151_v37  ;;  %v5176_v39 = vxor.u32 2147483648, %v5159_v51  ;;  %v9207_v37 = vsel %vm1462_vm0, %v1584_v25, %v1560_v36  ;;  %vm2733_vm10 = vcmp.lt.s32.totalorder %v9180_v55, 2 }
 0x50a   : > { %v5499_v5 = vadd.s32 4294967294, %v1566_v50  ;;  %v2741_v57 = vsel %vm2735_vm6, %v2728_v62, 920167782  ;;  %v2744_v19 = vsel %vm2732_vm5, %v2722_v28, %v2725_v0  ;;  %v2745_v15 = vsel %vm2735_vm6, %v2731_v52, 1326507024 }
 0x50b   : > { %v5173_v38 = vxor.u32 2147483648, %v5167_v31  ;;  %v5177_v53 = vsel %vm5175_vm15, %v5176_v39, %v5167_v31  ;;  %v2742_v32 = vsel %vm2734_vm7, %v2725_v0, %v2741_v57  ;;  %v2737_v40 = vsel %vm2735_vm6, %v2725_v0, 2102212464 }
 0x50c   : > { %vm5500_vm9 = vcmp.lt.s32.totalorder %v5499_v5, 0  ;;  %v2743_v8 = vsel %vm2733_vm10, %v2740_v13, %v2742_v32  ;;  %v2746_v61 = vsel %vm2734_vm7, %v2728_v62, %v2745_v15  ;;  %v3950_v46 = vadd.s32 1, %v5546_v54 }
 0x50d   : > { %v5174_v36 = vsel %vm5172_vm1, %v5159_v51, %v5173_v38  ;;  %v1569_v63 = vsel %vm5500_vm9, 0, %v5499_v5  ;;  %v2773_v4 = vand.u32 65535, %v2743_v8  ;;  %v2774_v48 = vshrl.u32 %v2743_v8, 16 }
 0x50e   : > { %v5178_v23 = vsel %vm5171_vm2, %v5174_v36, %v5177_v53  ;;  %v1570_v21 = vsub.s32 32, %v1569_v63  ;;  %v1574_v47 = vsub.s32 4294967266, %v1569_v63  ;;  %v1571_v17 = vshll.u32 %v9178_v27, %v1569_v63 }
 0x50f   : > { %v5179_v9 = vsel %vm5168_vm3, nan, %v5178_v23  ;;  %v2747_v3 = vsel %vm2733_vm10, %v2744_v19, %v2746_v61  ;;  %v2776_v41 = vmul.u32 %v2774_v48, %v9168_v58  ;;  %v1587_v25 = vsel %vm9197_vm8, 0, %v9207_v37 }
 0x510   : > { %5365 = vst [vmem:[%s6323_s27 + $0xf0] sm:$0xff] %v5179_v9  ;;  %v1572_v49 = vshrl.u32 %v9164_v6, %v1570_v21  ;;  %v1575_v26 = vadd.s32 127, %v1574_v47  ;;  %v2751_v7 = vand.u32 65535, %v2747_v3  ;;  %v2752_v56 = vshrl.u32 %v2747_v3, 16 }
 0x511   : > { %v2777_v62 = vmul.u32 %v2773_v4, %v2750_v45  ;;  %v2736_v27 = vsel %vm2732_vm5, %v2716_v22, %v2719_v33  ;;  %v2738_v6 = vsel %vm2734_vm7, %v2722_v28, %v2737_v40  ;;  %v2775_v50 = vmul.u32 %v2773_v4, %v9168_v58 }
 0x512   : > { %v1573_v1 = vor.u32 %v1572_v49, %v1571_v17  ;;  %v1576_v59 = vshll.u32 %v1575_v26, 23  ;;  %v2754_v51 = vmul.u32 %v2752_v56, %v9168_v58  ;;  %v2755_v60 = vmul.u32 %v2751_v7, %v2750_v45 }
 0x513   : > { %v2778_v0 = vmul.u32 %v2774_v48, %v2750_v45  ;;  %v2779_v31 = vshll.u32 %v2776_v41, 16  ;;  %v2753_v52 = vmul.u32 %v2751_v7, %v9168_v58  ;;  %v2756_v5 = vmul.u32 %v2752_v56, %v2750_v45 }
 0x514   : > { %v1577_v2 = vor.u32 4788187, %v1576_v59  ;;  %v1580_v39 = vcvt.s32.f32 %v1573_v1  ;;  %v2757_v13 = vshll.u32 %v2754_v51, 16  ;;  %v2759_v38 = vshll.u32 %v2755_v60, 16 }
 0x515   : > { %v2781_v37 = vshll.u32 %v2777_v62, 16  ;;  %vm2783_vm13 = vc.u32 %v2775_v50, %v2779_v31  ;;  %v2785_v22 = vadd.s32 %v2779_v31, %v2775_v50  ;;  %vm3951_vm12 = vcmp.gt.s32.totalorder %v3950_v46, 0 }
 0x516   : > { %v1578_v54 = vand.u32 2147483647, %v1577_v2  ;;  %vm2761_vm11 = vc.u32 %v2753_v52, %v2757_v13  ;;  %v2763_v33 = vadd.s32 %v2757_v13, %v2753_v52  ;;  %v2784_v28 = vsel %vm2783_vm13, 1, %v5845_v35 }
 0x517   : > { %v2762_v53 = vsel %vm2761_vm11, 1, %v5845_v35  ;;  %v2786_v32 = vadd.s32 %v2784_v28, %v2778_v0  ;;  %v2780_v36 = vshrl.u32 %v2776_v41, 16  ;;  %vm2787_vm15 = vc.u32 %v2785_v22, %v2781_v37 }
 0x518   : > { %v1581_v57 = vmul.f32 %v1580_v39, %v1578_v54  ;;  %v2764_v19 = vadd.s32 %v2762_v53, %v2756_v5  ;;  %vm2765_vm14 = vc.u32 %v2763_v33, %v2759_v38  ;;  %v2788_v63 = vsel %vm2787_vm15, 1, %v5845_v35 }
 0x519   : > { %v2766_v45 = vsel %vm2765_vm14, 1, %v5845_v35  ;;  %v3952_v8 = vsel %vm3951_vm12, %v3950_v46, 0  ;;  %v2758_v15 = vshrl.u32 %v2754_v51, 16  ;;  %v2790_v21 = vadd.s32 %v2788_v63, %v2786_v32 }
 0x51a   : > { %v1582_v58 = vxor.u32 2147483648, %v1581_v57  ;;  %v2768_v23 = vadd.s32 %v2766_v45, %v2764_v19  ;;  %v3954_v47 = vand.u32 31, %v3952_v8  ;;  %v2739_v9 = vsel %vm2733_vm10, %v2736_v27, %v2738_v6 }
 0x51b   : > { %v2760_v61 = vshrl.u32 %v2755_v60, 16  ;;  %v2782_v4 = vshrl.u32 %v2777_v62, 16  ;;  %v2791_v49 = vadd.s32 %v2790_v21, %v2780_v36  ;;  %v1604_v7 = vadd.s32 3, %v1587_v25 }
 0x51c   : > { %v1583_v40 = vsel %vm1462_vm0, %v1582_v58, %v1581_v57  ;;  %v2769_v17 = vadd.s32 %v2768_v23, %v2758_v15  ;;  %v9259_v26 = vsub.s32 32, %v3954_v47  ;;  %v3947_v56 = vand.u32 8388607, %v3940_v44 }
 0x51d   : > { %v1586_v48 = vsel %vm9197_vm8, %v8927_v24, %v1583_v40  ;;  %v9265_v46 = vadd.s32 %v2785_v22, %v2781_v37  ;;  %v2792_v55 = vadd.s32 %v2791_v49, %v2782_v4  ;;  %v2793_v1 = vmul.u32 %v9159_v42, %v2739_v9 }
 0x51e   : > { %v1588_v3 = vmul.f32 %v1586_v48, %v1586_v48  ;;  %v9263_v41 = vadd.s32 %v2769_v17, %v2760_v61  ;;  %v9268_v10 = vshrl.u32 %v3952_v8, 5  ;;  %v3960_v27 = vshll.u32 %v5840_v14, %v3954_v47 }
 0x51f   : > { %v2796_v25 = vadd.s32 1, %v2792_v55  ;;  %v3961_v6 = vshrl.u32 %v5841_v16, %v9259_v26  ;;  %v3964_v51 = vshrl.u32 %v5842_v18, %v9259_v26  ;;  %v3958_v42 = vshrl.u32 %v5840_v14, %v9259_v26 }
 0x520   : > { %v1589_v59 = vmul.f32 -0.001358992, %v1588_v3  ;;  %v1596_v62 = vmul.f32 -0.00019511016, %v1588_v3  ;;  %vm2795_vm0 = vc.u32 %v9263_v41, %v9265_v46  ;;  %v3963_v50 = vshll.u32 %v5841_v16, %v3954_v47 }
 0x521   : > { %v2797_v0 = vsel %vm2795_vm0, %v2796_v25, %v2792_v55  ;;  %v3966_v31 = vshll.u32 %v5842_v18, %v3954_v47  ;;  %v3967_v39 = vshrl.u32 %v5843_v20, %v9259_v26  ;;  %v3969_v52 = vshll.u32 %v5843_v20, %v3954_v47 }
 0x522   : > { %v1590_v60 = vadd.f32 0.041655596, %v1589_v59  ;;  %v1597_v2 = vadd.f32 0.008332121, %v1596_v62  ;;  %v2798_v54 = vadd.s32 %v2797_v0, %v2793_v1  ;;  %v3970_v38 = vshrl.u32 %v5844_v29, %v9259_v26 }
 0x523   : > { %v3957_v37 = vshll.u32 %v5839_v12, %v3954_v47  ;;  %v9287_v33 = vor.u32 %v3961_v6, %v3960_v27  ;;  %v9289_v28 = vor.u32 %v3964_v51, %v3963_v50  ;;  %v3968_v22 = vor.u32 %v3967_v39, %v3966_v31  ;;  %v372_v50 = vpop.f32.mrf.mxu3 }
 0x524   : > { %v1591_v5 = vmul.f32 %v1590_v60, %v1588_v3  ;;  %v1598_v13 = vmul.f32 %v1597_v2, %v1588_v3  ;;  %v2799_v32 = vadd.s32 536870912, %v2798_v54  ;;  %v3971_v19 = vor.u32 %v3970_v38, %v3969_v52 }
 0x525   : > { %v1605_v36 = vand.u32 3, %v1604_v7  ;;  %v3948_v58 = vor.u32 8388608, %v3947_v56  ;;  %v9291_v45 = vor.u32 %v3958_v42, %v3957_v37  ;;  %vm3975_vm1 = vcmp.lt.s32.totalorder %v9268_v10, 4 }
 0x526   : > { %v1592_v57 = vadd.f32 -0.4999988, %v1591_v5  ;;  %v1599_v53 = vadd.f32 -0.16666654, %v1598_v13  ;;  %v9293_v15 = vshrl.u32 %v2799_v32, 30  ;;  %vm3972_vm2 = vcmp.lt.s32.totalorder %v9268_v10, 1 }
 0x527   : > { %vm3974_vm4 = vcmp.lt.s32.totalorder %v9268_v10, 3  ;;  %v3981_v23 = vsel %vm3975_vm1, %v3968_v22, 920167782  ;;  %v3985_v21 = vsel %vm3975_vm1, %v3971_v19, 1326507024  ;;  %v3984_v61 = vsel %vm3972_vm2, %v9287_v33, %v9289_v28 }
 0x528   : > { %v1593_v63 = vmul.f32 %v1592_v57, %v1588_v3  ;;  %v1600_v8 = vmul.f32 %v1599_v53, %v1588_v3  ;;  %v2801_v9 = vshll.u32 %v9293_v15, 30  ;;  %v3980_v4 = vsel %vm3972_vm2, %v9291_v45, %v9287_v33 }
 0x529   : > { %v3982_v17 = vsel %vm3974_vm4, %v9289_v28, %v3981_v23  ;;  %v3986_v49 = vsel %vm3974_vm4, %v3968_v22, %v3985_v21  ;;  %v9316_v3 = vshll.u32 %v3948_v58, 8  ;;  %vm3973_vm3 = vcmp.lt.s32.totalorder %v9268_v10, 2 }
 0x52a   : > { %v1594_v47 = vadd.f32 1.0, %v1593_v63  ;;  %v1601_v40 = vadd.f32 1.0, %v1600_v8  ;;  %v2802_v55 = vsub.s32 %v2798_v54, %v2801_v9  ;;  %vm1606_vm5 = vcmp.lt.s32.totalorder %v1605_v36, 2 }
 0x52b   : > { %vm1607_vm6 = vcmp.eq.s32.totalorder %v1605_v36, 0  ;;  %v3987_v1 = vsel %vm3973_vm3, %v3984_v61, %v3986_v49  ;;  %v3983_v27 = vsel %vm3973_vm3, %v3980_v4, %v3982_v17  ;;  %vm1610_vm7 = vcmp.eq.s32.totalorder %v1605_v36, 2 }
 0x52c   : > { %v1602_v7 = vmul.f32 %v1601_v40, %v1586_v48  ;;  %v1611_v56 = vxor.u32 2147483648, %v1594_v47  ;;  %vm2803_vm8 = vcmp.lt.s32.totalorder %v2802_v55, 0  ;;  %v2804_v62 = vsub.s32 0, %v2802_v55 }
 0x52d   : > { %v3989_v25 = vand.u32 65535, %v9316_v3  ;;  %v3991_v48 = vand.u32 65535, %v3987_v1  ;;  %v3992_v6 = vshrl.u32 %v3987_v1, 16  ;;  %v3990_v42 = vshrl.u32 %v9316_v3, 16 }
 0x52e   : > { %v1608_v59 = vxor.u32 2147483648, %v1602_v7  ;;  %v1612_v60 = vsel %vm1610_vm7, %v1611_v56, %v1602_v7  ;;  %v2805_v2 = vsel %vm2803_vm8, %v2804_v62, %v2802_v55  ;;  %vm1603_vm10 = vweird.f32 %v8927_v24 }
 0x52f   : > { %v2806_v31 = vclz %v2805_v2  ;;  %v4014_v39 = vshrl.u32 %v3983_v27, 16  ;;  %v3994_v5 = vmul.u32 %v3992_v6, %v3989_v25  ;;  %v3995_v13 = vmul.u32 %v3991_v48, %v3990_v42 }
 0x530   : > { %v1609_v51 = vsel %vm1607_vm6, %v1594_v47, %v1608_v59  ;;  %v4013_v54 = vand.u32 65535, %v3983_v27  ;;  %v9329_v37 = vadd.f32 %v9122_v43, %v372_v50  ;;  %v2794_v22 = vadd.s32 %v9265_v46, %v9263_v41 }
 0x531   : > { %v1613_v0 = vsel %vm1606_vm5, %v1609_v51, %v1612_v60  ;;  %v5523_v38 = vadd.s32 4294967294, %v2806_v31  ;;  %v3993_v57 = vmul.u32 %v3991_v48, %v3989_v25  ;;  %v3996_v53 = vmul.u32 %v3992_v6, %v3990_v42 }
 0x532   : > { %v1614_v52 = vsel %vm1603_vm10, nan, %v1613_v0  ;;  %v3997_v32 = vshll.u32 %v3994_v5, 16  ;;  %v3998_v24 = vshrl.u32 %v3994_v5, 16  ;;  %v3999_v19 = vshll.u32 %v3995_v13, 16 }
 0x533   : > { %5342 = vst [vmem:[%s6323_s27 + $0x38] sm:$0xff] %v1614_v52  ;;  %vm5524_vm9 = vcmp.lt.s32.totalorder %v5523_v38, 0  ;;  %v4016_v36 = vmul.u32 %v4014_v39, %v3989_v25  ;;  %v4017_v8 = vmul.u32 %v4013_v54, %v3990_v42  ;;  %v4015_v43 = vmul.u32 %v4013_v54, %v3989_v25 }
 0x534   : > { %v2809_v58 = vsel %vm5524_vm9, 0, %v5523_v38  ;;  %vm4001_vm13 = vc.u32 %v3993_v57, %v3997_v32  ;;  %v4003_v63 = vadd.s32 %v3997_v32, %v3993_v57  ;;  %v4018_v9 = vmul.u32 %v4014_v39, %v3990_v42 }
 0x535   : > { %v2810_v23 = vsub.s32 32, %v2809_v58  ;;  %v2814_v21 = vsub.s32 4294967266, %v2809_v58  ;;  %v4002_v47 = vsel %vm4001_vm13, 1, %v5845_v35  ;;  %v4019_v41 = vshll.u32 %v4016_v36, 16 }
 0x536   : > { %v4004_v40 = vadd.s32 %v4002_v47, %v3996_v53  ;;  %vm4005_vm11 = vc.u32 %v4003_v63, %v3999_v19  ;;  %v2811_v46 = vshll.u32 %v2802_v55, %v2809_v58  ;;  %v4021_v7 = vshll.u32 %v4017_v8, 16 }
 0x537   : > { %v2812_v61 = vshrl.u32 %v2794_v22, %v2810_v23  ;;  %v2815_v4 = vadd.s32 127, %v2814_v21  ;;  %v4006_v17 = vsel %vm4005_vm11, 1, %v5845_v35  ;;  %vm4023_vm12 = vc.u32 %v4015_v43, %v4019_v41 }
 0x538   : > { %v4008_v49 = vadd.s32 %v4006_v17, %v4004_v40  ;;  %v4025_v56 = vadd.s32 %v4019_v41, %v4015_v43  ;;  %v3956_v62 = vshrl.u32 %v5839_v12, %v9259_v26  ;;  %v4024_v27 = vsel %vm4023_vm12, 1, %v5845_v35 }
 0x539   : > { %v2813_v1 = vor.u32 %v2812_v61, %v2811_v46  ;;  %v2816_v59 = vshll.u32 %v2815_v4, 23  ;;  %v3977_v25 = vsel %vm3975_vm1, %v9289_v28, 2102212464  ;;  %v4026_v48 = vadd.s32 %v4024_v27, %v4018_v9 }
 0x53a   : > { %v4009_v55 = vadd.s32 %v4008_v49, %v3998_v24  ;;  %vm4027_vm14 = vc.u32 %v4025_v56, %v4021_v7  ;;  %v3976_v51 = vsel %vm3972_vm2, %v3956_v62, %v9291_v45  ;;  %v4000_v60 = vshrl.u32 %v3995_v13, 16 }
 0x53b   : > { %v2817_v6 = vor.u32 4788187, %v2816_v59  ;;  %v4028_v2 = vsel %vm4027_vm14, 1, %v5845_v35  ;;  %v2824_v42 = vsub.s32 4, %v9293_v15  ;;  %v4020_v26 = vshrl.u32 %v4016_v36, 16 }
 0x53c   : > { %v4030_v50 = vadd.s32 %v4028_v2, %v4026_v48  ;;  %v5183_v0 = vand.u32 2139095040, %v9329_v37  ;;  %v2820_v39 = vcvt.s32.f32 %v2813_v1  ;;  %v3978_v28 = vsel %vm3974_vm4, %v9287_v33, %v3977_v25 }
 0x53d   : > { %v2818_v31 = vand.u32 2147483647, %v2817_v6  ;;  %v9350_v52 = vadd.s32 %v4009_v55, %v4000_v60  ;;  %v4022_v5 = vshrl.u32 %v4017_v8, 16  ;;  %vm2702_vm15 = vcmp.lt.s32.totalorder %v9125_v30, 0 }
 0x53e   : > { %v4031_v54 = vadd.s32 %v4030_v50, %v4020_v26  ;;  %v5184_v45 = vshrl.u32 %v5183_v0, 23  ;;  %v9353_v38 = vadd.s32 %v4025_v56, %v4021_v7  ;;  %v5180_v22 = vand.u32 2147483647, %v9329_v37 }
 0x53f   : > { %v2821_v13 = vmul.f32 %v2820_v39, %v2818_v31  ;;  %v2825_v57 = vsel %vm2702_vm15, %v2824_v42, %v9293_v15  ;;  %v3979_v53 = vsel %vm3973_vm3, %v3976_v51, %v3978_v28  ;;  %vm2701_vm1 = vcmp.le.f32.partialorder %v2700_v11, 0.7853982 }
 0x540   : > { %v4032_v32 = vadd.s32 %v4031_v54, %v4022_v5  ;;  %v5570_v24 = vadd.s32 4294967169, %v5184_v45  ;;  %vm4035_vm0 = vc.u32 %v9350_v52, %v9353_v38  ;;  %v2827_v63 = vsel %vm2701_vm1, 0, %v2825_v57 }
 0x541   : > { %v2822_v33 = vxor.u32 2147483648, %v2821_v13  ;;  %v4033_v8 = vmul.u32 %v9316_v3, %v3979_v53  ;;  %v5187_v15 = vand.u32 8388607, %v5180_v22  ;;  %v2844_v40 = vadd.s32 3, %v2827_v63 }
 0x542   : > { %v4036_v19 = vadd.s32 1, %v4032_v32  ;;  %v5190_v36 = vadd.s32 1, %v5570_v24  ;;  %vm2843_vm6 = vweird.f32 %v9125_v30  ;;  %vm3942_vm12 = vcmp.lt.s32.totalorder %v9153_v34, 0 }
 0x543   : > { %v2823_v58 = vsel %vm2702_vm15, %v2822_v33, %v2821_v13  ;;  %v5188_v61 = vor.u32 8388608, %v5187_v15  ;;  %v2845_v7 = vand.u32 3, %v2844_v40  ;;  %vm9436_vm14 = vcmp.le.f32.partialorder %v3940_v44, 0.7853982 }
 0x544   : > { %v2826_v10 = vsel %vm2701_vm1, %v9125_v30, %v2823_v58  ;;  %v4037_v23 = vsel %vm4035_vm0, %v4036_v19, %v4032_v32  ;;  %vm5191_vm2 = vcmp.gt.s32.totalorder %v5190_v36, 0 }
 0x545   : > { %v2828_v21 = vmul.f32 %v2826_v10, %v2826_v10  ;;  %v4038_v47 = vadd.s32 %v4037_v23, %v4033_v8  ;;  %v5192_v43 = vsel %vm5191_vm2, %v5190_v36, 0  ;;  %v9372_v62 = vshll.u32 %v5188_v61, 8 }
 0x546   : > { %v5194_v9 = vand.u32 31, %v5192_v43  ;;  %v9374_v27 = vshrl.u32 %v5192_v43, 5  ;;  %vm2847_vm4 = vcmp.eq.s32.totalorder %v2845_v7, 0  ;;  %vm2846_vm3 = vcmp.lt.s32.totalorder %v2845_v7, 2 }
 0x547   : > { %v2829_v41 = vmul.f32 -0.001358992, %v2828_v21  ;;  %v2836_v11 = vmul.f32 -0.00019511016, %v2828_v21  ;;  %v4039_v46 = vadd.s32 536870912, %v4038_v47  ;;  %vm2850_vm8 = vcmp.eq.s32.totalorder %v2845_v7, 2 }
 0x548   : > { %v9367_v4 = vsub.s32 32, %v5194_v9  ;;  %v5197_v2 = vshll.u32 %v5839_v12, %v5194_v9  ;;  %v5200_v42 = vshll.u32 %v5840_v14, %v5194_v9  ;;  %v5206_v50 = vshll.u32 %v5842_v18, %v5194_v9 }
 0x549   : > { %v2830_v17 = vadd.f32 0.041655596, %v2829_v41  ;;  %v2837_v3 = vadd.f32 0.008332121, %v2836_v11  ;;  %v9369_v49 = vshrl.u32 %v4039_v46, 30  ;;  %v5209_v53 = vshll.u32 %v5843_v20, %v5194_v9 }
 0x54a   : > { %v5198_v25 = vshrl.u32 %v5840_v14, %v9367_v4  ;;  %v5201_v55 = vshrl.u32 %v5841_v16, %v9367_v4  ;;  %v5207_v48 = vshrl.u32 %v5843_v20, %v9367_v4  ;;  %v5204_v26 = vshrl.u32 %v5842_v18, %v9367_v4 }
 0x54b   : > { %v2831_v56 = vmul.f32 %v2830_v17, %v2828_v21  ;;  %v2838_v1 = vmul.f32 %v2837_v3, %v2828_v21  ;;  %v4041_v59 = vshll.u32 %v9369_v49, 30  ;;  %v5210_v0 = vshrl.u32 %v5844_v29, %v9367_v4 }
 0x54c   : > { %v9390_v5 = vor.u32 %v5198_v25, %v5197_v2  ;;  %v9392_v54 = vor.u32 %v5201_v55, %v5200_v42  ;;  %v5203_v14 = vshll.u32 %v5841_v16, %v5194_v9  ;;  %v5208_v45 = vor.u32 %v5207_v48, %v5206_v50 }
 0x54d   : > { %v2832_v6 = vadd.f32 -0.4999988, %v2831_v56  ;;  %v2839_v51 = vadd.f32 -0.16666654, %v2838_v1  ;;  %v4042_v60 = vsub.s32 %v4038_v47, %v4041_v59  ;;  %v4034_v29 = vadd.s32 %v9353_v38, %v9350_v52 }
 0x54e   : > { %v9398_v24 = vor.u32 %v5204_v26, %v5203_v14  ;;  %v5211_v36 = vor.u32 %v5210_v0, %v5209_v53  ;;  %vm5212_vm7 = vcmp.lt.s32.totalorder %v9374_v27, 1  ;;  %vm5215_vm10 = vcmp.lt.s32.totalorder %v9374_v27, 4 }
 0x54f   : > { %v2833_v31 = vmul.f32 %v2832_v6, %v2828_v21  ;;  %v2840_v39 = vmul.f32 %v2839_v51, %v2828_v21  ;;  %vm4043_vm5 = vcmp.lt.s32.totalorder %v4042_v60, 0  ;;  %v4044_v28 = vsub.s32 0, %v4042_v60 }
 0x550   : > { %v5220_v16 = vsel %vm5212_vm7, %v9390_v5, %v9392_v54  ;;  %v5229_v20 = vand.u32 65535, %v9372_v62  ;;  %vm5213_vm9 = vcmp.lt.s32.totalorder %v9374_v27, 2  ;;  %vm5214_vm13 = vcmp.lt.s32.totalorder %v9374_v27, 3 }
 0x551   : > { %v2834_v13 = vadd.f32 1.0, %v2833_v31  ;;  %v2841_v57 = vadd.f32 1.0, %v2840_v39  ;;  %v4045_v18 = vsel %vm4043_vm5, %v4044_v28, %v4042_v60  ;;  %v5221_v52 = vsel %vm5215_vm10, %v5208_v45, 920167782 }
 0x552   : > { %v4046_v32 = vclz %v4045_v18  ;;  %v5222_v8 = vsel %vm5214_vm13, %v9398_v24, %v5221_v52  ;;  %v5224_v15 = vsel %vm5212_vm7, %v9392_v54, %v9398_v24  ;;  %v5225_v47 = vsel %vm5215_vm10, %v5211_v36, 1326507024 }
 0x553   : > { %v2842_v33 = vmul.f32 %v2841_v57, %v2826_v10  ;;  %v2851_v19 = vxor.u32 2147483648, %v2834_v13  ;;  %v5223_v21 = vsel %vm5213_vm9, %v5220_v16, %v5222_v8  ;;  %v5230_v41 = vshrl.u32 %v9372_v62, 16 }
 0x554   : > { %v5547_v58 = vadd.s32 4294967294, %v4046_v32  ;;  %v5226_v46 = vsel %vm5214_vm13, %v5208_v45, %v5225_v47  ;;  %v5253_v61 = vand.u32 65535, %v5223_v21  ;;  %v5254_v17 = vshrl.u32 %v5223_v21, 16 }
 0x555   : > { %v2848_v63 = vxor.u32 2147483648, %v2842_v33  ;;  %v2852_v38 = vsel %vm2850_vm8, %v2851_v19, %v2842_v33  ;;  %v5227_v7 = vsel %vm5213_vm9, %v5224_v15, %v5226_v46  ;;  %v5196_v32 = vshrl.u32 %v5839_v12, %v9367_v4 }
 0x556   : > { %vm5548_vm11 = vcmp.lt.s32.totalorder %v5547_v58, 0  ;;  %v5231_v59 = vand.u32 65535, %v5227_v7  ;;  %v5232_v25 = vshrl.u32 %v5227_v7, 16  ;;  %v5256_v55 = vmul.u32 %v5254_v17, %v5229_v20 }
 0x557   : > { %v2849_v10 = vsel %vm2847_vm4, %v2834_v13, %v2848_v63  ;;  %v4049_v23 = vsel %vm5548_vm11, 0, %v5547_v58  ;;  %v5257_v51 = vmul.u32 %v5253_v61, %v5230_v41  ;;  %v5255_v26 = vmul.u32 %v5253_v61, %v5229_v20 }
 0x558   : > { %v2853_v43 = vsel %vm2846_vm3, %v2849_v10, %v2852_v38  ;;  %v4050_v40 = vsub.s32 32, %v4049_v23  ;;  %v4054_v9 = vsub.s32 4294967266, %v4049_v23  ;;  %v4051_v3 = vshll.u32 %v4042_v60, %v4049_v23 }
 0x559   : > { %v2854_v11 = vsel %vm2843_vm6, nan, %v2853_v43  ;;  %v5234_v30 = vmul.u32 %v5232_v25, %v5229_v20  ;;  %v5235_v2 = vmul.u32 %v5231_v59, %v5230_v41  ;;  %v5258_v50 = vmul.u32 %v5254_v17, %v5230_v41 }
 0x55a   : > { %5350 = vst [vmem:[%s6323_s27 + $0x78] sm:$0xff] %v2854_v11  ;;  %v4052_v56 = vshrl.u32 %v4034_v29, %v4050_v40  ;;  %v4055_v1 = vadd.s32 127, %v4054_v9  ;;  %v5259_v0 = vshll.u32 %v5256_v55, 16  ;;  %v5233_v39 = vmul.u32 %v5231_v59, %v5229_v20 }
 0x55b   : > { %v5236_v28 = vmul.u32 %v5232_v25, %v5230_v41  ;;  %v5237_v14 = vshll.u32 %v5234_v30, 16  ;;  %v5239_v13 = vshll.u32 %v5235_v2, 16  ;;  %v5261_v57 = vshll.u32 %v5257_v51, 16 }
 0x55c   : > { %v4053_v48 = vor.u32 %v4052_v56, %v4051_v3  ;;  %v4056_v6 = vshll.u32 %v4055_v1, 23  ;;  %vm5263_vm15 = vc.u32 %v5255_v26, %v5259_v0  ;;  %v5265_v44 = vadd.s32 %v5259_v0, %v5255_v26 }
 0x55d   : > { %vm5241_vm0 = vc.u32 %v5233_v39, %v5237_v14  ;;  %v5243_v18 = vadd.s32 %v5237_v14, %v5233_v39  ;;  %v5264_v53 = vsel %vm5263_vm15, 1, %v5845_v35  ;;  %v5217_v36 = vsel %vm5215_vm10, %v9398_v24, 2102212464 }
 0x55e   : > { %v4057_v60 = vor.u32 4788187, %v4056_v6  ;;  %v4060_v31 = vcvt.s32.f32 %v4053_v48  ;;  %v5242_v33 = vsel %vm5241_vm0, 1, %v5845_v35  ;;  %v5266_v19 = vadd.s32 %v5264_v53, %v5258_v50 }
 0x55f   : > { %v5244_v58 = vadd.s32 %v5242_v33, %v5236_v28  ;;  %vm5245_vm1 = vc.u32 %v5243_v18, %v5239_v13  ;;  %vm5267_vm2 = vc.u32 %v5265_v44, %v5261_v57  ;;  %v4064_v20 = vsub.s32 4, %v9369_v49 }
 0x560   : > { %v4058_v45 = vand.u32 2147483647, %v4057_v60  ;;  %v5246_v63 = vsel %vm5245_vm1, 1, %v5845_v35  ;;  %v5268_v52 = vsel %vm5267_vm2, 1, %v5845_v35  ;;  %v5238_v38 = vshrl.u32 %v5234_v30, 16 }
 0x561   : > { %v5248_v8 = vadd.s32 %v5246_v63, %v5244_v58  ;;  %v5260_v12 = vshrl.u32 %v5256_v55, 16  ;;  %v5270_v4 = vadd.s32 %v5268_v52, %v5266_v19  ;;  %v5216_v24 = vsel %vm5212_vm7, %v5196_v32, %v9390_v5 }
 0x562   : > { %v4061_v29 = vmul.f32 %v4060_v31, %v4058_v45  ;;  %v5218_v10 = vsel %vm5214_vm13, %v9392_v54, %v5217_v36  ;;  %v5240_v23 = vshrl.u32 %v5235_v2, 16  ;;  %v5262_v47 = vshrl.u32 %v5257_v51, 16 }
 0x563   : > { %v5249_v21 = vadd.s32 %v5248_v8, %v5238_v38  ;;  %v5271_v43 = vadd.s32 %v5270_v4, %v5260_v12  ;;  %v5219_v9 = vsel %vm5213_vm9, %v5216_v24, %v5218_v10  ;;  %v5269_v11 = vadd.s32 %v5265_v44, %v5261_v57 }
 0x564   : > { %v4062_v16 = vxor.u32 2147483648, %v4061_v29  ;;  %v4065_v54 = vsel %vm3942_vm12, %v4064_v20, %v9369_v49  ;;  %v5273_v1 = vmul.u32 %v9372_v62, %v5219_v9  ;;  %vm4083_vm7 = vweird.f32 %v9153_v34 }
 0x565   : > { %v5250_v41 = vadd.s32 %v5249_v21, %v5240_v23  ;;  %v5272_v46 = vadd.s32 %v5271_v43, %v5262_v47  ;;  %v4067_v27 = vsel %vm9436_vm14, 0, %v4065_v54  ;;  %vm5182_vm9 = vcmp.lt.s32.totalorder %v9329_v37, 0 }
 0x566   : > { %v4063_v15 = vsel %vm3942_vm12, %v4062_v16, %v4061_v29  ;;  %v4084_v30 = vadd.s32 3, %v4067_v27  ;;  %vm5181_vm13 = vcmp.le.f32.partialorder %v5180_v22, 0.7853982  ;;  %vm5323_vm15 = vweird.f32 %v9329_v37 }
 0x567   : > { %v4066_v35 = vsel %vm9436_vm14, %v9153_v34, %v4063_v15  ;;  %vm5275_vm4 = vc.u32 %v5250_v41, %v5269_v11  ;;  %v5276_v17 = vadd.s32 1, %v5272_v46  ;;  %v5274_v33 = vadd.s32 %v5269_v11, %v5250_v41 }
 0x568   : > { %v4068_v40 = vmul.f32 %v4066_v35, %v4066_v35  ;;  %v4085_v31 = vand.u32 3, %v4084_v30 }
 0x569   : > { %v5277_v7 = vsel %vm5275_vm4, %v5276_v17, %v5272_v46 }
 0x56a   : > { %v4069_v5 = vmul.f32 -0.001358992, %v4068_v40  ;;  %v4076_v61 = vmul.f32 -0.00019511016, %v4068_v40  ;;  %v5278_v55 = vadd.s32 %v5277_v7, %v5273_v1  ;;  %vm4087_vm5 = vcmp.eq.s32.totalorder %v4085_v31, 0 }
 0x56b   : > { %vm4090_vm6 = vcmp.eq.s32.totalorder %v4085_v31, 2  ;;  %vm4086_vm8 = vcmp.lt.s32.totalorder %v4085_v31, 2 }
 0x56c   : > { %v4070_v3 = vadd.f32 0.041655596, %v4069_v5  ;;  %v4077_v56 = vadd.f32 0.008332121, %v4076_v61  ;;  %v5279_v51 = vadd.s32 536870912, %v5278_v55 }
 0x56e   : > { %v4071_v59 = vmul.f32 %v4070_v3, %v4068_v40  ;;  %v4078_v25 = vmul.f32 %v4077_v56, %v4068_v40  ;;  %v5280_v49 = vshrl.u32 %v5279_v51, 30 }
 0x570   : > { %v4072_v48 = vadd.f32 -0.4999988, %v4071_v59  ;;  %v4079_v6 = vadd.f32 -0.16666654, %v4078_v25  ;;  %v5281_v0 = vshll.u32 %v5280_v49, 30  ;;  %v5304_v24 = vsub.s32 4, %v5280_v49 }
 0x572   : > { %v4073_v2 = vmul.f32 %v4072_v48, %v4068_v40  ;;  %v4080_v60 = vmul.f32 %v4079_v6, %v4068_v40  ;;  %v5282_v28 = vsub.s32 %v5278_v55, %v5281_v0  ;;  %v5305_v47 = vsel %vm5182_vm9, %v5304_v24, %v5280_v49 }
 0x573   : > { %v5307_v9 = vsel %vm5181_vm13, 0, %v5305_v47 }
 0x574   : > { %v4074_v26 = vadd.f32 1.0, %v4073_v2  ;;  %v4081_v50 = vadd.f32 1.0, %v4080_v60  ;;  %vm5283_vm3 = vcmp.lt.s32.totalorder %v5282_v28, 0  ;;  %v5284_v14 = vsub.s32 0, %v5282_v28 }
 0x575   : > { %v5324_v61 = vadd.s32 3, %v5307_v9 }
 0x576   : > { %v4082_v39 = vmul.f32 %v4081_v50, %v4066_v35  ;;  %v4091_v62 = vxor.u32 2147483648, %v4074_v26  ;;  %v5285_v57 = vsel %vm5283_vm3, %v5284_v14, %v5282_v28 }
 0x577   : > { %v5286_v53 = vclz %v5285_v57  ;;  %v5325_v56 = vand.u32 3, %v5324_v61 }
 0x578   : > { %v4088_v42 = vxor.u32 2147483648, %v4082_v39  ;;  %v4092_v13 = vsel %vm4090_vm6, %v4091_v62, %v4082_v39 }
 0x579   : > { %v5571_v29 = vadd.s32 4294967294, %v5286_v53  ;;  %vm5327_vm11 = vcmp.eq.s32.totalorder %v5325_v56, 0  ;;  %vm5330_vm12 = vcmp.eq.s32.totalorder %v5325_v56, 2  ;;  %vm5326_vm14 = vcmp.lt.s32.totalorder %v5325_v56, 2 }
 0x57a   : > { %v4089_v45 = vsel %vm4087_vm5, %v4074_v26, %v4088_v42 }
 0x57b   : > { %v4093_v18 = vsel %vm4086_vm8, %v4089_v45, %v4092_v13  ;;  %vm5572_vm10 = vcmp.lt.s32.totalorder %v5571_v29, 0 }
 0x57c   : > { %v4094_v44 = vsel %vm4083_vm7, nan, %v4093_v18  ;;  %v5289_v32 = vsel %vm5572_vm10, 0, %v5571_v29 }
 0x57d   : > { %5358 = vst [vmem:[%s6323_s27 + $0xb8] sm:$0xff] %v4094_v44  ;;  %v5290_v19 = vsub.s32 32, %v5289_v32  ;;  %v5294_v36 = vsub.s32 4294967266, %v5289_v32  ;;  %v5291_v58 = vshll.u32 %v5282_v28, %v5289_v32 }
 0x57f   : > { %v5292_v16 = vshrl.u32 %v5274_v33, %v5290_v19  ;;  %v5295_v20 = vadd.s32 127, %v5294_v36 }
 0x581   : > { %v5293_v63 = vor.u32 %v5292_v16, %v5291_v58  ;;  %v5296_v52 = vshll.u32 %v5295_v20, 23 }
 0x583   : > { %v5297_v38 = vor.u32 4788187, %v5296_v52  ;;  %v5300_v12 = vcvt.s32.f32 %v5293_v63 }
 0x585   : > { %v5298_v8 = vand.u32 2147483647, %v5297_v38 }
 0x587   : > { %v5301_v4 = vmul.f32 %v5300_v12, %v5298_v8 }
 0x589   : > { %v5302_v34 = vxor.u32 2147483648, %v5301_v4 }
 0x58b   : > { %v5303_v15 = vsel %vm5182_vm9, %v5302_v34, %v5301_v4 }
 0x58c   : > { %v5306_v10 = vsel %vm5181_vm13, %v9329_v37, %v5303_v15 }
 0x58d   : > { %v5308_v23 = vmul.f32 %v5306_v10, %v5306_v10 }
 0x58f   : > { %v5309_v35 = vmul.f32 -0.001358992, %v5308_v23  ;;  %v5316_v21 = vmul.f32 -0.00019511016, %v5308_v23 }
 0x591   : > { %v5310_v43 = vadd.f32 0.041655596, %v5309_v35  ;;  %v5317_v40 = vadd.f32 0.008332121, %v5316_v21 }
 0x593   : > { %v5311_v41 = vmul.f32 %v5310_v43, %v5308_v23  ;;  %v5318_v11 = vmul.f32 %v5317_v40, %v5308_v23 }
 0x595   : > { %v5312_v46 = vadd.f32 -0.4999988, %v5311_v41  ;;  %v5319_v5 = vadd.f32 -0.16666654, %v5318_v11 }
 0x597   : > { %v5313_v22 = vmul.f32 %v5312_v46, %v5308_v23  ;;  %v5320_v54 = vmul.f32 %v5319_v5, %v5308_v23 }
 0x599   : > { %v5314_v17 = vadd.f32 1.0, %v5313_v22  ;;  %v5321_v3 = vadd.f32 1.0, %v5320_v54 }
 0x59b   : > { %v5322_v1 = vmul.f32 %v5321_v3, %v5306_v10  ;;  %v5331_v7 = vxor.u32 2147483648, %v5314_v17 }
 0x59d   : > { %v5328_v27 = vxor.u32 2147483648, %v5322_v1  ;;  %v5332_v25 = vsel %vm5330_vm12, %v5331_v7, %v5322_v1 }
 0x59f   : > { %v5329_v59 = vsel %vm5327_vm11, %v5314_v17, %v5328_v27 }
 0x5a0   : > { %v5333_v55 = vsel %vm5326_vm14, %v5329_v59, %v5332_v25 }
 0x5a1   : > { %v5334_v48 = vsel %vm5323_vm15, nan, %v5333_v55 }
 0x5a2   : > { %5366 = vst [vmem:[%s6323_s27 + $0xf8] sm:$0xff] %v5334_v48 }
 0x5a3   : > { %5791 = shalt.err (!%p5788_p10)
}
 0x5a4   : > { %s5846_s6 = smov 128   ;;  %s5847_s27 = smov 8  }
 0x5a5   : > { %5634 = dma.vmem_to_hbm [thread:$0]  (%p5937_p3), %s5381_s21, 4096, %s5383_s22, %s5368_s16, %s5846_s6, %s5846_s6, %s5847_s27  }
 0x5a6 PF: > { %s5397_s11 = sand.u32 1, %s5822_s12   ;;  %p9566_p12 = scmp.ge.s32.totalorder %s5834_s15, 2 }
 0x5a7   : > { %s5398_s20 = scalar_lea.sflag [#allocation4], %s5397_s11 }
 0x5a8   : > { %p5645_p13 = pnand %p9566_p12, %p5903_p6 }
 0x5aa   : > { %p5646_p0 = pneg %p5645_p13 }
 0x5ac   : > { %5817 = dma.done.wait (%p5646_p0), %s5398_s20, 4096  }
 0x5ad   : > { %5819 = vsyncadd (%p5646_p0), %s5398_s20, 4294963200  ;;  %p17_p5 = scmp.ge.s32.totalorder %s5921_s26, 4   ;;  %s9567_s12 = smov %s5826_s13 }
 0x5ae   : > { %s9568_s13 = smov %s5830_s14  ;;  %s9569_s14 = smov %s5933_s4 }
 0x5af   : > { %s9570_s15 = smov %s5921_s26  ;;  %19 = sbr.rel (!%p17_p5) target bundleno = 6 (0x6), region = 81 }
 0x5b4   :  { %5404 = vsyncpa [#allocation3], 1 }
 0x5b5   :  { %5406 = vsyncpa [#allocation3 + $0x1], 1 }
 0x5b6   :  { %5407 = vsyncpa [#allocation6], 1 }
 0x5b7   :  { %5408 = vsyncpa [#allocation4], 1 }
 0x5b8   :  { %5410 = vsyncpa [#allocation4 + $0x1], 1 }

</bundles_post_ra>
